<compile_context>
chip_gen: v5e
topology: v5e:2x2
jax: 0.10.0
libtpu: 0.0.40
codegen_flags: <defaults>
</compile_context>

<pallas_src>
import jax
import jax.numpy as jnp
from jax import lax
from jax.experimental import pallas as pl
from jax.experimental.pallas import tpu as pltpu


def _round_up(x, m):
    return ((x + m - 1) // m) * m


def _vmem_capacity_bytes():
    # Trace-time hardware query; conservative 128 MiB default if unavailable.
    try:
        return int(pltpu.get_tpu_info().vmem_capacity_bytes)
    except Exception:  # query-only fallback; never wraps the pallas_call
        return 128 << 20


def _make_kernel(n_axis, tn, mm_dtype):
    """Kernel for one (tm, tn) output tile of: out = x @ W + b + x."""

    def kernel(x_ref, w_ref, b_ref, o_ref):
        # x_ref: (tm, D) token rows (matmul LHS *and* residual source)
        # w_ref: (D, tn) weight column tile
        # b_ref: (1, tn) bias column tile
        lhs = x_ref[...]
        if mm_dtype is not None and lhs.dtype != jnp.dtype(mm_dtype):
            lhs = lhs.astype(mm_dtype)
        y = jnp.dot(lhs, w_ref[...],
                    preferred_element_type=jnp.float32,
                    precision=lax.Precision.HIGHEST)     # MXU, f32 accumulate
        y = y + b_ref[...].astype(jnp.float32)
        # Residual: slice the matching columns out of the LHS block already in
        # VMEM (no second HBM stream of x); stays in x's original precision.
        if n_axis is None:
            res = x_ref[...]
        else:
            j = pl.program_id(n_axis)
            res = x_ref[:, pl.ds(pl.multiple_of(j * tn, tn), tn)]
        o_ref[...] = (y + res.astype(jnp.float32)).astype(o_ref.dtype)

    return kernel


def residual_linear(x, w, b, *, tm=256, matmul_dtype=None):
    """Fused Residual(nn.Linear): out = x @ W + b + x.

    x: (B, N, D); w: (D, D) [in_dim, out_dim]; b: (D,).
    matmul_dtype=None keeps the native (f32) operands on the MXU, matching the
    PyTorch float32 nn.Linear.  Pass jnp.bfloat16 to opt into bf16 MXU
    operands with f32 accumulation; the residual add is still taken from the
    original-dtype x block, so residual precision is unchanged.
    """
    B, N, D = x.shape
    assert w.shape == (D, D) and b.shape == (D,)
    M = B * N
    x2 = x.reshape(M, D)
    w_mm = w if matmul_dtype is None else w.astype(matmul_dtype)
    b2 = b.reshape(1, D).astype(jnp.float32)

    xb = x2.dtype.itemsize
    wb = w_mm.dtype.itemsize
    ob = jnp.dtype(x.dtype).itemsize

    # ---- tile selection -----------------------------------------------------
    # Token tile: multiple of 8 sublanes, MXU-sized by default.  No jnp.pad:
    # grid uses cdiv(M, tm) and Pallas masks the partial tail tile's stores.
    tm = _round_up(max(8, min(tm, _round_up(M, 8))), 8)

    capacity = _vmem_capacity_bytes()
    budget = int(0.65 * capacity)

    def vmem_need(tm_, tn_):
        return (2 * tm_ * D * xb        # double-buffered LHS tiles
                + 2 * D * tn_ * wb      # double-buffered weight tiles
                + 2 * tn_ * 4           # double-buffered bias tiles (f32)
                + 2 * tm_ * tn_ * ob)   # double-buffered output tiles

    def pick_tn(tm_):
        # Prefer tn = D (weight fully VMEM-resident, x read once from HBM).
        if vmem_need(tm_, D) <= budget:
            return D
        if D % 128 != 0:
            return None                 # only full-width column blocks legal
        t = D - 128                     # largest 128-multiple divisor that fits
        while t >= 128:
            if D % t == 0 and vmem_need(tm_, t) <= budget:
                return t
            t -= 128
        return None

    tn = pick_tn(tm)
    while tn is None and tm > 64:
        tm = max(64, tm // 2)
        tn = pick_tn(tm)
    if tn is None:
        # TODO(synk): for very large D add an innermost "arbitrary" K grid axis
        # with an f32 VMEM accumulator (zero at k==0, add bias + residual at
        # k==last) instead of shrinking tiles below MXU-efficient sizes.
        tm = 64
        tn = 128 if D % 128 == 0 else D

    n_m = pl.cdiv(M, tm)
    n_n = pl.cdiv(D, tn)
    need = vmem_need(tm, tn)
    vmem_limit = min(int(0.8 * capacity), max(32 << 20, need + (4 << 20)))

    cost = pl.CostEstimate(
        flops=2 * M * D * D + 2 * M * D,
        transcendentals=0,
        # x is re-read n_n times (once when the weight is fully resident).
        bytes_accessed=n_n * M * D * xb + D * D * wb + D * 4 + M * D * ob,
    )

    if n_n == 1:
        # Weight fully resident; 1-D grid over token tiles so the v7x
        # TensorCores split the M axis.
        grid = (n_m,)
        in_specs = [
            pl.BlockSpec((tm, D), lambda i: (i, 0)),      # x (LHS + residual)
            pl.BlockSpec((D, D), lambda i: (0, 0)),       # W (grid invariant)
            pl.BlockSpec((1, D), lambda i: (0, 0)),       # b
        ]
        out_spec = pl.BlockSpec((tm, D), lambda i: (i, 0))
        semantics = ("parallel",)
        kernel = _make_kernel(None, tn, matmul_dtype)
    else:
        # N tiles outer so the weight/bias blocks are invariant over the inner
        # M loop (each column tile of W fetched once).
        grid = (n_n, n_m)
        in_specs = [
            pl.BlockSpec((tm, D), lambda j, i: (i, 0)),   # x (LHS + residual)
            pl.BlockSpec((D, tn), lambda j, i: (0, j)),   # W column tile
            pl.BlockSpec((1, tn), lambda j, i: (0, j)),   # b column tile
        ]
        out_spec = pl.BlockSpec((tm, tn), lambda j, i: (i, j))
        semantics = ("parallel", "parallel")
        kernel = _make_kernel(0, tn, matmul_dtype)

    out = pl.pallas_call(
        kernel,
        out_shape=jax.ShapeDtypeStruct((M, D), x.dtype),
        grid_spec=pltpu.PrefetchScalarGridSpec(
            num_scalar_prefetch=0,
            grid=grid,
            in_specs=in_specs,
            out_specs=out_spec,
        ),
        compiler_params=pltpu.CompilerParams(
            dimension_semantics=semantics,
            vmem_limit_bytes=vmem_limit,
        ),
        cost_estimate=cost,
    )(x2, w_mm, b2)
    return out.reshape(B, N, D)


if __name__ == "__main__":
    # Small but MXU-relevant shapes: 2 x 200 tokens (M=400 -> one full 256-row
    # tile + one masked partial tile, no pad copy), hidden D=256 (weight fully
    # VMEM-resident, n_n == 1).
    B, N, D = 2, 200, 256
    key = jax.random.PRNGKey(0)
    kx, kw, kb = jax.random.split(key, 3)
    x = jax.random.normal(kx, (B, N, D), dtype=jnp.float32)
    w = jax.random.normal(kw, (D, D), dtype=jnp.float32) * 0.02
    b = jax.random.normal(kb, (D,), dtype=jnp.float32) * 0.02

    out = residual_linear(x, w, b)
    out = jax.block_until_ready(out)

    # Reference: fn(x) + x with full f32 precision (matches PyTorch nn.Linear).
    ref = jnp.einsum("bnd,de->bne", x, w, precision=lax.Precision.HIGHEST)
    ref = ref + b[None, None, :] + x

    assert out.shape == (B, N, D)
    assert out.dtype == x.dtype
    assert jnp.allclose(out, ref, atol=1e-3, rtol=1e-3), "mismatch vs reference"

    print("KERNEL_OK")
</pallas_src>

<mosaic_0001>
module attributes {stable_mosaic.version = 11 : i64} {
  func.func @kernel(%arg0: i32, %arg1: memref<256x256xf32, #tpu.memory_space<vmem>>, %arg2: memref<256x256xf32, #tpu.memory_space<vmem>>, %arg3: memref<1x256xf32, #tpu.memory_space<vmem>>, %arg4: memref<256x256xf32, #tpu.memory_space<vmem>>) attributes {dimension_semantics = [#tpu.dimension_semantics<parallel>], iteration_bounds = array<i64: 2>, scalar_prefetch = 0 : i64, scratch_operands = 0 : i64, tpu.core_type = #tpu.core_type<tc>, window_params = [{transform_indices = @transform_0, window_bounds = array<i64: 256, 256>}, {pipeline_mode = #tpu.pipeline_mode<synchronous>, transform_indices = @transform_1, window_bounds = array<i64: 256, 256>}, {pipeline_mode = #tpu.pipeline_mode<synchronous>, transform_indices = @transform_2, window_bounds = array<i64: 1, 256>}, {transform_indices = @transform_3, window_bounds = array<i64: 256, 256>}]} {
    %c0 = arith.constant 0 : index
    %c0_0 = arith.constant 0 : index
    %0 = vector.load %arg1[%c0, %c0_0] : memref<256x256xf32, #tpu.memory_space<vmem>>, vector<256x256xf32>
    %c0_1 = arith.constant 0 : index
    %c0_2 = arith.constant 0 : index
    %1 = vector.load %arg2[%c0_1, %c0_2] : memref<256x256xf32, #tpu.memory_space<vmem>>, vector<256x256xf32>
    %cst = arith.constant dense<0.000000e+00> : vector<256x256xf32>
    %2 = tpu.matmul %0, %1, %cst {dimension_numbers = #tpu.dot_dimension_numbers<[1], [0], [0], [1], [0, 0, 1, 1], [], []>, precision = #tpu.contract_precision<fp32>} : vector<256x256xf32>, vector<256x256xf32>, vector<256x256xf32> -> vector<256x256xf32>
    %c0_3 = arith.constant 0 : index
    %c0_4 = arith.constant 0 : index
    %3 = vector.load %arg3[%c0_3, %c0_4] : memref<1x256xf32, #tpu.memory_space<vmem>>, vector<1x256xf32>
    %4 = vector.broadcast %3 : vector<1x256xf32> to vector<256x256xf32>
    %5 = arith.addf %2, %4 : vector<256x256xf32>
    %c0_5 = arith.constant 0 : index
    %c0_6 = arith.constant 0 : index
    %6 = vector.load %arg1[%c0_5, %c0_6] : memref<256x256xf32, #tpu.memory_space<vmem>>, vector<256x256xf32>
    %7 = arith.addf %5, %6 : vector<256x256xf32>
    %c0_7 = arith.constant 0 : index
    %c0_8 = arith.constant 0 : index
    %8 = vector.load %arg4[%c0_7, %c0_8] : memref<256x256xf32, #tpu.memory_space<vmem>>, vector<256x256xf32>
    tpu.vector_store %arg4[%c0_7, %c0_8], %7 {strides = array<i32>} : memref<256x256xf32, #tpu.memory_space<vmem>>, vector<256x256xf32>,
    return
  }
  func.func @transform_0(%arg0: i32) -> (i32, i32) {
    %c0_i32 = arith.constant 0 : i32
    %c0_i32_0 = arith.constant 0 : i32
    return %arg0, %c0_i32 : i32, i32
  }
  func.func @transform_1(%arg0: i32) -> (i32, i32) {
    %c0_i32 = arith.constant 0 : i32
    %c0_i32_0 = arith.constant 0 : i32
    %c0_i32_1 = arith.constant 0 : i32
    return %c0_i32, %c0_i32_0 : i32, i32
  }
  func.func @transform_2(%arg0: i32) -> (i32, i32) {
    %c0_i32 = arith.constant 0 : i32
    %c0_i32_0 = arith.constant 0 : i32
    %c0_i32_1 = arith.constant 0 : i32
    return %c0_i32, %c0_i32_0 : i32, i32
  }
  func.func @transform_3(%arg0: i32) -> (i32, i32) {
    %c0_i32 = arith.constant 0 : i32
    %c0_i32_0 = arith.constant 0 : i32
    return %arg0, %c0_i32 : i32, i32
  }
}

</mosaic_0001>

<bundles_post_ra>
// kernel: tpu_custom_call.1
= control target key start
LH: loop header
LB: loop body
LE: loop exit
PB: predicated region body
PF: predicated region fallthrough
CT: control target
= control target key end

     0   :  { %8 = vsyncpa [#allocation3], 0  ;;  %s9559_s0 = inlined_call_operand.hbm [shape: f32[400,256], index: 0, kind: input, shape index: {}]   ;;  %s9560_s1 = inlined_call_operand.hbm [shape: f32[256,256], index: 1, kind: input, shape index: {}]   ;;  %s9561_s2 = inlined_call_operand.hbm [shape: f32[1,256], index: 2, kind: input, shape index: {}]   ;;  %s9562_s3 = inlined_call_operand.hbm [shape: f32[400,256], index: 3, kind: output, shape index: {}]  }
   0x1   :  { %10 = vsyncpa [#allocation3 + $0x1], 0 }
   0x2   :  { %11 = vsyncpa [#allocation6], 0 }
   0x3   :  { %12 = vsyncpa [#allocation4], 0 }
   0x4   :  { %14 = vsyncpa [#allocation4 + $0x1], 0  ;;  %s6209_s12 = smov 0   ;;  %s6211_s13 = smov 0  }
   0x5   :  { %s6213_s14 = smov 0   ;;  %s6215_s15 = smov 0  }
   0x6 LB: > { %s6230_s16 = sadd.s32 4294967295, %s6177_s15   ;;  %s5830_s17 = sadd.s32 4294967294, %s6177_s15   ;;  %s6177_s15 = sphi %s6215_s15, %s10819_s15   ;;  %s6173_s14 = sphi %s6213_s14, %s10818_s14   ;;  %s6169_s13 = sphi %s6211_s13, %s10817_s13   ;;  %s6165_s12 = sphi %s6209_s12, %s10816_s12  }
   0x7   : > { %s6234_s18 = sadd.s32 1, %s6177_s15   ;;  %s27_s19 = sadd.s32 1, %s6173_s14 }
   0x8   : > { %s24_s20 = ssub.s32 %s6177_s15, %s6234_s18  ;;  %p34_p0 = scmp.ne.s32.totalorder %s6173_s14, %s6169_s13 }
   0x9   : > { %p25_p1 = scmp.eq.s32.totalorder %s24_s20, 0  ;;  %p35_p2 = scmp.eq.s32.totalorder %s6177_s15, 0 }
   0xa   : > { %p40_p3 = scmp.ne.s32.totalorder %s6169_s13, %s6165_s12  ;;  %p9564_p4 = scmp.eq.s32.totalorder %s6230_s16, 0 }
   0xb   : > { %s6246_s21 = scalar_select %p25_p1, %s6173_s14, %s27_s19  }
   0xc   : > { %p6248_p5 = por %p35_p2, %p34_p0  ;;  %p6254_p6 = por %p9564_p4, %p40_p3 }
   0xd   : > { %p106_p7 = scmp.eq.s32.totalorder %s6230_s16, 1  ;;  %p112_p8 = scmp.eq.s32.totalorder %s5830_s17, 1 }
   0xe   : > { %p5831_p9 = scmp.ge.s32.totalorder %s6177_s15, 1  ;;  %p119_p10 = scmp.lt.s32.totalorder %s6177_s15, 3 }
   0xf   : > { %p6261_p11 = por %p106_p7, %p34_p0  ;;  %p6265_p12 = por %p112_p8, %p40_p3 }
  0x10   : > { %p6269_p13 = pnand %p5831_p9, %p119_p10  ;;  %s130_s29 = sshll.u32 %s9560_s1, 4  ;;  %s131_s29 = int_to_ptr.hbm [resolvable:$true] %s130_s29 }
  0x11   : > { %s10029_s25 = scalar_select %p6265_p12, 1, 0 }
  0x12   : > { %p5876_p1 = pneg %p6269_p13  ;;  %s6179_s30 = smov [#allocation5]  }
  0x13   : > { %s132_s4 = sshll.u32 %s6179_s30, 4  ;;  %s145_s7 = sshll.u32 %s9561_s2, 4  ;;  %s133_s4 = int_to_ptr.vmem [resolvable:$true] %s132_s4  ;;  %s146_s7 = int_to_ptr.hbm [resolvable:$true] %s145_s7 }
  0x14   : > { %p5877_p0 = pnand %p5876_p1, %p9564_p4  ;;  %s6180_s8 = smov 256  }
  0x15   : > { %s6181_s9 = smov 16   ;;  %s6182_s10 = smov [#allocation7]  }
  0x16   : > { %5879 = dma.hbm_to_vmem [thread:$0]  (!%p5877_p0), %s131_s29, 8192, %s133_s4, [#allocation6], %s6180_s8, %s6180_s8, %s6181_s9  }
  0x17   : > { %s147_s11 = sshll.u32 %s6182_s10, 4  ;;  %p9563_p2 = scmp.ge.s32.totalorder %s6177_s15, 2  ;;  %s148_s11 = int_to_ptr.vmem [resolvable:$true] %s147_s11 }
  0x18   : > { %5882 = dma.hbm_to_vmem [thread:$0]  (!%p5877_p0), %s146_s7, 32, %s148_s11, [#allocation6]  }
  0x19   : > { %154 = sbr.rel (%p9563_p2) target bundleno = 66 (0x42), region = 24 }
  0x1e   : > { %157 = sbr.rel (!%p6248_p5) target bundleno = 66 (0x42), region = 28  ;;  %s158_s17 = sand.u32 (%p6248_p5), 1, %s6173_s14  }
  0x1f   : > { %s5836_s19 = sshll.u32 (%p6248_p5), %s6177_s15, 5  ;;  %s5835_s20 = sshll.u32 (%p6248_p5), %s158_s17, 9 }
  0x20   : > { %s164_s27 = ssub.s32 (%p6248_p5), 50, %s5836_s19  ;;  %s6293_s4 = scalar_lea.sflag (%p6248_p5), [#allocation3], %s158_s17 }
  0x21   : > { %p165_p3 = scmp.lt.s32.totalorder (%p6248_p5), %s164_s27, 32  ;;  %s162_s5 = scalar_lea.vmem (%p6248_p5), [#allocation2], %s5835_s20 }
  0x23   : > { %s10821_s27 = smov (!%p165_p3, %s164_s27), 32 }
  0x24   : > { %s5860_s28 = sshll.u32 %s10821_s27, 4 }
  0x25   : > { %s169_s29 = ssub.s32 512, %s5860_s28 }
  0x26   : > { %s170_s30 = sshll.u32 %s169_s29, 4 }
  0x27   : > { %171 = vsyncadd %s6293_s4, %s170_s30  ;;  %p6296_p5 = scmp.ne.s32.totalorder %s5860_s28, 0  ;;  %s5862_s6 = sshll.u32 %s6177_s15, 9 }
  0x28   : > { %s175_s9 = scalar_lea.hbm %s9559_s0, %s5862_s6  ;;  %s6304_s10 = sshll.u32 %s162_s5, 4  ;;  %s180_s10 = int_to_ptr.vmem [resolvable:$true] %s6304_s10 }
  0x29   : > { %s177_s11 = sshll.u32 %s175_s9, 4  ;;  %s5843_s17 = sshll.u32 %s10821_s27, 8  ;;  %s6307_s11 = int_to_ptr.hbm [resolvable:$true] %s177_s11 }
  0x2a   : > { %s6057_s19 = sshra.s32 %s6307_s11, 4  ;;  %s6059_s20 = sshrl.u32 %s5843_s17, 4  ;;  %s6058_s19 = int_to_ptr.hbm [resolvable:$true] %s6057_s19 }
  0x2b   : > { %s6064_s28 = scalar_lea.hbm %s6058_s19, %s6059_s20  ;;  %s6068_s5 = scalar_lea.hbm %s9559_s0, 800 }
  0x2c   : > { %p6065_p7 = scmp.ne.s32.totalorder %s6058_s19, %s6064_s28  ;;  %p6069_p10 = scmp.lt.s32.totalorder %s6058_s19, %s9559_s0 }
  0x2d   : > { %p6070_p1 = scmp.lt.s32.totalorder %s6068_s5, %s6064_s28 }
  0x2e   : > { %p6066_p8 = pnand %p6065_p7, %p6296_p5 }
  0x2f   : > { %p6071_p0 = por %p6070_p1, %p6069_p10 }
  0x30   : > { %p6067_p9 = pneg %p6066_p8 }
  0x32   : > { %p6072_p3 = pnand %p6071_p0, %p6067_p9 }
  0x34   : > { %6075 = shalt.err (!%p6072_p3)
}
  0x35   : > { %s6076_s8 = sshra.s32 %s180_s10, 4  ;;  %s6183_s29 = smov [#allocation2]   ;;  %s6077_s8 = int_to_ptr.vmem [resolvable:$true] %s6076_s8 }
  0x36   : > { %s6083_s9 = scalar_lea.vmem %s6077_s8, %s6059_s20  ;;  %s6087_s30 = scalar_lea.vmem %s6183_s29, 1024 }
  0x37   : > { %p6084_p7 = scmp.ne.s32.totalorder %s6077_s8, %s6083_s9  ;;  %p6089_p4 = scmp.lt.s32.totalorder %s6087_s30, %s6083_s9 }
  0x39   : > { %p6085_p8 = pnand %p6084_p7, %p6296_p5 }
  0x3b   : > { %p6086_p2 = pneg %p6085_p8 }
  0x3d   : > { %p6091_p12 = pnand %p6089_p4, %p6086_p2 }
  0x3f   : > { %6094 = shalt.err (!%p6091_p12)
}
  0x40   : > { %s6184_s19 = smov 256   ;;  %s6185_s28 = smov 16  }
  0x41   : > { %185 = dma.hbm_to_vmem [thread:$0]  (%p6296_p5), %s6307_s11, %s5843_s17, %s180_s10, %s6293_s4, %s6184_s19, %s6184_s19, %s6185_s28  }
  0x42 PF: > { %191 = sbr.rel (%p6269_p13) target bundleno = 1815 (0x717), region = 32 }
  0x47   : > { %s6336_s20 = sand.u32 1, %s6169_s13  }
  0x48   : > { %s5845_s5 = sshll.u32 %s6336_s20, 9  ;;  %s194_s6 = scalar_lea.sflag [#allocation3], %s6336_s20 }
  0x49   : > { %s6342_s7 = scalar_lea.vmem [#allocation2], %s5845_s5 }
  0x4a   : > { %6152 = dma.done.wait (%p6254_p6), %s194_s6, 8192  }
  0x4b   : > { %6154 = vsyncadd (%p6254_p6), %s194_s6, 4294959104  ;;  %p10032_p4 = scmp.eq.s32.totalorder %s6230_s16, 0 }
  0x4d   : > { %6156 = dma.done.wait (%p10032_p4), [#allocation6], 8224   ;;  %p10033_p12 = pmov %p10032_p4 }
  0x4e   : > { %v337_v0 = vld [vmem:[#allocation5 + $0xf0] sm:$0xff]  ;;  %v335_v1 = vld [vmem:[#allocation5 + $0xe0] sm:$0xff]  ;;  %s8322_s23 = scalar_lea.vmem [#allocation8], %s5845_s5  ;;  %s5714_s26 = scalar_lea.sflag [#allocation4], %s6336_s20 }
  0x4f   : > { %6158 = vsyncadd (%p10033_p12), [#allocation6], 4294959072  ;;  %v333_v2 = vld [vmem:[#allocation5 + $0xd0] sm:$0xff]  ;;  %v6352_v3 = vand.u32 4294901760, %v337_v0  ;;  %v6354_v4 = vand.u32 4294901760, %v335_v1  ;;  %v331_v6 = vld [vmem:[#allocation5 + $0xc0] sm:$0xff] }
  0x50   : > { %v6356_v5 = vand.u32 4294901760, %v333_v2  ;;  %v329_v7 = vld [vmem:[#allocation5 + $0xb0] sm:$0xff]  ;;  %v327_v8 = vld [vmem:[#allocation5 + $0xa0] sm:$0xff]  ;;  %v6358_v9 = vand.u32 4294901760, %v331_v6  ;;  %s5850_s27 = sshll.u32 (%p6261_p11), %s6230_s16, 5 }
  0x51   : > { %v6360_v10 = vand.u32 4294901760, %v329_v7  ;;  %v6362_v11 = vand.u32 4294901760, %v327_v8  ;;  %v325_v12 = vld [vmem:[#allocation5 + $0x90] sm:$0xff]  ;;  %v323_v13 = vld [vmem:[#allocation5 + $0x80] sm:$0xff]  ;;  %378 = vmatpush.msra.mxu0 %v6352_v3  ;;  %v6366_v14 = vsub.f32 %v337_v0, %v6352_v3  ;;  %v6369_v15 = vsub.f32 %v335_v1, %v6354_v4  ;;  %1101 = vmatpush.msra.mxu3 %v6352_v3  ;;  %s5722_s4 = ssub.s32 (%p6261_p11), 50, %s5850_s27 }
  0x52   : > { %v6373_v16 = vsub.f32 %v333_v2, %v6356_v5  ;;  %v6375_v17 = vand.u32 4294901760, %v325_v12  ;;  %v321_v18 = vld [vmem:[#allocation5 + $0x70] sm:$0xff]  ;;  %v6378_v19 = vsub.f32 %v331_v6, %v6358_v9  ;;  %v6391_v25 = vand.u32 4294901760, %v323_v13  ;;  %v319_v26 = vld [vmem:[#allocation5 + $0x60] sm:$0xff]  ;;  %p5723_p6 = scmp.lt.s32.totalorder (%p6261_p11), %s5722_s4, 32 }
  0x53   : > { %v6381_v20 = vsub.f32 %v329_v7, %v6360_v10  ;;  %v6384_v21 = vsub.f32 %v327_v8, %v6362_v11  ;;  %380 = vmatpush.msra.mxu0 %v6354_v4  ;;  %893 = vmatpush.msra.mxu2 %v6366_v14  ;;  %v668_v22 = vand.u32 4294901760, %v6366_v14  ;;  %v674_v23 = vand.u32 4294901760, %v6369_v15  ;;  %v317_v34 = vld [vmem:[#allocation5 + $0x50] sm:$0xff]  ;;  %v315_v44 = vld [vmem:[#allocation5 + $0x40] sm:$0xff] }
  0x54   : > { %v680_v24 = vand.u32 4294901760, %v6373_v16  ;;  %1103 = vmatpush.msra.mxu3 %v6354_v4  ;;  %v686_v27 = vand.u32 4294901760, %v6378_v19  ;;  %v6395_v28 = vand.u32 4294901760, %v321_v18  ;;  %v6398_v29 = vsub.f32 %v325_v12, %v6375_v17  ;;  %v313_v49 = vld [vmem:[#allocation5 + $0x30] sm:$0xff]  ;;  %v311_v56 = vld [vmem:[#allocation5 + $0x20] sm:$0xff] }
  0x55   : > { %382 = vmatpush.msra.mxu0 %v6356_v5  ;;  %896 = vmatpush.msra.mxu2 %v6369_v15  ;;  %v669_v30 = vsub.f32 %v6366_v14, %v668_v22  ;;  %v675_v31 = vsub.f32 %v6369_v15, %v674_v23  ;;  %v692_v33 = vand.u32 4294901760, %v6381_v20  ;;  %v6413_v35 = vand.u32 4294901760, %v319_v26  ;;  %v243_v57 = vld [vmem:[%s6342_s7] sm:$0xff]  ;;  %v309_v62 = vld [vmem:[#allocation5 + $0x10] sm:$0xff] }
  0x56   : > { %v681_v32 = vsub.f32 %v6373_v16, %v680_v24  ;;  %1105 = vmatpush.msra.mxu3 %v6356_v5  ;;  %v9577_v36 = vand.u32 4294901760, %v6384_v21  ;;  %v687_v39 = vsub.f32 %v6378_v19, %v686_v27  ;;  %v6422_v40 = vsub.f32 %v323_v13, %v6391_v25  ;;  %v369_v63 = vld [vmem:[#allocation5 + $0x1f0] sm:$0xff]  ;;  %v307_v13 = vld [vmem:[#allocation5] sm:$0xff] }
  0x57   : > { %384 = vmatpush.msra.mxu0 %v6358_v9  ;;  %v670_v37 = vand.u32 4294901760, %v669_v30  ;;  %899 = vmatpush.msra.mxu2 %v6373_v16  ;;  %v676_v38 = vand.u32 4294901760, %v675_v31  ;;  %v6425_v41 = vand.u32 4294901760, %v317_v34  ;;  %v9576_v42 = vand.u32 4294901760, %v6398_v29  ;;  %v251_v15 = vld [vmem:[%s6342_s7 + $0x40] sm:$0xff] }
  0x58   : > { %1107 = vmatpush.msra.mxu3 %v6358_v9  ;;  %v6429_v43 = vsub.f32 %v321_v18, %v6395_v28  ;;  %v682_v45 = vand.u32 4294901760, %v681_v32  ;;  %v693_v46 = vsub.f32 %v6381_v20, %v692_v33  ;;  %v699_v47 = vsub.f32 %v6384_v21, %v9577_v36  ;;  %v245_v32 = vld [vmem:[%s6342_s7 + $0x10] sm:$0xff] }
  0x59   : > { %386 = vmatpush.msra.mxu0 %v6360_v10  ;;  %671 = vmatpush.msra.mxu1 %v670_v37  ;;  %v6441_v48 = vsub.f32 %v319_v26, %v6413_v35  ;;  %v688_v50 = vand.u32 4294901760, %v687_v39  ;;  %v6444_v51 = vand.u32 4294901760, %v315_v44  ;;  %v9570_v52 = vand.u32 4294901760, %v6422_v40  ;;  %v365_v36 = vld [vmem:[#allocation5 + $0x1d0] sm:$0xff] }
  0x5a   : > { %902 = vmatpush.msra.mxu2 %v6378_v19  ;;  %1109 = vmatpush.msra.mxu3 %v6360_v10  ;;  %v705_v53 = vsub.f32 %v6398_v29, %v9576_v42  ;;  %v9569_v54 = vand.u32 4294901760, %v6429_v43  ;;  %v6454_v55 = vsub.f32 %v317_v34, %v6425_v41  ;;  %v694_v58 = vand.u32 4294901760, %v693_v46  ;;  %v253_v19 = vld [vmem:[%s6342_s7 + $0x50] sm:$0xff] }
  0x5b   : > { %388 = vmatpush.msra.mxu0 %v6362_v11  ;;  %677 = vmatpush.msra.mxu1 %v676_v38  ;;  %v6458_v59 = vand.u32 4294901760, %v313_v49  ;;  %v700_v60 = vand.u32 4294901760, %v699_v47  ;;  %v9568_v61 = vand.u32 4294901760, %v6441_v48  ;;  %v711_v0 = vsub.f32 %v6422_v40, %v9570_v52 }
  0x5c   : > { %905 = vmatpush.msra.mxu2 %v6381_v20  ;;  %1111 = vmatpush.msra.mxu3 %v6362_v11  ;;  %v6467_v1 = vand.u32 4294901760, %v311_v56  ;;  %v6470_v2 = vsub.f32 %v315_v44, %v6444_v51  ;;  %v6472_v6 = vand.u32 4294901760, %v243_v57  ;;  %v706_v7 = vand.u32 4294901760, %v705_v53 }
  0x5d   : > { %390 = vmatpush.msra.mxu0 %v6375_v17  ;;  %683 = vmatpush.msra.mxu1 %v682_v45  ;;  %v717_v8 = vsub.f32 %v6429_v43, %v9569_v54  ;;  %v9566_v12 = vand.u32 4294901760, %v6454_v55  ;;  %v6481_v18 = vand.u32 4294901760, %v309_v62  ;;  %v6484_v26 = vsub.f32 %v313_v49, %v6458_v59  ;;  %v367_v45 = vld [vmem:[#allocation5 + $0x1e0] sm:$0xff] }
  0x5e   : > { %908 = vmatpush.msra.mxu2 %v6384_v21  ;;  %1113 = vmatpush.msra.mxu3 %v6375_v17  ;;  %10034 = vst [vmem:[#allocation12_spill] sm:$0xff] %v6472_v6  ;;  %v6487_v30 = vsub.f32 %v243_v57, %v6472_v6  ;;  %v6489_v31 = vand.u32 4294901760, %v369_v63  ;;  %v723_v34 = vsub.f32 %v6441_v48, %v9568_v61  ;;  %v712_v37 = vand.u32 4294901760, %v711_v0 }
  0x5f   : > { %392 = vmatpush.msra.mxu0 %v6391_v25  ;;  %689 = vmatpush.msra.mxu1 %v688_v50  ;;  %v6498_v38 = vand.u32 4294901760, %v307_v13  ;;  %v9565_v39 = vand.u32 4294901760, %v6470_v2  ;;  %v6502_v44 = vsub.f32 %v311_v56, %v6467_v1  ;;  %v718_v46 = vand.u32 4294901760, %v717_v8 }
  0x60   : > { %911 = vmatpush.msra.mxu2 %v6398_v29  ;;  %1115 = vmatpush.msra.mxu3 %v6391_v25  ;;  %10035 = vst [vmem:[#allocation13_spill] sm:$0xff] %v6487_v30  ;;  %v729_v47 = vsub.f32 %v6454_v55, %v9566_v12  ;;  %v6510_v49 = vand.u32 4294901760, %v6487_v30  ;;  %v6512_v50 = vand.u32 4294901760, %v245_v32  ;;  %v9567_v53 = vand.u32 4294901760, %v6484_v26  ;;  %v247_v12 = vld [vmem:[%s6342_s7 + $0x20] sm:$0xff] }
  0x61   : > { %394 = vmatpush.msra.mxu0 %v6395_v28  ;;  %695 = vmatpush.msra.mxu1 %v694_v58  ;;  %v6517_v56 = vsub.f32 %v309_v62, %v6481_v18  ;;  %v6520_v57 = vsub.f32 %v369_v63, %v6489_v31  ;;  %v6522_v58 = vand.u32 4294901760, %v367_v45  ;;  %v735_v0 = vsub.f32 %v6470_v2, %v9565_v39 }
  0x62   : > { %914 = vmatpush.msra.mxu2 %v6422_v40  ;;  %1117 = vmatpush.msra.mxu3 %v6395_v28  ;;  %10036 = vst [vmem:[#allocation14_spill] sm:$0xff] %v6510_v49  ;;  %v9571_v62 = vand.u32 4294901760, %v6502_v44  ;;  %v6532_v63 = vsub.f32 %v307_v13, %v6498_v38  ;;  %v412_v8 = vsub.f32 %v6487_v30, %v6510_v49  ;;  %v6566_v52 = vand.u32 4294901760, %v247_v12 }
  0x63   : > { %396 = vmatpush.msra.mxu0 %v6413_v35  ;;  %701 = vmatpush.msra.mxu1 %v700_v60  ;;  %10037 = vst [vmem:[#allocation15_spill] sm:$0xff] %v6512_v50  ;;  %v724_v60 = vand.u32 4294901760, %v723_v34  ;;  %v6542_v34 = vsub.f32 %v245_v32, %v6512_v50  ;;  %v741_v13 = vsub.f32 %v6484_v26, %v9567_v53  ;;  %v9572_v39 = vand.u32 4294901760, %v6520_v57 }
  0x64   : > { %917 = vmatpush.msra.mxu2 %v6429_v43  ;;  %1119 = vmatpush.msra.mxu3 %v6413_v35  ;;  %v736_v32 = vand.u32 4294901760, %v735_v0  ;;  %v6560_v61 = vand.u32 4294901760, %v412_v8  ;;  %10041 = vst [vmem:[#allocation19_spill] sm:$0xff] %v6566_v52 }
  0x65   : > { %398 = vmatpush.msra.mxu0 %v6425_v41  ;;  %707 = vmatpush.msra.mxu1 %v706_v7  ;;  %v6535_v7 = vsub.f32 %v367_v45, %v6522_v58  ;;  %10038 = vst [vmem:[#allocation16_spill] sm:$0xff] %v6542_v34  ;;  %v9573_v45 = vand.u32 4294901760, %v6517_v56  ;;  %v6564_v54 = vand.u32 4294901760, %v6542_v34  ;;  %v1971_v8 = vsub.f32 %v6520_v57, %v9572_v39 }
  0x66   : > { %920 = vmatpush.msra.mxu2 %v6441_v48  ;;  %1121 = vmatpush.msra.mxu3 %v6425_v41  ;;  %10039 = vst [vmem:[#allocation17_spill] sm:$0xff] %v6560_v61 }
  0x67   : > { %400 = vmatpush.msra.mxu0 %v6444_v51  ;;  %713 = vmatpush.msra.mxu1 %v712_v37  ;;  %v730_v37 = vand.u32 4294901760, %v729_v47  ;;  %v9574_v47 = vand.u32 4294901760, %v6532_v63  ;;  %v9575_v53 = vand.u32 4294901760, %v6535_v7  ;;  %10040 = vst [vmem:[#allocation18_spill] sm:$0xff] %v6564_v54  ;;  %v753_v0 = vsub.f32 %v6517_v56, %v9573_v45 }
  0x68   : > { %923 = vmatpush.msra.mxu2 %v6454_v55  ;;  %1123 = vmatpush.msra.mxu3 %v6444_v51  ;;  %v420_v39 = vsub.f32 %v6542_v34, %v6564_v54  ;;  %v6589_v45 = vsub.f32 %v247_v12, %v6566_v52 }
  0x69   : > { %402 = vmatpush.msra.mxu0 %v6458_v59  ;;  %719 = vmatpush.msra.mxu1 %v718_v46  ;;  %v747_v46 = vsub.f32 %v6502_v44, %v9571_v62 }
  0x6a   : > { %926 = vmatpush.msra.mxu2 %v6470_v2  ;;  %1125 = vmatpush.msra.mxu3 %v6458_v59  ;;  %10042 = vst [vmem:[#allocation20_spill] sm:$0xff] %v6589_v45  ;;  %v6599_v12 = vand.u32 4294901760, %v420_v39 }
  0x6b   : > { %404 = vmatpush.msra.mxu0 %v6467_v1  ;;  %725 = vmatpush.msra.mxu1 %v724_v60  ;;  %v742_v60 = vand.u32 4294901760, %v741_v13  ;;  %v748_v62 = vand.u32 4294901760, %v747_v46  ;;  %v1977_v13 = vsub.f32 %v6535_v7, %v9575_v53  ;;  %v1972_v46 = vand.u32 4294901760, %v1971_v8 }
  0x6c   : > { %929 = vmatpush.msra.mxu2 %v6484_v26  ;;  %1127 = vmatpush.msra.mxu3 %v6467_v1  ;;  %10043 = vst [vmem:[#allocation21_spill] sm:$0xff] %v6599_v12  ;;  %v6606_v8 = vand.u32 4294901760, %v365_v36 }
  0x6d   : > { %406 = vmatpush.msra.mxu0 %v6481_v18  ;;  %731 = vmatpush.msra.mxu1 %v730_v37  ;;  %v759_v37 = vsub.f32 %v6532_v63, %v9574_v47  ;;  %v249_v47 = vld [vmem:[%s6342_s7 + $0x30] sm:$0xff]  ;;  %v1978_v42 = vand.u32 4294901760, %v1977_v13  ;;  %v10058_v13 = vand.u32 4294901760, %v6429_v43 }
  0x6e   : > { %932 = vmatpush.msra.mxu2 %v6502_v44  ;;  %1129 = vmatpush.msra.mxu3 %v6481_v18  ;;  %v6612_v14 = vsub.f32 %v365_v36, %v6606_v8 }
  0x6f   : > { %408 = vmatpush.msra.mxu0 %v6498_v38  ;;  %737 = vmatpush.msra.mxu1 %v736_v32  ;;  %v754_v32 = vand.u32 4294901760, %v753_v0  ;;  %v760_v53 = vand.u32 4294901760, %v759_v37  ;;  %v6604_v0 = vand.u32 4294901760, %v249_v47  ;;  %v255_v37 = vld [vmem:[%s6342_s7 + $0x60] sm:$0xff] }
  0x70   : > { %414 = vmatmul.f32.vlgmr.msra.gmra.mxu0 %v6560_v61  ;;  %935 = vmatpush.msra.mxu2 %v6517_v56  ;;  %v6703_v43 = vand.u32 4294901760, %v255_v37 }
  0x71   : > { %743 = vmatpush.msra.mxu1 %v742_v60  ;;  %1131 = vmatpush.msra.mxu3 %v6498_v38  ;;  %v6602_v60 = vand.u32 4294901760, %v6589_v45  ;;  %10045 = vst [vmem:[#allocation23_spill] sm:$0xff] %v6604_v0  ;;  %v6619_v39 = vsub.f32 %v249_v47, %v6604_v0 }
  0x72   : > { %938 = vmatpush.msra.mxu2 %v6532_v63  ;;  %1135 = vmatmul.f32.vlgmr.msra.gmra.mxu3 %v6510_v49  ;;  %10062 = vst [vmem:[#allocation35_spill] sm:$0xff] %v6703_v43 }
  0x73   : > { %749 = vmatpush.msra.mxu1 %v748_v62  ;;  %941 = vmatmul.f32.vlgmr.msra.gmra.mxu2 %v6487_v30  ;;  %10044 = vst [vmem:[#allocation22_spill] sm:$0xff] %v6602_v60  ;;  %v9581_v62 = vand.u32 4294901760, %v6612_v14 }
  0x74   : > { %1680 = vmatpush.msrb.mxu2 %v6489_v31  ;;  %1328 = vmatpush.msrb.mxu0 %v668_v22  ;;  %v428_v22 = vsub.f32 %v6589_v45, %v6602_v60  ;;  %10046 = vst [vmem:[#allocation24_spill] sm:$0xff] %v6619_v39 }
  0x75   : > { %755 = vmatpush.msra.mxu1 %v754_v32  ;;  %1973 = vmatpush.msrb.mxu3 %v1972_v46 }
  0x76   : > { %1682 = vmatpush.msrb.mxu2 %v6522_v58  ;;  %1332 = vmatpush.msrb.mxu0 %v674_v23  ;;  %v1983_v23 = vsub.f32 %v6612_v14, %v9581_v62  ;;  %v6633_v36 = vand.u32 4294901760, %v428_v22  ;;  %v10063_v22 = vand.u32 4294901760, %v6454_v55  ;;  %v10066_v55 = vand.u32 4294901760, %v6484_v26  ;;  %v267_v62 = vld [vmem:[%s6342_s7 + $0xc0] sm:$0xff] }
  0x77   : > { %761 = vmatpush.msra.mxu1 %v760_v53  ;;  %1979 = vmatpush.msrb.mxu3 %v1978_v42  ;;  %v6638_v42 = vand.u32 4294901760, %v251_v15 }
  0x78   : > { %422 = vmatmul.f32.gmra.mxu0 %v6599_v12  ;;  %763 = vmatmul.f32.vlgmr.msra.gmra.mxu1 %v6472_v6  ;;  %10047 = vst [vmem:[#allocation25_spill] sm:$0xff] %v6633_v36  ;;  %v1984_v53 = vand.u32 4294901760, %v1983_v23  ;;  %v6716_v23 = vsub.f32 %v255_v37, %v6703_v43 }
  0x79   : > { %1519 = vmatpush.msrb.mxu1 %v6352_v3  ;;  %1684 = vmatpush.msrb.mxu2 %v6606_v8  ;;  %v6636_v3 = vand.u32 4294901760, %v6619_v39  ;;  %10049 = vst [vmem:[#allocation27_spill] sm:$0xff] %v6638_v42  ;;  %v6651_v16 = vsub.f32 %v251_v15, %v6638_v42  ;;  %v10064_v15 = vand.u32 4294901760, %v6470_v2 }
  0x7a   : > { %1141 = vmatmul.f32.gmra.mxu3 %v6564_v54  ;;  %1336 = vmatpush.msrb.mxu0 %v680_v24  ;;  %10065 = vst [vmem:[#allocation36_spill] sm:$0xff] %v6716_v23 }
  0x7b   : > { %946 = vmatmul.f32.gmra.mxu2 %v6542_v34  ;;  %1521 = vmatpush.msrb.mxu1 %v6354_v4  ;;  %10048 = vst [vmem:[#allocation26_spill] sm:$0xff] %v6636_v3  ;;  %v436_v4 = vsub.f32 %v6619_v39, %v6636_v3  ;;  %v6663_v24 = vand.u32 4294901760, %v6651_v16 }
  0x7c   : > { %1340 = vmatpush.msrb.mxu0 %v686_v27  ;;  %1985 = vmatpush.msrb.mxu3 %v1984_v53  ;;  %10050 = vst [vmem:[#allocation28_spill] sm:$0xff] %v6651_v16  ;;  %v6665_v27 = vand.u32 4294901760, %v253_v19  ;;  %v6728_v53 = vand.u32 4294901760, %v6716_v23 }
  0x7d   : > { %1523 = vmatpush.msrb.mxu1 %v6356_v5  ;;  %v10051_v5 = vand.u32 4294901760, %v6384_v21  ;;  %v6660_v20 = vand.u32 4294901760, %v436_v4  ;;  %10053 = vst [vmem:[#allocation30_spill] sm:$0xff] %v6663_v24 }
  0x7e   : > { %1344 = vmatpush.msrb.mxu0 %v692_v33  ;;  %10054 = vst [vmem:[#allocation31_spill] sm:$0xff] %v6665_v27  ;;  %v6684_v47 = vsub.f32 %v253_v19, %v6665_v27 }
  0x7f   : > { %1525 = vmatpush.msrb.mxu1 %v6358_v9  ;;  %v363_v9 = vld [vmem:[#allocation5 + $0x1c0] sm:$0xff]  ;;  %10052 = vst [vmem:[#allocation29_spill] sm:$0xff] %v6660_v20 }
  0x80   : > { %430 = vmatmul.f32.gmra.mxu0 %v6633_v36  ;;  %767 = vmatmul.f32.gmra.mxu1 %v6512_v50  ;;  %v6667_v33 = vand.u32 4294901760, %v363_v9  ;;  %10057 = vst [vmem:[#allocation32_spill] sm:$0xff] %v6684_v47  ;;  %v6701_v46 = vand.u32 4294901760, %v6684_v47 }
  0x81   : > { %1527 = vmatpush.msrb.mxu1 %v6360_v10  ;;  %1348 = vmatpush.msrb.mxu0 %v10051_v5  ;;  %v10055_v10 = vand.u32 4294901760, %v6398_v29  ;;  %v444_v29 = vsub.f32 %v6651_v16, %v6663_v24  ;;  %10068 = vst [vmem:[#allocation38_spill] sm:$0xff] %v6728_v53 }
  0x82   : > { %1147 = vmatmul.f32.gmra.mxu3 %v6602_v60  ;;  %1686 = vmatpush.msrb.mxu2 %v6667_v33  ;;  %v6674_v21 = vsub.f32 %v363_v9, %v6667_v33  ;;  %10061 = vst [vmem:[#allocation34_spill] sm:$0xff] %v6701_v46  ;;  %v259_v9 = vld [vmem:[%s6342_s7 + $0x80] sm:$0xff] }
  0x83   : > { %951 = vmatmul.f32.gmra.mxu2 %v6589_v45  ;;  %1529 = vmatpush.msrb.mxu1 %v6362_v11  ;;  %v10056_v11 = vand.u32 4294901760, %v6422_v40  ;;  %v10059_v40 = vand.u32 4294901760, %v6441_v48  ;;  %v6698_v32 = vand.u32 4294901760, %v444_v29  ;;  %v452_v48 = vsub.f32 %v6684_v47, %v6701_v46 }
  0x84   : > { %1352 = vmatpush.msrb.mxu0 %v10055_v10  ;;  %v10073_v10 = vand.u32 4294901760, %v6532_v63 }
  0x85   : > { %1531 = vmatpush.msrb.mxu1 %v6375_v17  ;;  %v9580_v17 = vand.u32 4294901760, %v6674_v21  ;;  %10060 = vst [vmem:[#allocation33_spill] sm:$0xff] %v6698_v32  ;;  %v6725_v2 = vand.u32 4294901760, %v452_v48 }
  0x86   : > { %1356 = vmatpush.msrb.mxu0 %v10056_v11  ;;  %v6768_v11 = vand.u32 4294901760, %v259_v9 }
  0x87   : > { %1533 = vmatpush.msrb.mxu1 %v6391_v25  ;;  %v1989_v25 = vsub.f32 %v6674_v21, %v9580_v17  ;;  %10067 = vst [vmem:[#allocation37_spill] sm:$0xff] %v6725_v2 }
  0x88   : > { %438 = vmatmul.f32.gmra.mxu0 %v6660_v20  ;;  %771 = vmatmul.f32.gmra.mxu1 %v6566_v52  ;;  %10076 = vst [vmem:[#allocation43_spill] sm:$0xff] %v6768_v11  ;;  %v6779_v37 = vsub.f32 %v259_v9, %v6768_v11 }
  0x89   : > { %1360 = vmatpush.msrb.mxu0 %v10058_v13  ;;  %1535 = vmatpush.msrb.mxu1 %v6395_v28  ;;  %v1990_v28 = vand.u32 4294901760, %v1989_v25  ;;  %v261_v13 = vld [vmem:[%s6342_s7 + $0x90] sm:$0xff]  ;;  %v359_v25 = vld [vmem:[#allocation5 + $0x1a0] sm:$0xff] }
  0x8a   : > { %1153 = vmatmul.f32.gmra.mxu3 %v6636_v3  ;;  %10077 = vst [vmem:[#allocation44_spill] sm:$0xff] %v6779_v37 }
  0x8b   : > { %956 = vmatmul.f32.gmra.mxu2 %v6619_v39  ;;  %1364 = vmatpush.msrb.mxu0 %v10059_v40 }
  0x8c   : > { %1537 = vmatpush.msrb.mxu1 %v6413_v35  ;;  %1991 = vmatpush.msrb.mxu3 %v1990_v28  ;;  %v257_v35 = vld [vmem:[%s6342_s7 + $0x70] sm:$0xff]  ;;  %v6790_v28 = vand.u32 4294901760, %v6779_v37 }
  0x8d   : > { %1368 = vmatpush.msrb.mxu0 %v10063_v22  ;;  %v6730_v4 = vand.u32 4294901760, %v257_v35  ;;  %v6792_v22 = vand.u32 4294901760, %v261_v13 }
  0x8e   : > { %1539 = vmatpush.msrb.mxu1 %v6425_v41  ;;  %v361_v41 = vld [vmem:[#allocation5 + $0x1b0] sm:$0xff]  ;;  %10079 = vst [vmem:[#allocation46_spill] sm:$0xff] %v6790_v28 }
  0x8f   : > { %1372 = vmatpush.msrb.mxu0 %v10064_v15  ;;  %10069 = vst [vmem:[#allocation39_spill] sm:$0xff] %v6730_v4  ;;  %v6732_v19 = vand.u32 4294901760, %v361_v41  ;;  %v6749_v5 = vsub.f32 %v257_v35, %v6730_v4  ;;  %v6794_v15 = vand.u32 4294901760, %v359_v25  ;;  %v476_v35 = vsub.f32 %v6779_v37, %v6790_v28 }
  0x90   : > { %446 = vmatmul.f32.gmra.mxu0 %v6698_v32  ;;  %775 = vmatmul.f32.gmra.mxu1 %v6604_v0  ;;  %10080 = vst [vmem:[#allocation47_spill] sm:$0xff] %v6792_v22 }
  0x91   : > { %1541 = vmatpush.msrb.mxu1 %v6444_v51  ;;  %1376 = vmatpush.msrb.mxu0 %v10066_v55  ;;  %v10070_v51 = vand.u32 4294901760, %v6502_v44  ;;  %v6739_v26 = vsub.f32 %v361_v41, %v6732_v19  ;;  %v460_v44 = vsub.f32 %v6716_v23, %v6728_v53  ;;  %10072 = vst [vmem:[#allocation40_spill] sm:$0xff] %v6749_v5  ;;  %v6766_v63 = vand.u32 4294901760, %v6749_v5 }
  0x92   : > { %1159 = vmatmul.f32.gmra.mxu3 %v6663_v24  ;;  %1688 = vmatpush.msrb.mxu2 %v6732_v19  ;;  %v6799_v48 = vsub.f32 %v359_v25, %v6794_v15  ;;  %v6807_v55 = vsub.f32 %v261_v13, %v6792_v22  ;;  %v265_v13 = vld [vmem:[%s6342_s7 + $0xb0] sm:$0xff] }
  0x93   : > { %961 = vmatmul.f32.gmra.mxu2 %v6651_v16  ;;  %1543 = vmatpush.msrb.mxu1 %v6458_v59  ;;  %v10071_v59 = vand.u32 4294901760, %v6517_v56  ;;  %v6763_v56 = vand.u32 4294901760, %v460_v44  ;;  %10075 = vst [vmem:[#allocation42_spill] sm:$0xff] %v6766_v63  ;;  %v468_v29 = vsub.f32 %v6749_v5, %v6766_v63  ;;  %v6817_v44 = vand.u32 4294901760, %v476_v35  ;;  %v357_v25 = vld [vmem:[#allocation5 + $0x190] sm:$0xff] }
  0x94   : > { %1380 = vmatpush.msrb.mxu0 %v10070_v51  ;;  %1690 = vmatpush.msrb.mxu2 %v6794_v15  ;;  %10081 = vst [vmem:[#allocation48_spill] sm:$0xff] %v6807_v55  ;;  %v9578_v41 = vand.u32 4294901760, %v6799_v48  ;;  %v263_v51 = vld [vmem:[%s6342_s7 + $0xa0] sm:$0xff]  ;;  %v6820_v9 = vand.u32 4294901760, %v6807_v55 }
  0x95   : > { %1545 = vmatpush.msrb.mxu1 %v6467_v1  ;;  %v9579_v1 = vand.u32 4294901760, %v6739_v26  ;;  %10074 = vst [vmem:[#allocation41_spill] sm:$0xff] %v6763_v56  ;;  %v6787_v40 = vand.u32 4294901760, %v468_v29 }
  0x96   : > { %1384 = vmatpush.msrb.mxu0 %v10071_v59  ;;  %v2001_v59 = vsub.f32 %v6799_v48, %v9578_v41  ;;  %10082 = vst [vmem:[#allocation49_spill] sm:$0xff] %v6817_v44  ;;  %v6841_v41 = vand.u32 4294901760, %v357_v25 }
  0x97   : > { %1547 = vmatpush.msrb.mxu1 %v6481_v18  ;;  %v1995_v18 = vsub.f32 %v6739_v26, %v9579_v1  ;;  %10078 = vst [vmem:[#allocation45_spill] sm:$0xff] %v6787_v40 }
  0x98   : > { %454 = vmatmul.f32.gmra.mxu0 %v6725_v2  ;;  %779 = vmatmul.f32.gmra.mxu1 %v6638_v42  ;;  %10083 = vst [vmem:[#allocation50_spill] sm:$0xff] %v6820_v9  ;;  %v279_v2 = vld [vmem:[%s6342_s7 + $0x120] sm:$0xff] }
  0x99   : > { %1388 = vmatpush.msrb.mxu0 %v10073_v10  ;;  %1549 = vmatpush.msrb.mxu1 %v6498_v38  ;;  %v1996_v38 = vand.u32 4294901760, %v1995_v18  ;;  %v6822_v10 = vand.u32 4294901760, %v263_v51  ;;  %v2002_v18 = vand.u32 4294901760, %v2001_v59  ;;  %v7006_v24 = vand.u32 4294901760, %v279_v2 }
  0x9a   : > { %1165 = vmatmul.f32.gmra.mxu3 %v6701_v46  ;;  %1692 = vmatpush.msrb.mxu2 %v6841_v41 }
  0x9b   : > { %2195 = vmatpush.msra.mxu0 %v6520_v57  ;;  %966 = vmatmul.f32.gmra.mxu2 %v6684_v47  ;;  %10084 = vst [vmem:[#allocation51_spill] sm:$0xff] %v6822_v10  ;;  %v6829_v29 = vsub.f32 %v263_v51, %v6822_v10  ;;  %v6845_v51 = vsub.f32 %v357_v25, %v6841_v41 }
  0x9c   : > { %2403 = vmatpush.msra.mxu1 %v6489_v31  ;;  %1997 = vmatpush.msrb.mxu3 %v1996_v38  ;;  %v484_v38 = vsub.f32 %v6807_v55, %v6820_v9  ;;  %10116 = vst [vmem:[#allocation83_spill] sm:$0xff] %v7006_v24 }
  0x9d   : > { %2198 = vmatpush.msra.mxu0 %v6535_v7  ;;  %10085 = vst [vmem:[#allocation52_spill] sm:$0xff] %v6829_v29  ;;  %v6837_v59 = vand.u32 4294901760, %v6829_v29  ;;  %v9586_v17 = vand.u32 4294901760, %v6845_v51 }
  0x9e   : > { %2405 = vmatpush.msra.mxu1 %v6522_v58  ;;  %2003 = vmatpush.msrb.mxu3 %v2002_v18  ;;  %v6834_v35 = vand.u32 4294901760, %v484_v38  ;;  %v6839_v18 = vand.u32 4294901760, %v265_v13 }
  0x9f   : > { %2201 = vmatpush.msra.mxu0 %v6612_v14  ;;  %10087 = vst [vmem:[#allocation54_spill] sm:$0xff] %v6837_v59  ;;  %v492_v38 = vsub.f32 %v6829_v29, %v6837_v59  ;;  %v2007_v25 = vsub.f32 %v6845_v51, %v9586_v17 }
  0xa0   : > { %2407 = vmatpush.msra.mxu1 %v6606_v8  ;;  %462 = vmatmul.f32.gmra.mxu0 %v6763_v56  ;;  %10086 = vst [vmem:[#allocation53_spill] sm:$0xff] %v6834_v35  ;;  %v6853_v1 = vsub.f32 %v265_v13, %v6839_v18  ;;  %v6868_v13 = vand.u32 4294901760, %v267_v62 }
  0xa1   : > { %783 = vmatmul.f32.gmra.mxu1 %v6665_v27  ;;  %2204 = vmatpush.msra.mxu0 %v6674_v21  ;;  %10088 = vst [vmem:[#allocation55_spill] sm:$0xff] %v6839_v18 }
  0xa2   : > { %2409 = vmatpush.msra.mxu1 %v6667_v33  ;;  %1171 = vmatmul.f32.gmra.mxu3 %v6728_v53  ;;  %10089 = vst [vmem:[#allocation56_spill] sm:$0xff] %v6853_v1  ;;  %v6875_v17 = vsub.f32 %v267_v62, %v6868_v13  ;;  %v275_v53 = vld [vmem:[%s6342_s7 + $0x100] sm:$0xff] }
  0xa3   : > { %971 = vmatmul.f32.gmra.mxu2 %v6716_v23  ;;  %2207 = vmatpush.msra.mxu0 %v6739_v26  ;;  %10092 = vst [vmem:[#allocation59_spill] sm:$0xff] %v6868_v13 }
  0xa4   : > { %2411 = vmatpush.msra.mxu1 %v6732_v19  ;;  %10093 = vst [vmem:[#allocation60_spill] sm:$0xff] %v6875_v17 }
  0xa5   : > { %2210 = vmatpush.msra.mxu0 %v6799_v48 }
  0xa6   : > { %2413 = vmatpush.msra.mxu1 %v6794_v15 }
  0xa7   : > { %2213 = vmatpush.msra.mxu0 %v6845_v51 }
  0xa8   : > { %470 = vmatmul.f32.gmra.mxu0 %v6787_v40  ;;  %2415 = vmatpush.msra.mxu1 %v6841_v41 }
  0xa9   : > { %787 = vmatmul.f32.gmra.mxu1 %v6703_v43 }
  0xaa   : > { %1177 = vmatmul.f32.gmra.mxu3 %v6766_v63 }
  0xab   : > { %976 = vmatmul.f32.gmra.mxu2 %v6749_v5  ;;  %v271_v5 = vld [vmem:[%s6342_s7 + $0xe0] sm:$0xff] }
  0xb0   : > { %478 = vmatmul.f32.gmra.mxu0 %v6817_v44 }
  0xb1   : > { %791 = vmatmul.f32.gmra.mxu1 %v6730_v4 }
  0xb2   : > { %1183 = vmatmul.f32.gmra.mxu3 %v6790_v28  ;;  %v2008_v28 = vand.u32 4294901760, %v2007_v25 }
  0xb3   : > { %981 = vmatmul.f32.gmra.mxu2 %v6779_v37  ;;  %v6866_v37 = vand.u32 4294901760, %v6853_v1 }
  0xb4   : > { %2009 = vmatpush.msrb.mxu3 %v2008_v28  ;;  %v6883_v28 = vand.u32 4294901760, %v6875_v17 }
  0xb5   : > { %10091 = vst [vmem:[#allocation58_spill] sm:$0xff] %v6866_v37 }
  0xb6   : > { %10095 = vst [vmem:[#allocation62_spill] sm:$0xff] %v6883_v28 }
  0xb8   : > { %486 = vmatmul.f32.gmra.mxu0 %v6834_v35  ;;  %v6863_v35 = vand.u32 4294901760, %v492_v38  ;;  %v355_v38 = vld [vmem:[#allocation5 + $0x180] sm:$0xff] }
  0xb9   : > { %795 = vmatmul.f32.gmra.mxu1 %v6768_v11 }
  0xba   : > { %1189 = vmatmul.f32.gmra.mxu3 %v6820_v9  ;;  %10090 = vst [vmem:[#allocation57_spill] sm:$0xff] %v6863_v35  ;;  %v500_v9 = vsub.f32 %v6853_v1, %v6866_v37 }
  0xbb   : > { %986 = vmatmul.f32.gmra.mxu2 %v6807_v55  ;;  %v269_v55 = vld [vmem:[%s6342_s7 + $0xd0] sm:$0xff] }
  0xbc   : > { %v6880_v44 = vand.u32 4294901760, %v500_v9  ;;  %v6885_v25 = vand.u32 4294901760, %v269_v55  ;;  %v508_v9 = vsub.f32 %v6875_v17, %v6883_v28 }
  0xbe   : > { %10094 = vst [vmem:[#allocation61_spill] sm:$0xff] %v6880_v44 }
  0xbf   : > { %10096 = vst [vmem:[#allocation63_spill] sm:$0xff] %v6885_v25 }
  0xc0   : > { %494 = vmatmul.f32.gmra.mxu0 %v6863_v35  ;;  %v6887_v35 = vand.u32 4294901760, %v355_v38 }
  0xc1   : > { %799 = vmatmul.f32.gmra.mxu1 %v6792_v22 }
  0xc2   : > { %1195 = vmatmul.f32.gmra.mxu3 %v6837_v59  ;;  %1694 = vmatpush.msrb.mxu2 %v6887_v35  ;;  %v6891_v62 = vsub.f32 %v355_v38, %v6887_v35 }
  0xc3   : > { %991 = vmatmul.f32.gmra.mxu2 %v6829_v29  ;;  %2417 = vmatpush.msra.mxu1 %v6887_v35  ;;  %v6899_v29 = vsub.f32 %v269_v55, %v6885_v25  ;;  %v6914_v55 = vand.u32 4294901760, %v271_v5 }
  0xc4   : > { %v9597_v59 = vand.u32 4294901760, %v6891_v62  ;;  %2216 = vmatpush.msra.mxu0 %v6891_v62 }
  0xc5   : > { %10097 = vst [vmem:[#allocation64_spill] sm:$0xff] %v6899_v29  ;;  %v6912_v63 = vand.u32 4294901760, %v6899_v29 }
  0xc6   : > { %v2013_v38 = vsub.f32 %v6891_v62, %v9597_v59  ;;  %10100 = vst [vmem:[#allocation67_spill] sm:$0xff] %v6914_v55  ;;  %v6921_v59 = vsub.f32 %v271_v5, %v6914_v55 }
  0xc7   : > { %10099 = vst [vmem:[#allocation66_spill] sm:$0xff] %v6912_v63 }
  0xc8   : > { %502 = vmatmul.f32.gmra.mxu0 %v6880_v44  ;;  %v6909_v44 = vand.u32 4294901760, %v508_v9  ;;  %v2014_v40 = vand.u32 4294901760, %v2013_v38  ;;  %10101 = vst [vmem:[#allocation68_spill] sm:$0xff] %v6921_v59  ;;  %v353_v9 = vld [vmem:[#allocation5 + $0x170] sm:$0xff] }
  0xc9   : > { %803 = vmatmul.f32.gmra.mxu1 %v6822_v10 }
  0xca   : > { %1201 = vmatmul.f32.gmra.mxu3 %v6866_v37  ;;  %10098 = vst [vmem:[#allocation65_spill] sm:$0xff] %v6909_v44  ;;  %v516_v37 = vsub.f32 %v6899_v29, %v6912_v63 }
  0xcb   : > { %996 = vmatmul.f32.gmra.mxu2 %v6853_v1  ;;  %2015 = vmatpush.msrb.mxu3 %v2014_v40  ;;  %v273_v1 = vld [vmem:[%s6342_s7 + $0xf0] sm:$0xff]  ;;  %v6929_v40 = vand.u32 4294901760, %v6921_v59 }
  0xcc   : > { %v6926_v23 = vand.u32 4294901760, %v516_v37  ;;  %v6931_v38 = vand.u32 4294901760, %v273_v1 }
  0xcd   : > { %10103 = vst [vmem:[#allocation70_spill] sm:$0xff] %v6929_v40  ;;  %v524_v37 = vsub.f32 %v6921_v59, %v6929_v40 }
  0xce   : > { %10102 = vst [vmem:[#allocation69_spill] sm:$0xff] %v6926_v23 }
  0xcf   : > { %10104 = vst [vmem:[#allocation71_spill] sm:$0xff] %v6931_v38 }
  0xd0   : > { %510 = vmatmul.f32.gmra.mxu0 %v6909_v44  ;;  %v6933_v44 = vand.u32 4294901760, %v353_v9 }
  0xd1   : > { %807 = vmatmul.f32.gmra.mxu1 %v6839_v18 }
  0xd2   : > { %1207 = vmatmul.f32.gmra.mxu3 %v6883_v28  ;;  %1696 = vmatpush.msrb.mxu2 %v6933_v44  ;;  %v6937_v5 = vsub.f32 %v353_v9, %v6933_v44 }
  0xd3   : > { %1001 = vmatmul.f32.gmra.mxu2 %v6875_v17  ;;  %2419 = vmatpush.msra.mxu1 %v6933_v44  ;;  %v6945_v17 = vsub.f32 %v273_v1, %v6931_v38  ;;  %v6960_v1 = vand.u32 4294901760, %v275_v53 }
  0xd4   : > { %v9608_v28 = vand.u32 4294901760, %v6937_v5  ;;  %2219 = vmatpush.msra.mxu0 %v6937_v5 }
  0xd5   : > { %10105 = vst [vmem:[#allocation72_spill] sm:$0xff] %v6945_v17  ;;  %v6958_v56 = vand.u32 4294901760, %v6945_v17 }
  0xd6   : > { %v2019_v9 = vsub.f32 %v6937_v5, %v9608_v28  ;;  %10108 = vst [vmem:[#allocation75_spill] sm:$0xff] %v6960_v1  ;;  %v6967_v28 = vsub.f32 %v275_v53, %v6960_v1 }
  0xd7   : > { %10107 = vst [vmem:[#allocation74_spill] sm:$0xff] %v6958_v56 }
  0xd8   : > { %518 = vmatmul.f32.gmra.mxu0 %v6926_v23  ;;  %v6955_v23 = vand.u32 4294901760, %v524_v37  ;;  %v2020_v47 = vand.u32 4294901760, %v2019_v9  ;;  %10109 = vst [vmem:[#allocation76_spill] sm:$0xff] %v6967_v28  ;;  %v351_v37 = vld [vmem:[#allocation5 + $0x160] sm:$0xff] }
  0xd9   : > { %811 = vmatmul.f32.gmra.mxu1 %v6868_v13 }
  0xda   : > { %1213 = vmatmul.f32.gmra.mxu3 %v6912_v63  ;;  %10106 = vst [vmem:[#allocation73_spill] sm:$0xff] %v6955_v23  ;;  %v532_v63 = vsub.f32 %v6945_v17, %v6958_v56 }
  0xdb   : > { %1006 = vmatmul.f32.gmra.mxu2 %v6899_v29  ;;  %2021 = vmatpush.msrb.mxu3 %v2020_v47  ;;  %v277_v29 = vld [vmem:[%s6342_s7 + $0x110] sm:$0xff]  ;;  %v6975_v47 = vand.u32 4294901760, %v6967_v28 }
  0xdc   : > { %v6972_v46 = vand.u32 4294901760, %v532_v63  ;;  %v6977_v9 = vand.u32 4294901760, %v277_v29 }
  0xdd   : > { %10111 = vst [vmem:[#allocation78_spill] sm:$0xff] %v6975_v47  ;;  %v540_v63 = vsub.f32 %v6967_v28, %v6975_v47 }
  0xde   : > { %10110 = vst [vmem:[#allocation77_spill] sm:$0xff] %v6972_v46 }
  0xdf   : > { %10112 = vst [vmem:[#allocation79_spill] sm:$0xff] %v6977_v9  ;;  %v7001_v16 = vand.u32 4294901760, %v540_v63  ;;  %v7015_v63 = vsub.f32 %v279_v2, %v7006_v24 }
  0xe0   : > { %526 = vmatmul.f32.gmra.mxu0 %v6955_v23  ;;  %v6979_v23 = vand.u32 4294901760, %v351_v37 }
  0xe1   : > { %815 = vmatmul.f32.gmra.mxu1 %v6885_v25  ;;  %10114 = vst [vmem:[#allocation81_spill] sm:$0xff] %v7001_v16 }
  0xe2   : > { %1219 = vmatmul.f32.gmra.mxu3 %v6929_v40  ;;  %1698 = vmatpush.msrb.mxu2 %v6979_v23  ;;  %v6983_v53 = vsub.f32 %v351_v37, %v6979_v23  ;;  %10117 = vst [vmem:[#allocation84_spill] sm:$0xff] %v7015_v63 }
  0xe3   : > { %1011 = vmatmul.f32.gmra.mxu2 %v6921_v59  ;;  %2421 = vmatpush.msra.mxu1 %v6979_v23  ;;  %v6991_v59 = vsub.f32 %v277_v29, %v6977_v9 }
  0xe4   : > { %v9621_v40 = vand.u32 4294901760, %v6983_v53  ;;  %2222 = vmatpush.msra.mxu0 %v6983_v53 }
  0xe5   : > { %10113 = vst [vmem:[#allocation80_spill] sm:$0xff] %v6991_v59  ;;  %v7004_v29 = vand.u32 4294901760, %v6991_v59 }
  0xe6   : > { %v2025_v37 = vsub.f32 %v6983_v53, %v9621_v40 }
  0xe7   : > { %10115 = vst [vmem:[#allocation82_spill] sm:$0xff] %v7004_v29  ;;  %v548_v40 = vsub.f32 %v6991_v59, %v7004_v29 }
  0xe8   : > { %534 = vmatmul.f32.gmra.mxu0 %v6972_v46  ;;  %v371_v46 = vld [vmem:[#allocation7] sm:$0x3]  ;;  %v2026_v32 = vand.u32 4294901760, %v2025_v37 }
  0xe9   : > { %819 = vmatmul.f32.gmra.mxu1 %v6914_v55  ;;  %v7008_v3 = vperm.slane %v371_v46, 0  ;;  %v349_v46 = vld [vmem:[#allocation5 + $0x150] sm:$0xff]  ;;  %v7021_v37 = vand.u32 4294901760, %v548_v40 }
  0xea   : > { %1225 = vmatmul.f32.gmra.mxu3 %v6958_v56  ;;  %v7028_v20 = vand.u32 4294901760, %v349_v46 }
  0xeb   : > { %1016 = vmatmul.f32.gmra.mxu2 %v6945_v17  ;;  %2027 = vmatpush.msrb.mxu3 %v2026_v32  ;;  %v281_v17 = vld [vmem:[%s6342_s7 + $0x130] sm:$0xff]  ;;  %10118 = vst [vmem:[#allocation85_spill] sm:$0xff] %v7021_v37  ;;  %v7024_v32 = vand.u32 4294901760, %v7015_v63 }
  0xec   : > { %1700 = vmatpush.msrb.mxu2 %v7028_v20  ;;  %2423 = vmatpush.msra.mxu1 %v7028_v20 }
  0xed   : > { %v415_v39 = vpop.f32.mrf.mxu0  ;;  %10119 = vst [vmem:[#allocation86_spill] sm:$0xff] %v7024_v32 }
  0xee   : > { %v416_v56 = vadd.f32 %v415_v39, %v7008_v3 }
  0xf0   : > { %542 = vmatmul.f32.gmra.mxu0 %v7001_v16  ;;  %v7026_v16 = vand.u32 4294901760, %v281_v17 }
  0xf1   : > { %823 = vmatmul.f32.gmra.mxu1 %v6931_v38 }
  0xf2   : > { %1231 = vmatmul.f32.gmra.mxu3 %v6975_v47  ;;  %10120 = vst [vmem:[#allocation87_spill] sm:$0xff] %v7026_v16  ;;  %v556_v47 = vsub.f32 %v7015_v63, %v7024_v32  ;;  %v7040_v34 = vsub.f32 %v281_v17, %v7026_v16 }
  0xf3   : > { %1021 = vmatmul.f32.gmra.mxu2 %v6967_v28  ;;  %v7032_v28 = vsub.f32 %v349_v46, %v7028_v20 }
  0xf4   : > { %10121 = vst [vmem:[#allocation88_spill] sm:$0xff] %v7040_v34  ;;  %v7056_v17 = vand.u32 4294901760, %v7040_v34 }
  0xf5   : > { %v423_v2 = vpop.f32.mrf.mxu0  ;;  %v764_v45 = vpop.f32.mrf.mxu1  ;;  %2225 = vmatpush.msra.mxu0 %v7032_v28 }
  0xf6   : > { %v765_v60 = vadd.f32 %v764_v45, %v416_v56  ;;  %v942_v36 = vpop.f32.mrf.mxu2  ;;  %v1136_v39 = vpop.f32.mrf.mxu3  ;;  %v9638_v45 = vand.u32 4294901760, %v7032_v28  ;;  %v283_v56 = vld [vmem:[%s6342_s7 + $0x140] sm:$0xff]  ;;  %v424_v46 = vadd.f32 %v423_v2, %v7008_v3  ;;  %10124 = vst [vmem:[#allocation91_spill] sm:$0xff] %v7056_v17 }
  0xf8   : > { %v943_v40 = vadd.f32 %v942_v36, %v765_v60  ;;  %550 = vmatmul.f32.gmra.mxu0 %v7021_v37  ;;  %v2031_v60 = vsub.f32 %v7032_v28, %v9638_v45  ;;  %v7053_v36 = vand.u32 4294901760, %v556_v47  ;;  %v7058_v37 = vand.u32 4294901760, %v283_v56 }
  0xf9   : > { %827 = vmatmul.f32.gmra.mxu1 %v6960_v1  ;;  %v564_v47 = vsub.f32 %v7040_v34, %v7056_v17 }
  0xfa   : > { %v7046_v54 = vadd.f32 %v1136_v39, %v943_v40  ;;  %1237 = vmatmul.f32.gmra.mxu3 %v7004_v29  ;;  %10123 = vst [vmem:[#allocation90_spill] sm:$0xff] %v7053_v36  ;;  %v2032_v12 = vand.u32 4294901760, %v2031_v60  ;;  %v7065_v45 = vsub.f32 %v283_v56, %v7058_v37 }
  0xfb   : > { %1026 = vmatmul.f32.gmra.mxu2 %v6991_v59  ;;  %10125 = vst [vmem:[#allocation92_spill] sm:$0xff] %v7058_v37  ;;  %v285_v59 = vld [vmem:[%s6342_s7 + $0x150] sm:$0xff] }
  0xfc   : > { %10122 = vst [vmem:[#allocation89_spill] sm:$0xff] %v7046_v54  ;;  %2033 = vmatpush.msrb.mxu3 %v2032_v12  ;;  %v7073_v12 = vand.u32 4294901760, %v564_v47 }
  0xfd   : > { %v431_v2 = vpop.f32.mrf.mxu0  ;;  %v768_v39 = vpop.f32.mrf.mxu1  ;;  %10126 = vst [vmem:[#allocation93_spill] sm:$0xff] %v7065_v45 }
  0xfe   : > { %v769_v40 = vadd.f32 %v768_v39, %v424_v46  ;;  %v947_v30 = vpop.f32.mrf.mxu2  ;;  %v1142_v29 = vpop.f32.mrf.mxu3  ;;  %v432_v60 = vadd.f32 %v431_v2, %v7008_v3  ;;  %10128 = vst [vmem:[#allocation95_spill] sm:$0xff] %v7073_v12  ;;  %v7076_v46 = vand.u32 4294901760, %v7065_v45  ;;  %v7078_v39 = vand.u32 4294901760, %v285_v59 }
 0x100   : > { %v948_v49 = vadd.f32 %v947_v30, %v769_v40  ;;  %558 = vmatmul.f32.gmra.mxu0 %v7053_v36  ;;  %v347_v30 = vld [vmem:[#allocation5 + $0x140] sm:$0xff]  ;;  %10129 = vst [vmem:[#allocation96_spill] sm:$0xff] %v7076_v46 }
 0x101   : > { %831 = vmatmul.f32.gmra.mxu1 %v6977_v9  ;;  %10130 = vst [vmem:[#allocation97_spill] sm:$0xff] %v7078_v39  ;;  %v7080_v56 = vand.u32 4294901760, %v347_v30 }
 0x102   : > { %v7069_v61 = vadd.f32 %v1142_v29, %v948_v49  ;;  %1243 = vmatmul.f32.gmra.mxu3 %v7024_v32  ;;  %v572_v32 = vsub.f32 %v7065_v45, %v7076_v46 }
 0x103   : > { %1031 = vmatmul.f32.gmra.mxu2 %v7015_v63  ;;  %v7084_v63 = vsub.f32 %v347_v30, %v7080_v56  ;;  %2425 = vmatpush.msra.mxu1 %v7080_v56 }
 0x104   : > { %10127 = vst [vmem:[#allocation94_spill] sm:$0xff] %v7069_v61  ;;  %1702 = vmatpush.msrb.mxu2 %v7080_v56  ;;  %v7092_v61 = vsub.f32 %v285_v59, %v7078_v39  ;;  %v7105_v59 = vand.u32 4294901760, %v572_v32 }
 0x105   : > { %v439_v40 = vpop.f32.mrf.mxu0  ;;  %v772_v36 = vpop.f32.mrf.mxu1  ;;  %2228 = vmatpush.msra.mxu0 %v7084_v63 }
 0x106   : > { %v773_v2 = vadd.f32 %v772_v36, %v432_v60  ;;  %v952_v49 = vpop.f32.mrf.mxu2  ;;  %v1148_v29 = vpop.f32.mrf.mxu3  ;;  %10131 = vst [vmem:[#allocation98_spill] sm:$0xff] %v7092_v61  ;;  %v9650_v36 = vand.u32 4294901760, %v7084_v63  ;;  %v287_v60 = vld [vmem:[%s6342_s7 + $0x160] sm:$0xff]  ;;  %v440_v30 = vadd.f32 %v439_v40, %v7008_v3 }
 0x107   : > { %10133 = vst [vmem:[#allocation100_spill] sm:$0xff] %v7105_v59 }
 0x108   : > { %v953_v47 = vadd.f32 %v952_v49, %v773_v2  ;;  %566 = vmatmul.f32.gmra.mxu0 %v7073_v12  ;;  %v2037_v2 = vsub.f32 %v7084_v63, %v9650_v36  ;;  %v7108_v49 = vand.u32 4294901760, %v7092_v61  ;;  %v7110_v12 = vand.u32 4294901760, %v287_v60 }
 0x109   : > { %835 = vmatmul.f32.gmra.mxu1 %v7006_v24 }
 0x10a   : > { %v7098_v9 = vadd.f32 %v1148_v29, %v953_v47  ;;  %1249 = vmatmul.f32.gmra.mxu3 %v7056_v17  ;;  %10134 = vst [vmem:[#allocation101_spill] sm:$0xff] %v7108_v49  ;;  %v2038_v24 = vand.u32 4294901760, %v2037_v2  ;;  %v580_v32 = vsub.f32 %v7092_v61, %v7108_v49  ;;  %v7117_v36 = vsub.f32 %v287_v60, %v7110_v12 }
 0x10b   : > { %1036 = vmatmul.f32.gmra.mxu2 %v7040_v34  ;;  %10135 = vst [vmem:[#allocation102_spill] sm:$0xff] %v7110_v12  ;;  %v289_v34 = vld [vmem:[%s6342_s7 + $0x170] sm:$0xff] }
 0x10c   : > { %10132 = vst [vmem:[#allocation99_spill] sm:$0xff] %v7098_v9  ;;  %2039 = vmatpush.msrb.mxu3 %v2038_v24  ;;  %v345_v24 = vld [vmem:[#allocation5 + $0x130] sm:$0xff] }
 0x10d   : > { %v447_v40 = vpop.f32.mrf.mxu0  ;;  %v776_v29 = vpop.f32.mrf.mxu1  ;;  %10136 = vst [vmem:[#allocation103_spill] sm:$0xff] %v7117_v36  ;;  %v7132_v60 = vand.u32 4294901760, %v345_v24 }
 0x10e   : > { %v777_v47 = vadd.f32 %v776_v29, %v440_v30  ;;  %v957_v9 = vpop.f32.mrf.mxu2  ;;  %v1154_v17 = vpop.f32.mrf.mxu3  ;;  %v448_v2 = vadd.f32 %v447_v40, %v7008_v3  ;;  %v7128_v30 = vand.u32 4294901760, %v7117_v36  ;;  %v7130_v29 = vand.u32 4294901760, %v289_v34 }
 0x10f   : > { %1704 = vmatpush.msrb.mxu2 %v7132_v60  ;;  %2427 = vmatpush.msra.mxu1 %v7132_v60 }
 0x110   : > { %v958_v54 = vadd.f32 %v957_v9, %v777_v47  ;;  %574 = vmatmul.f32.gmra.mxu0 %v7105_v59  ;;  %v7125_v9 = vand.u32 4294901760, %v580_v32  ;;  %10139 = vst [vmem:[#allocation106_spill] sm:$0xff] %v7128_v30 }
 0x111   : > { %839 = vmatmul.f32.gmra.mxu1 %v7026_v16  ;;  %10140 = vst [vmem:[#allocation107_spill] sm:$0xff] %v7130_v29 }
 0x112   : > { %v7121_v1 = vadd.f32 %v1154_v17, %v958_v54  ;;  %1255 = vmatmul.f32.gmra.mxu3 %v7076_v46  ;;  %10138 = vst [vmem:[#allocation105_spill] sm:$0xff] %v7125_v9  ;;  %v588_v46 = vsub.f32 %v7117_v36, %v7128_v30 }
 0x113   : > { %1041 = vmatmul.f32.gmra.mxu2 %v7065_v45  ;;  %v7136_v45 = vsub.f32 %v345_v24, %v7132_v60 }
 0x114   : > { %10137 = vst [vmem:[#allocation104_spill] sm:$0xff] %v7121_v1  ;;  %v7144_v1 = vsub.f32 %v289_v34, %v7130_v29  ;;  %v7157_v34 = vand.u32 4294901760, %v588_v46 }
 0x115   : > { %v455_v47 = vpop.f32.mrf.mxu0  ;;  %v780_v59 = vpop.f32.mrf.mxu1  ;;  %2231 = vmatpush.msra.mxu0 %v7136_v45 }
 0x116   : > { %v781_v40 = vadd.f32 %v780_v59, %v448_v2  ;;  %v962_v54 = vpop.f32.mrf.mxu2  ;;  %v1160_v17 = vpop.f32.mrf.mxu3  ;;  %10141 = vst [vmem:[#allocation108_spill] sm:$0xff] %v7144_v1  ;;  %v9665_v59 = vand.u32 4294901760, %v7136_v45  ;;  %v291_v2 = vld [vmem:[%s6342_s7 + $0x180] sm:$0xff]  ;;  %v456_v24 = vadd.f32 %v455_v47, %v7008_v3 }
 0x117   : > { %10143 = vst [vmem:[#allocation110_spill] sm:$0xff] %v7157_v34 }
 0x118   : > { %v963_v32 = vadd.f32 %v962_v54, %v781_v40  ;;  %582 = vmatmul.f32.gmra.mxu0 %v7125_v9  ;;  %v2043_v40 = vsub.f32 %v7136_v45, %v9665_v59  ;;  %v7160_v54 = vand.u32 4294901760, %v7144_v1  ;;  %v7162_v9 = vand.u32 4294901760, %v291_v2 }
 0x119   : > { %843 = vmatmul.f32.gmra.mxu1 %v7058_v37 }
 0x11a   : > { %v7150_v16 = vadd.f32 %v1160_v17, %v963_v32  ;;  %1261 = vmatmul.f32.gmra.mxu3 %v7108_v49  ;;  %10144 = vst [vmem:[#allocation111_spill] sm:$0xff] %v7160_v54  ;;  %v2044_v37 = vand.u32 4294901760, %v2043_v40  ;;  %v596_v46 = vsub.f32 %v7144_v1, %v7160_v54  ;;  %v7169_v59 = vsub.f32 %v291_v2, %v7162_v9 }
 0x11b   : > { %1046 = vmatmul.f32.gmra.mxu2 %v7092_v61  ;;  %10145 = vst [vmem:[#allocation112_spill] sm:$0xff] %v7162_v9  ;;  %v293_v61 = vld [vmem:[%s6342_s7 + $0x190] sm:$0xff] }
 0x11c   : > { %10142 = vst [vmem:[#allocation109_spill] sm:$0xff] %v7150_v16  ;;  %2045 = vmatpush.msrb.mxu3 %v2044_v37  ;;  %v7177_v37 = vand.u32 4294901760, %v596_v46 }
 0x11d   : > { %v463_v47 = vpop.f32.mrf.mxu0  ;;  %10146 = vst [vmem:[#allocation113_spill] sm:$0xff] %v7169_v59 }
 0x11e   : > { %v784_v17 = vpop.f32.mrf.mxu1  ;;  %v967_v16 = vpop.f32.mrf.mxu2  ;;  %v464_v40 = vadd.f32 %v463_v47, %v7008_v3  ;;  %10148 = vst [vmem:[#allocation115_spill] sm:$0xff] %v7177_v37 }
 0x11f   : > { %v785_v32 = vadd.f32 %v784_v17, %v456_v24  ;;  %v1166_v49 = vpop.f32.mrf.mxu3  ;;  %v7180_v24 = vand.u32 4294901760, %v7169_v59  ;;  %v7182_v17 = vand.u32 4294901760, %v293_v61 }
 0x120   : > { %590 = vmatmul.f32.gmra.mxu0 %v7157_v34 }
 0x121   : > { %v968_v38 = vadd.f32 %v967_v16, %v785_v32  ;;  %847 = vmatmul.f32.gmra.mxu1 %v7078_v39  ;;  %v343_v16 = vld [vmem:[#allocation5 + $0x120] sm:$0xff]  ;;  %10149 = vst [vmem:[#allocation116_spill] sm:$0xff] %v7180_v24 }
 0x122   : > { %1267 = vmatmul.f32.gmra.mxu3 %v7128_v30  ;;  %10150 = vst [vmem:[#allocation117_spill] sm:$0xff] %v7182_v17  ;;  %v7184_v2 = vand.u32 4294901760, %v343_v16  ;;  %v604_v30 = vsub.f32 %v7169_v59, %v7180_v24 }
 0x123   : > { %v7173_v55 = vadd.f32 %v1166_v49, %v968_v38  ;;  %1051 = vmatmul.f32.gmra.mxu2 %v7117_v36 }
 0x124   : > { %1706 = vmatpush.msrb.mxu2 %v7184_v2  ;;  %v7188_v36 = vsub.f32 %v343_v16, %v7184_v2  ;;  %2429 = vmatpush.msra.mxu1 %v7184_v2 }
 0x125   : > { %10147 = vst [vmem:[#allocation114_spill] sm:$0xff] %v7173_v55  ;;  %v471_v32 = vpop.f32.mrf.mxu0  ;;  %v7196_v55 = vsub.f32 %v293_v61, %v7182_v17  ;;  %v7209_v61 = vand.u32 4294901760, %v604_v30 }
 0x126   : > { %v788_v34 = vpop.f32.mrf.mxu1  ;;  %v972_v38 = vpop.f32.mrf.mxu2  ;;  %2234 = vmatpush.msra.mxu0 %v7188_v36  ;;  %v472_v16 = vadd.f32 %v471_v32, %v7008_v3 }
 0x127   : > { %v789_v47 = vadd.f32 %v788_v34, %v464_v40  ;;  %v1172_v49 = vpop.f32.mrf.mxu3  ;;  %10151 = vst [vmem:[#allocation118_spill] sm:$0xff] %v7196_v55  ;;  %v9680_v34 = vand.u32 4294901760, %v7188_v36  ;;  %v295_v40 = vld [vmem:[%s6342_s7 + $0x1a0] sm:$0xff] }
 0x128   : > { %598 = vmatmul.f32.gmra.mxu0 %v7177_v37  ;;  %10153 = vst [vmem:[#allocation120_spill] sm:$0xff] %v7209_v61  ;;  %v7214_v37 = vand.u32 4294901760, %v295_v40 }
 0x129   : > { %v973_v46 = vadd.f32 %v972_v38, %v789_v47  ;;  %851 = vmatmul.f32.gmra.mxu1 %v7110_v12  ;;  %v2049_v47 = vsub.f32 %v7188_v36, %v9680_v34  ;;  %v7212_v38 = vand.u32 4294901760, %v7196_v55 }
 0x12a   : > { %1273 = vmatmul.f32.gmra.mxu3 %v7160_v54  ;;  %10155 = vst [vmem:[#allocation122_spill] sm:$0xff] %v7214_v37  ;;  %v7221_v34 = vsub.f32 %v295_v40, %v7214_v37 }
 0x12b   : > { %v7202_v39 = vadd.f32 %v1172_v49, %v973_v46  ;;  %1056 = vmatmul.f32.gmra.mxu2 %v7144_v1  ;;  %10154 = vst [vmem:[#allocation121_spill] sm:$0xff] %v7212_v38  ;;  %v2050_v12 = vand.u32 4294901760, %v2049_v47  ;;  %v612_v30 = vsub.f32 %v7196_v55, %v7212_v38  ;;  %v297_v1 = vld [vmem:[%s6342_s7 + $0x1b0] sm:$0xff] }
 0x12c   : > { %10156 = vst [vmem:[#allocation123_spill] sm:$0xff] %v7221_v34 }
 0x12d   : > { %10152 = vst [vmem:[#allocation119_spill] sm:$0xff] %v7202_v39  ;;  %v479_v32 = vpop.f32.mrf.mxu0  ;;  %2051 = vmatpush.msrb.mxu3 %v2050_v12  ;;  %v341_v12 = vld [vmem:[#allocation5 + $0x110] sm:$0xff] }
 0x12e   : > { %v792_v49 = vpop.f32.mrf.mxu1  ;;  %v977_v39 = vpop.f32.mrf.mxu2  ;;  %v480_v47 = vadd.f32 %v479_v32, %v7008_v3  ;;  %v7236_v40 = vand.u32 4294901760, %v341_v12 }
 0x12f   : > { %v793_v46 = vadd.f32 %v792_v49, %v472_v16  ;;  %v1178_v54 = vpop.f32.mrf.mxu3  ;;  %v7232_v16 = vand.u32 4294901760, %v7221_v34  ;;  %v7234_v49 = vand.u32 4294901760, %v297_v1 }
 0x130   : > { %606 = vmatmul.f32.gmra.mxu0 %v7209_v61  ;;  %1708 = vmatpush.msrb.mxu2 %v7236_v40 }
 0x131   : > { %v978_v25 = vadd.f32 %v977_v39, %v793_v46  ;;  %855 = vmatmul.f32.gmra.mxu1 %v7130_v29  ;;  %v7229_v39 = vand.u32 4294901760, %v612_v30  ;;  %10159 = vst [vmem:[#allocation126_spill] sm:$0xff] %v7232_v16 }
 0x132   : > { %1279 = vmatmul.f32.gmra.mxu3 %v7180_v24  ;;  %10160 = vst [vmem:[#allocation127_spill] sm:$0xff] %v7234_v49  ;;  %2431 = vmatpush.msra.mxu1 %v7236_v40  ;;  %v620_v24 = vsub.f32 %v7221_v34, %v7232_v16 }
 0x133   : > { %v7225_v13 = vadd.f32 %v1178_v54, %v978_v25  ;;  %1061 = vmatmul.f32.gmra.mxu2 %v7169_v59  ;;  %10158 = vst [vmem:[#allocation125_spill] sm:$0xff] %v7229_v39  ;;  %v7240_v59 = vsub.f32 %v341_v12, %v7236_v40 }
 0x135   : > { %10157 = vst [vmem:[#allocation124_spill] sm:$0xff] %v7225_v13  ;;  %v487_v46 = vpop.f32.mrf.mxu0  ;;  %v7248_v13 = vsub.f32 %v297_v1, %v7234_v49  ;;  %2237 = vmatpush.msra.mxu0 %v7240_v59  ;;  %v7261_v1 = vand.u32 4294901760, %v620_v24 }
 0x136   : > { %v796_v61 = vpop.f32.mrf.mxu1  ;;  %v982_v25 = vpop.f32.mrf.mxu2  ;;  %v488_v12 = vadd.f32 %v487_v46, %v7008_v3 }
 0x137   : > { %v797_v32 = vadd.f32 %v796_v61, %v480_v47  ;;  %v1184_v54 = vpop.f32.mrf.mxu3  ;;  %10161 = vst [vmem:[#allocation128_spill] sm:$0xff] %v7248_v13  ;;  %v9695_v61 = vand.u32 4294901760, %v7240_v59  ;;  %v299_v47 = vld [vmem:[%s6342_s7 + $0x1c0] sm:$0xff] }
 0x138   : > { %614 = vmatmul.f32.gmra.mxu0 %v7229_v39  ;;  %10163 = vst [vmem:[#allocation130_spill] sm:$0xff] %v7261_v1  ;;  %v7266_v39 = vand.u32 4294901760, %v299_v47 }
 0x139   : > { %v983_v30 = vadd.f32 %v982_v25, %v797_v32  ;;  %859 = vmatmul.f32.gmra.mxu1 %v7162_v9  ;;  %v2055_v32 = vsub.f32 %v7240_v59, %v9695_v61  ;;  %v7264_v25 = vand.u32 4294901760, %v7248_v13 }
 0x13a   : > { %1285 = vmatmul.f32.gmra.mxu3 %v7212_v38  ;;  %10165 = vst [vmem:[#allocation132_spill] sm:$0xff] %v7266_v39  ;;  %v7273_v61 = vsub.f32 %v299_v47, %v7266_v39 }
 0x13b   : > { %v7254_v29 = vadd.f32 %v1184_v54, %v983_v30  ;;  %1066 = vmatmul.f32.gmra.mxu2 %v7196_v55  ;;  %10164 = vst [vmem:[#allocation131_spill] sm:$0xff] %v7264_v25  ;;  %v2056_v9 = vand.u32 4294901760, %v2055_v32  ;;  %v628_v24 = vsub.f32 %v7248_v13, %v7264_v25  ;;  %v301_v55 = vld [vmem:[%s6342_s7 + $0x1d0] sm:$0xff] }
 0x13c   : > { %10166 = vst [vmem:[#allocation133_spill] sm:$0xff] %v7273_v61 }
 0x13d   : > { %10162 = vst [vmem:[#allocation129_spill] sm:$0xff] %v7254_v29  ;;  %v495_v46 = vpop.f32.mrf.mxu0  ;;  %2057 = vmatpush.msrb.mxu3 %v2056_v9  ;;  %v339_v9 = vld [vmem:[#allocation5 + $0x100] sm:$0xff] }
 0x13e   : > { %v800_v54 = vpop.f32.mrf.mxu1  ;;  %v987_v29 = vpop.f32.mrf.mxu2  ;;  %v496_v32 = vadd.f32 %v495_v46, %v7008_v3 }
 0x13f   : > { %v801_v30 = vadd.f32 %v800_v54, %v488_v12  ;;  %v1190_v38 = vpop.f32.mrf.mxu3  ;;  %v7284_v12 = vand.u32 4294901760, %v7273_v61  ;;  %v7286_v54 = vand.u32 4294901760, %v301_v55 }
 0x140   : > { %622 = vmatmul.f32.gmra.mxu0 %v7261_v1 }
 0x141   : > { %v988_v18 = vadd.f32 %v987_v29, %v801_v30  ;;  %863 = vmatmul.f32.gmra.mxu1 %v7182_v17  ;;  %v7281_v29 = vand.u32 4294901760, %v628_v24  ;;  %10169 = vst [vmem:[#allocation136_spill] sm:$0xff] %v7284_v12  ;;  %v7288_v30 = vand.u32 4294901760, %v339_v9  ;;  %v10171_v24 = vand.u32 4294901760, %v6520_v57 }
 0x142   : > { %1291 = vmatmul.f32.gmra.mxu3 %v7232_v16  ;;  %10170 = vst [vmem:[#allocation137_spill] sm:$0xff] %v7286_v54  ;;  %v10173_v17 = vand.u32 4294901760, %v6535_v7 }
 0x143   : > { %v7277_v10 = vadd.f32 %v1190_v38, %v988_v18  ;;  %1071 = vmatmul.f32.gmra.mxu2 %v7221_v34  ;;  %10168 = vst [vmem:[#allocation135_spill] sm:$0xff] %v7281_v29  ;;  %v7292_v34 = vsub.f32 %v339_v9, %v7288_v30  ;;  %2433 = vmatpush.msra.mxu1 %v7288_v30  ;;  %v303_v9 = vld [vmem:[%s6342_s7 + $0x1e0] sm:$0xff] }
 0x144   : > { %1710 = vmatpush.msrb.mxu2 %v7288_v30  ;;  %v7322_v7 = vand.u32 4294901760, %v303_v9 }
 0x145   : > { %10167 = vst [vmem:[#allocation134_spill] sm:$0xff] %v7277_v10  ;;  %v503_v47 = vpop.f32.mrf.mxu0  ;;  %v9706_v10 = vand.u32 4294901760, %v7292_v34  ;;  %2240 = vmatpush.msra.mxu0 %v7292_v34 }
 0x146   : > { %v804_v1 = vpop.f32.mrf.mxu1  ;;  %v992_v18 = vpop.f32.mrf.mxu2  ;;  %2630 = vmatpush.msra.mxu2 %v10171_v24  ;;  %v504_v57 = vadd.f32 %v503_v47, %v7008_v3  ;;  %10177 = vst [vmem:[#allocation142_spill] sm:$0xff] %v7322_v7 }
 0x147   : > { %v805_v46 = vadd.f32 %v804_v1, %v496_v32  ;;  %v1196_v38 = vpop.f32.mrf.mxu3  ;;  %v636_v1 = vsub.f32 %v7273_v61, %v7284_v12  ;;  %v7302_v32 = vsub.f32 %v301_v55, %v7286_v54 }
 0x148   : > { %630 = vmatmul.f32.gmra.mxu0 %v7281_v29  ;;  %2634 = vmatpush.msra.mxu2 %v10173_v17 }
 0x149   : > { %v993_v16 = vadd.f32 %v992_v18, %v805_v46  ;;  %867 = vmatmul.f32.gmra.mxu1 %v7214_v37  ;;  %10172 = vst [vmem:[#allocation138_spill] sm:$0xff] %v7302_v32  ;;  %v2061_v18 = vsub.f32 %v7292_v34, %v9706_v10  ;;  %v7317_v55 = vand.u32 4294901760, %v636_v1  ;;  %v7320_v24 = vand.u32 4294901760, %v7302_v32 }
 0x14a   : > { %1297 = vmatmul.f32.gmra.mxu3 %v7264_v25  ;;  %v10179_v10 = vand.u32 4294901760, %v6674_v21 }
 0x14b   : > { %v7310_v46 = vadd.f32 %v1196_v38, %v993_v16  ;;  %1076 = vmatmul.f32.gmra.mxu2 %v7248_v13  ;;  %10175 = vst [vmem:[#allocation140_spill] sm:$0xff] %v7317_v55  ;;  %v2062_v17 = vand.u32 4294901760, %v2061_v18  ;;  %v10178_v16 = vand.u32 4294901760, %v6612_v14  ;;  %v644_v14 = vsub.f32 %v7302_v32, %v7320_v24 }
 0x14c   : > { %10176 = vst [vmem:[#allocation141_spill] sm:$0xff] %v7320_v24  ;;  %v7334_v18 = vsub.f32 %v303_v9, %v7322_v7 }
 0x14d   : > { %10174 = vst [vmem:[#allocation139_spill] sm:$0xff] %v7310_v46  ;;  %2638 = vmatpush.msra.mxu2 %v10178_v16  ;;  %v511_v47 = vpop.f32.mrf.mxu0  ;;  %2063 = vmatpush.msrb.mxu3 %v2062_v17  ;;  %v10181_v17 = vand.u32 4294901760, %v6739_v26 }
 0x14e   : > { %v808_v38 = vpop.f32.mrf.mxu1  ;;  %v997_v29 = vpop.f32.mrf.mxu2  ;;  %10180 = vst [vmem:[#allocation143_spill] sm:$0xff] %v7334_v18  ;;  %v512_v21 = vadd.f32 %v511_v47, %v7008_v3 }
 0x14f   : > { %v809_v25 = vadd.f32 %v808_v38, %v504_v57  ;;  %v1202_v46 = vpop.f32.mrf.mxu3  ;;  %2642 = vmatpush.msra.mxu2 %v10179_v10  ;;  %2821 = vmatpush.msra.mxu3 %v6489_v31  ;;  %v305_v57 = vld [vmem:[%s6342_s7 + $0x1f0] sm:$0xff]  ;;  %v7346_v10 = vand.u32 4294901760, %v644_v14  ;;  %v10186_v38 = vand.u32 4294901760, %v6845_v51 }
 0x150   : > { %638 = vmatmul.f32.gmra.mxu0 %v7317_v55 }
 0x151   : > { %v998_v1 = vadd.f32 %v997_v29, %v809_v25  ;;  %871 = vmatmul.f32.gmra.mxu1 %v7234_v49  ;;  %2823 = vmatpush.msra.mxu3 %v6522_v58  ;;  %10182 = vst [vmem:[#allocation144_spill] sm:$0xff] %v7346_v10  ;;  %v7349_v25 = vand.u32 4294901760, %v7334_v18  ;;  %v7351_v29 = vand.u32 4294901760, %v305_v57  ;;  %v10185_v58 = vand.u32 4294901760, %v6799_v48 }
 0x152   : > { %2646 = vmatpush.msra.mxu2 %v10181_v17  ;;  %1303 = vmatmul.f32.gmra.mxu3 %v7284_v12  ;;  %v244_v17 = vld [vmem:[%s6342_s7 + $0x8] sm:$0xff] }
 0x153   : > { %v7341_v31 = vadd.f32 %v1202_v46, %v998_v1  ;;  %1081 = vmatmul.f32.gmra.mxu2 %v7273_v61  ;;  %2825 = vmatpush.msra.mxu3 %v6606_v8  ;;  %10183 = vst [vmem:[#allocation145_spill] sm:$0xff] %v7349_v25  ;;  %v652_v48 = vsub.f32 %v7334_v18, %v7349_v25 }
 0x154   : > { %10184 = vst [vmem:[#allocation146_spill] sm:$0xff] %v7351_v29  ;;  %2650 = vmatpush.msra.mxu2 %v10185_v58  ;;  %v7364_v1 = vsub.f32 %v305_v57, %v7351_v29 }
 0x155   : > { %v519_v26 = vpop.f32.mrf.mxu0  ;;  %2827 = vmatpush.msra.mxu3 %v6667_v33  ;;  %v10188_v33 = vand.u32 4294901760, %v6891_v62 }
 0x156   : > { %v812_v9 = vpop.f32.mrf.mxu1  ;;  %v1002_v16 = vpop.f32.mrf.mxu2  ;;  %2654 = vmatpush.msra.mxu2 %v10186_v38  ;;  %10187 = vst [vmem:[#allocation147_spill] sm:$0xff] %v7364_v1  ;;  %v520_v51 = vadd.f32 %v519_v26, %v7008_v3  ;;  %v7378_v57 = vand.u32 4294901760, %v7364_v1 }
 0x157   : > { %v813_v46 = vadd.f32 %v812_v9, %v512_v21  ;;  %v1208_v47 = vpop.f32.mrf.mxu3  ;;  %2829 = vmatpush.msra.mxu3 %v6732_v19  ;;  %v7375_v19 = vand.u32 4294901760, %v652_v48 }
 0x158   : > { %646 = vmatmul.f32.gmra.mxu0 %v7346_v10  ;;  %2658 = vmatpush.msra.mxu2 %v10188_v33  ;;  %10190 = vst [vmem:[#allocation149_spill] sm:$0xff] %v7378_v57 }
 0x159   : > { %v1003_v8 = vadd.f32 %v1002_v16, %v813_v46  ;;  %875 = vmatmul.f32.gmra.mxu1 %v7266_v39  ;;  %2831 = vmatpush.msra.mxu3 %v6794_v15  ;;  %10189 = vst [vmem:[#allocation148_spill] sm:$0xff] %v7375_v19  ;;  %v10191_v15 = vand.u32 4294901760, %v6937_v5  ;;  %v10192_v46 = vand.u32 4294901760, %v6983_v53  ;;  %v660_v5 = vsub.f32 %v7364_v1, %v7378_v57 }
 0x15a   : > { %1309 = vmatmul.f32.gmra.mxu3 %v7320_v24 }
 0x15b   : > { %v7370_v14 = vadd.f32 %v1208_v47, %v1003_v8  ;;  %1086 = vmatmul.f32.gmra.mxu2 %v7302_v32  ;;  %2833 = vmatpush.msra.mxu3 %v6841_v41  ;;  %v7386_v41 = vand.u32 4294901760, %v244_v17  ;;  %v7405_v38 = vand.u32 4294901760, %v660_v5  ;;  %v246_v8 = vld [vmem:[%s6342_s7 + $0x18] sm:$0xff] }
 0x15c   : > { %2662 = vmatpush.msra.mxu2 %v10191_v15 }
 0x15d   : > { %v527_v62 = vpop.f32.mrf.mxu0  ;;  %2835 = vmatpush.msra.mxu3 %v6887_v35  ;;  %10193 = vst [vmem:[#allocation150_spill] sm:$0xff] %v7386_v41  ;;  %v10194_v35 = vand.u32 4294901760, %v7032_v28 }
 0x15e   : > { %v816_v21 = vpop.f32.mrf.mxu1  ;;  %v1007_v26 = vpop.f32.mrf.mxu2  ;;  %2666 = vmatpush.msra.mxu2 %v10192_v46  ;;  %v528_v53 = vadd.f32 %v527_v62, %v7008_v3  ;;  %10196 = vst [vmem:[#allocation152_spill] sm:$0xff] %v7405_v38  ;;  %v10198_v62 = vand.u32 4294901760, %v7136_v45 }
 0x15f   : > { %v817_v58 = vadd.f32 %v816_v21, %v520_v51  ;;  %v1214_v9 = vpop.f32.mrf.mxu3  ;;  %2837 = vmatpush.msra.mxu3 %v6933_v44  ;;  %v7402_v44 = vsub.f32 %v244_v17, %v7386_v41 }
 0x160   : > { %654 = vmatmul.f32.gmra.mxu0 %v7375_v19  ;;  %2670 = vmatpush.msra.mxu2 %v10194_v35  ;;  %v10204_v35 = vand.u32 4294901760, %v7292_v34 }
 0x161   : > { %v1008_v16 = vadd.f32 %v1007_v26, %v817_v58  ;;  %879 = vmatmul.f32.gmra.mxu1 %v7286_v54  ;;  %2839 = vmatpush.msra.mxu3 %v6979_v23  ;;  %10195 = vst [vmem:[#allocation151_spill] sm:$0xff] %v7402_v44  ;;  %v10197_v23 = vand.u32 4294901760, %v7084_v63  ;;  %v7414_v17 = vand.u32 4294901760, %v7402_v44  ;;  %v10203_v26 = vand.u32 4294901760, %v7240_v59 }
 0x162   : > { %1315 = vmatmul.f32.gmra.mxu3 %v7349_v25 }
 0x163   : > { %v7397_v47 = vadd.f32 %v1214_v9, %v1008_v16  ;;  %1091 = vmatmul.f32.gmra.mxu2 %v7334_v18  ;;  %2841 = vmatpush.msra.mxu3 %v7028_v20  ;;  %10199 = vst [vmem:[#allocation153_spill] sm:$0xff] %v7414_v17  ;;  %v7416_v20 = vand.u32 4294901760, %v246_v8 }
 0x164   : > { %2674 = vmatpush.msra.mxu2 %v10197_v23 }
 0x165   : > { %v535_v28 = vpop.f32.mrf.mxu0  ;;  %2843 = vmatpush.msra.mxu3 %v7080_v56  ;;  %10200 = vst [vmem:[#allocation154_spill] sm:$0xff] %v7416_v20  ;;  %v10201_v56 = vand.u32 4294901760, %v7188_v36  ;;  %v7432_v58 = vsub.f32 %v246_v8, %v7416_v20  ;;  %v248_v36 = vld [vmem:[%s6342_s7 + $0x28] sm:$0xff] }
 0x166   : > { %v820_v48 = vpop.f32.mrf.mxu1  ;;  %v1012_v51 = vpop.f32.mrf.mxu2  ;;  %2678 = vmatpush.msra.mxu2 %v10198_v62  ;;  %v536_v45 = vadd.f32 %v535_v28, %v7008_v3 }
 0x167   : > { %v821_v33 = vadd.f32 %v820_v48, %v528_v53  ;;  %v1220_v15 = vpop.f32.mrf.mxu3  ;;  %2845 = vmatpush.msra.mxu3 %v7132_v60  ;;  %v1714_v60 = vsub.f32 %v7402_v44, %v7414_v17  ;;  %10202 = vst [vmem:[#allocation155_spill] sm:$0xff] %v7432_v58  ;;  %v7444_v8 = vand.u32 4294901760, %v7432_v58  ;;  %v250_v48 = vld [vmem:[%s6342_s7 + $0x38] sm:$0xff] }
 0x168   : > { %662 = vmatmul.f32.gmra.mxu0 %v7405_v38  ;;  %2682 = vmatpush.msra.mxu2 %v10201_v56 }
 0x169   : > { %v1013_v63 = vadd.f32 %v1012_v51, %v821_v33  ;;  %883 = vmatmul.f32.gmra.mxu1 %v7322_v7  ;;  %2847 = vmatpush.msra.mxu3 %v7184_v2  ;;  %v7441_v53 = vand.u32 4294901760, %v1714_v60  ;;  %10206 = vst [vmem:[#allocation157_spill] sm:$0xff] %v7444_v8  ;;  %v1722_v34 = vsub.f32 %v7432_v58, %v7444_v8  ;;  %v7466_v60 = vand.u32 4294901760, %v250_v48 }
 0x16a   : > { %1321 = vmatmul.f32.gmra.mxu3 %v7378_v57  ;;  %2686 = vmatpush.msra.mxu2 %v10203_v26 }
 0x16b   : > { %v7425_v21 = vadd.f32 %v1220_v15, %v1013_v63  ;;  %1096 = vmatmul.f32.gmra.mxu2 %v7364_v1  ;;  %2849 = vmatpush.msra.mxu3 %v7236_v40  ;;  %10205 = vst [vmem:[#allocation156_spill] sm:$0xff] %v7441_v53  ;;  %v7446_v40 = vand.u32 4294901760, %v248_v36  ;;  %v7461_v56 = vand.u32 4294901760, %v1722_v34 }
 0x16c   : > { %2690 = vmatpush.msra.mxu2 %v10204_v35  ;;  %10211 = vst [vmem:[#allocation162_spill] sm:$0xff] %v7466_v60 }
 0x16d   : > { %v543_v2 = vpop.f32.mrf.mxu0  ;;  %2851 = vmatpush.msra.mxu3 %v7288_v30  ;;  %10207 = vst [vmem:[#allocation158_spill] sm:$0xff] %v7446_v40  ;;  %v7458_v28 = vsub.f32 %v248_v36, %v7446_v40 }
 0x16e   : > { %v824_v9 = vpop.f32.mrf.mxu1  ;;  %v1017_v16 = vpop.f32.mrf.mxu2  ;;  %v544_v30 = vadd.f32 %v543_v2, %v7008_v3  ;;  %10209 = vst [vmem:[#allocation160_spill] sm:$0xff] %v7461_v56 }
 0x16f   : > { %v825_v46 = vadd.f32 %v824_v9, %v536_v45  ;;  %v1226_v5 = vpop.f32.mrf.mxu3  ;;  %10208 = vst [vmem:[#allocation159_spill] sm:$0xff] %v7458_v28  ;;  %v7464_v45 = vand.u32 4294901760, %v7458_v28 }
 0x170   : > { %1390 = vmatmul.f32.vlgmr.msrb.gmra.mxu0 %v6472_v6 }
 0x171   : > { %v1018_v59 = vadd.f32 %v1017_v16, %v825_v46  ;;  %887 = vmatmul.f32.gmra.mxu1 %v7351_v29  ;;  %10210 = vst [vmem:[#allocation161_spill] sm:$0xff] %v7464_v45  ;;  %v1730_v9 = vsub.f32 %v7458_v28, %v7464_v45  ;;  %v7478_v46 = vsub.f32 %v250_v48, %v7466_v60  ;;  %v252_v16 = vld [vmem:[%s6342_s7 + $0x48] sm:$0xff] }
 0x172   : > { %2065 = vmatmul.f32.vlgmr.msrb.gmra.mxu3 %v7386_v41 }
 0x173   : > { %v7451_v23 = vadd.f32 %v1226_v5, %v1018_v59  ;;  %1716 = vmatmul.f32.vlgmr.msrb.gmra.mxu2 %v7441_v53  ;;  %10212 = vst [vmem:[#allocation163_spill] sm:$0xff] %v7478_v46 }
 0x175   : > { %v551_v33 = vpop.f32.mrf.mxu0 }
 0x176   : > { %v828_v51 = vpop.f32.mrf.mxu1  ;;  %v1022_v62 = vpop.f32.mrf.mxu2  ;;  %v552_v36 = vadd.f32 %v551_v33, %v7008_v3  ;;  %v7481_v33 = vand.u32 4294901760, %v1730_v9  ;;  %v254_v9 = vld [vmem:[%s6342_s7 + $0x58] sm:$0xff] }
 0x177   : > { %v829_v15 = vadd.f32 %v828_v51, %v544_v30  ;;  %v1232_v63 = vpop.f32.mrf.mxu3  ;;  %v7484_v51 = vand.u32 4294901760, %v7478_v46 }
 0x178   : > { %1394 = vmatmul.f32.gmra.mxu0 %v6512_v50  ;;  %10213 = vst [vmem:[#allocation164_spill] sm:$0xff] %v7481_v33 }
 0x179   : > { %v1023_v26 = vadd.f32 %v1022_v62, %v829_v15  ;;  %1551 = vmatmul.f32.vlgmr.msrb.gmra.mxu1 %v6472_v6  ;;  %10214 = vst [vmem:[#allocation165_spill] sm:$0xff] %v7484_v51  ;;  %v7486_v15 = vand.u32 4294901760, %v252_v16 }
 0x17a   : > { %2069 = vmatmul.f32.gmra.mxu3 %v7416_v20 }
 0x17b   : > { %v7471_v2 = vadd.f32 %v1232_v63, %v1023_v26  ;;  %1724 = vmatmul.f32.gmra.mxu2 %v7461_v56  ;;  %10215 = vst [vmem:[#allocation166_spill] sm:$0xff] %v7486_v15  ;;  %v1738_v26 = vsub.f32 %v7478_v46, %v7484_v51 }
 0x17d   : > { %v559_v5 = vpop.f32.mrf.mxu0 }
 0x17e   : > { %v832_v35 = vpop.f32.mrf.mxu1  ;;  %v1027_v30 = vpop.f32.mrf.mxu2  ;;  %v560_v48 = vadd.f32 %v559_v5, %v7008_v3  ;;  %v7501_v5 = vand.u32 4294901760, %v1738_v26 }
 0x17f   : > { %v833_v59 = vadd.f32 %v832_v35, %v552_v36  ;;  %v1238_v34 = vpop.f32.mrf.mxu3  ;;  %v7498_v36 = vsub.f32 %v252_v16, %v7486_v15 }
 0x180   : > { %1398 = vmatmul.f32.gmra.mxu0 %v6566_v52  ;;  %10217 = vst [vmem:[#allocation168_spill] sm:$0xff] %v7501_v5 }
 0x181   : > { %v1028_v62 = vadd.f32 %v1027_v30, %v833_v59  ;;  %1555 = vmatmul.f32.gmra.mxu1 %v6512_v50  ;;  %10216 = vst [vmem:[#allocation167_spill] sm:$0xff] %v7498_v36 }
 0x182   : > { %2073 = vmatmul.f32.gmra.mxu3 %v7446_v40 }
 0x183   : > { %v7491_v63 = vadd.f32 %v1238_v34, %v1028_v62  ;;  %1732 = vmatmul.f32.gmra.mxu2 %v7481_v33  ;;  %v7504_v34 = vand.u32 4294901760, %v7498_v36  ;;  %v7506_v62 = vand.u32 4294901760, %v254_v9 }
 0x185   : > { %v567_v35 = vpop.f32.mrf.mxu0  ;;  %10218 = vst [vmem:[#allocation169_spill] sm:$0xff] %v7504_v34  ;;  %v7518_v26 = vsub.f32 %v254_v9, %v7506_v62 }
 0x186   : > { %v836_v59 = vpop.f32.mrf.mxu1  ;;  %v1032_v56 = vpop.f32.mrf.mxu2  ;;  %10219 = vst [vmem:[#allocation170_spill] sm:$0xff] %v7506_v62  ;;  %v568_v16 = vadd.f32 %v567_v35, %v7008_v3 }
 0x187   : > { %v837_v30 = vadd.f32 %v836_v59, %v560_v48  ;;  %v1244_v53 = vpop.f32.mrf.mxu3  ;;  %v1746_v48 = vsub.f32 %v7498_v36, %v7504_v34  ;;  %10220 = vst [vmem:[#allocation171_spill] sm:$0xff] %v7518_v26  ;;  %v256_v59 = vld [vmem:[%s6342_s7 + $0x68] sm:$0xff] }
 0x188   : > { %1402 = vmatmul.f32.gmra.mxu0 %v6604_v0 }
 0x189   : > { %v1033_v33 = vadd.f32 %v1032_v56, %v837_v30  ;;  %1559 = vmatmul.f32.gmra.mxu1 %v6566_v52  ;;  %v7521_v35 = vand.u32 4294901760, %v1746_v48 }
 0x18a   : > { %2077 = vmatmul.f32.gmra.mxu3 %v7466_v60 }
 0x18b   : > { %v7511_v1 = vadd.f32 %v1244_v53, %v1033_v33  ;;  %1740 = vmatmul.f32.gmra.mxu2 %v7501_v5  ;;  %10221 = vst [vmem:[#allocation172_spill] sm:$0xff] %v7521_v35  ;;  %v7524_v53 = vand.u32 4294901760, %v7518_v26  ;;  %v7526_v33 = vand.u32 4294901760, %v256_v59 }
 0x18d   : > { %v575_v56 = vpop.f32.mrf.mxu0  ;;  %10222 = vst [vmem:[#allocation173_spill] sm:$0xff] %v7524_v53  ;;  %v7538_v48 = vsub.f32 %v256_v59, %v7526_v33 }
 0x18e   : > { %v840_v30 = vpop.f32.mrf.mxu1  ;;  %v1037_v38 = vpop.f32.mrf.mxu2  ;;  %10223 = vst [vmem:[#allocation174_spill] sm:$0xff] %v7526_v33  ;;  %v576_v9 = vadd.f32 %v575_v56, %v7008_v3 }
 0x18f   : > { %v841_v57 = vadd.f32 %v840_v30, %v568_v16  ;;  %v1250_v18 = vpop.f32.mrf.mxu3  ;;  %v1754_v16 = vsub.f32 %v7518_v26, %v7524_v53  ;;  %10224 = vst [vmem:[#allocation175_spill] sm:$0xff] %v7538_v48  ;;  %v258_v30 = vld [vmem:[%s6342_s7 + $0x78] sm:$0xff] }
 0x190   : > { %1406 = vmatmul.f32.gmra.mxu0 %v6638_v42 }
 0x191   : > { %v1038_v5 = vadd.f32 %v1037_v38, %v841_v57  ;;  %1563 = vmatmul.f32.gmra.mxu1 %v6604_v0  ;;  %v7541_v56 = vand.u32 4294901760, %v1754_v16 }
 0x192   : > { %2081 = vmatmul.f32.gmra.mxu3 %v7486_v15 }
 0x193   : > { %v7531_v25 = vadd.f32 %v1250_v18, %v1038_v5  ;;  %1748 = vmatmul.f32.gmra.mxu2 %v7521_v35  ;;  %10225 = vst [vmem:[#allocation176_spill] sm:$0xff] %v7541_v56  ;;  %v7544_v18 = vand.u32 4294901760, %v7538_v48  ;;  %v7546_v5 = vand.u32 4294901760, %v258_v30 }
 0x195   : > { %v583_v57 = vpop.f32.mrf.mxu0  ;;  %10226 = vst [vmem:[#allocation177_spill] sm:$0xff] %v7544_v18  ;;  %v7558_v16 = vsub.f32 %v258_v30, %v7546_v5 }
 0x196   : > { %v844_v38 = vpop.f32.mrf.mxu1  ;;  %v1042_v32 = vpop.f32.mrf.mxu2  ;;  %10227 = vst [vmem:[#allocation178_spill] sm:$0xff] %v7546_v5  ;;  %v584_v59 = vadd.f32 %v583_v57, %v7008_v3 }
 0x197   : > { %v845_v19 = vadd.f32 %v844_v38, %v576_v9  ;;  %v1256_v24 = vpop.f32.mrf.mxu3  ;;  %v1762_v9 = vsub.f32 %v7538_v48, %v7544_v18  ;;  %10228 = vst [vmem:[#allocation179_spill] sm:$0xff] %v7558_v16  ;;  %v260_v38 = vld [vmem:[%s6342_s7 + $0x88] sm:$0xff] }
 0x198   : > { %1410 = vmatmul.f32.gmra.mxu0 %v6665_v27 }
 0x199   : > { %v1043_v35 = vadd.f32 %v1042_v32, %v845_v19  ;;  %1567 = vmatmul.f32.gmra.mxu1 %v6638_v42  ;;  %v7561_v57 = vand.u32 4294901760, %v1762_v9 }
 0x19a   : > { %2085 = vmatmul.f32.gmra.mxu3 %v7506_v62 }
 0x19b   : > { %v7551_v10 = vadd.f32 %v1256_v24, %v1043_v35  ;;  %1756 = vmatmul.f32.gmra.mxu2 %v7541_v56  ;;  %10229 = vst [vmem:[#allocation180_spill] sm:$0xff] %v7561_v57  ;;  %v7564_v24 = vand.u32 4294901760, %v7558_v16  ;;  %v7566_v35 = vand.u32 4294901760, %v260_v38 }
 0x19d   : > { %v591_v32 = vpop.f32.mrf.mxu0  ;;  %10230 = vst [vmem:[#allocation181_spill] sm:$0xff] %v7564_v24  ;;  %v7578_v9 = vsub.f32 %v260_v38, %v7566_v35 }
 0x19e   : > { %v848_v19 = vpop.f32.mrf.mxu1  ;;  %v1047_v12 = vpop.f32.mrf.mxu2  ;;  %10231 = vst [vmem:[#allocation182_spill] sm:$0xff] %v7566_v35  ;;  %v592_v30 = vadd.f32 %v591_v32, %v7008_v3 }
 0x19f   : > { %v849_v61 = vadd.f32 %v848_v19, %v584_v59  ;;  %v1262_v55 = vpop.f32.mrf.mxu3  ;;  %v1770_v59 = vsub.f32 %v7558_v16, %v7564_v24  ;;  %10232 = vst [vmem:[#allocation183_spill] sm:$0xff] %v7578_v9  ;;  %v262_v19 = vld [vmem:[%s6342_s7 + $0x98] sm:$0xff] }
 0x1a0   : > { %1414 = vmatmul.f32.gmra.mxu0 %v6703_v43 }
 0x1a1   : > { %v1048_v56 = vadd.f32 %v1047_v12, %v849_v61  ;;  %1571 = vmatmul.f32.gmra.mxu1 %v6665_v27  ;;  %v7581_v32 = vand.u32 4294901760, %v1770_v59 }
 0x1a2   : > { %2089 = vmatmul.f32.gmra.mxu3 %v7526_v33 }
 0x1a3   : > { %v7571_v13 = vadd.f32 %v1262_v55, %v1048_v56  ;;  %1764 = vmatmul.f32.gmra.mxu2 %v7561_v57  ;;  %10233 = vst [vmem:[#allocation184_spill] sm:$0xff] %v7581_v32  ;;  %v7584_v55 = vand.u32 4294901760, %v7578_v9  ;;  %v7586_v56 = vand.u32 4294901760, %v262_v19 }
 0x1a5   : > { %v599_v61 = vpop.f32.mrf.mxu0  ;;  %10234 = vst [vmem:[#allocation185_spill] sm:$0xff] %v7584_v55  ;;  %v7598_v59 = vsub.f32 %v262_v19, %v7586_v56 }
 0x1a6   : > { %v852_v12 = vpop.f32.mrf.mxu1  ;;  %v1052_v27 = vpop.f32.mrf.mxu2  ;;  %10235 = vst [vmem:[#allocation186_spill] sm:$0xff] %v7586_v56  ;;  %v600_v38 = vadd.f32 %v599_v61, %v7008_v3 }
 0x1a7   : > { %v853_v42 = vadd.f32 %v852_v12, %v592_v30  ;;  %v1268_v0 = vpop.f32.mrf.mxu3  ;;  %v1778_v30 = vsub.f32 %v7578_v9, %v7584_v55  ;;  %10236 = vst [vmem:[#allocation187_spill] sm:$0xff] %v7598_v59  ;;  %v264_v12 = vld [vmem:[%s6342_s7 + $0xa8] sm:$0xff] }
 0x1a8   : > { %1418 = vmatmul.f32.gmra.mxu0 %v6730_v4 }
 0x1a9   : > { %v1053_v57 = vadd.f32 %v1052_v27, %v853_v42  ;;  %1575 = vmatmul.f32.gmra.mxu1 %v6703_v43  ;;  %v7601_v61 = vand.u32 4294901760, %v1778_v30 }
 0x1aa   : > { %2093 = vmatmul.f32.gmra.mxu3 %v7546_v5 }
 0x1ab   : > { %v7591_v52 = vadd.f32 %v1268_v0, %v1053_v57  ;;  %1772 = vmatmul.f32.gmra.mxu2 %v7581_v32  ;;  %10237 = vst [vmem:[#allocation188_spill] sm:$0xff] %v7601_v61  ;;  %v7604_v0 = vand.u32 4294901760, %v7598_v59  ;;  %v7606_v57 = vand.u32 4294901760, %v264_v12 }
 0x1ad   : > { %v607_v42 = vpop.f32.mrf.mxu0  ;;  %10238 = vst [vmem:[#allocation189_spill] sm:$0xff] %v7604_v0  ;;  %v7618_v30 = vsub.f32 %v264_v12, %v7606_v57 }
 0x1ae   : > { %v856_v27 = vpop.f32.mrf.mxu1  ;;  %v1057_v43 = vpop.f32.mrf.mxu2  ;;  %10239 = vst [vmem:[#allocation190_spill] sm:$0xff] %v7606_v57  ;;  %v608_v19 = vadd.f32 %v607_v42, %v7008_v3 }
 0x1af   : > { %v857_v50 = vadd.f32 %v856_v27, %v600_v38  ;;  %v1274_v6 = vpop.f32.mrf.mxu3  ;;  %v1786_v38 = vsub.f32 %v7598_v59, %v7604_v0  ;;  %10240 = vst [vmem:[#allocation191_spill] sm:$0xff] %v7618_v30  ;;  %v266_v27 = vld [vmem:[%s6342_s7 + $0xb8] sm:$0xff] }
 0x1b0   : > { %1422 = vmatmul.f32.gmra.mxu0 %v6768_v11 }
 0x1b1   : > { %v1058_v32 = vadd.f32 %v1057_v43, %v857_v50  ;;  %1579 = vmatmul.f32.gmra.mxu1 %v6730_v4  ;;  %v7621_v42 = vand.u32 4294901760, %v1786_v38 }
 0x1b2   : > { %2097 = vmatmul.f32.gmra.mxu3 %v7566_v35 }
 0x1b3   : > { %v7611_v55 = vadd.f32 %v1274_v6, %v1058_v32  ;;  %1780 = vmatmul.f32.gmra.mxu2 %v7601_v61  ;;  %10241 = vst [vmem:[#allocation192_spill] sm:$0xff] %v7621_v42  ;;  %v7624_v6 = vand.u32 4294901760, %v7618_v30  ;;  %v7626_v32 = vand.u32 4294901760, %v266_v27 }
 0x1b5   : > { %v615_v50 = vpop.f32.mrf.mxu0  ;;  %10242 = vst [vmem:[#allocation193_spill] sm:$0xff] %v7624_v6  ;;  %v7638_v38 = vsub.f32 %v266_v27, %v7626_v32 }
 0x1b6   : > { %v860_v43 = vpop.f32.mrf.mxu1  ;;  %v1062_v4 = vpop.f32.mrf.mxu2  ;;  %10243 = vst [vmem:[#allocation194_spill] sm:$0xff] %v7626_v32  ;;  %v616_v12 = vadd.f32 %v615_v50, %v7008_v3 }
 0x1b7   : > { %v861_v24 = vadd.f32 %v860_v43, %v608_v19  ;;  %v1280_v9 = vpop.f32.mrf.mxu3  ;;  %v1794_v19 = vsub.f32 %v7618_v30, %v7624_v6  ;;  %10245 = vst [vmem:[#allocation196_spill] sm:$0xff] %v7638_v38  ;;  %v268_v43 = vld [vmem:[%s6342_s7 + $0xc8] sm:$0xff] }
 0x1b8   : > { %1426 = vmatmul.f32.gmra.mxu0 %v6792_v22 }
 0x1b9   : > { %v1063_v61 = vadd.f32 %v1062_v4, %v861_v24  ;;  %1583 = vmatmul.f32.gmra.mxu1 %v6768_v11  ;;  %v7641_v50 = vand.u32 4294901760, %v1794_v19 }
 0x1ba   : > { %2101 = vmatmul.f32.gmra.mxu3 %v7586_v56  ;;  %v10249_v56 = vld [vmem:[#allocation51_spill] sm:$0xff] }
 0x1bb   : > { %v7631_v0 = vadd.f32 %v1280_v9, %v1063_v61  ;;  %1788 = vmatmul.f32.gmra.mxu2 %v7621_v42  ;;  %10246 = vst [vmem:[#allocation197_spill] sm:$0xff] %v7641_v50  ;;  %v7644_v9 = vand.u32 4294901760, %v7638_v38  ;;  %v7646_v61 = vand.u32 4294901760, %v268_v43 }
 0x1bd   : > { %10244 = vst [vmem:[#allocation195_spill] sm:$0xff] %v7631_v0  ;;  %v623_v4 = vpop.f32.mrf.mxu0  ;;  %v7658_v19 = vsub.f32 %v268_v43, %v7646_v61 }
 0x1be   : > { %v864_v24 = vpop.f32.mrf.mxu1  ;;  %v1067_v11 = vpop.f32.mrf.mxu2  ;;  %10247 = vst [vmem:[#allocation198_spill] sm:$0xff] %v7644_v9  ;;  %v624_v27 = vadd.f32 %v623_v4, %v7008_v3 }
 0x1bf   : > { %v865_v59 = vadd.f32 %v864_v24, %v616_v12  ;;  %v1286_v35 = vpop.f32.mrf.mxu3  ;;  %10248 = vst [vmem:[#allocation199_spill] sm:$0xff] %v7646_v61  ;;  %v1802_v12 = vsub.f32 %v7638_v38, %v7644_v9  ;;  %v270_v24 = vld [vmem:[%s6342_s7 + $0xd8] sm:$0xff] }
 0x1c0   : > { %1430 = vmatmul.f32.gmra.mxu0 %v10249_v56  ;;  %10251 = vst [vmem:[#allocation201_spill] sm:$0xff] %v7658_v19 }
 0x1c1   : > { %v1068_v42 = vadd.f32 %v1067_v11, %v865_v59  ;;  %1587 = vmatmul.f32.gmra.mxu1 %v6792_v22  ;;  %v7661_v4 = vand.u32 4294901760, %v1802_v12 }
 0x1c2   : > { %2105 = vmatmul.f32.gmra.mxu3 %v7606_v57  ;;  %v10255_v57 = vld [vmem:[#allocation55_spill] sm:$0xff] }
 0x1c3   : > { %v7651_v6 = vadd.f32 %v1286_v35, %v1068_v42  ;;  %1796 = vmatmul.f32.gmra.mxu2 %v7641_v50  ;;  %10252 = vst [vmem:[#allocation202_spill] sm:$0xff] %v7661_v4  ;;  %v7664_v35 = vand.u32 4294901760, %v7658_v19  ;;  %v7666_v42 = vand.u32 4294901760, %v270_v24 }
 0x1c5   : > { %10250 = vst [vmem:[#allocation200_spill] sm:$0xff] %v7651_v6  ;;  %v631_v11 = vpop.f32.mrf.mxu0  ;;  %v7678_v12 = vsub.f32 %v270_v24, %v7666_v42 }
 0x1c6   : > { %v868_v59 = vpop.f32.mrf.mxu1  ;;  %v1072_v22 = vpop.f32.mrf.mxu2  ;;  %10253 = vst [vmem:[#allocation203_spill] sm:$0xff] %v7664_v35  ;;  %v632_v43 = vadd.f32 %v631_v11, %v7008_v3 }
 0x1c7   : > { %v869_v30 = vadd.f32 %v868_v59, %v624_v27  ;;  %v1292_v0 = vpop.f32.mrf.mxu3  ;;  %10254 = vst [vmem:[#allocation204_spill] sm:$0xff] %v7666_v42  ;;  %v1810_v27 = vsub.f32 %v7658_v19, %v7664_v35  ;;  %v272_v59 = vld [vmem:[%s6342_s7 + $0xe8] sm:$0xff] }
 0x1c8   : > { %1434 = vmatmul.f32.gmra.mxu0 %v10255_v57  ;;  %10257 = vst [vmem:[#allocation206_spill] sm:$0xff] %v7678_v12 }
 0x1c9   : > { %v1073_v50 = vadd.f32 %v1072_v22, %v869_v30  ;;  %1591 = vmatmul.f32.gmra.mxu1 %v10249_v56  ;;  %v7681_v11 = vand.u32 4294901760, %v1810_v27 }
 0x1ca   : > { %2109 = vmatmul.f32.gmra.mxu3 %v7626_v32  ;;  %v10261_v32 = vld [vmem:[#allocation59_spill] sm:$0xff] }
 0x1cb   : > { %v7671_v9 = vadd.f32 %v1292_v0, %v1073_v50  ;;  %1804 = vmatmul.f32.gmra.mxu2 %v7661_v4  ;;  %10258 = vst [vmem:[#allocation207_spill] sm:$0xff] %v7681_v11  ;;  %v7684_v0 = vand.u32 4294901760, %v7678_v12  ;;  %v7686_v50 = vand.u32 4294901760, %v272_v59 }
 0x1cd   : > { %10256 = vst [vmem:[#allocation205_spill] sm:$0xff] %v7671_v9  ;;  %v639_v22 = vpop.f32.mrf.mxu0  ;;  %v7698_v27 = vsub.f32 %v272_v59, %v7686_v50 }
 0x1ce   : > { %v872_v30 = vpop.f32.mrf.mxu1  ;;  %v1077_v56 = vpop.f32.mrf.mxu2  ;;  %10259 = vst [vmem:[#allocation208_spill] sm:$0xff] %v7684_v0  ;;  %v640_v24 = vadd.f32 %v639_v22, %v7008_v3 }
 0x1cf   : > { %v873_v38 = vadd.f32 %v872_v30, %v632_v43  ;;  %v1298_v6 = vpop.f32.mrf.mxu3  ;;  %10260 = vst [vmem:[#allocation209_spill] sm:$0xff] %v7686_v50  ;;  %v1818_v43 = vsub.f32 %v7678_v12, %v7684_v0  ;;  %v274_v30 = vld [vmem:[%s6342_s7 + $0xf8] sm:$0xff] }
 0x1d0   : > { %1438 = vmatmul.f32.gmra.mxu0 %v10261_v32  ;;  %10263 = vst [vmem:[#allocation211_spill] sm:$0xff] %v7698_v27 }
 0x1d1   : > { %v1078_v4 = vadd.f32 %v1077_v56, %v873_v38  ;;  %1595 = vmatmul.f32.gmra.mxu1 %v10255_v57  ;;  %v7701_v22 = vand.u32 4294901760, %v1818_v43 }
 0x1d2   : > { %2113 = vmatmul.f32.gmra.mxu3 %v7646_v61  ;;  %v10267_v61 = vld [vmem:[#allocation63_spill] sm:$0xff] }
 0x1d3   : > { %v7691_v35 = vadd.f32 %v1298_v6, %v1078_v4  ;;  %1812 = vmatmul.f32.gmra.mxu2 %v7681_v11  ;;  %10264 = vst [vmem:[#allocation212_spill] sm:$0xff] %v7701_v22  ;;  %v7704_v6 = vand.u32 4294901760, %v7698_v27  ;;  %v7706_v4 = vand.u32 4294901760, %v274_v30 }
 0x1d5   : > { %10262 = vst [vmem:[#allocation210_spill] sm:$0xff] %v7691_v35  ;;  %v647_v56 = vpop.f32.mrf.mxu0  ;;  %v7718_v43 = vsub.f32 %v274_v30, %v7706_v4 }
 0x1d6   : > { %v876_v38 = vpop.f32.mrf.mxu1  ;;  %v1082_v57 = vpop.f32.mrf.mxu2  ;;  %10265 = vst [vmem:[#allocation213_spill] sm:$0xff] %v7704_v6  ;;  %v648_v59 = vadd.f32 %v647_v56, %v7008_v3 }
 0x1d7   : > { %v877_v19 = vadd.f32 %v876_v38, %v640_v24  ;;  %v1304_v9 = vpop.f32.mrf.mxu3  ;;  %10266 = vst [vmem:[#allocation214_spill] sm:$0xff] %v7706_v4  ;;  %v1826_v24 = vsub.f32 %v7698_v27, %v7704_v6  ;;  %v276_v38 = vld [vmem:[%s6342_s7 + $0x108] sm:$0xff] }
 0x1d8   : > { %1442 = vmatmul.f32.gmra.mxu0 %v10267_v61  ;;  %10269 = vst [vmem:[#allocation216_spill] sm:$0xff] %v7718_v43 }
 0x1d9   : > { %v1083_v11 = vadd.f32 %v1082_v57, %v877_v19  ;;  %1599 = vmatmul.f32.gmra.mxu1 %v10261_v32  ;;  %v7721_v56 = vand.u32 4294901760, %v1826_v24 }
 0x1da   : > { %2117 = vmatmul.f32.gmra.mxu3 %v7666_v42  ;;  %v10273_v42 = vld [vmem:[#allocation67_spill] sm:$0xff] }
 0x1db   : > { %v7711_v0 = vadd.f32 %v1304_v9, %v1083_v11  ;;  %1820 = vmatmul.f32.gmra.mxu2 %v7701_v22  ;;  %10270 = vst [vmem:[#allocation217_spill] sm:$0xff] %v7721_v56  ;;  %v7724_v9 = vand.u32 4294901760, %v7718_v43  ;;  %v7726_v11 = vand.u32 4294901760, %v276_v38 }
 0x1dd   : > { %10268 = vst [vmem:[#allocation215_spill] sm:$0xff] %v7711_v0  ;;  %v655_v57 = vpop.f32.mrf.mxu0  ;;  %v7738_v24 = vsub.f32 %v276_v38, %v7726_v11 }
 0x1de   : > { %v880_v19 = vpop.f32.mrf.mxu1  ;;  %v1087_v32 = vpop.f32.mrf.mxu2  ;;  %10271 = vst [vmem:[#allocation218_spill] sm:$0xff] %v7724_v9  ;;  %v656_v30 = vadd.f32 %v655_v57, %v7008_v3 }
 0x1df   : > { %v881_v12 = vadd.f32 %v880_v19, %v648_v59  ;;  %v1310_v35 = vpop.f32.mrf.mxu3  ;;  %10272 = vst [vmem:[#allocation219_spill] sm:$0xff] %v7726_v11  ;;  %v1834_v59 = vsub.f32 %v7718_v43, %v7724_v9  ;;  %v278_v19 = vld [vmem:[%s6342_s7 + $0x118] sm:$0xff] }
 0x1e0   : > { %1446 = vmatmul.f32.gmra.mxu0 %v10273_v42  ;;  %10275 = vst [vmem:[#allocation221_spill] sm:$0xff] %v7738_v24 }
 0x1e1   : > { %v1088_v22 = vadd.f32 %v1087_v32, %v881_v12  ;;  %1603 = vmatmul.f32.gmra.mxu1 %v10267_v61  ;;  %v7741_v57 = vand.u32 4294901760, %v1834_v59 }
 0x1e2   : > { %2121 = vmatmul.f32.gmra.mxu3 %v7686_v50  ;;  %v10279_v50 = vld [vmem:[#allocation71_spill] sm:$0xff] }
 0x1e3   : > { %v7731_v6 = vadd.f32 %v1310_v35, %v1088_v22  ;;  %1828 = vmatmul.f32.gmra.mxu2 %v7721_v56  ;;  %10276 = vst [vmem:[#allocation222_spill] sm:$0xff] %v7741_v57  ;;  %v7744_v35 = vand.u32 4294901760, %v7738_v24  ;;  %v7746_v22 = vand.u32 4294901760, %v278_v19 }
 0x1e5   : > { %10274 = vst [vmem:[#allocation220_spill] sm:$0xff] %v7731_v6  ;;  %v663_v32 = vpop.f32.mrf.mxu0  ;;  %v7758_v59 = vsub.f32 %v278_v19, %v7746_v22 }
 0x1e6   : > { %v884_v12 = vpop.f32.mrf.mxu1  ;;  %v1092_v61 = vpop.f32.mrf.mxu2  ;;  %10277 = vst [vmem:[#allocation223_spill] sm:$0xff] %v7744_v35  ;;  %v664_v38 = vadd.f32 %v663_v32, %v7008_v3 }
 0x1e7   : > { %v885_v27 = vadd.f32 %v884_v12, %v656_v30  ;;  %v1316_v0 = vpop.f32.mrf.mxu3  ;;  %10278 = vst [vmem:[#allocation224_spill] sm:$0xff] %v7746_v22  ;;  %v1842_v30 = vsub.f32 %v7738_v24, %v7744_v35  ;;  %v280_v12 = vld [vmem:[%s6342_s7 + $0x128] sm:$0xff]  ;;  %v282_v24 = vld [vmem:[%s6342_s7 + $0x138] sm:$0xff] }
 0x1e8   : > { %1450 = vmatmul.f32.gmra.mxu0 %v10279_v50  ;;  %10280 = vst [vmem:[#allocation225_spill] sm:$0xff] %v7758_v59 }
 0x1e9   : > { %v1093_v56 = vadd.f32 %v1092_v61, %v885_v27  ;;  %1607 = vmatmul.f32.gmra.mxu1 %v10273_v42  ;;  %v7761_v3 = vand.u32 4294901760, %v1842_v30 }
 0x1ea   : > { %2125 = vmatmul.f32.gmra.mxu3 %v7706_v4 }
 0x1eb   : > { %v7751_v9 = vadd.f32 %v1316_v0, %v1093_v56  ;;  %1836 = vmatmul.f32.gmra.mxu2 %v7741_v57  ;;  %10281 = vst [vmem:[#allocation226_spill] sm:$0xff] %v7761_v3  ;;  %v7764_v0 = vand.u32 4294901760, %v7758_v59  ;;  %v7766_v56 = vand.u32 4294901760, %v280_v12  ;;  %v10284_v57 = vld [vmem:[#allocation75_spill] sm:$0xff] }
 0x1ed   : > { %v1391_v27 = vpop.f32.mrf.mxu0  ;;  %10282 = vst [vmem:[#allocation227_spill] sm:$0xff] %v7764_v0  ;;  %v7777_v30 = vsub.f32 %v280_v12, %v7766_v56 }
 0x1ee   : > { %v888_v61 = vpop.f32.mrf.mxu1  ;;  %v1097_v42 = vpop.f32.mrf.mxu2  ;;  %10283 = vst [vmem:[#allocation228_spill] sm:$0xff] %v7766_v56 }
 0x1ef   : > { %v889_v43 = vadd.f32 %v888_v61, %v664_v38  ;;  %v1322_v6 = vpop.f32.mrf.mxu3  ;;  %v1850_v38 = vsub.f32 %v7758_v59, %v7764_v0  ;;  %10286 = vst [vmem:[#allocation230_spill] sm:$0xff] %v7777_v30  ;;  %v10287_v61 = vld [vmem:[#allocation89_spill] sm:$0xff]  ;;  %v10291_v59 = vld [vmem:[#allocation79_spill] sm:$0xff] }
 0x1f0   : > { %1454 = vmatmul.f32.gmra.mxu0 %v10284_v57  ;;  %v1392_v35 = vadd.f32 %v1391_v27, %v10287_v61 }
 0x1f1   : > { %v1098_v32 = vadd.f32 %v1097_v42, %v889_v43  ;;  %1611 = vmatmul.f32.gmra.mxu1 %v10279_v50 }
 0x1f2   : > { %2129 = vmatmul.f32.gmra.mxu3 %v7726_v11  ;;  %v7784_v11 = vand.u32 4294901760, %v7777_v30 }
 0x1f3   : > { %v7770_v19 = vadd.f32 %v1322_v6, %v1098_v32  ;;  %1844 = vmatmul.f32.gmra.mxu2 %v7761_v3  ;;  %v7781_v32 = vand.u32 4294901760, %v1850_v38  ;;  %v7786_v3 = vand.u32 4294901760, %v282_v24  ;;  %v10294_v38 = vld [vmem:[#allocation94_spill] sm:$0xff] }
 0x1f4   : > { %10289 = vst [vmem:[#allocation231_spill] sm:$0xff] %v7784_v11 }
 0x1f5   : > { %10285 = vst [vmem:[#allocation229_spill] sm:$0xff] %v7770_v19  ;;  %v1395_v42 = vpop.f32.mrf.mxu0  ;;  %v7797_v27 = vsub.f32 %v282_v24, %v7786_v3 }
 0x1f6   : > { %v1552_v43 = vpop.f32.mrf.mxu1  ;;  %v1717_v50 = vpop.f32.mrf.mxu2  ;;  %10288 = vst [vmem:[#allocation89_spill] sm:$0xff] %v7781_v32  ;;  %v1396_v61 = vadd.f32 %v1395_v42, %v10294_v38  ;;  %v10301_v38 = vld [vmem:[#allocation99_spill] sm:$0xff] }
 0x1f7   : > { %v1553_v4 = vadd.f32 %v1552_v43, %v1392_v35  ;;  %v2066_v6 = vpop.f32.mrf.mxu3  ;;  %10290 = vst [vmem:[#allocation232_spill] sm:$0xff] %v7786_v3  ;;  %v1858_v35 = vsub.f32 %v7777_v30, %v7784_v11  ;;  %v284_v43 = vld [vmem:[%s6342_s7 + $0x148] sm:$0xff]  ;;  %v10298_v30 = vld [vmem:[#allocation83_spill] sm:$0xff] }
 0x1f8   : > { %1458 = vmatmul.f32.gmra.mxu0 %v10291_v59  ;;  %10293 = vst [vmem:[#allocation234_spill] sm:$0xff] %v7797_v27 }
 0x1f9   : > { %v1718_v0 = vadd.f32 %v1717_v50, %v1553_v4  ;;  %1615 = vmatmul.f32.gmra.mxu1 %v10284_v57 }
 0x1fa   : > { %2133 = vmatmul.f32.gmra.mxu3 %v7746_v22  ;;  %v7804_v22 = vand.u32 4294901760, %v7797_v27 }
 0x1fb   : > { %v7790_v12 = vadd.f32 %v2066_v6, %v1718_v0  ;;  %1852 = vmatmul.f32.gmra.mxu2 %v7781_v32  ;;  %v7801_v6 = vand.u32 4294901760, %v1858_v35  ;;  %v7806_v32 = vand.u32 4294901760, %v284_v43 }
 0x1fc   : > { %10296 = vst [vmem:[#allocation235_spill] sm:$0xff] %v7804_v22  ;;  %v1866_v42 = vsub.f32 %v7797_v27, %v7804_v22  ;;  %v10305_v27 = vld [vmem:[#allocation87_spill] sm:$0xff] }
 0x1fd   : > { %10292 = vst [vmem:[#allocation233_spill] sm:$0xff] %v7790_v12  ;;  %v1399_v50 = vpop.f32.mrf.mxu0  ;;  %v7817_v35 = vsub.f32 %v284_v43, %v7806_v32 }
 0x1fe   : > { %v1556_v4 = vpop.f32.mrf.mxu1  ;;  %v1725_v57 = vpop.f32.mrf.mxu2  ;;  %10295 = vst [vmem:[#allocation94_spill] sm:$0xff] %v7801_v6 }
 0x1ff   : > { %v1557_v19 = vadd.f32 %v1556_v4, %v1396_v61  ;;  %v2070_v0 = vpop.f32.mrf.mxu3  ;;  %10297 = vst [vmem:[#allocation236_spill] sm:$0xff] %v7806_v32  ;;  %v1400_v61 = vadd.f32 %v1399_v50, %v10301_v38  ;;  %v286_v4 = vld [vmem:[%s6342_s7 + $0x158] sm:$0xff]  ;;  %v10308_v38 = vld [vmem:[#allocation104_spill] sm:$0xff] }
 0x200   : > { %1462 = vmatmul.f32.gmra.mxu0 %v10298_v30  ;;  %10300 = vst [vmem:[#allocation238_spill] sm:$0xff] %v7817_v35 }
 0x201   : > { %v1726_v11 = vadd.f32 %v1725_v57, %v1557_v19  ;;  %1619 = vmatmul.f32.gmra.mxu1 %v10291_v59 }
 0x202   : > { %2137 = vmatmul.f32.gmra.mxu3 %v7766_v56  ;;  %v7824_v56 = vand.u32 4294901760, %v7817_v35 }
 0x203   : > { %v7810_v24 = vadd.f32 %v2070_v0, %v1726_v11  ;;  %1860 = vmatmul.f32.gmra.mxu2 %v7801_v6  ;;  %v7821_v0 = vand.u32 4294901760, %v1866_v42  ;;  %v7826_v6 = vand.u32 4294901760, %v286_v4 }
 0x204   : > { %10303 = vst [vmem:[#allocation239_spill] sm:$0xff] %v7824_v56  ;;  %v1874_v50 = vsub.f32 %v7817_v35, %v7824_v56  ;;  %v10312_v35 = vld [vmem:[#allocation92_spill] sm:$0xff] }
 0x205   : > { %10299 = vst [vmem:[#allocation237_spill] sm:$0xff] %v7810_v24  ;;  %v1403_v57 = vpop.f32.mrf.mxu0  ;;  %v7837_v42 = vsub.f32 %v286_v4, %v7826_v6 }
 0x206   : > { %v1560_v19 = vpop.f32.mrf.mxu1  ;;  %v1733_v59 = vpop.f32.mrf.mxu2  ;;  %10302 = vst [vmem:[#allocation99_spill] sm:$0xff] %v7821_v0 }
 0x207   : > { %v1561_v12 = vadd.f32 %v1560_v19, %v1400_v61  ;;  %v2074_v11 = vpop.f32.mrf.mxu3  ;;  %10304 = vst [vmem:[#allocation240_spill] sm:$0xff] %v7826_v6  ;;  %v1404_v61 = vadd.f32 %v1403_v57, %v10308_v38  ;;  %v288_v19 = vld [vmem:[%s6342_s7 + $0x168] sm:$0xff] }
 0x208   : > { %1466 = vmatmul.f32.gmra.mxu0 %v10305_v27  ;;  %10307 = vst [vmem:[#allocation242_spill] sm:$0xff] %v7837_v42  ;;  %v10315_v38 = vld [vmem:[#allocation109_spill] sm:$0xff] }
 0x209   : > { %v1734_v22 = vadd.f32 %v1733_v59, %v1561_v12  ;;  %1623 = vmatmul.f32.gmra.mxu1 %v10298_v30 }
 0x20a   : > { %2141 = vmatmul.f32.gmra.mxu3 %v7786_v3  ;;  %v7844_v3 = vand.u32 4294901760, %v7837_v42 }
 0x20b   : > { %v7830_v43 = vadd.f32 %v2074_v11, %v1734_v22  ;;  %1868 = vmatmul.f32.gmra.mxu2 %v7821_v0  ;;  %v7841_v11 = vand.u32 4294901760, %v1874_v50  ;;  %v7846_v0 = vand.u32 4294901760, %v288_v19 }
 0x20c   : > { %10310 = vst [vmem:[#allocation243_spill] sm:$0xff] %v7844_v3  ;;  %v1882_v57 = vsub.f32 %v7837_v42, %v7844_v3  ;;  %v10319_v42 = vld [vmem:[#allocation97_spill] sm:$0xff] }
 0x20d   : > { %10306 = vst [vmem:[#allocation241_spill] sm:$0xff] %v7830_v43  ;;  %v1407_v59 = vpop.f32.mrf.mxu0  ;;  %v7857_v50 = vsub.f32 %v288_v19, %v7846_v0 }
 0x20e   : > { %v1564_v12 = vpop.f32.mrf.mxu1  ;;  %v1741_v30 = vpop.f32.mrf.mxu2  ;;  %10309 = vst [vmem:[#allocation104_spill] sm:$0xff] %v7841_v11 }
 0x20f   : > { %v1565_v24 = vadd.f32 %v1564_v12, %v1404_v61  ;;  %v2078_v22 = vpop.f32.mrf.mxu3  ;;  %10311 = vst [vmem:[#allocation244_spill] sm:$0xff] %v7846_v0  ;;  %v1408_v61 = vadd.f32 %v1407_v59, %v10315_v38  ;;  %v290_v12 = vld [vmem:[%s6342_s7 + $0x178] sm:$0xff] }
 0x210   : > { %1470 = vmatmul.f32.gmra.mxu0 %v10312_v35  ;;  %10314 = vst [vmem:[#allocation246_spill] sm:$0xff] %v7857_v50  ;;  %v10322_v38 = vld [vmem:[#allocation114_spill] sm:$0xff] }
 0x211   : > { %v1742_v56 = vadd.f32 %v1741_v30, %v1565_v24  ;;  %1627 = vmatmul.f32.gmra.mxu1 %v10305_v27 }
 0x212   : > { %2145 = vmatmul.f32.gmra.mxu3 %v7806_v32  ;;  %v7864_v32 = vand.u32 4294901760, %v7857_v50 }
 0x213   : > { %v7850_v4 = vadd.f32 %v2078_v22, %v1742_v56  ;;  %1876 = vmatmul.f32.gmra.mxu2 %v7841_v11  ;;  %v7861_v22 = vand.u32 4294901760, %v1882_v57  ;;  %v7866_v11 = vand.u32 4294901760, %v290_v12 }
 0x214   : > { %10317 = vst [vmem:[#allocation247_spill] sm:$0xff] %v7864_v32  ;;  %v1890_v59 = vsub.f32 %v7857_v50, %v7864_v32  ;;  %v10326_v50 = vld [vmem:[#allocation102_spill] sm:$0xff] }
 0x215   : > { %10313 = vst [vmem:[#allocation245_spill] sm:$0xff] %v7850_v4  ;;  %v1411_v30 = vpop.f32.mrf.mxu0  ;;  %v7877_v57 = vsub.f32 %v290_v12, %v7866_v11 }
 0x216   : > { %v1568_v24 = vpop.f32.mrf.mxu1  ;;  %v1749_v27 = vpop.f32.mrf.mxu2  ;;  %10316 = vst [vmem:[#allocation109_spill] sm:$0xff] %v7861_v22 }
 0x217   : > { %v1569_v43 = vadd.f32 %v1568_v24, %v1408_v61  ;;  %v2082_v56 = vpop.f32.mrf.mxu3  ;;  %10318 = vst [vmem:[#allocation248_spill] sm:$0xff] %v7866_v11  ;;  %v1412_v61 = vadd.f32 %v1411_v30, %v10322_v38  ;;  %v292_v24 = vld [vmem:[%s6342_s7 + $0x188] sm:$0xff]  ;;  %v10329_v38 = vld [vmem:[#allocation119_spill] sm:$0xff] }
 0x218   : > { %1474 = vmatmul.f32.gmra.mxu0 %v10319_v42  ;;  %10321 = vst [vmem:[#allocation250_spill] sm:$0xff] %v7877_v57 }
 0x219   : > { %v1750_v3 = vadd.f32 %v1749_v27, %v1569_v43  ;;  %1631 = vmatmul.f32.gmra.mxu1 %v10312_v35 }
 0x21a   : > { %2149 = vmatmul.f32.gmra.mxu3 %v7826_v6  ;;  %v7884_v6 = vand.u32 4294901760, %v7877_v57 }
 0x21b   : > { %v7870_v19 = vadd.f32 %v2082_v56, %v1750_v3  ;;  %1884 = vmatmul.f32.gmra.mxu2 %v7861_v22  ;;  %v7881_v56 = vand.u32 4294901760, %v1890_v59  ;;  %v7886_v22 = vand.u32 4294901760, %v292_v24 }
 0x21c   : > { %10324 = vst [vmem:[#allocation251_spill] sm:$0xff] %v7884_v6  ;;  %v1898_v30 = vsub.f32 %v7877_v57, %v7884_v6  ;;  %v10333_v57 = vld [vmem:[#allocation107_spill] sm:$0xff] }
 0x21d   : > { %10320 = vst [vmem:[#allocation249_spill] sm:$0xff] %v7870_v19  ;;  %v1415_v27 = vpop.f32.mrf.mxu0  ;;  %v7897_v59 = vsub.f32 %v292_v24, %v7886_v22 }
 0x21e   : > { %v1572_v43 = vpop.f32.mrf.mxu1  ;;  %v1757_v35 = vpop.f32.mrf.mxu2  ;;  %10323 = vst [vmem:[#allocation114_spill] sm:$0xff] %v7881_v56 }
 0x21f   : > { %v1573_v4 = vadd.f32 %v1572_v43, %v1412_v61  ;;  %v2086_v3 = vpop.f32.mrf.mxu3  ;;  %10325 = vst [vmem:[#allocation252_spill] sm:$0xff] %v7886_v22  ;;  %v1416_v61 = vadd.f32 %v1415_v27, %v10329_v38  ;;  %v294_v43 = vld [vmem:[%s6342_s7 + $0x198] sm:$0xff]  ;;  %v10336_v38 = vld [vmem:[#allocation124_spill] sm:$0xff] }
 0x220   : > { %1478 = vmatmul.f32.gmra.mxu0 %v10326_v50  ;;  %10328 = vst [vmem:[#allocation254_spill] sm:$0xff] %v7897_v59 }
 0x221   : > { %v1758_v32 = vadd.f32 %v1757_v35, %v1573_v4  ;;  %1635 = vmatmul.f32.gmra.mxu1 %v10319_v42 }
 0x222   : > { %2153 = vmatmul.f32.gmra.mxu3 %v7846_v0  ;;  %v7904_v0 = vand.u32 4294901760, %v7897_v59 }
 0x223   : > { %v7890_v12 = vadd.f32 %v2086_v3, %v1758_v32  ;;  %1892 = vmatmul.f32.gmra.mxu2 %v7881_v56  ;;  %v7901_v3 = vand.u32 4294901760, %v1898_v30  ;;  %v7906_v56 = vand.u32 4294901760, %v294_v43 }
 0x224   : > { %10331 = vst [vmem:[#allocation255_spill] sm:$0xff] %v7904_v0  ;;  %v1906_v27 = vsub.f32 %v7897_v59, %v7904_v0  ;;  %v10340_v59 = vld [vmem:[#allocation112_spill] sm:$0xff] }
 0x225   : > { %10327 = vst [vmem:[#allocation253_spill] sm:$0xff] %v7890_v12  ;;  %v1419_v35 = vpop.f32.mrf.mxu0  ;;  %v7917_v30 = vsub.f32 %v294_v43, %v7906_v56 }
 0x226   : > { %v1576_v4 = vpop.f32.mrf.mxu1  ;;  %v1765_v42 = vpop.f32.mrf.mxu2  ;;  %10330 = vst [vmem:[#allocation119_spill] sm:$0xff] %v7901_v3 }
 0x227   : > { %v1577_v19 = vadd.f32 %v1576_v4, %v1416_v61  ;;  %v2090_v32 = vpop.f32.mrf.mxu3  ;;  %10332 = vst [vmem:[#allocation256_spill] sm:$0xff] %v7906_v56  ;;  %v1420_v61 = vadd.f32 %v1419_v35, %v10336_v38  ;;  %v296_v4 = vld [vmem:[%s6342_s7 + $0x1a8] sm:$0xff] }
 0x228   : > { %1482 = vmatmul.f32.gmra.mxu0 %v10333_v57  ;;  %10335 = vst [vmem:[#allocation258_spill] sm:$0xff] %v7917_v30  ;;  %v10343_v38 = vld [vmem:[#allocation129_spill] sm:$0xff] }
 0x229   : > { %v1766_v6 = vadd.f32 %v1765_v42, %v1577_v19  ;;  %1639 = vmatmul.f32.gmra.mxu1 %v10326_v50 }
 0x22a   : > { %2157 = vmatmul.f32.gmra.mxu3 %v7866_v11  ;;  %v7924_v11 = vand.u32 4294901760, %v7917_v30 }
 0x22b   : > { %v7910_v24 = vadd.f32 %v2090_v32, %v1766_v6  ;;  %1900 = vmatmul.f32.gmra.mxu2 %v7901_v3  ;;  %v7921_v32 = vand.u32 4294901760, %v1906_v27  ;;  %v7926_v3 = vand.u32 4294901760, %v296_v4 }
 0x22c   : > { %10338 = vst [vmem:[#allocation259_spill] sm:$0xff] %v7924_v11  ;;  %v1914_v35 = vsub.f32 %v7917_v30, %v7924_v11  ;;  %v10347_v30 = vld [vmem:[#allocation117_spill] sm:$0xff] }
 0x22d   : > { %10334 = vst [vmem:[#allocation257_spill] sm:$0xff] %v7910_v24  ;;  %v1423_v42 = vpop.f32.mrf.mxu0  ;;  %v7937_v27 = vsub.f32 %v296_v4, %v7926_v3 }
 0x22e   : > { %v1580_v19 = vpop.f32.mrf.mxu1  ;;  %v1773_v50 = vpop.f32.mrf.mxu2  ;;  %10337 = vst [vmem:[#allocation124_spill] sm:$0xff] %v7921_v32 }
 0x22f   : > { %v1581_v12 = vadd.f32 %v1580_v19, %v1420_v61  ;;  %v2094_v6 = vpop.f32.mrf.mxu3  ;;  %10339 = vst [vmem:[#allocation260_spill] sm:$0xff] %v7926_v3  ;;  %v1424_v61 = vadd.f32 %v1423_v42, %v10343_v38  ;;  %v298_v19 = vld [vmem:[%s6342_s7 + $0x1b8] sm:$0xff] }
 0x230   : > { %1486 = vmatmul.f32.gmra.mxu0 %v10340_v59  ;;  %10342 = vst [vmem:[#allocation262_spill] sm:$0xff] %v7937_v27  ;;  %v10349_v38 = vld [vmem:[#allocation134_spill] sm:$0xff] }
 0x231   : > { %v1774_v0 = vadd.f32 %v1773_v50, %v1581_v12  ;;  %1643 = vmatmul.f32.gmra.mxu1 %v10333_v57 }
 0x232   : > { %2161 = vmatmul.f32.gmra.mxu3 %v7886_v22  ;;  %v7944_v22 = vand.u32 4294901760, %v7937_v27 }
 0x233   : > { %v7930_v43 = vadd.f32 %v2094_v6, %v1774_v0  ;;  %1908 = vmatmul.f32.gmra.mxu2 %v7921_v32  ;;  %v7941_v6 = vand.u32 4294901760, %v1914_v35  ;;  %v7946_v32 = vand.u32 4294901760, %v298_v19 }
 0x234   : > { %10345 = vst [vmem:[#allocation263_spill] sm:$0xff] %v7944_v22  ;;  %v1922_v42 = vsub.f32 %v7937_v27, %v7944_v22 }
 0x235   : > { %10341 = vst [vmem:[#allocation261_spill] sm:$0xff] %v7930_v43  ;;  %v1427_v50 = vpop.f32.mrf.mxu0  ;;  %v7957_v35 = vsub.f32 %v298_v19, %v7946_v32 }
 0x236   : > { %v1584_v12 = vpop.f32.mrf.mxu1  ;;  %v1781_v57 = vpop.f32.mrf.mxu2  ;;  %10344 = vst [vmem:[#allocation129_spill] sm:$0xff] %v7941_v6 }
 0x237   : > { %v1585_v24 = vadd.f32 %v1584_v12, %v1424_v61  ;;  %v2098_v0 = vpop.f32.mrf.mxu3  ;;  %10346 = vst [vmem:[#allocation264_spill] sm:$0xff] %v7946_v32  ;;  %v1428_v61 = vadd.f32 %v1427_v50, %v10349_v38  ;;  %v300_v12 = vld [vmem:[%s6342_s7 + $0x1c8] sm:$0xff]  ;;  %v10354_v38 = vld [vmem:[#allocation139_spill] sm:$0xff] }
 0x238   : > { %1490 = vmatmul.f32.gmra.mxu0 %v10347_v30  ;;  %10348 = vst [vmem:[#allocation265_spill] sm:$0xff] %v7957_v35 }
 0x239   : > { %v1782_v11 = vadd.f32 %v1781_v57, %v1585_v24  ;;  %1647 = vmatmul.f32.gmra.mxu1 %v10340_v59 }
 0x23a   : > { %2165 = vmatmul.f32.gmra.mxu3 %v7906_v56  ;;  %v7964_v56 = vand.u32 4294901760, %v7957_v35 }
 0x23b   : > { %v7950_v4 = vadd.f32 %v2098_v0, %v1782_v11  ;;  %1916 = vmatmul.f32.gmra.mxu2 %v7941_v6  ;;  %v7961_v0 = vand.u32 4294901760, %v1922_v42  ;;  %v7966_v6 = vand.u32 4294901760, %v300_v12 }
 0x23c   : > { %10351 = vst [vmem:[#allocation266_spill] sm:$0xff] %v7964_v56  ;;  %v1930_v50 = vsub.f32 %v7957_v35, %v7964_v56 }
 0x23d   : > { %v1431_v57 = vpop.f32.mrf.mxu0  ;;  %10350 = vst [vmem:[#allocation134_spill] sm:$0xff] %v7961_v0  ;;  %v7977_v42 = vsub.f32 %v300_v12, %v7966_v6 }
 0x23e   : > { %v1588_v24 = vpop.f32.mrf.mxu1  ;;  %v1789_v59 = vpop.f32.mrf.mxu2  ;;  %10352 = vst [vmem:[#allocation267_spill] sm:$0xff] %v7966_v6 }
 0x23f   : > { %v1589_v43 = vadd.f32 %v1588_v24, %v1428_v61  ;;  %v2102_v11 = vpop.f32.mrf.mxu3  ;;  %10353 = vst [vmem:[#allocation268_spill] sm:$0xff] %v7977_v42  ;;  %v1432_v61 = vadd.f32 %v1431_v57, %v10354_v38  ;;  %v302_v24 = vld [vmem:[%s6342_s7 + $0x1d8] sm:$0xff] }
 0x240   : > { %1494 = vmatmul.f32.gmra.mxu0 %v7214_v37 }
 0x241   : > { %v1790_v22 = vadd.f32 %v1789_v59, %v1589_v43  ;;  %1651 = vmatmul.f32.gmra.mxu1 %v10347_v30 }
 0x242   : > { %2169 = vmatmul.f32.gmra.mxu3 %v7926_v3  ;;  %v7984_v3 = vand.u32 4294901760, %v7977_v42 }
 0x243   : > { %v7970_v19 = vadd.f32 %v2102_v11, %v1790_v22  ;;  %1924 = vmatmul.f32.gmra.mxu2 %v7961_v0  ;;  %v7981_v11 = vand.u32 4294901760, %v1930_v50  ;;  %v7986_v0 = vand.u32 4294901760, %v302_v24 }
 0x244   : > { %10356 = vst [vmem:[#allocation269_spill] sm:$0xff] %v7984_v3  ;;  %v1938_v57 = vsub.f32 %v7977_v42, %v7984_v3 }
 0x245   : > { %v1435_v59 = vpop.f32.mrf.mxu0  ;;  %10355 = vst [vmem:[#allocation139_spill] sm:$0xff] %v7981_v11  ;;  %v7997_v50 = vsub.f32 %v302_v24, %v7986_v0 }
 0x246   : > { %v1592_v43 = vpop.f32.mrf.mxu1  ;;  %v1797_v30 = vpop.f32.mrf.mxu2  ;;  %10357 = vst [vmem:[#allocation270_spill] sm:$0xff] %v7986_v0  ;;  %v1436_v38 = vadd.f32 %v1435_v59, %v7341_v31 }
 0x247   : > { %v1593_v27 = vadd.f32 %v1592_v43, %v1432_v61  ;;  %v2106_v22 = vpop.f32.mrf.mxu3  ;;  %10358 = vst [vmem:[#allocation271_spill] sm:$0xff] %v7997_v50  ;;  %v304_v61 = vld [vmem:[%s6342_s7 + $0x1e8] sm:$0xff] }
 0x248   : > { %1498 = vmatmul.f32.gmra.mxu0 %v7234_v49 }
 0x249   : > { %v1798_v56 = vadd.f32 %v1797_v30, %v1593_v27  ;;  %1655 = vmatmul.f32.gmra.mxu1 %v7214_v37 }
 0x24a   : > { %2173 = vmatmul.f32.gmra.mxu3 %v7946_v32  ;;  %v8004_v32 = vand.u32 4294901760, %v7997_v50 }
 0x24b   : > { %v7990_v12 = vadd.f32 %v2106_v22, %v1798_v56  ;;  %1932 = vmatmul.f32.gmra.mxu2 %v7981_v11  ;;  %v8001_v22 = vand.u32 4294901760, %v1938_v57  ;;  %v8006_v11 = vand.u32 4294901760, %v304_v61  ;;  %v338_v57 = vld [vmem:[#allocation5 + $0xf8] sm:$0xff] }
 0x24c   : > { %10360 = vst [vmem:[#allocation273_spill] sm:$0xff] %v8004_v32  ;;  %v1946_v24 = vsub.f32 %v7997_v50, %v8004_v32 }
 0x24d   : > { %v1439_v30 = vpop.f32.mrf.mxu0  ;;  %10359 = vst [vmem:[#allocation272_spill] sm:$0xff] %v8001_v22  ;;  %v8017_v59 = vsub.f32 %v304_v61, %v8006_v11 }
 0x24e   : > { %v1596_v27 = vpop.f32.mrf.mxu1  ;;  %v1805_v37 = vpop.f32.mrf.mxu2  ;;  %10361 = vst [vmem:[#allocation274_spill] sm:$0xff] %v8006_v11  ;;  %v8028_v61 = vand.u32 4294901760, %v1946_v24 }
 0x24f   : > { %v1597_v43 = vadd.f32 %v1596_v27, %v1436_v38  ;;  %v2110_v56 = vpop.f32.mrf.mxu3  ;;  %10362 = vst [vmem:[#allocation275_spill] sm:$0xff] %v8017_v59  ;;  %v1440_v38 = vadd.f32 %v1439_v30, %v7370_v14  ;;  %v8021_v27 = vand.u32 4294901760, %v338_v57 }
 0x250   : > { %1502 = vmatmul.f32.gmra.mxu0 %v7266_v39  ;;  %10363 = vst [vmem:[#allocation276_spill] sm:$0xff] %v8028_v61 }
 0x251   : > { %v1806_v3 = vadd.f32 %v1805_v37, %v1597_v43  ;;  %1659 = vmatmul.f32.gmra.mxu1 %v7234_v49  ;;  %v306_v37 = vld [vmem:[%s6342_s7 + $0x1f8] sm:$0xff]  ;;  %2982 = vmatpush.msrb.mxu0 %v8021_v27 }
 0x252   : > { %2177 = vmatmul.f32.gmra.mxu3 %v7966_v6  ;;  %v8024_v6 = vsub.f32 %v338_v57, %v8021_v27  ;;  %v8033_v14 = vand.u32 4294901760, %v306_v37 }
 0x253   : > { %v8010_v31 = vadd.f32 %v2110_v56, %v1806_v3  ;;  %1940 = vmatmul.f32.gmra.mxu2 %v8001_v22  ;;  %3705 = vmatpush.msrb.mxu3 %v8021_v27  ;;  %v8031_v22 = vand.u32 4294901760, %v8017_v59 }
 0x254   : > { %10365 = vst [vmem:[#allocation278_spill] sm:$0xff] %v8033_v14  ;;  %3497 = vmatpush.msrb.mxu2 %v8024_v6 }
 0x255   : > { %v1443_v43 = vpop.f32.mrf.mxu0  ;;  %10364 = vst [vmem:[#allocation277_spill] sm:$0xff] %v8031_v22 }
 0x256   : > { %v1600_v49 = vpop.f32.mrf.mxu1  ;;  %v1813_v56 = vpop.f32.mrf.mxu2 }
 0x257   : > { %v1601_v3 = vadd.f32 %v1600_v49, %v1440_v38  ;;  %v2114_v42 = vpop.f32.mrf.mxu3  ;;  %v9923_v49 = vand.u32 4294901760, %v8024_v6  ;;  %v1954_v38 = vsub.f32 %v8017_v59, %v8031_v22 }
 0x258   : > { %1506 = vmatmul.f32.gmra.mxu0 %v7286_v54 }
 0x259   : > { %v1814_v30 = vadd.f32 %v1813_v56, %v1601_v3  ;;  %1663 = vmatmul.f32.gmra.mxu1 %v7266_v39  ;;  %v3273_v24 = vsub.f32 %v8024_v6, %v9923_v49  ;;  %v8049_v3 = vsub.f32 %v306_v37, %v8033_v14  ;;  %v1444_v56 = vadd.f32 %v1443_v43, %v7397_v47 }
 0x25a   : > { %2181 = vmatmul.f32.gmra.mxu3 %v7986_v0 }
 0x25b   : > { %v8039_v57 = vadd.f32 %v2114_v42, %v1814_v30  ;;  %1948 = vmatmul.f32.gmra.mxu2 %v8028_v61  ;;  %10367 = vst [vmem:[#allocation280_spill] sm:$0xff] %v8049_v3  ;;  %v3274_v39 = vand.u32 4294901760, %v3273_v24  ;;  %v8055_v49 = vand.u32 4294901760, %v8049_v3 }
 0x25d   : > { %10366 = vst [vmem:[#allocation279_spill] sm:$0xff] %v8039_v57  ;;  %v1447_v32 = vpop.f32.mrf.mxu0  ;;  %3275 = vmatpush.msrb.mxu1 %v3274_v39  ;;  %v8052_v57 = vand.u32 4294901760, %v1954_v38  ;;  %v1962_v47 = vsub.f32 %v8049_v3, %v8055_v49  ;;  %v336_v39 = vld [vmem:[#allocation5 + $0xe8] sm:$0xff] }
 0x25e   : > { %v1604_v42 = vpop.f32.mrf.mxu1  ;;  %v1821_v50 = vpop.f32.mrf.mxu2  ;;  %10369 = vst [vmem:[#allocation282_spill] sm:$0xff] %v8055_v49  ;;  %v1448_v43 = vadd.f32 %v1447_v32, %v7425_v21  ;;  %v8066_v24 = vand.u32 4294901760, %v336_v39 }
 0x25f   : > { %v1605_v30 = vadd.f32 %v1604_v42, %v1444_v56  ;;  %v2118_v0 = vpop.f32.mrf.mxu3  ;;  %10368 = vst [vmem:[#allocation281_spill] sm:$0xff] %v8052_v57 }
 0x260   : > { %1510 = vmatmul.f32.gmra.mxu0 %v7322_v7  ;;  %3707 = vmatpush.msrb.mxu3 %v8066_v24 }
 0x261   : > { %v1822_v61 = vadd.f32 %v1821_v50, %v1605_v30  ;;  %1667 = vmatmul.f32.gmra.mxu1 %v7286_v54  ;;  %2984 = vmatpush.msrb.mxu0 %v8066_v24 }
 0x262   : > { %2185 = vmatmul.f32.gmra.mxu3 %v8006_v11 }
 0x263   : > { %v8059_v37 = vadd.f32 %v2118_v0, %v1822_v61  ;;  %1956 = vmatmul.f32.gmra.mxu2 %v8052_v57  ;;  %v8069_v0 = vsub.f32 %v336_v39, %v8066_v24  ;;  %v8073_v61 = vand.u32 4294901760, %v1962_v47 }
 0x265   : > { %v1451_v38 = vpop.f32.mrf.mxu0  ;;  %10370 = vst [vmem:[#allocation283_spill] sm:$0xff] %v8073_v61  ;;  %v9932_v21 = vand.u32 4294901760, %v8069_v0  ;;  %3500 = vmatpush.msrb.mxu2 %v8069_v0 }
 0x266   : > { %v1608_v50 = vpop.f32.mrf.mxu1  ;;  %v1829_v42 = vpop.f32.mrf.mxu2  ;;  %v1452_v47 = vadd.f32 %v1451_v38, %v7451_v23 }
 0x267   : > { %v1609_v56 = vadd.f32 %v1608_v50, %v1448_v43  ;;  %v2122_v30 = vpop.f32.mrf.mxu3  ;;  %v3279_v39 = vsub.f32 %v8069_v0, %v9932_v21 }
 0x268   : > { %1514 = vmatmul.f32.gmra.mxu0 %v7351_v29 }
 0x269   : > { %v1830_v57 = vadd.f32 %v1829_v42, %v1609_v56  ;;  %1671 = vmatmul.f32.gmra.mxu1 %v7322_v7  ;;  %v3280_v43 = vand.u32 4294901760, %v3279_v39 }
 0x26a   : > { %2189 = vmatmul.f32.gmra.mxu3 %v8033_v14 }
 0x26b   : > { %v8079_v32 = vadd.f32 %v2122_v30, %v1830_v57  ;;  %1964 = vmatmul.f32.gmra.mxu2 %v8073_v61  ;;  %3281 = vmatpush.msrb.mxu1 %v3280_v43  ;;  %v334_v30 = vld [vmem:[#allocation5 + $0xd8] sm:$0xff] }
 0x26c   : > { %v8094_v38 = vand.u32 4294901760, %v334_v30  ;;  %v10385_v61 = vld [vmem:[#allocation190_spill] sm:$0xff] }
 0x26d   : > { %v1455_v50 = vpop.f32.mrf.mxu0 }
 0x26e   : > { %v1612_v56 = vpop.f32.mrf.mxu1  ;;  %v1837_v7 = vpop.f32.mrf.mxu2  ;;  %v1456_v23 = vadd.f32 %v1455_v50, %v7471_v2  ;;  %2986 = vmatpush.msrb.mxu0 %v8094_v38  ;;  %3709 = vmatpush.msrb.mxu3 %v8094_v38 }
 0x26f   : > { %v1613_v42 = vadd.f32 %v1612_v56, %v1452_v47  ;;  %v2126_v54 = vpop.f32.mrf.mxu3 }
 0x270   : > { %2243 = vmatmul.f32.vlgmr.msra.gmra.mxu0 %v7402_v44 }
 0x271   : > { %v1838_v49 = vadd.f32 %v1837_v7, %v1613_v42  ;;  %1675 = vmatmul.f32.gmra.mxu1 %v7351_v29  ;;  %v8097_v42 = vsub.f32 %v334_v30, %v8094_v38 }
 0x272   : > { %2853 = vmatmul.f32.vlgmr.msra.gmra.mxu3 %v7386_v41 }
 0x273   : > { %v8089_v57 = vadd.f32 %v2126_v54, %v1838_v49  ;;  %2692 = vmatmul.f32.vlgmr.msra.gmra.mxu2 %v7386_v41  ;;  %v9935_v2 = vand.u32 4294901760, %v8097_v42 }
 0x274   : > { %3503 = vmatpush.msrb.mxu2 %v8097_v42 }
 0x275   : > { %v1459_v39 = vpop.f32.mrf.mxu0  ;;  %v3285_v50 = vsub.f32 %v8097_v42, %v9935_v2 }
 0x276   : > { %v1616_v47 = vpop.f32.mrf.mxu1  ;;  %v1845_v43 = vpop.f32.mrf.mxu2  ;;  %v1460_v30 = vadd.f32 %v1459_v39, %v7491_v63 }
 0x277   : > { %v1617_v56 = vadd.f32 %v1616_v47, %v1456_v23  ;;  %v2130_v7 = vpop.f32.mrf.mxu3  ;;  %v3286_v23 = vand.u32 4294901760, %v3285_v50 }
 0x278   : > { %2248 = vmatmul.f32.gmra.mxu0 %v7432_v58 }
 0x279   : > { %v1846_v54 = vadd.f32 %v1845_v43, %v1617_v56  ;;  %2437 = vmatmul.f32.vlgmr.msra.gmra.mxu1 %v7414_v17 }
 0x27a   : > { %2857 = vmatmul.f32.gmra.mxu3 %v7416_v20  ;;  %3287 = vmatpush.msrb.mxu1 %v3286_v23 }
 0x27b   : > { %v8105_v49 = vadd.f32 %v2130_v7, %v1846_v54  ;;  %2696 = vmatmul.f32.gmra.mxu2 %v7416_v20  ;;  %v332_v54 = vld [vmem:[#allocation5 + $0xc8] sm:$0xff] }
 0x27c   : > { %v8120_v39 = vand.u32 4294901760, %v332_v54  ;;  %v10405_v20 = vld [vmem:[#allocation209_spill] sm:$0xff] }
 0x27d   : > { %v1463_v47 = vpop.f32.mrf.mxu0 }
 0x27e   : > { %v1620_v56 = vpop.f32.mrf.mxu1  ;;  %v1853_v21 = vpop.f32.mrf.mxu2  ;;  %v1464_v63 = vadd.f32 %v1463_v47, %v7511_v1  ;;  %2988 = vmatpush.msrb.mxu0 %v8120_v39  ;;  %3711 = vmatpush.msrb.mxu3 %v8120_v39 }
 0x27f   : > { %v1621_v43 = vadd.f32 %v1620_v56, %v1460_v30  ;;  %v2134_v17 = vpop.f32.mrf.mxu3 }
 0x280   : > { %2253 = vmatmul.f32.gmra.mxu0 %v7458_v28 }
 0x281   : > { %v1854_v58 = vadd.f32 %v1853_v21, %v1621_v43  ;;  %2443 = vmatmul.f32.gmra.mxu1 %v7444_v8  ;;  %v8123_v43 = vsub.f32 %v332_v54, %v8120_v39 }
 0x282   : > { %2861 = vmatmul.f32.gmra.mxu3 %v7446_v40 }
 0x283   : > { %v8115_v7 = vadd.f32 %v2134_v17, %v1854_v58  ;;  %2700 = vmatmul.f32.gmra.mxu2 %v7446_v40  ;;  %v9938_v1 = vand.u32 4294901760, %v8123_v43 }
 0x284   : > { %3506 = vmatpush.msrb.mxu2 %v8123_v43 }
 0x285   : > { %v1467_v50 = vpop.f32.mrf.mxu0  ;;  %v3291_v47 = vsub.f32 %v8123_v43, %v9938_v1 }
 0x286   : > { %v1624_v30 = vpop.f32.mrf.mxu1  ;;  %v1861_v23 = vpop.f32.mrf.mxu2  ;;  %v1468_v54 = vadd.f32 %v1467_v50, %v7531_v25 }
 0x287   : > { %v1625_v56 = vadd.f32 %v1624_v30, %v1464_v63  ;;  %v2138_v21 = vpop.f32.mrf.mxu3  ;;  %v3292_v63 = vand.u32 4294901760, %v3291_v47 }
 0x288   : > { %2258 = vmatmul.f32.gmra.mxu0 %v7478_v46 }
 0x289   : > { %v1862_v17 = vadd.f32 %v1861_v23, %v1625_v56  ;;  %2449 = vmatmul.f32.gmra.mxu1 %v7464_v45 }
 0x28a   : > { %2865 = vmatmul.f32.gmra.mxu3 %v7466_v60  ;;  %3293 = vmatpush.msrb.mxu1 %v3292_v63 }
 0x28b   : > { %v8131_v58 = vadd.f32 %v2138_v21, %v1862_v17  ;;  %2704 = vmatmul.f32.gmra.mxu2 %v7466_v60  ;;  %v330_v17 = vld [vmem:[#allocation5 + $0xb8] sm:$0xff] }
 0x28c   : > { %v8146_v50 = vand.u32 4294901760, %v330_v17 }
 0x28d   : > { %v1471_v30 = vpop.f32.mrf.mxu0 }
 0x28e   : > { %v1628_v56 = vpop.f32.mrf.mxu1  ;;  %v1869_v2 = vpop.f32.mrf.mxu2  ;;  %v1472_v25 = vadd.f32 %v1471_v30, %v7551_v10  ;;  %2990 = vmatpush.msrb.mxu0 %v8146_v50  ;;  %3713 = vmatpush.msrb.mxu3 %v8146_v50 }
 0x28f   : > { %v1629_v23 = vadd.f32 %v1628_v56, %v1468_v54  ;;  %v2142_v45 = vpop.f32.mrf.mxu3 }
 0x290   : > { %2263 = vmatmul.f32.gmra.mxu0 %v7498_v36 }
 0x291   : > { %v1870_v46 = vadd.f32 %v1869_v2, %v1629_v23  ;;  %2455 = vmatmul.f32.gmra.mxu1 %v7484_v51  ;;  %v8149_v23 = vsub.f32 %v330_v17, %v8146_v50 }
 0x292   : > { %2869 = vmatmul.f32.gmra.mxu3 %v7486_v15 }
 0x293   : > { %v8141_v21 = vadd.f32 %v2142_v45, %v1870_v46  ;;  %2708 = vmatmul.f32.gmra.mxu2 %v7486_v15  ;;  %v9941_v10 = vand.u32 4294901760, %v8149_v23 }
 0x294   : > { %3509 = vmatpush.msrb.mxu2 %v8149_v23 }
 0x295   : > { %v1475_v47 = vpop.f32.mrf.mxu0  ;;  %v3297_v30 = vsub.f32 %v8149_v23, %v9941_v10 }
 0x296   : > { %v1632_v54 = vpop.f32.mrf.mxu1  ;;  %v1877_v63 = vpop.f32.mrf.mxu2  ;;  %v1476_v17 = vadd.f32 %v1475_v47, %v7571_v13 }
 0x297   : > { %v1633_v56 = vadd.f32 %v1632_v54, %v1472_v25  ;;  %v2146_v2 = vpop.f32.mrf.mxu3  ;;  %v3298_v25 = vand.u32 4294901760, %v3297_v30 }
 0x298   : > { %2268 = vmatmul.f32.gmra.mxu0 %v7518_v26 }
 0x299   : > { %v1878_v45 = vadd.f32 %v1877_v63, %v1633_v56  ;;  %2461 = vmatmul.f32.gmra.mxu1 %v7504_v34 }
 0x29a   : > { %2873 = vmatmul.f32.gmra.mxu3 %v7506_v62  ;;  %3299 = vmatpush.msrb.mxu1 %v3298_v25 }
 0x29b   : > { %v8157_v46 = vadd.f32 %v2146_v2, %v1878_v45  ;;  %2712 = vmatmul.f32.gmra.mxu2 %v7506_v62  ;;  %v328_v45 = vld [vmem:[#allocation5 + $0xa8] sm:$0xff]  ;;  %v10395_v62 = vld [vmem:[#allocation199_spill] sm:$0xff] }
 0x29c   : > { %v8172_v47 = vand.u32 4294901760, %v328_v45 }
 0x29d   : > { %v1479_v54 = vpop.f32.mrf.mxu0 }
 0x29e   : > { %v1636_v56 = vpop.f32.mrf.mxu1  ;;  %v1885_v1 = vpop.f32.mrf.mxu2  ;;  %v1480_v13 = vadd.f32 %v1479_v54, %v7591_v52  ;;  %2992 = vmatpush.msrb.mxu0 %v8172_v47  ;;  %3715 = vmatpush.msrb.mxu3 %v8172_v47 }
 0x29f   : > { %v1637_v63 = vadd.f32 %v1636_v56, %v1476_v17  ;;  %v2150_v34 = vpop.f32.mrf.mxu3 }
 0x2a0   : > { %2273 = vmatmul.f32.gmra.mxu0 %v7538_v48  ;;  %v10375_v48 = vld [vmem:[#allocation182_spill] sm:$0xff] }
 0x2a1   : > { %v1886_v26 = vadd.f32 %v1885_v1, %v1637_v63  ;;  %2467 = vmatmul.f32.gmra.mxu1 %v7524_v53  ;;  %v8175_v63 = vsub.f32 %v328_v45, %v8172_v47 }
 0x2a2   : > { %2877 = vmatmul.f32.gmra.mxu3 %v7526_v33 }
 0x2a3   : > { %v8167_v2 = vadd.f32 %v2150_v34, %v1886_v26  ;;  %2716 = vmatmul.f32.gmra.mxu2 %v7526_v33  ;;  %v9946_v52 = vand.u32 4294901760, %v8175_v63 }
 0x2a4   : > { %3512 = vmatpush.msrb.mxu2 %v8175_v63 }
 0x2a5   : > { %v1483_v30 = vpop.f32.mrf.mxu0  ;;  %v3303_v54 = vsub.f32 %v8175_v63, %v9946_v52  ;;  %v326_v52 = vld [vmem:[#allocation5 + $0x98] sm:$0xff] }
 0x2a6   : > { %v1640_v17 = vpop.f32.mrf.mxu1  ;;  %v1893_v25 = vpop.f32.mrf.mxu2  ;;  %v1484_v45 = vadd.f32 %v1483_v30, %v7611_v55  ;;  %v10376_v55 = vld [vmem:[#allocation195_spill] sm:$0xff] }
 0x2a7   : > { %v1641_v56 = vadd.f32 %v1640_v17, %v1480_v13  ;;  %v2154_v1 = vpop.f32.mrf.mxu3  ;;  %v3304_v13 = vand.u32 4294901760, %v3303_v54  ;;  %v8198_v54 = vand.u32 4294901760, %v326_v52 }
 0x2a8   : > { %2278 = vmatmul.f32.gmra.mxu0 %v7558_v16 }
 0x2a9   : > { %v1894_v34 = vadd.f32 %v1893_v25, %v1641_v56  ;;  %2473 = vmatmul.f32.gmra.mxu1 %v7544_v18  ;;  %2994 = vmatpush.msrb.mxu0 %v8198_v54 }
 0x2aa   : > { %2881 = vmatmul.f32.gmra.mxu3 %v7546_v5  ;;  %3305 = vmatpush.msrb.mxu1 %v3304_v13 }
 0x2ab   : > { %v8183_v26 = vadd.f32 %v2154_v1, %v1894_v34  ;;  %2720 = vmatmul.f32.gmra.mxu2 %v7546_v5  ;;  %v10372_v1 = vld [vmem:[#allocation183_spill] sm:$0xff]  ;;  %v10373_v34 = vld [vmem:[#allocation181_spill] sm:$0xff]  ;;  %3717 = vmatpush.msrb.mxu3 %v8198_v54 }
 0x2ad   : > { %10371 = vst [vmem:[#allocation284_spill] sm:$0xff] %v8183_v26  ;;  %v1487_v17 = vpop.f32.mrf.mxu0 }
 0x2ae   : > { %v1644_v56 = vpop.f32.mrf.mxu1  ;;  %v1901_v10 = vpop.f32.mrf.mxu2  ;;  %v1488_v30 = vadd.f32 %v1487_v17, %v10376_v55 }
 0x2af   : > { %v1645_v25 = vadd.f32 %v1644_v56, %v1484_v45  ;;  %v2158_v18 = vpop.f32.mrf.mxu3 }
 0x2b0   : > { %2283 = vmatmul.f32.gmra.mxu0 %v10372_v1 }
 0x2b1   : > { %v1902_v16 = vadd.f32 %v1901_v10, %v1645_v25  ;;  %2479 = vmatmul.f32.gmra.mxu1 %v10373_v34  ;;  %v8201_v25 = vsub.f32 %v326_v52, %v8198_v54  ;;  %v10378_v34 = vld [vmem:[#allocation185_spill] sm:$0xff] }
 0x2b2   : > { %2885 = vmatmul.f32.gmra.mxu3 %v10375_v48 }
 0x2b3   : > { %v8193_v53 = vadd.f32 %v2158_v18, %v1902_v16  ;;  %2724 = vmatmul.f32.gmra.mxu2 %v10375_v48  ;;  %v10377_v16 = vld [vmem:[#allocation187_spill] sm:$0xff]  ;;  %v9953_v17 = vand.u32 4294901760, %v8201_v25 }
 0x2b4   : > { %3515 = vmatpush.msrb.mxu2 %v8201_v25 }
 0x2b5   : > { %10374 = vst [vmem:[#allocation285_spill] sm:$0xff] %v8193_v53  ;;  %v1491_v45 = vpop.f32.mrf.mxu0  ;;  %v3309_v52 = vsub.f32 %v8201_v25, %v9953_v17  ;;  %v324_v17 = vld [vmem:[#allocation5 + $0x88] sm:$0xff] }
 0x2b6   : > { %v1648_v56 = vpop.f32.mrf.mxu1  ;;  %v1909_v13 = vpop.f32.mrf.mxu2 }
 0x2b7   : > { %v1649_v51 = vadd.f32 %v1648_v56, %v1488_v30  ;;  %v2162_v10 = vpop.f32.mrf.mxu3  ;;  %v10380_v30 = vld [vmem:[#allocation186_spill] sm:$0xff]  ;;  %v10381_v56 = vld [vmem:[#allocation200_spill] sm:$0xff] }
 0x2b8   : > { %2288 = vmatmul.f32.gmra.mxu0 %v10377_v16 }
 0x2b9   : > { %v1910_v18 = vadd.f32 %v1909_v13, %v1649_v51  ;;  %2485 = vmatmul.f32.gmra.mxu1 %v10378_v34  ;;  %v1492_v51 = vadd.f32 %v1491_v45, %v10381_v56  ;;  %v3310_v13 = vand.u32 4294901760, %v3309_v52  ;;  %v10386_v45 = vld [vmem:[#allocation205_spill] sm:$0xff]  ;;  %v8224_v56 = vand.u32 4294901760, %v324_v17 }
 0x2ba   : > { %2889 = vmatmul.f32.gmra.mxu3 %v10380_v30 }
 0x2bb   : > { %v8209_v55 = vadd.f32 %v2162_v10, %v1910_v18  ;;  %2728 = vmatmul.f32.gmra.mxu2 %v10380_v30  ;;  %3311 = vmatpush.msrb.mxu1 %v3310_v13  ;;  %v10382_v10 = vld [vmem:[#allocation191_spill] sm:$0xff]  ;;  %v10383_v18 = vld [vmem:[#allocation189_spill] sm:$0xff] }
 0x2bc   : > { %2996 = vmatpush.msrb.mxu0 %v8224_v56  ;;  %3719 = vmatpush.msrb.mxu3 %v8224_v56 }
 0x2bd   : > { %10379 = vst [vmem:[#allocation195_spill] sm:$0xff] %v8209_v55  ;;  %v1495_v16 = vpop.f32.mrf.mxu0 }
 0x2be   : > { %v1652_v1 = vpop.f32.mrf.mxu1  ;;  %v1917_v36 = vpop.f32.mrf.mxu2  ;;  %v1496_v52 = vadd.f32 %v1495_v16, %v10386_v45 }
 0x2bf   : > { %v1653_v34 = vadd.f32 %v1652_v1, %v1492_v51  ;;  %v2166_v8 = vpop.f32.mrf.mxu3 }
 0x2c0   : > { %2293 = vmatmul.f32.gmra.mxu0 %v10382_v10 }
 0x2c1   : > { %v1918_v28 = vadd.f32 %v1917_v36, %v1653_v34  ;;  %2491 = vmatmul.f32.gmra.mxu1 %v10383_v18  ;;  %v8227_v34 = vsub.f32 %v324_v17, %v8224_v56  ;;  %v10388_v18 = vld [vmem:[#allocation193_spill] sm:$0xff] }
 0x2c2   : > { %2893 = vmatmul.f32.gmra.mxu3 %v10385_v61 }
 0x2c3   : > { %v8219_v44 = vadd.f32 %v2166_v8, %v1918_v28  ;;  %2732 = vmatmul.f32.gmra.mxu2 %v10385_v61  ;;  %v10387_v28 = vld [vmem:[#allocation196_spill] sm:$0xff]  ;;  %v9963_v16 = vand.u32 4294901760, %v8227_v34 }
 0x2c4   : > { %3518 = vmatpush.msrb.mxu2 %v8227_v34 }
 0x2c5   : > { %10384 = vst [vmem:[#allocation200_spill] sm:$0xff] %v8219_v44  ;;  %v1499_v1 = vpop.f32.mrf.mxu0  ;;  %v3315_v17 = vsub.f32 %v8227_v34, %v9963_v16  ;;  %v322_v16 = vld [vmem:[#allocation5 + $0x78] sm:$0xff] }
 0x2c6   : > { %v1656_v51 = vpop.f32.mrf.mxu1  ;;  %v1925_v13 = vpop.f32.mrf.mxu2 }
 0x2c7   : > { %v1657_v30 = vadd.f32 %v1656_v51, %v1496_v52  ;;  %v2170_v36 = vpop.f32.mrf.mxu3  ;;  %v10390_v52 = vld [vmem:[#allocation194_spill] sm:$0xff] }
 0x2c8   : > { %2298 = vmatmul.f32.gmra.mxu0 %v10387_v28  ;;  %v10391_v51 = vld [vmem:[#allocation210_spill] sm:$0xff] }
 0x2c9   : > { %v1926_v8 = vadd.f32 %v1925_v13, %v1657_v30  ;;  %2497 = vmatmul.f32.gmra.mxu1 %v10388_v18  ;;  %v1500_v30 = vadd.f32 %v1499_v1, %v10391_v51  ;;  %v3316_v13 = vand.u32 4294901760, %v3315_v17  ;;  %v10396_v1 = vld [vmem:[#allocation215_spill] sm:$0xff]  ;;  %v8250_v51 = vand.u32 4294901760, %v322_v16 }
 0x2ca   : > { %2897 = vmatmul.f32.gmra.mxu3 %v10390_v52 }
 0x2cb   : > { %v8235_v45 = vadd.f32 %v2170_v36, %v1926_v8  ;;  %2736 = vmatmul.f32.gmra.mxu2 %v10390_v52  ;;  %3317 = vmatpush.msrb.mxu1 %v3316_v13  ;;  %v10392_v36 = vld [vmem:[#allocation201_spill] sm:$0xff]  ;;  %v10393_v8 = vld [vmem:[#allocation198_spill] sm:$0xff] }
 0x2cc   : > { %2998 = vmatpush.msrb.mxu0 %v8250_v51  ;;  %3721 = vmatpush.msrb.mxu3 %v8250_v51 }
 0x2cd   : > { %10389 = vst [vmem:[#allocation205_spill] sm:$0xff] %v8235_v45  ;;  %v1503_v28 = vpop.f32.mrf.mxu0 }
 0x2ce   : > { %v1660_v10 = vpop.f32.mrf.mxu1  ;;  %v1933_v61 = vpop.f32.mrf.mxu2  ;;  %v1504_v17 = vadd.f32 %v1503_v28, %v10396_v1 }
 0x2cf   : > { %v1661_v18 = vadd.f32 %v1660_v10, %v1500_v30  ;;  %v2174_v48 = vpop.f32.mrf.mxu3 }
 0x2d0   : > { %2303 = vmatmul.f32.gmra.mxu0 %v10392_v36 }
 0x2d1   : > { %v1934_v5 = vadd.f32 %v1933_v61, %v1661_v18  ;;  %2503 = vmatmul.f32.gmra.mxu1 %v10393_v8  ;;  %v8253_v18 = vsub.f32 %v322_v16, %v8250_v51  ;;  %v10398_v8 = vld [vmem:[#allocation203_spill] sm:$0xff] }
 0x2d2   : > { %2901 = vmatmul.f32.gmra.mxu3 %v10395_v62 }
 0x2d3   : > { %v8245_v33 = vadd.f32 %v2174_v48, %v1934_v5  ;;  %2740 = vmatmul.f32.gmra.mxu2 %v10395_v62  ;;  %v10397_v5 = vld [vmem:[#allocation206_spill] sm:$0xff]  ;;  %v9974_v28 = vand.u32 4294901760, %v8253_v18 }
 0x2d4   : > { %3521 = vmatpush.msrb.mxu2 %v8253_v18 }
 0x2d5   : > { %10394 = vst [vmem:[#allocation210_spill] sm:$0xff] %v8245_v33  ;;  %v1507_v10 = vpop.f32.mrf.mxu0  ;;  %v3321_v16 = vsub.f32 %v8253_v18, %v9974_v28 }
 0x2d6   : > { %v1664_v30 = vpop.f32.mrf.mxu1  ;;  %v1941_v13 = vpop.f32.mrf.mxu2 }
 0x2d7   : > { %v1665_v52 = vadd.f32 %v1664_v30, %v1504_v17  ;;  %v2178_v61 = vpop.f32.mrf.mxu3  ;;  %v10400_v17 = vld [vmem:[#allocation204_spill] sm:$0xff] }
 0x2d8   : > { %2308 = vmatmul.f32.gmra.mxu0 %v10397_v5  ;;  %v10401_v30 = vld [vmem:[#allocation220_spill] sm:$0xff] }
 0x2d9   : > { %v1942_v48 = vadd.f32 %v1941_v13, %v1665_v52  ;;  %2509 = vmatmul.f32.gmra.mxu1 %v10398_v8  ;;  %v1508_v52 = vadd.f32 %v1507_v10, %v10401_v30  ;;  %v3322_v13 = vand.u32 4294901760, %v3321_v16 }
 0x2da   : > { %2905 = vmatmul.f32.gmra.mxu3 %v10400_v17 }
 0x2db   : > { %v8261_v1 = vadd.f32 %v2178_v61, %v1942_v48  ;;  %2744 = vmatmul.f32.gmra.mxu2 %v10400_v17  ;;  %3323 = vmatpush.msrb.mxu1 %v3322_v13  ;;  %v10402_v61 = vld [vmem:[#allocation211_spill] sm:$0xff]  ;;  %v10403_v48 = vld [vmem:[#allocation208_spill] sm:$0xff] }
 0x2dc   : > { %v320_v17 = vld [vmem:[#allocation5 + $0x68] sm:$0xff] }
 0x2dd   : > { %10399 = vst [vmem:[#allocation215_spill] sm:$0xff] %v8261_v1  ;;  %v1511_v5 = vpop.f32.mrf.mxu0  ;;  %v8276_v13 = vand.u32 4294901760, %v320_v17  ;;  %v5933_v1 = vld [vmem:[%s6342_s7 + $0x10] sm:$0xff] }
 0x2de   : > { %v1668_v36 = vpop.f32.mrf.mxu1  ;;  %v1949_v62 = vpop.f32.mrf.mxu2  ;;  %v1512_v10 = vadd.f32 %v1511_v5, %v7751_v9  ;;  %v10409_v9 = vld [vmem:[#allocation214_spill] sm:$0xff] }
 0x2df   : > { %v1669_v8 = vadd.f32 %v1668_v36, %v1508_v52  ;;  %v2182_v15 = vpop.f32.mrf.mxu3  ;;  %3000 = vmatpush.msrb.mxu0 %v8276_v13  ;;  %3723 = vmatpush.msrb.mxu3 %v8276_v13 }
 0x2e0   : > { %2313 = vmatmul.f32.gmra.mxu0 %v10402_v61 }
 0x2e1   : > { %v1950_v60 = vadd.f32 %v1949_v62, %v1669_v8  ;;  %2515 = vmatmul.f32.gmra.mxu1 %v10403_v48  ;;  %v10406_v8 = vld [vmem:[#allocation216_spill] sm:$0xff]  ;;  %v10407_v48 = vld [vmem:[#allocation213_spill] sm:$0xff] }
 0x2e2   : > { %2909 = vmatmul.f32.gmra.mxu3 %v10405_v20 }
 0x2e3   : > { %v8271_v40 = vadd.f32 %v2182_v15, %v1950_v60  ;;  %2748 = vmatmul.f32.gmra.mxu2 %v10405_v20  ;;  %v8281_v60 = vsub.f32 %v320_v17, %v8276_v13  ;;  %v10411_v20 = vld [vmem:[#allocation221_spill] sm:$0xff] }
 0x2e5   : > { %10404 = vst [vmem:[#allocation220_spill] sm:$0xff] %v8271_v40  ;;  %v1515_v16 = vpop.f32.mrf.mxu0  ;;  %v9982_v5 = vand.u32 4294901760, %v8281_v60  ;;  %3524 = vmatpush.msrb.mxu2 %v8281_v60 }
 0x2e6   : > { %v1672_v30 = vpop.f32.mrf.mxu1  ;;  %v1957_v36 = vpop.f32.mrf.mxu2 }
 0x2e7   : > { %v1673_v28 = vadd.f32 %v1672_v30, %v1512_v10  ;;  %v2186_v52 = vpop.f32.mrf.mxu3  ;;  %v3327_v17 = vsub.f32 %v8281_v60, %v9982_v5 }
 0x2e8   : > { %2318 = vmatmul.f32.gmra.mxu0 %v10406_v8 }
 0x2e9   : > { %v1958_v62 = vadd.f32 %v1957_v36, %v1673_v28  ;;  %2521 = vmatmul.f32.gmra.mxu1 %v10407_v48  ;;  %v10410_v28 = vld [vmem:[#allocation229_spill] sm:$0xff] }
 0x2ea   : > { %2913 = vmatmul.f32.gmra.mxu3 %v10409_v9  ;;  %v1516_v10 = vadd.f32 %v1515_v16, %v10410_v28  ;;  %v10414_v16 = vld [vmem:[#allocation219_spill] sm:$0xff]  ;;  %v10415_v28 = vld [vmem:[#allocation233_spill] sm:$0xff] }
 0x2eb   : > { %v8285_v15 = vadd.f32 %v2186_v52, %v1958_v62  ;;  %2752 = vmatmul.f32.gmra.mxu2 %v10409_v9  ;;  %v3328_v62 = vand.u32 4294901760, %v3327_v17  ;;  %v10412_v9 = vld [vmem:[#allocation218_spill] sm:$0xff] }
 0x2ed   : > { %10408 = vst [vmem:[#allocation286_spill] sm:$0xff] %v8285_v15  ;;  %v2244_v36 = vpop.f32.mrf.mxu0  ;;  %3329 = vmatpush.msrb.mxu1 %v3328_v62  ;;  %v10419_v62 = vld [vmem:[#allocation237_spill] sm:$0xff] }
 0x2ee   : > { %v1676_v30 = vpop.f32.mrf.mxu1  ;;  %v1965_v8 = vpop.f32.mrf.mxu2  ;;  %v2245_v29 = vadd.f32 %v2244_v36, %v10415_v28 }
 0x2ef   : > { %v1677_v48 = vadd.f32 %v1676_v30, %v1516_v10  ;;  %v2190_v52 = vpop.f32.mrf.mxu3 }
 0x2f0   : > { %2323 = vmatmul.f32.gmra.mxu0 %v10411_v20 }
 0x2f1   : > { %v1966_v61 = vadd.f32 %v1965_v8, %v1677_v48  ;;  %2527 = vmatmul.f32.gmra.mxu1 %v10412_v9  ;;  %v318_v48 = vld [vmem:[#allocation5 + $0x58] sm:$0xff]  ;;  %v10416_v9 = vld [vmem:[#allocation225_spill] sm:$0xff] }
 0x2f2   : > { %2917 = vmatmul.f32.gmra.mxu3 %v10414_v16  ;;  %v8302_v8 = vand.u32 4294901760, %v318_v48 }
 0x2f3   : > { %v8297_v41 = vadd.f32 %v2190_v52, %v1966_v61  ;;  %2756 = vmatmul.f32.gmra.mxu2 %v10414_v16  ;;  %v10417_v61 = vld [vmem:[#allocation223_spill] sm:$0xff] }
 0x2f4   : > { %v8307_v52 = vsub.f32 %v318_v48, %v8302_v8  ;;  %3002 = vmatpush.msrb.mxu0 %v8302_v8  ;;  %3725 = vmatpush.msrb.mxu3 %v8302_v8 }
 0x2f5   : > { %10413 = vst [vmem:[#allocation229_spill] sm:$0xff] %v8297_v41  ;;  %v2249_v15 = vpop.f32.mrf.mxu0  ;;  %v10422_v41 = vld [vmem:[#allocation228_spill] sm:$0xff] }
 0x2f6   : > { %v2438_v5 = vpop.f32.mrf.mxu1  ;;  %v2693_v30 = vpop.f32.mrf.mxu2  ;;  %v9985_v36 = vand.u32 4294901760, %v8307_v52  ;;  %v2250_v28 = vadd.f32 %v2249_v15, %v10419_v62  ;;  %3527 = vmatpush.msrb.mxu2 %v8307_v52 }
 0x2f7   : > { %v2439_v10 = vadd.f32 %v2438_v5, %v2245_v29  ;;  %v2854_v17 = vpop.f32.mrf.mxu3  ;;  %v10418_v5 = vld [vmem:[#allocation224_spill] sm:$0xff] }
 0x2f8   : > { %2328 = vmatmul.f32.gmra.mxu0 %v10416_v9  ;;  %v3333_v9 = vsub.f32 %v8307_v52, %v9985_v36  ;;  %v10423_v36 = vld [vmem:[#allocation241_spill] sm:$0xff] }
 0x2f9   : > { %v2694_v20 = vadd.f32 %v2693_v30, %v2439_v10  ;;  %2533 = vmatmul.f32.gmra.mxu1 %v10417_v61  ;;  %v5932_v10 = vld [vmem:[%s6342_s7] sm:$0xff] }
 0x2fa   : > { %2921 = vmatmul.f32.gmra.mxu3 %v10418_v5  ;;  %v3334_v62 = vand.u32 4294901760, %v3333_v9 }
 0x2fb   : > { %v2855_v29 = vadd.f32 %v2854_v17, %v2694_v20  ;;  %2760 = vmatmul.f32.gmra.mxu2 %v10418_v5  ;;  %v10421_v5 = vld [vmem:[#allocation227_spill] sm:$0xff] }
 0x2fc   : > { %3335 = vmatpush.msrb.mxu1 %v3334_v62 }
 0x2fd   : > { %v5585_v30 = vadd.f32 %v5932_v10, %v2855_v29  ;;  %v2254_v61 = vpop.f32.mrf.mxu0  ;;  %v10420_v10 = vld [vmem:[#allocation230_spill] sm:$0xff] }
 0x2fe   : > { %v2444_v48 = vpop.f32.mrf.mxu1  ;;  %v2697_v17 = vpop.f32.mrf.mxu2  ;;  %v2255_v40 = vadd.f32 %v2254_v61, %v10423_v36 }
 0x2ff   : > { %5649 = vst [vmem:[%s8322_s23] sm:$0xff] %v5585_v30  ;;  %v2445_v20 = vadd.f32 %v2444_v48, %v2250_v28  ;;  %v2858_v15 = vpop.f32.mrf.mxu3 }
 0x300   : > { %2333 = vmatmul.f32.gmra.mxu0 %v10420_v10 }
 0x301   : > { %v2698_v29 = vadd.f32 %v2697_v17, %v2445_v20  ;;  %2539 = vmatmul.f32.gmra.mxu1 %v10421_v5  ;;  %v316_v17 = vld [vmem:[#allocation5 + $0x48] sm:$0xff] }
 0x302   : > { %2925 = vmatmul.f32.gmra.mxu3 %v10422_v41  ;;  %v8332_v10 = vand.u32 4294901760, %v316_v17 }
 0x303   : > { %v2859_v16 = vadd.f32 %v2858_v15, %v2698_v29  ;;  %2764 = vmatmul.f32.gmra.mxu2 %v10422_v41  ;;  %v10424_v15 = vld [vmem:[#allocation234_spill] sm:$0xff]  ;;  %v10425_v29 = vld [vmem:[#allocation231_spill] sm:$0xff] }
 0x304   : > { %v8337_v61 = vsub.f32 %v316_v17, %v8332_v10  ;;  %3004 = vmatpush.msrb.mxu0 %v8332_v10  ;;  %3727 = vmatpush.msrb.mxu3 %v8332_v10  ;;  %v10428_v41 = vld [vmem:[#allocation238_spill] sm:$0xff] }
 0x305   : > { %v5587_v30 = vadd.f32 %v5933_v1, %v2859_v16  ;;  %v2259_v28 = vpop.f32.mrf.mxu0  ;;  %v10426_v1 = vld [vmem:[#allocation232_spill] sm:$0xff] }
 0x306   : > { %v2450_v48 = vpop.f32.mrf.mxu1  ;;  %v2701_v9 = vpop.f32.mrf.mxu2  ;;  %v9988_v16 = vand.u32 4294901760, %v8337_v61  ;;  %3530 = vmatpush.msrb.mxu2 %v8337_v61 }
 0x307   : > { %5651 = vst [vmem:[%s8322_s23 + $0x10] sm:$0xff] %v5587_v30  ;;  %v2451_v33 = vadd.f32 %v2450_v48, %v2255_v40  ;;  %v2862_v20 = vpop.f32.mrf.mxu3  ;;  %v5934_v30 = vld [vmem:[%s6342_s7 + $0x20] sm:$0xff] }
 0x308   : > { %2338 = vmatmul.f32.gmra.mxu0 %v10424_v15 }
 0x309   : > { %v2702_v62 = vadd.f32 %v2701_v9, %v2451_v33  ;;  %2545 = vmatmul.f32.gmra.mxu1 %v10425_v29  ;;  %v10427_v33 = vld [vmem:[#allocation245_spill] sm:$0xff]  ;;  %v3339_v29 = vsub.f32 %v8337_v61, %v9988_v16 }
 0x30a   : > { %2929 = vmatmul.f32.gmra.mxu3 %v10426_v1  ;;  %v2260_v36 = vadd.f32 %v2259_v28, %v10427_v33  ;;  %v10429_v28 = vld [vmem:[#allocation235_spill] sm:$0xff]  ;;  %v10430_v33 = vld [vmem:[#allocation236_spill] sm:$0xff]  ;;  %v5935_v16 = vld [vmem:[%s6342_s7 + $0x30] sm:$0xff] }
 0x30b   : > { %v2863_v40 = vadd.f32 %v2862_v20, %v2702_v62  ;;  %2768 = vmatmul.f32.gmra.mxu2 %v10426_v1  ;;  %v3340_v5 = vand.u32 4294901760, %v3339_v29 }
 0x30d   : > { %v5589_v48 = vadd.f32 %v5934_v30, %v2863_v40  ;;  %v2264_v9 = vpop.f32.mrf.mxu0  ;;  %3341 = vmatpush.msrb.mxu1 %v3340_v5  ;;  %v10431_v30 = vld [vmem:[#allocation249_spill] sm:$0xff] }
 0x30e   : > { %v2456_v17 = vpop.f32.mrf.mxu1  ;;  %v2705_v62 = vpop.f32.mrf.mxu2  ;;  %v2265_v45 = vadd.f32 %v2264_v9, %v10431_v30 }
 0x30f   : > { %5653 = vst [vmem:[%s8322_s23 + $0x20] sm:$0xff] %v5589_v48  ;;  %v2457_v20 = vadd.f32 %v2456_v17, %v2260_v36  ;;  %v2866_v15 = vpop.f32.mrf.mxu3 }
 0x310   : > { %2343 = vmatmul.f32.gmra.mxu0 %v10428_v41 }
 0x311   : > { %v2706_v1 = vadd.f32 %v2705_v62, %v2457_v20  ;;  %2551 = vmatmul.f32.gmra.mxu1 %v10429_v28  ;;  %v314_v62 = vld [vmem:[#allocation5 + $0x38] sm:$0xff] }
 0x312   : > { %2933 = vmatmul.f32.gmra.mxu3 %v10430_v33  ;;  %v8358_v41 = vand.u32 4294901760, %v314_v62 }
 0x313   : > { %v2867_v40 = vadd.f32 %v2866_v15, %v2706_v1  ;;  %2772 = vmatmul.f32.gmra.mxu2 %v10430_v33  ;;  %v10432_v15 = vld [vmem:[#allocation242_spill] sm:$0xff]  ;;  %v10433_v1 = vld [vmem:[#allocation239_spill] sm:$0xff] }
 0x314   : > { %v8363_v9 = vsub.f32 %v314_v62, %v8358_v41  ;;  %3006 = vmatpush.msrb.mxu0 %v8358_v41  ;;  %3729 = vmatpush.msrb.mxu3 %v8358_v41  ;;  %v10436_v33 = vld [vmem:[#allocation246_spill] sm:$0xff] }
 0x315   : > { %v5591_v48 = vadd.f32 %v5935_v16, %v2867_v40  ;;  %v2269_v36 = vpop.f32.mrf.mxu0  ;;  %v10434_v16 = vld [vmem:[#allocation240_spill] sm:$0xff] }
 0x316   : > { %v2462_v17 = vpop.f32.mrf.mxu1  ;;  %v2709_v29 = vpop.f32.mrf.mxu2  ;;  %v9991_v40 = vand.u32 4294901760, %v8363_v9  ;;  %3533 = vmatpush.msrb.mxu2 %v8363_v9 }
 0x317   : > { %5655 = vst [vmem:[%s8322_s23 + $0x30] sm:$0xff] %v5591_v48  ;;  %v2463_v44 = vadd.f32 %v2462_v17, %v2265_v45  ;;  %v2870_v20 = vpop.f32.mrf.mxu3  ;;  %v5936_v48 = vld [vmem:[%s6342_s7 + $0x40] sm:$0xff] }
 0x318   : > { %2348 = vmatmul.f32.gmra.mxu0 %v10432_v15 }
 0x319   : > { %v2710_v5 = vadd.f32 %v2709_v29, %v2463_v44  ;;  %2557 = vmatmul.f32.gmra.mxu1 %v10433_v1  ;;  %v10435_v44 = vld [vmem:[#allocation253_spill] sm:$0xff]  ;;  %v3345_v1 = vsub.f32 %v8363_v9, %v9991_v40 }
 0x31a   : > { %2937 = vmatmul.f32.gmra.mxu3 %v10434_v16  ;;  %v2270_v30 = vadd.f32 %v2269_v36, %v10435_v44  ;;  %v10437_v36 = vld [vmem:[#allocation243_spill] sm:$0xff]  ;;  %v10438_v44 = vld [vmem:[#allocation244_spill] sm:$0xff]  ;;  %v5937_v40 = vld [vmem:[%s6342_s7 + $0x50] sm:$0xff] }
 0x31b   : > { %v2871_v45 = vadd.f32 %v2870_v20, %v2710_v5  ;;  %2776 = vmatmul.f32.gmra.mxu2 %v10434_v16  ;;  %v3346_v28 = vand.u32 4294901760, %v3345_v1 }
 0x31d   : > { %v5593_v17 = vadd.f32 %v5936_v48, %v2871_v45  ;;  %v2274_v29 = vpop.f32.mrf.mxu0  ;;  %3347 = vmatpush.msrb.mxu1 %v3346_v28  ;;  %v10439_v48 = vld [vmem:[#allocation257_spill] sm:$0xff] }
 0x31e   : > { %v2468_v62 = vpop.f32.mrf.mxu1  ;;  %v2713_v5 = vpop.f32.mrf.mxu2  ;;  %v2275_v55 = vadd.f32 %v2274_v29, %v10439_v48 }
 0x31f   : > { %5657 = vst [vmem:[%s8322_s23 + $0x40] sm:$0xff] %v5593_v17  ;;  %v2469_v20 = vadd.f32 %v2468_v62, %v2270_v30  ;;  %v2874_v15 = vpop.f32.mrf.mxu3 }
 0x320   : > { %2353 = vmatmul.f32.gmra.mxu0 %v10436_v33 }
 0x321   : > { %v2714_v16 = vadd.f32 %v2713_v5, %v2469_v20  ;;  %2563 = vmatmul.f32.gmra.mxu1 %v10437_v36  ;;  %v312_v5 = vld [vmem:[#allocation5 + $0x28] sm:$0xff] }
 0x322   : > { %2941 = vmatmul.f32.gmra.mxu3 %v10438_v44  ;;  %v8384_v33 = vand.u32 4294901760, %v312_v5 }
 0x323   : > { %v2875_v45 = vadd.f32 %v2874_v15, %v2714_v16  ;;  %2780 = vmatmul.f32.gmra.mxu2 %v10438_v44  ;;  %v10440_v15 = vld [vmem:[#allocation250_spill] sm:$0xff]  ;;  %v10441_v16 = vld [vmem:[#allocation247_spill] sm:$0xff] }
 0x324   : > { %v8389_v29 = vsub.f32 %v312_v5, %v8384_v33  ;;  %3008 = vmatpush.msrb.mxu0 %v8384_v33  ;;  %3731 = vmatpush.msrb.mxu3 %v8384_v33  ;;  %v10444_v44 = vld [vmem:[#allocation254_spill] sm:$0xff] }
 0x325   : > { %v5595_v17 = vadd.f32 %v5937_v40, %v2875_v45  ;;  %v2279_v30 = vpop.f32.mrf.mxu0  ;;  %v10442_v40 = vld [vmem:[#allocation248_spill] sm:$0xff] }
 0x326   : > { %v2474_v62 = vpop.f32.mrf.mxu1  ;;  %v2717_v1 = vpop.f32.mrf.mxu2  ;;  %v9994_v45 = vand.u32 4294901760, %v8389_v29  ;;  %3536 = vmatpush.msrb.mxu2 %v8389_v29 }
 0x327   : > { %5659 = vst [vmem:[%s8322_s23 + $0x50] sm:$0xff] %v5595_v17  ;;  %v2475_v53 = vadd.f32 %v2474_v62, %v2275_v55  ;;  %v2878_v20 = vpop.f32.mrf.mxu3  ;;  %v5938_v17 = vld [vmem:[%s6342_s7 + $0x60] sm:$0xff] }
 0x328   : > { %2358 = vmatmul.f32.gmra.mxu0 %v10440_v15 }
 0x329   : > { %v2718_v28 = vadd.f32 %v2717_v1, %v2475_v53  ;;  %2569 = vmatmul.f32.gmra.mxu1 %v10441_v16  ;;  %v10443_v53 = vld [vmem:[#allocation261_spill] sm:$0xff]  ;;  %v3351_v16 = vsub.f32 %v8389_v29, %v9994_v45 }
 0x32a   : > { %2945 = vmatmul.f32.gmra.mxu3 %v10442_v40  ;;  %v2280_v48 = vadd.f32 %v2279_v30, %v10443_v53  ;;  %v10445_v30 = vld [vmem:[#allocation251_spill] sm:$0xff]  ;;  %v10446_v53 = vld [vmem:[#allocation252_spill] sm:$0xff]  ;;  %v5939_v45 = vld [vmem:[%s6342_s7 + $0x70] sm:$0xff] }
 0x32b   : > { %v2879_v55 = vadd.f32 %v2878_v20, %v2718_v28  ;;  %2784 = vmatmul.f32.gmra.mxu2 %v10442_v40  ;;  %v3352_v36 = vand.u32 4294901760, %v3351_v16 }
 0x32d   : > { %v5597_v62 = vadd.f32 %v5938_v17, %v2879_v55  ;;  %v2284_v1 = vpop.f32.mrf.mxu0  ;;  %3353 = vmatpush.msrb.mxu1 %v3352_v36 }
 0x32e   : > { %v2480_v5 = vpop.f32.mrf.mxu1  ;;  %v2721_v28 = vpop.f32.mrf.mxu2  ;;  %v2285_v17 = vadd.f32 %v2284_v1, %v7950_v4  ;;  %v10449_v1 = vld [vmem:[#allocation256_spill] sm:$0xff] }
 0x32f   : > { %5661 = vst [vmem:[%s8322_s23 + $0x60] sm:$0xff] %v5597_v62  ;;  %v2481_v20 = vadd.f32 %v2480_v5, %v2280_v48  ;;  %v2882_v15 = vpop.f32.mrf.mxu3 }
 0x330   : > { %2363 = vmatmul.f32.gmra.mxu0 %v10444_v44 }
 0x331   : > { %v2722_v40 = vadd.f32 %v2721_v28, %v2481_v20  ;;  %2575 = vmatmul.f32.gmra.mxu1 %v10445_v30  ;;  %v310_v28 = vld [vmem:[#allocation5 + $0x18] sm:$0xff] }
 0x332   : > { %2949 = vmatmul.f32.gmra.mxu3 %v10446_v53  ;;  %v8410_v44 = vand.u32 4294901760, %v310_v28 }
 0x333   : > { %v2883_v55 = vadd.f32 %v2882_v15, %v2722_v40  ;;  %2788 = vmatmul.f32.gmra.mxu2 %v10446_v53  ;;  %v10447_v15 = vld [vmem:[#allocation258_spill] sm:$0xff]  ;;  %v10448_v40 = vld [vmem:[#allocation255_spill] sm:$0xff] }
 0x334   : > { %v8415_v4 = vsub.f32 %v310_v28, %v8410_v44  ;;  %3010 = vmatpush.msrb.mxu0 %v8410_v44  ;;  %3733 = vmatpush.msrb.mxu3 %v8410_v44 }
 0x335   : > { %v5599_v62 = vadd.f32 %v5939_v45, %v2883_v55  ;;  %v2289_v48 = vpop.f32.mrf.mxu0 }
 0x336   : > { %v2486_v5 = vpop.f32.mrf.mxu1  ;;  %v2725_v16 = vpop.f32.mrf.mxu2  ;;  %v9996_v55 = vand.u32 4294901760, %v8415_v4  ;;  %3539 = vmatpush.msrb.mxu2 %v8415_v4 }
 0x337   : > { %5663 = vst [vmem:[%s8322_s23 + $0x70] sm:$0xff] %v5599_v62  ;;  %v2487_v26 = vadd.f32 %v2486_v5, %v2285_v17  ;;  %v2886_v20 = vpop.f32.mrf.mxu3  ;;  %v5940_v17 = vld [vmem:[%s6342_s7 + $0x80] sm:$0xff] }
 0x338   : > { %2368 = vmatmul.f32.gmra.mxu0 %v10447_v15  ;;  %v3357_v28 = vsub.f32 %v8415_v4, %v9996_v55  ;;  %v5941_v55 = vld [vmem:[%s6342_s7 + $0x90] sm:$0xff] }
 0x339   : > { %v2726_v36 = vadd.f32 %v2725_v16, %v2487_v26  ;;  %2581 = vmatmul.f32.gmra.mxu1 %v10448_v40  ;;  %v2290_v26 = vadd.f32 %v2289_v48, %v7970_v19  ;;  %v10451_v19 = vld [vmem:[#allocation259_spill] sm:$0xff] }
 0x33a   : > { %2953 = vmatmul.f32.gmra.mxu3 %v10449_v1  ;;  %v3358_v15 = vand.u32 4294901760, %v3357_v28 }
 0x33b   : > { %v2887_v45 = vadd.f32 %v2886_v20, %v2726_v36  ;;  %2792 = vmatmul.f32.gmra.mxu2 %v10449_v1  ;;  %v10450_v1 = vld [vmem:[#allocation262_spill] sm:$0xff] }
 0x33c   : > { %3359 = vmatpush.msrb.mxu1 %v3358_v15 }
 0x33d   : > { %v5601_v62 = vadd.f32 %v5940_v17, %v2887_v45  ;;  %v2294_v5 = vpop.f32.mrf.mxu0  ;;  %v10452_v45 = vld [vmem:[#allocation260_spill] sm:$0xff] }
 0x33e   : > { %v2492_v16 = vpop.f32.mrf.mxu1  ;;  %v2729_v36 = vpop.f32.mrf.mxu2  ;;  %v2295_v17 = vadd.f32 %v2294_v5, %v7990_v12  ;;  %v10455_v5 = vand.u32 4294901760, %v8024_v6 }
 0x33f   : > { %5665 = vst [vmem:[%s8322_s23 + $0x80] sm:$0xff] %v5601_v62  ;;  %v2493_v20 = vadd.f32 %v2492_v16, %v2290_v26  ;;  %v2890_v40 = vpop.f32.mrf.mxu3 }
 0x340   : > { %2373 = vmatmul.f32.gmra.mxu0 %v10450_v1 }
 0x341   : > { %v2730_v30 = vadd.f32 %v2729_v36, %v2493_v20  ;;  %2587 = vmatmul.f32.gmra.mxu1 %v10451_v19  ;;  %v308_v36 = vld [vmem:[#allocation5 + $0x8] sm:$0xff] }
 0x342   : > { %2957 = vmatmul.f32.gmra.mxu3 %v10452_v45  ;;  %v8436_v1 = vand.u32 4294901760, %v308_v36 }
 0x343   : > { %v2891_v48 = vadd.f32 %v2890_v40, %v2730_v30  ;;  %2796 = vmatmul.f32.gmra.mxu2 %v10452_v45  ;;  %v10453_v30 = vld [vmem:[#allocation263_spill] sm:$0xff] }
 0x344   : > { %v8441_v40 = vsub.f32 %v308_v36, %v8436_v1  ;;  %3012 = vmatpush.msrb.mxu0 %v8436_v1  ;;  %3735 = vmatpush.msrb.mxu3 %v8436_v1 }
 0x345   : > { %v5603_v62 = vadd.f32 %v5941_v55, %v2891_v48  ;;  %v2299_v26 = vpop.f32.mrf.mxu0  ;;  %v10454_v55 = vld [vmem:[#allocation264_spill] sm:$0xff] }
 0x346   : > { %v2498_v16 = vpop.f32.mrf.mxu1  ;;  %v2733_v28 = vpop.f32.mrf.mxu2  ;;  %3932 = vmatpush.msra.mxu0 %v10455_v5  ;;  %v2300_v48 = vadd.f32 %v2299_v26, %v8010_v31  ;;  %3542 = vmatpush.msrb.mxu2 %v8441_v40  ;;  %v10457_v31 = vand.u32 4294901760, %v8097_v42  ;;  %v10462_v42 = vand.u32 4294901760, %v8149_v23 }
 0x347   : > { %5667 = vst [vmem:[%s8322_s23 + $0x90] sm:$0xff] %v5603_v62  ;;  %v2499_v53 = vadd.f32 %v2498_v16, %v2295_v17  ;;  %v2894_v20 = vpop.f32.mrf.mxu3  ;;  %v5942_v17 = vld [vmem:[%s6342_s7 + $0xa0] sm:$0xff]  ;;  %v10456_v16 = vand.u32 4294901760, %v8069_v0  ;;  %v10459_v0 = vld [vmem:[#allocation266_spill] sm:$0xff] }
 0x348   : > { %2378 = vmatmul.f32.gmra.mxu0 %v7957_v35  ;;  %v10562_v35 = vld [vmem:[#allocation90_spill] sm:$0xff] }
 0x349   : > { %v2734_v15 = vadd.f32 %v2733_v28, %v2499_v53  ;;  %2593 = vmatmul.f32.gmra.mxu1 %v10453_v30  ;;  %v9998_v53 = vand.u32 4294901760, %v8441_v40  ;;  %3936 = vmatpush.msra.mxu0 %v10456_v16  ;;  %v10460_v16 = vand.u32 4294901760, %v8123_v43  ;;  %v10464_v43 = vand.u32 4294901760, %v8175_v63 }
 0x34a   : > { %2961 = vmatmul.f32.gmra.mxu3 %v10454_v55 }
 0x34b   : > { %v2895_v12 = vadd.f32 %v2894_v20, %v2734_v15  ;;  %2800 = vmatmul.f32.gmra.mxu2 %v10454_v55  ;;  %v3363_v6 = vsub.f32 %v8441_v40, %v9998_v53  ;;  %3940 = vmatpush.msra.mxu0 %v10457_v31  ;;  %v10572_v55 = vld [vmem:[#allocation100_spill] sm:$0xff] }
 0x34d   : > { %v5605_v62 = vadd.f32 %v5942_v17, %v2895_v12  ;;  %v2304_v28 = vpop.f32.mrf.mxu0  ;;  %v3364_v26 = vand.u32 4294901760, %v3363_v6  ;;  %v10458_v17 = vld [vmem:[#allocation268_spill] sm:$0xff]  ;;  %3944 = vmatpush.msra.mxu0 %v10460_v16  ;;  %v5943_v6 = vld [vmem:[%s6342_s7 + $0xb0] sm:$0xff] }
 0x34e   : > { %v2504_v20 = vpop.f32.mrf.mxu1  ;;  %v2737_v15 = vpop.f32.mrf.mxu2  ;;  %v10467_v16 = vld [vmem:[#allocation269_spill] sm:$0xff] }
 0x34f   : > { %5669 = vst [vmem:[%s8322_s23 + $0xa0] sm:$0xff] %v5605_v62  ;;  %v2505_v36 = vadd.f32 %v2504_v20, %v2300_v48  ;;  %v2898_v5 = vpop.f32.mrf.mxu3  ;;  %3365 = vmatpush.msrb.mxu1 %v3364_v26  ;;  %v10461_v62 = vld [vmem:[#allocation267_spill] sm:$0xff]  ;;  %3948 = vmatpush.msra.mxu0 %v10462_v42  ;;  %v10468_v42 = vld [vmem:[#allocation270_spill] sm:$0xff] }
 0x350   : > { %2383 = vmatmul.f32.gmra.mxu0 %v10458_v17  ;;  %v10463_v48 = vld [vmem:[#allocation279_spill] sm:$0xff] }
 0x351   : > { %v2738_v12 = vadd.f32 %v2737_v15, %v2505_v36  ;;  %2599 = vmatmul.f32.gmra.mxu1 %v10459_v0  ;;  %v2305_v20 = vadd.f32 %v2304_v28, %v10463_v48  ;;  %3952 = vmatpush.msra.mxu0 %v10464_v43  ;;  %v10465_v28 = vand.u32 4294901760, %v8201_v25  ;;  %v10469_v48 = vand.u32 4294901760, %v8227_v34 }
 0x352   : > { %2965 = vmatmul.f32.gmra.mxu3 %v10461_v62  ;;  %4123 = vmatpush.msra.mxu1 %v8021_v27 }
 0x353   : > { %v2899_v53 = vadd.f32 %v2898_v5, %v2738_v12  ;;  %2804 = vmatmul.f32.gmra.mxu2 %v10461_v62  ;;  %v370_v12 = vld [vmem:[#allocation5 + $0x1f8] sm:$0xff]  ;;  %3956 = vmatpush.msra.mxu0 %v10465_v28 }
 0x354   : > { %4125 = vmatpush.msra.mxu1 %v8066_v24  ;;  %v8477_v23 = vand.u32 4294901760, %v370_v12  ;;  %v10466_v24 = vld [vmem:[#allocation271_spill] sm:$0xff] }
 0x355   : > { %v5607_v36 = vadd.f32 %v5943_v6, %v2899_v53  ;;  %v2309_v15 = vpop.f32.mrf.mxu0  ;;  %3960 = vmatpush.msra.mxu0 %v10469_v48  ;;  %v5944_v6 = vld [vmem:[%s6342_s7 + $0xc0] sm:$0xff] }
 0x356   : > { %v2510_v31 = vpop.f32.mrf.mxu1  ;;  %v2741_v26 = vpop.f32.mrf.mxu2  ;;  %4127 = vmatpush.msra.mxu1 %v8094_v38  ;;  %4284 = vmatpush.msra.mxu2 %v8477_v23  ;;  %v8485_v63 = vsub.f32 %v370_v12, %v8477_v23  ;;  %v10473_v12 = vand.u32 4294901760, %v8307_v52 }
 0x357   : > { %5671 = vst [vmem:[%s8322_s23 + $0xb0] sm:$0xff] %v5607_v36  ;;  %v2511_v5 = vadd.f32 %v2510_v31, %v2305_v20  ;;  %v2902_v27 = vpop.f32.mrf.mxu3  ;;  %v2310_v20 = vadd.f32 %v2309_v15, %v8059_v37  ;;  %v10470_v31 = vand.u32 4294901760, %v8253_v18  ;;  %v10471_v37 = vand.u32 4294901760, %v8281_v60  ;;  %v5945_v60 = vld [vmem:[%s6342_s7 + $0xd0] sm:$0xff] }
 0x358   : > { %2388 = vmatmul.f32.gmra.mxu0 %v10466_v24  ;;  %4129 = vmatpush.msra.mxu1 %v8120_v39  ;;  %v10006_v25 = vand.u32 4294901760, %v8485_v63  ;;  %v10553_v24 = vld [vmem:[#allocation81_spill] sm:$0xff] }
 0x359   : > { %v2742_v53 = vadd.f32 %v2741_v26, %v2511_v5  ;;  %2605 = vmatmul.f32.gmra.mxu1 %v10467_v16  ;;  %3964 = vmatpush.msra.mxu0 %v10470_v31  ;;  %v5963_v16 = vld [vmem:[#allocation7] sm:$0x3] }
 0x35a   : > { %2969 = vmatmul.f32.gmra.mxu3 %v10468_v42  ;;  %4131 = vmatpush.msra.mxu1 %v8146_v50  ;;  %v4575_v34 = vsub.f32 %v8485_v63, %v10006_v25 }
 0x35b   : > { %v2903_v38 = vadd.f32 %v2902_v27, %v2742_v53  ;;  %2808 = vmatmul.f32.gmra.mxu2 %v10468_v42  ;;  %3968 = vmatpush.msra.mxu0 %v10471_v37  ;;  %v10472_v27 = vld [vmem:[#allocation273_spill] sm:$0xff]  ;;  %v10474_v53 = vand.u32 4294901760, %v8337_v61 }
 0x35c   : > { %4133 = vmatpush.msra.mxu1 %v8172_v47  ;;  %v4576_v15 = vand.u32 4294901760, %v4575_v34  ;;  %v10477_v34 = vand.u32 4294901760, %v8415_v4 }
 0x35d   : > { %v5609_v36 = vadd.f32 %v5944_v6, %v2903_v38  ;;  %v2314_v39 = vpop.f32.mrf.mxu0  ;;  %3972 = vmatpush.msra.mxu0 %v10473_v12  ;;  %v368_v6 = vld [vmem:[#allocation5 + $0x1e8] sm:$0xff] }
 0x35e   : > { %v2516_v43 = vpop.f32.mrf.mxu1  ;;  %v2745_v26 = vpop.f32.mrf.mxu2  ;;  %4135 = vmatpush.msra.mxu1 %v8198_v54  ;;  %4577 = vmatpush.msra.mxu3 %v4576_v15  ;;  %v2315_v54 = vadd.f32 %v2314_v39, %v8079_v32  ;;  %v5946_v39 = vld [vmem:[%s6342_s7 + $0xe0] sm:$0xff]  ;;  %v10479_v15 = vld [vmem:[#allocation282_spill] sm:$0xff]  ;;  %v10482_v12 = vld [vmem:[#allocation13_spill] sm:$0xff] }
 0x35f   : > { %5673 = vst [vmem:[%s8322_s23 + $0xc0] sm:$0xff] %v5609_v36  ;;  %v2517_v5 = vadd.f32 %v2516_v43, %v2310_v20  ;;  %v2906_v50 = vpop.f32.mrf.mxu3  ;;  %3976 = vmatpush.msra.mxu0 %v10474_v53  ;;  %v10475_v36 = vand.u32 4294901760, %v8363_v9  ;;  %v10476_v9 = vand.u32 4294901760, %v8389_v29 }
 0x360   : > { %2393 = vmatmul.f32.gmra.mxu0 %v8017_v59  ;;  %4137 = vmatpush.msra.mxu1 %v8224_v56 }
 0x361   : > { %v2746_v18 = vadd.f32 %v2745_v26, %v2517_v5  ;;  %2611 = vmatmul.f32.gmra.mxu1 %v10472_v27  ;;  %3980 = vmatpush.msra.mxu0 %v10475_v36 }
 0x362   : > { %2973 = vmatmul.f32.gmra.mxu3 %v8006_v11  ;;  %4139 = vmatpush.msra.mxu1 %v8250_v51  ;;  %v8522_v51 = vand.u32 4294901760, %v368_v6 }
 0x363   : > { %v2907_v47 = vadd.f32 %v2906_v50, %v2746_v18  ;;  %2812 = vmatmul.f32.gmra.mxu2 %v8006_v11  ;;  %3984 = vmatpush.msra.mxu0 %v10476_v9  ;;  %v10480_v18 = vld [vmem:[#allocation17_spill] sm:$0xff] }
 0x364   : > { %4141 = vmatpush.msra.mxu1 %v8276_v13  ;;  %4286 = vmatpush.msra.mxu2 %v8522_v51  ;;  %v8529_v13 = vsub.f32 %v368_v6, %v8522_v51  ;;  %v10484_v6 = vld [vmem:[#allocation12_spill] sm:$0xff] }
 0x365   : > { %v5611_v28 = vadd.f32 %v5945_v60, %v2907_v47  ;;  %v2319_v38 = vpop.f32.mrf.mxu0  ;;  %3988 = vmatpush.msra.mxu0 %v10477_v34  ;;  %v10481_v47 = vld [vmem:[#allocation14_spill] sm:$0xff] }
 0x366   : > { %v2522_v48 = vpop.f32.mrf.mxu1  ;;  %v2749_v20 = vpop.f32.mrf.mxu2  ;;  %4143 = vmatpush.msra.mxu1 %v8302_v8  ;;  %v10004_v8 = vand.u32 4294901760, %v8529_v13  ;;  %v2320_v31 = vadd.f32 %v2319_v38, %v8089_v57  ;;  %v10478_v57 = vand.u32 4294901760, %v8441_v40 }
 0x367   : > { %5675 = vst [vmem:[%s8322_s23 + $0xd0] sm:$0xff] %v5611_v28  ;;  %v2523_v56 = vadd.f32 %v2522_v48, %v2315_v54  ;;  %v2910_v52 = vpop.f32.mrf.mxu3  ;;  %v5947_v54 = vld [vmem:[%s6342_s7 + $0xf0] sm:$0xff]  ;;  %v366_v48 = vld [vmem:[#allocation5 + $0x1d8] sm:$0xff] }
 0x368   : > { %2398 = vmatmul.f32.gmra.mxu0 %v8049_v3  ;;  %4145 = vmatpush.msra.mxu1 %v8332_v10  ;;  %v4581_v29 = vsub.f32 %v8529_v13, %v10004_v8  ;;  %v10547_v3 = vld [vmem:[#allocation286_spill] sm:$0xff] }
 0x369   : > { %v2750_v32 = vadd.f32 %v2749_v20, %v2523_v56  ;;  %2617 = vmatmul.f32.gmra.mxu1 %v8031_v22  ;;  %3992 = vmatpush.msra.mxu0 %v10478_v57  ;;  %v8560_v56 = vand.u32 4294901760, %v366_v48  ;;  %v10487_v57 = vld [vmem:[#allocation25_spill] sm:$0xff]  ;;  %v10544_v22 = vld [vmem:[#allocation63_spill] sm:$0xff] }
 0x36a   : > { %2977 = vmatmul.f32.gmra.mxu3 %v8033_v14  ;;  %4147 = vmatpush.msra.mxu1 %v8358_v41  ;;  %v4582_v37 = vand.u32 4294901760, %v4581_v29 }
 0x36b   : > { %v2911_v61 = vadd.f32 %v2910_v52, %v2750_v32  ;;  %2816 = vmatmul.f32.gmra.mxu2 %v8033_v14  ;;  %v10483_v52 = vld [vmem:[#allocation21_spill] sm:$0xff]  ;;  %v10485_v32 = vld [vmem:[#allocation18_spill] sm:$0xff] }
 0x36c   : > { %4149 = vmatpush.msra.mxu1 %v8384_v33  ;;  %4583 = vmatpush.msra.mxu3 %v4582_v37  ;;  %v10488_v37 = vld [vmem:[#allocation15_spill] sm:$0xff] }
 0x36d   : > { %v5613_v43 = vadd.f32 %v5946_v39, %v2911_v61  ;;  %v2324_v10 = vpop.f32.mrf.mxu0  ;;  %4288 = vmatpush.msra.mxu2 %v8560_v56  ;;  %v10486_v61 = vld [vmem:[#allocation16_spill] sm:$0xff] }
 0x36e   : > { %v2528_v5 = vpop.f32.mrf.mxu1  ;;  %v2753_v50 = vpop.f32.mrf.mxu2  ;;  %4151 = vmatpush.msra.mxu1 %v8410_v44  ;;  %v2325_v40 = vadd.f32 %v2324_v10, %v8105_v49  ;;  %v8566_v49 = vsub.f32 %v366_v48, %v8560_v56  ;;  %v5948_v39 = vld [vmem:[%s6342_s7 + $0x100] sm:$0xff] }
 0x36f   : > { %5677 = vst [vmem:[%s8322_s23 + $0xe0] sm:$0xff] %v5613_v43  ;;  %v2529_v26 = vadd.f32 %v2528_v5, %v2320_v31  ;;  %v2914_v41 = vpop.f32.mrf.mxu3 }
 0x370   : > { %3018 = vmatmul.f32.vlgmr.msrb.gmra.mxu0 %v10480_v18  ;;  %4153 = vmatpush.msra.mxu1 %v8436_v1  ;;  %v10003_v9 = vand.u32 4294901760, %v8566_v49  ;;  %v10489_v18 = vld [vmem:[#allocation22_spill] sm:$0xff] }
 0x371   : > { %v2754_v4 = vadd.f32 %v2753_v50, %v2529_v26  ;;  %2623 = vmatmul.f32.gmra.mxu1 %v10479_v15  ;;  %4799 = vmatpush.msrb.mxu0 %v8485_v63  ;;  %v10543_v15 = vld [vmem:[#allocation73_spill] sm:$0xff] }
 0x372   : > { %3739 = vmatmul.f32.vlgmr.msrb.gmra.mxu3 %v10481_v47  ;;  %v4587_v5 = vsub.f32 %v8566_v49, %v10003_v9  ;;  %v10534_v9 = vld [vmem:[#allocation55_spill] sm:$0xff] }
 0x373   : > { %v2915_v33 = vadd.f32 %v2914_v41, %v2754_v4  ;;  %3545 = vmatmul.f32.vlgmr.msrb.gmra.mxu2 %v10482_v12  ;;  %4802 = vmatpush.msrb.mxu0 %v8529_v13  ;;  %v5949_v12 = vld [vmem:[%s6342_s7 + $0x110] sm:$0xff] }
 0x374   : > { %v4588_v41 = vand.u32 4294901760, %v4587_v5 }
 0x375   : > { %v5615_v44 = vadd.f32 %v5947_v54, %v2915_v33  ;;  %v2329_v60 = vpop.f32.mrf.mxu0  ;;  %4805 = vmatpush.msrb.mxu0 %v8566_v49  ;;  %v10490_v33 = vld [vmem:[#allocation20_spill] sm:$0xff] }
 0x376   : > { %v2534_v28 = vpop.f32.mrf.mxu1  ;;  %v2757_v38 = vpop.f32.mrf.mxu2  ;;  %v2330_v31 = vadd.f32 %v2329_v60, %v8115_v7  ;;  %4589 = vmatpush.msra.mxu3 %v4588_v41 }
 0x377   : > { %5679 = vst [vmem:[%s8322_s23 + $0xf0] sm:$0xff] %v5615_v44  ;;  %v2535_v53 = vadd.f32 %v2534_v28, %v2325_v40  ;;  %v2918_v1 = vpop.f32.mrf.mxu3 }
 0x378   : > { %3026 = vmatmul.f32.gmra.mxu0 %v10483_v52  ;;  %v10492_v52 = vld [vmem:[#allocation19_spill] sm:$0xff] }
 0x379   : > { %v2758_v20 = vadd.f32 %v2757_v38, %v2535_v53  ;;  %3367 = vmatmul.f32.vlgmr.msrb.gmra.mxu1 %v10484_v6  ;;  %v364_v38 = vld [vmem:[#allocation5 + $0x1c8] sm:$0xff] }
 0x37a   : > { %5007 = vmatpush.msrb.mxu1 %v8477_v23  ;;  %3745 = vmatmul.f32.gmra.mxu3 %v10485_v32  ;;  %v10493_v32 = vld [vmem:[#allocation26_spill] sm:$0xff] }
 0x37b   : > { %v2919_v36 = vadd.f32 %v2918_v1, %v2758_v20  ;;  %3550 = vmatmul.f32.gmra.mxu2 %v10486_v61  ;;  %v8588_v1 = vand.u32 4294901760, %v364_v38  ;;  %v10491_v20 = vld [vmem:[#allocation29_spill] sm:$0xff]  ;;  %v10494_v61 = vld [vmem:[#allocation24_spill] sm:$0xff] }
 0x37c   : > { %5009 = vmatpush.msrb.mxu1 %v8522_v51 }
 0x37d   : > { %v5617_v43 = vadd.f32 %v5948_v39, %v2919_v36  ;;  %v2334_v34 = vpop.f32.mrf.mxu0  ;;  %4290 = vmatpush.msra.mxu2 %v8588_v1 }
 0x37e   : > { %v2540_v10 = vpop.f32.mrf.mxu1  ;;  %5011 = vmatpush.msrb.mxu1 %v8560_v56  ;;  %v2761_v26 = vpop.f32.mrf.mxu2  ;;  %v2335_v47 = vadd.f32 %v2334_v34, %v8131_v58  ;;  %v8594_v58 = vsub.f32 %v364_v38, %v8588_v1 }
 0x37f   : > { %5681 = vst [vmem:[%s8322_s23 + $0x100] sm:$0xff] %v5617_v43  ;;  %v2541_v29 = vadd.f32 %v2540_v10, %v2330_v31  ;;  %v2922_v50 = vpop.f32.mrf.mxu3  ;;  %v5950_v43 = vld [vmem:[%s6342_s7 + $0x120] sm:$0xff] }
 0x380   : > { %3034 = vmatmul.f32.gmra.mxu0 %v10487_v57  ;;  %5013 = vmatpush.msrb.mxu1 %v8588_v1  ;;  %v10002_v31 = vand.u32 4294901760, %v8594_v58 }
 0x381   : > { %v2762_v7 = vadd.f32 %v2761_v26, %v2541_v29  ;;  %3371 = vmatmul.f32.gmra.mxu1 %v10488_v37  ;;  %4808 = vmatpush.msrb.mxu0 %v8594_v58 }
 0x382   : > { %3751 = vmatmul.f32.gmra.mxu3 %v10489_v18  ;;  %v4593_v29 = vsub.f32 %v8594_v58, %v10002_v31  ;;  %v10496_v18 = vld [vmem:[#allocation23_spill] sm:$0xff]  ;;  %v10533_v31 = vld [vmem:[#allocation65_spill] sm:$0xff] }
 0x383   : > { %v2923_v4 = vadd.f32 %v2922_v50, %v2762_v7  ;;  %3555 = vmatmul.f32.gmra.mxu2 %v10490_v33  ;;  %v10497_v33 = vld [vmem:[#allocation30_spill] sm:$0xff] }
 0x384   : > { %v4594_v7 = vand.u32 4294901760, %v4593_v29  ;;  %v5952_v29 = vld [vmem:[%s6342_s7 + $0x140] sm:$0xff] }
 0x385   : > { %v5619_v40 = vadd.f32 %v5949_v12, %v2923_v4  ;;  %v2339_v54 = vpop.f32.mrf.mxu0  ;;  %v10495_v4 = vld [vmem:[#allocation33_spill] sm:$0xff] }
 0x386   : > { %v2546_v44 = vpop.f32.mrf.mxu1  ;;  %v2765_v28 = vpop.f32.mrf.mxu2  ;;  %v2340_v39 = vadd.f32 %v2339_v54, %v8141_v21  ;;  %4595 = vmatpush.msra.mxu3 %v4594_v7 }
 0x387   : > { %5683 = vst [vmem:[%s8322_s23 + $0x110] sm:$0xff] %v5619_v40  ;;  %v2547_v60 = vadd.f32 %v2546_v44, %v2335_v47  ;;  %v2926_v53 = vpop.f32.mrf.mxu3  ;;  %v10498_v47 = vld [vmem:[#allocation28_spill] sm:$0xff]  ;;  %v5951_v40 = vld [vmem:[%s6342_s7 + $0x130] sm:$0xff] }
 0x388   : > { %3042 = vmatmul.f32.gmra.mxu0 %v10491_v20 }
 0x389   : > { %v2766_v48 = vadd.f32 %v2765_v28, %v2547_v60  ;;  %3375 = vmatmul.f32.gmra.mxu1 %v10492_v52 }
 0x38a   : > { %3757 = vmatmul.f32.gmra.mxu3 %v10493_v32  ;;  %v10499_v32 = vld [vmem:[#allocation37_spill] sm:$0xff] }
 0x38b   : > { %v2927_v36 = vadd.f32 %v2926_v53, %v2766_v48  ;;  %3560 = vmatmul.f32.gmra.mxu2 %v10494_v61  ;;  %v362_v48 = vld [vmem:[#allocation5 + $0x1b8] sm:$0xff] }
 0x38c   : > { %v8614_v20 = vand.u32 4294901760, %v362_v48  ;;  %v10500_v61 = vld [vmem:[#allocation27_spill] sm:$0xff] }
 0x38d   : > { %v5621_v34 = vadd.f32 %v5950_v43, %v2927_v36  ;;  %v2344_v10 = vpop.f32.mrf.mxu0  ;;  %v10501_v43 = vld [vmem:[#allocation34_spill] sm:$0xff] }
 0x38e   : > { %v2552_v5 = vpop.f32.mrf.mxu1  ;;  %v2769_v50 = vpop.f32.mrf.mxu2  ;;  %v2345_v12 = vadd.f32 %v2344_v10, %v8157_v46  ;;  %4292 = vmatpush.msra.mxu2 %v8614_v20  ;;  %v8620_v46 = vsub.f32 %v362_v48, %v8614_v20  ;;  %5015 = vmatpush.msrb.mxu1 %v8614_v20 }
 0x38f   : > { %5685 = vst [vmem:[%s8322_s23 + $0x120] sm:$0xff] %v5621_v34  ;;  %v2553_v26 = vadd.f32 %v2552_v5, %v2340_v39  ;;  %v2930_v41 = vpop.f32.mrf.mxu3  ;;  %v10502_v34 = vld [vmem:[#allocation32_spill] sm:$0xff] }
 0x390   : > { %3050 = vmatmul.f32.gmra.mxu0 %v10495_v4  ;;  %v10001_v10 = vand.u32 4294901760, %v8620_v46 }
 0x391   : > { %v2770_v57 = vadd.f32 %v2769_v50, %v2553_v26  ;;  %3379 = vmatmul.f32.gmra.mxu1 %v10496_v18  ;;  %4811 = vmatpush.msrb.mxu0 %v8620_v46 }
 0x392   : > { %3763 = vmatmul.f32.gmra.mxu3 %v10497_v33  ;;  %v4599_v7 = vsub.f32 %v8620_v46, %v10001_v10 }
 0x393   : > { %v2931_v21 = vadd.f32 %v2930_v41, %v2770_v57  ;;  %3565 = vmatmul.f32.gmra.mxu2 %v10498_v47 }
 0x394   : > { %v4600_v33 = vand.u32 4294901760, %v4599_v7 }
 0x395   : > { %v5623_v54 = vadd.f32 %v5951_v40, %v2931_v21  ;;  %v2349_v44 = vpop.f32.mrf.mxu0  ;;  %v10504_v40 = vld [vmem:[#allocation31_spill] sm:$0xff] }
 0x396   : > { %v2558_v60 = vpop.f32.mrf.mxu1  ;;  %v2773_v53 = vpop.f32.mrf.mxu2  ;;  %v2350_v5 = vadd.f32 %v2349_v44, %v8167_v2  ;;  %4601 = vmatpush.msra.mxu3 %v4600_v33  ;;  %v10506_v44 = vld [vmem:[#allocation36_spill] sm:$0xff]  ;;  %v10512_v33 = vld [vmem:[#allocation285_spill] sm:$0xff] }
 0x397   : > { %5687 = vst [vmem:[%s8322_s23 + $0x130] sm:$0xff] %v5623_v54  ;;  %v2559_v28 = vadd.f32 %v2558_v60, %v2345_v12  ;;  %v2934_v38 = vpop.f32.mrf.mxu3  ;;  %v10503_v12 = vld [vmem:[#allocation41_spill] sm:$0xff]  ;;  %v10505_v54 = vld [vmem:[#allocation38_spill] sm:$0xff]  ;;  %v10507_v60 = vld [vmem:[#allocation284_spill] sm:$0xff] }
 0x398   : > { %3058 = vmatmul.f32.gmra.mxu0 %v10499_v32 }
 0x399   : > { %v2774_v36 = vadd.f32 %v2773_v53, %v2559_v28  ;;  %3383 = vmatmul.f32.gmra.mxu1 %v10500_v61  ;;  %v5953_v53 = vld [vmem:[%s6342_s7 + $0x150] sm:$0xff] }
 0x39a   : > { %3769 = vmatmul.f32.gmra.mxu3 %v10501_v43 }
 0x39b   : > { %v2935_v39 = vadd.f32 %v2934_v38, %v2774_v36  ;;  %3570 = vmatmul.f32.gmra.mxu2 %v10502_v34  ;;  %v360_v34 = vld [vmem:[#allocation5 + $0x1a8] sm:$0xff] }
 0x39d   : > { %v5625_v26 = vadd.f32 %v5952_v29, %v2935_v39  ;;  %v2354_v50 = vpop.f32.mrf.mxu0 }
 0x39e   : > { %v2564_v41 = vpop.f32.mrf.mxu1  ;;  %v2777_v4 = vpop.f32.mrf.mxu2  ;;  %v2355_v28 = vadd.f32 %v2354_v50, %v10507_v60 }
 0x39f   : > { %5689 = vst [vmem:[%s8322_s23 + $0x140] sm:$0xff] %v5625_v26  ;;  %v2565_v57 = vadd.f32 %v2564_v41, %v2350_v5  ;;  %v2938_v21 = vpop.f32.mrf.mxu3  ;;  %v8640_v5 = vand.u32 4294901760, %v360_v34  ;;  %v10508_v26 = vld [vmem:[#allocation45_spill] sm:$0xff]  ;;  %v10509_v41 = vld [vmem:[#allocation35_spill] sm:$0xff] }
 0x3a0   : > { %3066 = vmatmul.f32.gmra.mxu0 %v10503_v12  ;;  %v5954_v12 = vld [vmem:[%s6342_s7 + $0x160] sm:$0xff] }
 0x3a1   : > { %v2778_v47 = vadd.f32 %v2777_v4, %v2565_v57  ;;  %3387 = vmatmul.f32.gmra.mxu1 %v10504_v40  ;;  %4294 = vmatpush.msra.mxu2 %v8640_v5  ;;  %v8646_v50 = vsub.f32 %v360_v34, %v8640_v5  ;;  %v10510_v57 = vld [vmem:[#allocation42_spill] sm:$0xff]  ;;  %v10511_v4 = vld [vmem:[#allocation40_spill] sm:$0xff] }
 0x3a2   : > { %3775 = vmatmul.f32.gmra.mxu3 %v10505_v54  ;;  %5017 = vmatpush.msrb.mxu1 %v8640_v5  ;;  %v10515_v34 = vld [vmem:[#allocation46_spill] sm:$0xff] }
 0x3a3   : > { %v2939_v2 = vadd.f32 %v2938_v21, %v2778_v47  ;;  %3575 = vmatmul.f32.gmra.mxu2 %v10506_v44  ;;  %v9999_v21 = vand.u32 4294901760, %v8646_v50  ;;  %4814 = vmatpush.msrb.mxu0 %v8646_v50 }
 0x3a5   : > { %v5627_v38 = vadd.f32 %v5953_v53, %v2939_v2  ;;  %v2359_v48 = vpop.f32.mrf.mxu0  ;;  %v4605_v60 = vsub.f32 %v8646_v50, %v9999_v21 }
 0x3a6   : > { %v2570_v36 = vpop.f32.mrf.mxu1  ;;  %v2781_v39 = vpop.f32.mrf.mxu2  ;;  %v2360_v47 = vadd.f32 %v2359_v48, %v10512_v33 }
 0x3a7   : > { %5691 = vst [vmem:[%s8322_s23 + $0x150] sm:$0xff] %v5627_v38  ;;  %v2571_v32 = vadd.f32 %v2570_v36, %v2355_v28  ;;  %v2942_v43 = vpop.f32.mrf.mxu3  ;;  %v4606_v36 = vand.u32 4294901760, %v4605_v60  ;;  %v358_v60 = vld [vmem:[#allocation5 + $0x198] sm:$0xff] }
 0x3a8   : > { %3074 = vmatmul.f32.gmra.mxu0 %v10508_v26  ;;  %v10517_v26 = vld [vmem:[#allocation195_spill] sm:$0xff] }
 0x3a9   : > { %v2782_v29 = vadd.f32 %v2781_v39, %v2571_v32  ;;  %3391 = vmatmul.f32.gmra.mxu1 %v10509_v41  ;;  %v10513_v39 = vld [vmem:[#allocation49_spill] sm:$0xff]  ;;  %4607 = vmatpush.msra.mxu3 %v4606_v36  ;;  %v10519_v36 = vld [vmem:[#allocation43_spill] sm:$0xff] }
 0x3aa   : > { %3781 = vmatmul.f32.gmra.mxu3 %v10510_v57  ;;  %v5955_v57 = vld [vmem:[%s6342_s7 + $0x170] sm:$0xff] }
 0x3ab   : > { %v2943_v7 = vadd.f32 %v2942_v43, %v2782_v29  ;;  %3580 = vmatmul.f32.gmra.mxu2 %v10511_v4  ;;  %v10514_v43 = vld [vmem:[#allocation39_spill] sm:$0xff]  ;;  %v10516_v29 = vld [vmem:[#allocation44_spill] sm:$0xff] }
 0x3ad   : > { %v5629_v2 = vadd.f32 %v5954_v12, %v2943_v7  ;;  %v2364_v54 = vpop.f32.mrf.mxu0 }
 0x3ae   : > { %v2576_v44 = vpop.f32.mrf.mxu1  ;;  %v2785_v53 = vpop.f32.mrf.mxu2  ;;  %v2365_v7 = vadd.f32 %v2364_v54, %v10517_v26 }
 0x3af   : > { %5693 = vst [vmem:[%s8322_s23 + $0x160] sm:$0xff] %v5629_v2  ;;  %v2577_v28 = vadd.f32 %v2576_v44, %v2360_v47  ;;  %v2946_v38 = vpop.f32.mrf.mxu3 }
 0x3b0   : > { %3082 = vmatmul.f32.gmra.mxu0 %v10513_v39  ;;  %v10520_v39 = vld [vmem:[#allocation50_spill] sm:$0xff] }
 0x3b1   : > { %v2786_v32 = vadd.f32 %v2785_v53, %v2577_v28  ;;  %3395 = vmatmul.f32.gmra.mxu1 %v10514_v43  ;;  %v8666_v28 = vand.u32 4294901760, %v358_v60 }
 0x3b2   : > { %3787 = vmatmul.f32.gmra.mxu3 %v10515_v34 }
 0x3b3   : > { %v2947_v48 = vadd.f32 %v2946_v38, %v2786_v32  ;;  %3585 = vmatmul.f32.gmra.mxu2 %v10516_v29  ;;  %v10518_v38 = vld [vmem:[#allocation53_spill] sm:$0xff]  ;;  %v8672_v54 = vsub.f32 %v358_v60, %v8666_v28  ;;  %5019 = vmatpush.msrb.mxu1 %v8666_v28  ;;  %v10522_v29 = vld [vmem:[#allocation200_spill] sm:$0xff] }
 0x3b4   : > { %4296 = vmatpush.msra.mxu2 %v8666_v28 }
 0x3b5   : > { %v5631_v4 = vadd.f32 %v5955_v57, %v2947_v48  ;;  %v2369_v33 = vpop.f32.mrf.mxu0  ;;  %v10521_v48 = vld [vmem:[#allocation48_spill] sm:$0xff]  ;;  %v10000_v34 = vand.u32 4294901760, %v8672_v54  ;;  %4817 = vmatpush.msrb.mxu0 %v8672_v54 }
 0x3b6   : > { %v2582_v47 = vpop.f32.mrf.mxu1  ;;  %v2789_v2 = vpop.f32.mrf.mxu2  ;;  %v2370_v26 = vadd.f32 %v2369_v33, %v10522_v29  ;;  %v10526_v29 = vld [vmem:[#allocation52_spill] sm:$0xff] }
 0x3b7   : > { %5695 = vst [vmem:[%s8322_s23 + $0x170] sm:$0xff] %v5631_v4  ;;  %v2583_v12 = vadd.f32 %v2582_v47, %v2365_v7  ;;  %v2950_v44 = vpop.f32.mrf.mxu3  ;;  %v5956_v7 = vld [vmem:[%s6342_s7 + $0x180] sm:$0xff] }
 0x3b8   : > { %3090 = vmatmul.f32.gmra.mxu0 %v10518_v38 }
 0x3b9   : > { %v2790_v53 = vadd.f32 %v2789_v2, %v2583_v12  ;;  %3399 = vmatmul.f32.gmra.mxu1 %v10519_v36  ;;  %v4611_v12 = vsub.f32 %v8672_v54, %v10000_v34  ;;  %v5957_v34 = vld [vmem:[%s6342_s7 + $0x190] sm:$0xff] }
 0x3ba   : > { %3793 = vmatmul.f32.gmra.mxu3 %v10520_v39  ;;  %v10523_v39 = vld [vmem:[#allocation57_spill] sm:$0xff] }
 0x3bb   : > { %v2951_v32 = vadd.f32 %v2950_v44, %v2790_v53  ;;  %3590 = vmatmul.f32.gmra.mxu2 %v10521_v48  ;;  %v4612_v53 = vand.u32 4294901760, %v4611_v12  ;;  %v10524_v48 = vld [vmem:[#allocation47_spill] sm:$0xff] }
 0x3bd   : > { %v5633_v57 = vadd.f32 %v5956_v7, %v2951_v32  ;;  %v2374_v4 = vpop.f32.mrf.mxu0  ;;  %4613 = vmatpush.msra.mxu3 %v4612_v53  ;;  %v10525_v32 = vld [vmem:[#allocation54_spill] sm:$0xff]  ;;  %v10527_v7 = vld [vmem:[#allocation205_spill] sm:$0xff] }
 0x3be   : > { %v2588_v47 = vpop.f32.mrf.mxu1  ;;  %v2793_v44 = vpop.f32.mrf.mxu2  ;;  %v2375_v21 = vadd.f32 %v2374_v4, %v10527_v7  ;;  %v10530_v4 = vld [vmem:[#allocation58_spill] sm:$0xff]  ;;  %v5958_v7 = vld [vmem:[%s6342_s7 + $0x1a0] sm:$0xff] }
 0x3bf   : > { %5697 = vst [vmem:[%s8322_s23 + $0x180] sm:$0xff] %v5633_v57  ;;  %v2589_v2 = vadd.f32 %v2588_v47, %v2370_v26  ;;  %v2954_v60 = vpop.f32.mrf.mxu3 }
 0x3c0   : > { %3098 = vmatmul.f32.gmra.mxu0 %v10523_v39 }
 0x3c1   : > { %v2794_v38 = vadd.f32 %v2793_v44, %v2589_v2  ;;  %3403 = vmatmul.f32.gmra.mxu1 %v10524_v48  ;;  %v356_v44 = vld [vmem:[#allocation5 + $0x188] sm:$0xff] }
 0x3c2   : > { %3799 = vmatmul.f32.gmra.mxu3 %v10525_v32  ;;  %v8692_v39 = vand.u32 4294901760, %v356_v44 }
 0x3c3   : > { %v2955_v33 = vadd.f32 %v2954_v60, %v2794_v38  ;;  %3595 = vmatmul.f32.gmra.mxu2 %v10526_v29  ;;  %v10528_v60 = vld [vmem:[#allocation61_spill] sm:$0xff]  ;;  %v10529_v38 = vld [vmem:[#allocation51_spill] sm:$0xff] }
 0x3c4   : > { %4298 = vmatpush.msra.mxu2 %v8692_v39  ;;  %5021 = vmatpush.msrb.mxu1 %v8692_v39 }
 0x3c5   : > { %v5635_v57 = vadd.f32 %v5957_v34, %v2955_v33  ;;  %v2379_v26 = vpop.f32.mrf.mxu0  ;;  %v8698_v34 = vsub.f32 %v356_v44, %v8692_v39  ;;  %v10531_v33 = vld [vmem:[#allocation56_spill] sm:$0xff] }
 0x3c6   : > { %v2594_v47 = vpop.f32.mrf.mxu1  ;;  %v2797_v12 = vpop.f32.mrf.mxu2 }
 0x3c7   : > { %5699 = vst [vmem:[%s8322_s23 + $0x190] sm:$0xff] %v5635_v57  ;;  %v2595_v10 = vadd.f32 %v2594_v47, %v2375_v21  ;;  %v2958_v2 = vpop.f32.mrf.mxu3  ;;  %v10005_v32 = vand.u32 4294901760, %v8698_v34  ;;  %4820 = vmatpush.msrb.mxu0 %v8698_v34 }
 0x3c8   : > { %3106 = vmatmul.f32.gmra.mxu0 %v10528_v60 }
 0x3c9   : > { %v2798_v53 = vadd.f32 %v2797_v12, %v2595_v10  ;;  %3407 = vmatmul.f32.gmra.mxu1 %v10529_v38  ;;  %v10532_v10 = vld [vmem:[#allocation210_spill] sm:$0xff]  ;;  %v4617_v44 = vsub.f32 %v8698_v34, %v10005_v32 }
 0x3ca   : > { %3805 = vmatmul.f32.gmra.mxu3 %v10530_v4  ;;  %v2380_v29 = vadd.f32 %v2379_v26, %v10532_v10  ;;  %v10536_v10 = vld [vmem:[#allocation60_spill] sm:$0xff]  ;;  %v5959_v32 = vld [vmem:[%s6342_s7 + $0x1b0] sm:$0xff] }
 0x3cb   : > { %v2959_v21 = vadd.f32 %v2958_v2, %v2798_v53  ;;  %3600 = vmatmul.f32.gmra.mxu2 %v10531_v33  ;;  %v4618_v4 = vand.u32 4294901760, %v4617_v44 }
 0x3cd   : > { %v5637_v57 = vadd.f32 %v5958_v7, %v2959_v21  ;;  %v2384_v47 = vpop.f32.mrf.mxu0  ;;  %4619 = vmatpush.msra.mxu3 %v4618_v4  ;;  %v10535_v21 = vld [vmem:[#allocation62_spill] sm:$0xff]  ;;  %v10537_v7 = vld [vmem:[#allocation215_spill] sm:$0xff] }
 0x3ce   : > { %v2600_v12 = vpop.f32.mrf.mxu1  ;;  %v2801_v53 = vpop.f32.mrf.mxu2  ;;  %v2385_v8 = vadd.f32 %v2384_v47, %v10537_v7  ;;  %v10540_v47 = vld [vmem:[#allocation66_spill] sm:$0xff]  ;;  %v5960_v7 = vld [vmem:[%s6342_s7 + $0x1c0] sm:$0xff] }
 0x3cf   : > { %5701 = vst [vmem:[%s8322_s23 + $0x1a0] sm:$0xff] %v5637_v57  ;;  %v2601_v2 = vadd.f32 %v2600_v12, %v2380_v29  ;;  %v2962_v60 = vpop.f32.mrf.mxu3 }
 0x3d0   : > { %3114 = vmatmul.f32.gmra.mxu0 %v10533_v31  ;;  %v354_v31 = vld [vmem:[#allocation5 + $0x178] sm:$0xff] }
 0x3d1   : > { %v2802_v33 = vadd.f32 %v2801_v53, %v2601_v2  ;;  %3411 = vmatmul.f32.gmra.mxu1 %v10534_v9  ;;  %v8718_v53 = vand.u32 4294901760, %v354_v31 }
 0x3d2   : > { %3811 = vmatmul.f32.gmra.mxu3 %v10535_v21 }
 0x3d3   : > { %v2963_v26 = vadd.f32 %v2962_v60, %v2802_v33  ;;  %3605 = vmatmul.f32.gmra.mxu2 %v10536_v10  ;;  %v10538_v60 = vld [vmem:[#allocation69_spill] sm:$0xff]  ;;  %v10539_v33 = vld [vmem:[#allocation59_spill] sm:$0xff]  ;;  %5023 = vmatpush.msrb.mxu1 %v8718_v53 }
 0x3d4   : > { %4300 = vmatpush.msra.mxu2 %v8718_v53 }
 0x3d5   : > { %v5639_v57 = vadd.f32 %v5959_v32, %v2963_v26  ;;  %v2389_v29 = vpop.f32.mrf.mxu0  ;;  %v8724_v32 = vsub.f32 %v354_v31, %v8718_v53  ;;  %v10541_v26 = vld [vmem:[#allocation64_spill] sm:$0xff] }
 0x3d6   : > { %v2606_v12 = vpop.f32.mrf.mxu1  ;;  %v2805_v44 = vpop.f32.mrf.mxu2 }
 0x3d7   : > { %5703 = vst [vmem:[%s8322_s23 + $0x1b0] sm:$0xff] %v5639_v57  ;;  %v2607_v25 = vadd.f32 %v2606_v12, %v2385_v8  ;;  %v2966_v2 = vpop.f32.mrf.mxu3  ;;  %v10009_v21 = vand.u32 4294901760, %v8724_v32  ;;  %4823 = vmatpush.msrb.mxu0 %v8724_v32 }
 0x3d8   : > { %3122 = vmatmul.f32.gmra.mxu0 %v10538_v60 }
 0x3d9   : > { %v2806_v4 = vadd.f32 %v2805_v44, %v2607_v25  ;;  %3415 = vmatmul.f32.gmra.mxu1 %v10539_v33  ;;  %v10542_v25 = vld [vmem:[#allocation220_spill] sm:$0xff]  ;;  %v4623_v31 = vsub.f32 %v8724_v32, %v10009_v21 }
 0x3da   : > { %3817 = vmatmul.f32.gmra.mxu3 %v10540_v47  ;;  %v2390_v10 = vadd.f32 %v2389_v29, %v10542_v25  ;;  %v10546_v25 = vld [vmem:[#allocation68_spill] sm:$0xff] }
 0x3db   : > { %v2967_v8 = vadd.f32 %v2966_v2, %v2806_v4  ;;  %3610 = vmatmul.f32.gmra.mxu2 %v10541_v26  ;;  %v4624_v47 = vand.u32 4294901760, %v4623_v31 }
 0x3dd   : > { %v5641_v57 = vadd.f32 %v5960_v7, %v2967_v8  ;;  %v2394_v12 = vpop.f32.mrf.mxu0  ;;  %4625 = vmatpush.msra.mxu3 %v4624_v47  ;;  %v10545_v8 = vld [vmem:[#allocation70_spill] sm:$0xff]  ;;  %v352_v7 = vld [vmem:[#allocation5 + $0x168] sm:$0xff]  ;;  %v10549_v47 = vld [vmem:[#allocation67_spill] sm:$0xff] }
 0x3de   : > { %v2612_v44 = vpop.f32.mrf.mxu1  ;;  %v2809_v4 = vpop.f32.mrf.mxu2  ;;  %v2395_v21 = vadd.f32 %v2394_v12, %v10547_v3  ;;  %v10548_v12 = vld [vmem:[#allocation77_spill] sm:$0xff] }
 0x3df   : > { %5705 = vst [vmem:[%s8322_s23 + $0x1c0] sm:$0xff] %v5641_v57  ;;  %v2613_v2 = vadd.f32 %v2612_v44, %v2390_v10  ;;  %v2970_v60 = vpop.f32.mrf.mxu3  ;;  %v5961_v57 = vld [vmem:[%s6342_s7 + $0x1d0] sm:$0xff]  ;;  %v8743_v44 = vand.u32 4294901760, %v352_v7 }
 0x3e0   : > { %3130 = vmatmul.f32.gmra.mxu0 %v10543_v15 }
 0x3e1   : > { %v2810_v26 = vadd.f32 %v2809_v4, %v2613_v2  ;;  %3419 = vmatmul.f32.gmra.mxu1 %v10544_v22  ;;  %4302 = vmatpush.msra.mxu2 %v8743_v44 }
 0x3e2   : > { %3823 = vmatmul.f32.gmra.mxu3 %v10545_v8  ;;  %5025 = vmatpush.msrb.mxu1 %v8743_v44 }
 0x3e3   : > { %v2971_v29 = vadd.f32 %v2970_v60, %v2810_v26  ;;  %3615 = vmatmul.f32.gmra.mxu2 %v10546_v25  ;;  %v8748_v60 = vsub.f32 %v352_v7, %v8743_v44  ;;  %v10551_v25 = vld [vmem:[#allocation72_spill] sm:$0xff]  ;;  %v10552_v7 = vld [vmem:[#allocation229_spill] sm:$0xff] }
 0x3e5   : > { %v5643_v10 = vadd.f32 %v5961_v57, %v2971_v29  ;;  %v2399_v27 = vpop.f32.mrf.mxu0  ;;  %v10011_v26 = vand.u32 4294901760, %v8748_v60  ;;  %4826 = vmatpush.msrb.mxu0 %v8748_v60  ;;  %v10550_v29 = vld [vmem:[#allocation74_spill] sm:$0xff] }
 0x3e6   : > { %v2618_v31 = vpop.f32.mrf.mxu1  ;;  %v2813_v15 = vpop.f32.mrf.mxu2  ;;  %v2400_v57 = vadd.f32 %v2399_v27, %v10552_v7  ;;  %v10556_v7 = vld [vmem:[#allocation76_spill] sm:$0xff] }
 0x3e7   : > { %5707 = vst [vmem:[%s8322_s23 + $0x1d0] sm:$0xff] %v5643_v10  ;;  %v2619_v2 = vadd.f32 %v2618_v31, %v2395_v21  ;;  %v2974_v4 = vpop.f32.mrf.mxu3  ;;  %v4629_v8 = vsub.f32 %v8748_v60, %v10011_v26  ;;  %v5962_v10 = vld [vmem:[%s6342_s7 + $0x1e0] sm:$0xff] }
 0x3e8   : > { %3138 = vmatmul.f32.gmra.mxu0 %v10548_v12 }
 0x3e9   : > { %v2814_v3 = vadd.f32 %v2813_v15, %v2619_v2  ;;  %3423 = vmatmul.f32.gmra.mxu1 %v10549_v47  ;;  %v4630_v2 = vand.u32 4294901760, %v4629_v8  ;;  %v10555_v8 = vld [vmem:[#allocation78_spill] sm:$0xff] }
 0x3ea   : > { %3829 = vmatmul.f32.gmra.mxu3 %v10550_v29 }
 0x3eb   : > { %v2975_v21 = vadd.f32 %v2974_v4, %v2814_v3  ;;  %3620 = vmatmul.f32.gmra.mxu2 %v10551_v25  ;;  %v8763_v4 = vperm.slane %v5963_v16, 1  ;;  %4631 = vmatpush.msra.mxu3 %v4630_v2  ;;  %v10554_v25 = vld [vmem:[#allocation71_spill] sm:$0xff] }
 0x3ed   : > { %v5645_v31 = vadd.f32 %v5962_v10, %v2975_v21  ;;  %v3019_v12 = vpop.f32.mrf.mxu0  ;;  %v5964_v10 = vld [vmem:[%s6342_s7 + $0x1f0] sm:$0xff] }
 0x3ee   : > { %v2624_v15 = vpop.f32.mrf.mxu1  ;;  %v2817_v3 = vpop.f32.mrf.mxu2  ;;  %v3020_v27 = vadd.f32 %v3019_v12, %v8763_v4 }
 0x3ef   : > { %5709 = vst [vmem:[%s8322_s23 + $0x1e0] sm:$0xff] %v5645_v31  ;;  %v2625_v59 = vadd.f32 %v2624_v15, %v2400_v57  ;;  %v2978_v29 = vpop.f32.mrf.mxu3  ;;  %v350_v57 = vld [vmem:[#allocation5 + $0x158] sm:$0xff] }
 0x3f0   : > { %3146 = vmatmul.f32.gmra.mxu0 %v10553_v24  ;;  %v8771_v31 = vand.u32 4294901760, %v350_v57 }
 0x3f1   : > { %v2818_v26 = vadd.f32 %v2817_v3, %v2625_v59  ;;  %3427 = vmatmul.f32.gmra.mxu1 %v10554_v25  ;;  %v10557_v3 = vld [vmem:[#allocation85_spill] sm:$0xff] }
 0x3f2   : > { %3835 = vmatmul.f32.gmra.mxu3 %v10555_v8  ;;  %4304 = vmatpush.msra.mxu2 %v8771_v31  ;;  %v8776_v12 = vsub.f32 %v350_v57, %v8771_v31  ;;  %v10560_v8 = vld [vmem:[#allocation82_spill] sm:$0xff]  ;;  %v10561_v57 = vld [vmem:[#allocation80_spill] sm:$0xff] }
 0x3f3   : > { %v2979_v21 = vadd.f32 %v2978_v29, %v2818_v26  ;;  %3625 = vmatmul.f32.gmra.mxu2 %v10556_v7  ;;  %5027 = vmatpush.msrb.mxu1 %v8771_v31  ;;  %v10558_v29 = vld [vmem:[#allocation75_spill] sm:$0xff] }
 0x3f4   : > { %4829 = vmatpush.msrb.mxu0 %v8776_v12 }
 0x3f5   : > { %v5647_v16 = vadd.f32 %v5964_v10, %v2979_v21  ;;  %v3027_v15 = vpop.f32.mrf.mxu0  ;;  %v10013_v21 = vand.u32 4294901760, %v8776_v12 }
 0x3f6   : > { %v3368_v0 = vpop.f32.mrf.mxu1  ;;  %v3546_v2 = vpop.f32.mrf.mxu2 }
 0x3f7   : > { %5711 = vst [vmem:[%s8322_s23 + $0x1f0] sm:$0xff] %v5647_v16  ;;  %v3369_v59 = vadd.f32 %v3368_v0, %v3020_v27  ;;  %v3740_v24 = vpop.f32.mrf.mxu3  ;;  %v3028_v0 = vadd.f32 %v3027_v15, %v8763_v4  ;;  %v4635_v7 = vsub.f32 %v8776_v12, %v10013_v21  ;;  %v10563_v15 = vld [vmem:[#allocation79_spill] sm:$0xff]  ;;  %v10566_v21 = vld [vmem:[#allocation84_spill] sm:$0xff] }
 0x3f8   : > { %3154 = vmatmul.f32.gmra.mxu0 %v10557_v3 }
 0x3f9   : > { %v3547_v26 = vadd.f32 %v3546_v2, %v3369_v59  ;;  %3431 = vmatmul.f32.gmra.mxu1 %v10558_v29  ;;  %v4636_v10 = vand.u32 4294901760, %v4635_v7  ;;  %v348_v7 = vld [vmem:[#allocation5 + $0x148] sm:$0xff]  ;;  %v10602_v29 = vld [vmem:[#allocation130_spill] sm:$0xff] }
 0x3fa   : > { %3841 = vmatmul.f32.gmra.mxu3 %v10560_v8  ;;  %v10565_v8 = vld [vmem:[#allocation86_spill] sm:$0xff] }
 0x3fb   : > { %v8784_v27 = vadd.f32 %v3740_v24, %v3547_v26  ;;  %3630 = vmatmul.f32.gmra.mxu2 %v10561_v57  ;;  %4637 = vmatpush.msra.mxu3 %v4636_v10  ;;  %v8798_v57 = vand.u32 4294901760, %v348_v7 }
 0x3fd   : > { %10559 = vst [vmem:[#allocation233_spill] sm:$0xff] %v8784_v27  ;;  %v3035_v16 = vpop.f32.mrf.mxu0  ;;  %4306 = vmatpush.msra.mxu2 %v8798_v57  ;;  %5029 = vmatpush.msrb.mxu1 %v8798_v57 }
 0x3fe   : > { %v3372_v59 = vpop.f32.mrf.mxu1  ;;  %v3551_v3 = vpop.f32.mrf.mxu2  ;;  %v3036_v24 = vadd.f32 %v3035_v16, %v8763_v4  ;;  %v10568_v16 = vld [vmem:[#allocation83_spill] sm:$0xff] }
 0x3ff   : > { %v3373_v2 = vadd.f32 %v3372_v59, %v3028_v0  ;;  %v3746_v17 = vpop.f32.mrf.mxu3 }
 0x400   : > { %3162 = vmatmul.f32.gmra.mxu0 %v10562_v35  ;;  %v8802_v35 = vsub.f32 %v348_v7, %v8798_v57 }
 0x401   : > { %v3552_v30 = vadd.f32 %v3551_v3, %v3373_v2  ;;  %3435 = vmatmul.f32.gmra.mxu1 %v10563_v15  ;;  %v10592_v15 = vld [vmem:[#allocation120_spill] sm:$0xff] }
 0x402   : > { %3847 = vmatmul.f32.gmra.mxu3 %v10565_v8  ;;  %4832 = vmatpush.msrb.mxu0 %v8802_v35  ;;  %v10570_v8 = vld [vmem:[#allocation91_spill] sm:$0xff] }
 0x403   : > { %v8794_v26 = vadd.f32 %v3746_v17, %v3552_v30  ;;  %3635 = vmatmul.f32.gmra.mxu2 %v10566_v21  ;;  %v10567_v17 = vld [vmem:[#allocation95_spill] sm:$0xff]  ;;  %v10021_v21 = vand.u32 4294901760, %v8802_v35 }
 0x405   : > { %10564 = vst [vmem:[#allocation237_spill] sm:$0xff] %v8794_v26  ;;  %v3043_v0 = vpop.f32.mrf.mxu0  ;;  %v4641_v7 = vsub.f32 %v8802_v35, %v10021_v21  ;;  %v10576_v21 = vld [vmem:[#allocation93_spill] sm:$0xff] }
 0x406   : > { %v3376_v59 = vpop.f32.mrf.mxu1  ;;  %v3556_v10 = vpop.f32.mrf.mxu2  ;;  %v3044_v3 = vadd.f32 %v3043_v0, %v8763_v4  ;;  %v10573_v0 = vld [vmem:[#allocation87_spill] sm:$0xff] }
 0x407   : > { %v3377_v19 = vadd.f32 %v3376_v59, %v3036_v24  ;;  %v3752_v2 = vpop.f32.mrf.mxu3  ;;  %v10571_v59 = vld [vmem:[#allocation88_spill] sm:$0xff] }
 0x408   : > { %3170 = vmatmul.f32.gmra.mxu0 %v10567_v17 }
 0x409   : > { %v3557_v30 = vadd.f32 %v3556_v10, %v3377_v19  ;;  %3439 = vmatmul.f32.gmra.mxu1 %v10568_v16  ;;  %v4642_v19 = vand.u32 4294901760, %v4641_v7  ;;  %v346_v7 = vld [vmem:[#allocation5 + $0x138] sm:$0xff] }
 0x40a   : > { %3853 = vmatmul.f32.gmra.mxu3 %v10570_v8  ;;  %v10575_v8 = vld [vmem:[#allocation96_spill] sm:$0xff]  ;;  %v10582_v16 = vld [vmem:[#allocation110_spill] sm:$0xff] }
 0x40b   : > { %v8810_v24 = vadd.f32 %v3752_v2, %v3557_v30  ;;  %3640 = vmatmul.f32.gmra.mxu2 %v10571_v59  ;;  %4643 = vmatpush.msra.mxu3 %v4642_v19  ;;  %v8824_v59 = vand.u32 4294901760, %v346_v7 }
 0x40d   : > { %10569 = vst [vmem:[#allocation241_spill] sm:$0xff] %v8810_v24  ;;  %v3051_v10 = vpop.f32.mrf.mxu0  ;;  %4308 = vmatpush.msra.mxu2 %v8824_v59  ;;  %5031 = vmatpush.msrb.mxu1 %v8824_v59 }
 0x40e   : > { %v3380_v17 = vpop.f32.mrf.mxu1  ;;  %v3561_v11 = vpop.f32.mrf.mxu2  ;;  %v3052_v2 = vadd.f32 %v3051_v10, %v8763_v4 }
 0x40f   : > { %v3381_v14 = vadd.f32 %v3380_v17, %v3044_v3  ;;  %v3758_v42 = vpop.f32.mrf.mxu3 }
 0x410   : > { %3178 = vmatmul.f32.gmra.mxu0 %v10572_v55 }
 0x411   : > { %v3562_v62 = vadd.f32 %v3561_v11, %v3381_v14  ;;  %3443 = vmatmul.f32.gmra.mxu1 %v10573_v0  ;;  %v8828_v14 = vsub.f32 %v346_v7, %v8824_v59 }
 0x412   : > { %3859 = vmatmul.f32.gmra.mxu3 %v10575_v8  ;;  %v10580_v8 = vld [vmem:[#allocation101_spill] sm:$0xff] }
 0x413   : > { %v8820_v30 = vadd.f32 %v3758_v42, %v3562_v62  ;;  %3645 = vmatmul.f32.gmra.mxu2 %v10576_v21  ;;  %v10577_v62 = vld [vmem:[#allocation105_spill] sm:$0xff]  ;;  %v10578_v42 = vld [vmem:[#allocation92_spill] sm:$0xff]  ;;  %v10023_v21 = vand.u32 4294901760, %v8828_v14  ;;  %4835 = vmatpush.msrb.mxu0 %v8828_v14 }
 0x415   : > { %10574 = vst [vmem:[#allocation245_spill] sm:$0xff] %v8820_v30  ;;  %v3059_v3 = vpop.f32.mrf.mxu0  ;;  %v4647_v7 = vsub.f32 %v8828_v14, %v10023_v21  ;;  %v10586_v21 = vld [vmem:[#allocation103_spill] sm:$0xff] }
 0x416   : > { %v3384_v17 = vpop.f32.mrf.mxu1  ;;  %v3566_v19 = vpop.f32.mrf.mxu2  ;;  %v3060_v10 = vadd.f32 %v3059_v3, %v8763_v4  ;;  %v10583_v3 = vld [vmem:[#allocation97_spill] sm:$0xff] }
 0x417   : > { %v3385_v45 = vadd.f32 %v3384_v17, %v3052_v2  ;;  %v3764_v11 = vpop.f32.mrf.mxu3  ;;  %v10581_v17 = vld [vmem:[#allocation98_spill] sm:$0xff] }
 0x418   : > { %3186 = vmatmul.f32.gmra.mxu0 %v10577_v62 }
 0x419   : > { %v3567_v55 = vadd.f32 %v3566_v19, %v3385_v45  ;;  %3447 = vmatmul.f32.gmra.mxu1 %v10578_v42  ;;  %v4648_v45 = vand.u32 4294901760, %v4647_v7  ;;  %v344_v7 = vld [vmem:[#allocation5 + $0x128] sm:$0xff] }
 0x41a   : > { %3865 = vmatmul.f32.gmra.mxu3 %v10580_v8  ;;  %v10585_v8 = vld [vmem:[#allocation106_spill] sm:$0xff] }
 0x41b   : > { %v8836_v2 = vadd.f32 %v3764_v11, %v3567_v55  ;;  %3650 = vmatmul.f32.gmra.mxu2 %v10581_v17  ;;  %4649 = vmatpush.msra.mxu3 %v4648_v45  ;;  %v8850_v17 = vand.u32 4294901760, %v344_v7 }
 0x41d   : > { %10579 = vst [vmem:[#allocation249_spill] sm:$0xff] %v8836_v2  ;;  %v3067_v19 = vpop.f32.mrf.mxu0  ;;  %4310 = vmatpush.msra.mxu2 %v8850_v17  ;;  %5033 = vmatpush.msrb.mxu1 %v8850_v17 }
 0x41e   : > { %v3388_v62 = vpop.f32.mrf.mxu1  ;;  %v3571_v30 = vpop.f32.mrf.mxu2  ;;  %v3068_v11 = vadd.f32 %v3067_v19, %v8763_v4 }
 0x41f   : > { %v3389_v42 = vadd.f32 %v3388_v62, %v3060_v10  ;;  %v3770_v0 = vpop.f32.mrf.mxu3 }
 0x420   : > { %3194 = vmatmul.f32.gmra.mxu0 %v10582_v16  ;;  %v8854_v16 = vsub.f32 %v344_v7, %v8850_v17 }
 0x421   : > { %v3572_v24 = vadd.f32 %v3571_v30, %v3389_v42  ;;  %3451 = vmatmul.f32.gmra.mxu1 %v10583_v3  ;;  %v10588_v42 = vld [vmem:[#allocation102_spill] sm:$0xff] }
 0x422   : > { %3871 = vmatmul.f32.gmra.mxu3 %v10585_v8  ;;  %4838 = vmatpush.msrb.mxu0 %v8854_v16  ;;  %v10590_v8 = vld [vmem:[#allocation111_spill] sm:$0xff] }
 0x423   : > { %v8846_v55 = vadd.f32 %v3770_v0, %v3572_v24  ;;  %3655 = vmatmul.f32.gmra.mxu2 %v10586_v21  ;;  %v10587_v0 = vld [vmem:[#allocation115_spill] sm:$0xff]  ;;  %v10024_v21 = vand.u32 4294901760, %v8854_v16 }
 0x425   : > { %10584 = vst [vmem:[#allocation253_spill] sm:$0xff] %v8846_v55  ;;  %v3075_v10 = vpop.f32.mrf.mxu0  ;;  %v4653_v7 = vsub.f32 %v8854_v16, %v10024_v21  ;;  %v10596_v21 = vld [vmem:[#allocation113_spill] sm:$0xff] }
 0x426   : > { %v3392_v62 = vpop.f32.mrf.mxu1  ;;  %v3576_v45 = vpop.f32.mrf.mxu2  ;;  %v3076_v19 = vadd.f32 %v3075_v10, %v8763_v4  ;;  %v10593_v10 = vld [vmem:[#allocation107_spill] sm:$0xff] }
 0x427   : > { %v3393_v2 = vadd.f32 %v3392_v62, %v3068_v11  ;;  %v3776_v30 = vpop.f32.mrf.mxu3  ;;  %v10591_v62 = vld [vmem:[#allocation108_spill] sm:$0xff] }
 0x428   : > { %3202 = vmatmul.f32.gmra.mxu0 %v10587_v0 }
 0x429   : > { %v3577_v24 = vadd.f32 %v3576_v45, %v3393_v2  ;;  %3455 = vmatmul.f32.gmra.mxu1 %v10588_v42  ;;  %v4654_v2 = vand.u32 4294901760, %v4653_v7  ;;  %v342_v7 = vld [vmem:[#allocation5 + $0x118] sm:$0xff] }
 0x42a   : > { %3877 = vmatmul.f32.gmra.mxu3 %v10590_v8  ;;  %v10595_v8 = vld [vmem:[#allocation116_spill] sm:$0xff] }
 0x42b   : > { %v8862_v11 = vadd.f32 %v3776_v30, %v3577_v24  ;;  %3660 = vmatmul.f32.gmra.mxu2 %v10591_v62  ;;  %4655 = vmatpush.msra.mxu3 %v4654_v2  ;;  %v8876_v62 = vand.u32 4294901760, %v342_v7 }
 0x42d   : > { %10589 = vst [vmem:[#allocation257_spill] sm:$0xff] %v8862_v11  ;;  %v3083_v45 = vpop.f32.mrf.mxu0  ;;  %4312 = vmatpush.msra.mxu2 %v8876_v62  ;;  %5035 = vmatpush.msrb.mxu1 %v8876_v62 }
 0x42e   : > { %v3396_v0 = vpop.f32.mrf.mxu1  ;;  %v3581_v55 = vpop.f32.mrf.mxu2  ;;  %v3084_v30 = vadd.f32 %v3083_v45, %v8763_v4 }
 0x42f   : > { %v3397_v42 = vadd.f32 %v3396_v0, %v3076_v19  ;;  %v3782_v3 = vpop.f32.mrf.mxu3 }
 0x430   : > { %3210 = vmatmul.f32.gmra.mxu0 %v10592_v15  ;;  %v8880_v15 = vsub.f32 %v342_v7, %v8876_v62 }
 0x431   : > { %v3582_v26 = vadd.f32 %v3581_v55, %v3397_v42  ;;  %3459 = vmatmul.f32.gmra.mxu1 %v10593_v10  ;;  %v10598_v42 = vld [vmem:[#allocation112_spill] sm:$0xff] }
 0x432   : > { %3883 = vmatmul.f32.gmra.mxu3 %v10595_v8  ;;  %4841 = vmatpush.msrb.mxu0 %v8880_v15  ;;  %v10600_v8 = vld [vmem:[#allocation121_spill] sm:$0xff] }
 0x433   : > { %v8872_v24 = vadd.f32 %v3782_v3, %v3582_v26  ;;  %3665 = vmatmul.f32.gmra.mxu2 %v10596_v21  ;;  %v10597_v3 = vld [vmem:[#allocation125_spill] sm:$0xff]  ;;  %v10025_v21 = vand.u32 4294901760, %v8880_v15 }
 0x435   : > { %10594 = vst [vmem:[#allocation261_spill] sm:$0xff] %v8872_v24  ;;  %v3091_v19 = vpop.f32.mrf.mxu0  ;;  %v4659_v7 = vsub.f32 %v8880_v15, %v10025_v21  ;;  %v10606_v21 = vld [vmem:[#allocation123_spill] sm:$0xff] }
 0x436   : > { %v3400_v0 = vpop.f32.mrf.mxu1  ;;  %v3586_v2 = vpop.f32.mrf.mxu2  ;;  %v3092_v45 = vadd.f32 %v3091_v19, %v8763_v4  ;;  %v10603_v19 = vld [vmem:[#allocation117_spill] sm:$0xff] }
 0x437   : > { %v3401_v11 = vadd.f32 %v3400_v0, %v3084_v30  ;;  %v3788_v55 = vpop.f32.mrf.mxu3  ;;  %v10601_v0 = vld [vmem:[#allocation118_spill] sm:$0xff] }
 0x438   : > { %3218 = vmatmul.f32.gmra.mxu0 %v10597_v3 }
 0x439   : > { %v3587_v26 = vadd.f32 %v3586_v2, %v3401_v11  ;;  %3463 = vmatmul.f32.gmra.mxu1 %v10598_v42  ;;  %v4660_v11 = vand.u32 4294901760, %v4659_v7  ;;  %v340_v7 = vld [vmem:[#allocation5 + $0x108] sm:$0xff] }
 0x43a   : > { %3889 = vmatmul.f32.gmra.mxu3 %v10600_v8  ;;  %v10605_v8 = vld [vmem:[#allocation126_spill] sm:$0xff] }
 0x43b   : > { %v8888_v30 = vadd.f32 %v3788_v55, %v3587_v26  ;;  %3670 = vmatmul.f32.gmra.mxu2 %v10601_v0  ;;  %4661 = vmatpush.msra.mxu3 %v4660_v11  ;;  %v8902_v0 = vand.u32 4294901760, %v340_v7 }
 0x43d   : > { %10599 = vst [vmem:[#allocation279_spill] sm:$0xff] %v8888_v30  ;;  %v3099_v2 = vpop.f32.mrf.mxu0  ;;  %4314 = vmatpush.msra.mxu2 %v8902_v0  ;;  %5037 = vmatpush.msrb.mxu1 %v8902_v0 }
 0x43e   : > { %v3404_v3 = vpop.f32.mrf.mxu1  ;;  %v3591_v24 = vpop.f32.mrf.mxu2  ;;  %v3100_v55 = vadd.f32 %v3099_v2, %v8763_v4 }
 0x43f   : > { %v3405_v42 = vadd.f32 %v3404_v3, %v3092_v45  ;;  %v3794_v10 = vpop.f32.mrf.mxu3 }
 0x440   : > { %3226 = vmatmul.f32.gmra.mxu0 %v10602_v29  ;;  %v8906_v29 = vsub.f32 %v340_v7, %v8902_v0 }
 0x441   : > { %v3592_v27 = vadd.f32 %v3591_v24, %v3405_v42  ;;  %3467 = vmatmul.f32.gmra.mxu1 %v10603_v19  ;;  %v10608_v42 = vld [vmem:[#allocation135_spill] sm:$0xff] }
 0x442   : > { %3895 = vmatmul.f32.gmra.mxu3 %v10605_v8  ;;  %v4664_v2 = vand.u32 4294901760, %v8906_v29  ;;  %4844 = vmatpush.msrb.mxu0 %v8906_v29 }
 0x443   : > { %v8898_v26 = vadd.f32 %v3794_v10, %v3592_v27  ;;  %3675 = vmatmul.f32.gmra.mxu2 %v10606_v21  ;;  %v10607_v27 = vand.u32 4294901760, %v8485_v63  ;;  %v10609_v21 = vld [vmem:[#allocation122_spill] sm:$0xff] }
 0x444   : > { %v4665_v63 = vsub.f32 %v8906_v29, %v4664_v2 }
 0x445   : > { %10604 = vst [vmem:[#allocation17_spill] sm:$0xff] %v8898_v26  ;;  %v3107_v45 = vpop.f32.mrf.mxu0  ;;  %5234 = vmatpush.msrb.mxu2 %v10607_v27  ;;  %v10613_v27 = vand.u32 4294901760, %v8566_v49  ;;  %v10617_v49 = vand.u32 4294901760, %v8620_v46 }
 0x446   : > { %v3408_v3 = vpop.f32.mrf.mxu1  ;;  %v3596_v11 = vpop.f32.mrf.mxu2  ;;  %v3108_v8 = vadd.f32 %v3107_v45, %v8763_v4  ;;  %v10614_v45 = vand.u32 4294901760, %v8594_v58  ;;  %v10619_v58 = vld [vmem:[#allocation133_spill] sm:$0xff] }
 0x447   : > { %v3409_v30 = vadd.f32 %v3408_v3, %v3100_v55  ;;  %v3800_v24 = vpop.f32.mrf.mxu3  ;;  %v10610_v55 = vand.u32 4294901760, %v8529_v13  ;;  %v10611_v3 = vld [vmem:[#allocation131_spill] sm:$0xff] }
 0x448   : > { %3234 = vmatmul.f32.gmra.mxu0 %v10608_v42 }
 0x449   : > { %v3597_v10 = vadd.f32 %v3596_v11, %v3409_v30  ;;  %3471 = vmatmul.f32.gmra.mxu1 %v10609_v21  ;;  %5238 = vmatpush.msrb.mxu2 %v10610_v55  ;;  %v10612_v30 = vld [vmem:[#allocation128_spill] sm:$0xff]  ;;  %v4666_v11 = vand.u32 4294901760, %v4665_v63 }
 0x44a   : > { %3901 = vmatmul.f32.gmra.mxu3 %v10611_v3  ;;  %v10616_v3 = vld [vmem:[#allocation127_spill] sm:$0xff] }
 0x44b   : > { %v8918_v7 = vadd.f32 %v3800_v24, %v3597_v10  ;;  %3680 = vmatmul.f32.gmra.mxu2 %v10612_v30  ;;  %4667 = vmatpush.msra.mxu3 %v4666_v11  ;;  %v10615_v10 = vld [vmem:[#allocation140_spill] sm:$0xff] }
 0x44c   : > { %5242 = vmatpush.msrb.mxu2 %v10613_v27  ;;  %v10618_v30 = vld [vmem:[#allocation136_spill] sm:$0xff] }
 0x44d   : > { %v3115_v13 = vpop.f32.mrf.mxu0  ;;  %5425 = vmatpush.msrb.mxu3 %v8477_v23  ;;  %v10620_v23 = vand.u32 4294901760, %v8646_v50 }
 0x44e   : > { %v3412_v42 = vpop.f32.mrf.mxu1  ;;  %v3601_v21 = vpop.f32.mrf.mxu2  ;;  %5246 = vmatpush.msrb.mxu2 %v10614_v45  ;;  %v10625_v45 = vld [vmem:[#allocation141_spill] sm:$0xff] }
 0x44f   : > { %v3413_v55 = vadd.f32 %v3412_v42, %v3108_v8  ;;  %v3806_v26 = vpop.f32.mrf.mxu3  ;;  %5427 = vmatpush.msrb.mxu3 %v8522_v51  ;;  %v3116_v8 = vadd.f32 %v3115_v13, %v8763_v4  ;;  %v10621_v13 = vand.u32 4294901760, %v8672_v54  ;;  %v10622_v42 = vld [vmem:[#allocation144_spill] sm:$0xff]  ;;  %v10626_v54 = vld [vmem:[#allocation138_spill] sm:$0xff] }
 0x450   : > { %3242 = vmatmul.f32.gmra.mxu0 %v10615_v10  ;;  %5250 = vmatpush.msrb.mxu2 %v10617_v49 }
 0x451   : > { %v3602_v24 = vadd.f32 %v3601_v21, %v3413_v55  ;;  %3475 = vmatmul.f32.gmra.mxu1 %v10616_v3  ;;  %5429 = vmatpush.msrb.mxu3 %v8560_v56  ;;  %v10623_v55 = vld [vmem:[#allocation132_spill] sm:$0xff]  ;;  %v10624_v56 = vand.u32 4294901760, %v8698_v34 }
 0x452   : > { %3907 = vmatmul.f32.gmra.mxu3 %v10618_v30  ;;  %5254 = vmatpush.msrb.mxu2 %v10620_v23  ;;  %v10630_v23 = vld [vmem:[#allocation137_spill] sm:$0xff] }
 0x453   : > { %v8936_v63 = vadd.f32 %v3806_v26, %v3602_v24  ;;  %3685 = vmatmul.f32.gmra.mxu2 %v10619_v58  ;;  %5431 = vmatpush.msrb.mxu3 %v8588_v1  ;;  %v10629_v58 = vld [vmem:[#allocation148_spill] sm:$0xff] }
 0x454   : > { %5258 = vmatpush.msrb.mxu2 %v10621_v13 }
 0x455   : > { %v3123_v21 = vpop.f32.mrf.mxu0  ;;  %5433 = vmatpush.msrb.mxu3 %v8614_v20  ;;  %v10627_v20 = vand.u32 4294901760, %v8724_v32 }
 0x456   : > { %v3416_v11 = vpop.f32.mrf.mxu1  ;;  %v3606_v46 = vpop.f32.mrf.mxu2  ;;  %5262 = vmatpush.msrb.mxu2 %v10624_v56  ;;  %v3124_v1 = vadd.f32 %v3123_v21, %v8763_v4  ;;  %v10632_v21 = vld [vmem:[#allocation145_spill] sm:$0xff] }
 0x457   : > { %v3417_v51 = vadd.f32 %v3416_v11, %v3116_v8  ;;  %v3812_v27 = vpop.f32.mrf.mxu3  ;;  %5435 = vmatpush.msrb.mxu3 %v8640_v5  ;;  %v10628_v8 = vand.u32 4294901760, %v8748_v60  ;;  %v10633_v60 = vld [vmem:[#allocation143_spill] sm:$0xff]  ;;  %v10639_v56 = vld [vmem:[#allocation149_spill] sm:$0xff] }
 0x458   : > { %3250 = vmatmul.f32.gmra.mxu0 %v10622_v42  ;;  %5266 = vmatpush.msrb.mxu2 %v10627_v20  ;;  %v10637_v42 = vld [vmem:[#allocation142_spill] sm:$0xff] }
 0x459   : > { %v3607_v26 = vadd.f32 %v3606_v46, %v3417_v51  ;;  %3479 = vmatmul.f32.gmra.mxu1 %v10623_v55  ;;  %5437 = vmatpush.msrb.mxu3 %v8666_v28  ;;  %v10631_v28 = vand.u32 4294901760, %v8776_v12 }
 0x45a   : > { %3913 = vmatmul.f32.gmra.mxu3 %v10625_v45  ;;  %5270 = vmatpush.msrb.mxu2 %v10628_v8 }
 0x45b   : > { %v8953_v50 = vadd.f32 %v3812_v27, %v3607_v26  ;;  %3690 = vmatmul.f32.gmra.mxu2 %v10626_v54  ;;  %5439 = vmatpush.msrb.mxu3 %v8692_v39  ;;  %v10635_v27 = vand.u32 4294901760, %v8828_v14  ;;  %v10636_v26 = vld [vmem:[#allocation152_spill] sm:$0xff]  ;;  %v10640_v14 = vld [vmem:[#allocation147_spill] sm:$0xff] }
 0x45c   : > { %5274 = vmatpush.msrb.mxu2 %v10631_v28  ;;  %v10645_v28 = vld [vmem:[#allocation154_spill] sm:$0xff] }
 0x45d   : > { %v3131_v24 = vpop.f32.mrf.mxu0  ;;  %5441 = vmatpush.msrb.mxu3 %v8718_v53  ;;  %v10634_v53 = vand.u32 4294901760, %v8802_v35 }
 0x45e   : > { %v3420_v10 = vpop.f32.mrf.mxu1  ;;  %v3611_v34 = vpop.f32.mrf.mxu2  ;;  %v3132_v39 = vadd.f32 %v3131_v24, %v8763_v4  ;;  %v10642_v24 = vld [vmem:[#allocation146_spill] sm:$0xff] }
 0x45f   : > { %v3421_v5 = vadd.f32 %v3420_v10, %v3124_v1  ;;  %v3818_v49 = vpop.f32.mrf.mxu3  ;;  %5443 = vmatpush.msrb.mxu3 %v8743_v44  ;;  %5278 = vmatpush.msrb.mxu2 %v10634_v53 }
 0x460   : > { %3258 = vmatmul.f32.gmra.mxu0 %v10629_v58 }
 0x461   : > { %v3612_v30 = vadd.f32 %v3611_v34, %v3421_v5  ;;  %3483 = vmatmul.f32.gmra.mxu1 %v10630_v23  ;;  %5445 = vmatpush.msrb.mxu3 %v8771_v31  ;;  %v10638_v31 = vand.u32 4294901760, %v8854_v16  ;;  %v10644_v5 = vld [vmem:[#allocation156_spill] sm:$0xff] }
 0x462   : > { %3919 = vmatmul.f32.gmra.mxu3 %v10632_v21  ;;  %5282 = vmatpush.msrb.mxu2 %v10635_v27  ;;  %v10648_v27 = vld [vmem:[#allocation164_spill] sm:$0xff] }
 0x463   : > { %v8970_v32 = vadd.f32 %v3818_v49, %v3612_v30  ;;  %3695 = vmatmul.f32.gmra.mxu2 %v10633_v60  ;;  %5447 = vmatpush.msrb.mxu3 %v8798_v57 }
 0x464   : > { %5286 = vmatpush.msrb.mxu2 %v10638_v31 }
 0x465   : > { %v3139_v11 = vpop.f32.mrf.mxu0  ;;  %5449 = vmatpush.msrb.mxu3 %v8824_v59  ;;  %v10641_v59 = vand.u32 4294901760, %v8880_v15  ;;  %v10643_v15 = vld [vmem:[#allocation150_spill] sm:$0xff] }
 0x466   : > { %v3424_v51 = vpop.f32.mrf.mxu1  ;;  %v3616_v12 = vpop.f32.mrf.mxu2  ;;  %v3140_v57 = vadd.f32 %v3139_v11, %v8763_v4 }
 0x467   : > { %v3425_v44 = vadd.f32 %v3424_v51, %v3132_v39  ;;  %v3824_v46 = vpop.f32.mrf.mxu3  ;;  %5451 = vmatpush.msrb.mxu3 %v8850_v17  ;;  %5290 = vmatpush.msrb.mxu2 %v10641_v59  ;;  %v10646_v39 = vld [vmem:[#allocation160_spill] sm:$0xff] }
 0x468   : > { %3266 = vmatmul.f32.gmra.mxu0 %v10636_v26 }
 0x469   : > { %v3617_v13 = vadd.f32 %v3616_v12, %v3425_v44  ;;  %3487 = vmatmul.f32.gmra.mxu1 %v10637_v42  ;;  %5453 = vmatpush.msrb.mxu3 %v8876_v62 }
 0x46a   : > { %3925 = vmatmul.f32.gmra.mxu3 %v10639_v56  ;;  %5294 = vmatpush.msrb.mxu2 %v4664_v2 }
 0x46b   : > { %v8987_v35 = vadd.f32 %v3824_v46, %v3617_v13  ;;  %3700 = vmatmul.f32.gmra.mxu2 %v10640_v14  ;;  %5455 = vmatpush.msrb.mxu3 %v8902_v0  ;;  %v10647_v46 = vld [vmem:[#allocation158_spill] sm:$0xff] }
 0x46d   : > { %v3147_v1 = vpop.f32.mrf.mxu0 }
 0x46e   : > { %v3428_v45 = vpop.f32.mrf.mxu1  ;;  %v3621_v54 = vpop.f32.mrf.mxu2  ;;  %v3148_v62 = vadd.f32 %v3147_v1, %v8763_v4  ;;  %v10649_v1 = vld [vmem:[#allocation162_spill] sm:$0xff] }
 0x46f   : > { %v3429_v16 = vadd.f32 %v3428_v45, %v3140_v57  ;;  %v3830_v17 = vpop.f32.mrf.mxu3  ;;  %v10650_v45 = vld [vmem:[#allocation168_spill] sm:$0xff] }
 0x470   : > { %3994 = vmatmul.f32.vlgmr.msra.gmra.mxu0 %v10484_v6 }
 0x471   : > { %v3622_v20 = vadd.f32 %v3621_v54, %v3429_v16  ;;  %3491 = vmatmul.f32.gmra.mxu1 %v10642_v24 }
 0x472   : > { %4669 = vmatmul.f32.vlgmr.msra.gmra.mxu3 %v10643_v15 }
 0x473   : > { %v9000_v10 = vadd.f32 %v3830_v17, %v3622_v20  ;;  %4320 = vmatmul.f32.vlgmr.msra.gmra.mxu2 %v10644_v5 }
 0x475   : > { %v3155_v0 = vpop.f32.mrf.mxu0 }
 0x476   : > { %v3432_v34 = vpop.f32.mrf.mxu1  ;;  %v3626_v8 = vpop.f32.mrf.mxu2  ;;  %v3156_v2 = vadd.f32 %v3155_v0, %v8763_v4 }
 0x477   : > { %v3433_v49 = vadd.f32 %v3432_v34, %v3148_v62  ;;  %v3836_v30 = vpop.f32.mrf.mxu3  ;;  %v10651_v34 = vld [vmem:[#allocation166_spill] sm:$0xff] }
 0x478   : > { %3998 = vmatmul.f32.gmra.mxu0 %v10488_v37 }
 0x479   : > { %v3627_v29 = vadd.f32 %v3626_v8, %v3433_v49  ;;  %4155 = vmatmul.f32.vlgmr.msra.gmra.mxu1 %v10484_v6  ;;  %v10652_v49 = vld [vmem:[#allocation172_spill] sm:$0xff] }
 0x47a   : > { %4673 = vmatmul.f32.gmra.mxu3 %v10645_v28 }
 0x47b   : > { %v9007_v58 = vadd.f32 %v3836_v30, %v3627_v29  ;;  %4328 = vmatmul.f32.gmra.mxu2 %v10646_v39 }
 0x47d   : > { %v3163_v21 = vpop.f32.mrf.mxu0 }
 0x47e   : > { %v3436_v60 = vpop.f32.mrf.mxu1  ;;  %v3631_v11 = vpop.f32.mrf.mxu2  ;;  %v3164_v6 = vadd.f32 %v3163_v21, %v8763_v4 }
 0x47f   : > { %v3437_v53 = vadd.f32 %v3436_v60, %v3156_v2  ;;  %v3842_v51 = vpop.f32.mrf.mxu3 }
 0x480   : > { %4002 = vmatmul.f32.gmra.mxu0 %v10492_v52 }
 0x481   : > { %v3632_v44 = vadd.f32 %v3631_v11, %v3437_v53  ;;  %4159 = vmatmul.f32.gmra.mxu1 %v10488_v37  ;;  %v10653_v53 = vld [vmem:[#allocation170_spill] sm:$0xff]  ;;  %v10654_v11 = vld [vmem:[#allocation176_spill] sm:$0xff] }
 0x482   : > { %4677 = vmatmul.f32.gmra.mxu3 %v10647_v46 }
 0x483   : > { %v9014_v12 = vadd.f32 %v3842_v51, %v3632_v44  ;;  %4336 = vmatmul.f32.gmra.mxu2 %v10648_v27 }
 0x485   : > { %v3171_v13 = vpop.f32.mrf.mxu0 }
 0x486   : > { %v3440_v26 = vpop.f32.mrf.mxu1  ;;  %v3636_v57 = vpop.f32.mrf.mxu2  ;;  %v3172_v37 = vadd.f32 %v3171_v13, %v8763_v4 }
 0x487   : > { %v3441_v31 = vadd.f32 %v3440_v26, %v3164_v6  ;;  %v3848_v56 = vpop.f32.mrf.mxu3 }
 0x488   : > { %4006 = vmatmul.f32.gmra.mxu0 %v10496_v18 }
 0x489   : > { %v3637_v14 = vadd.f32 %v3636_v57, %v3441_v31  ;;  %4163 = vmatmul.f32.gmra.mxu1 %v10492_v52  ;;  %v10655_v57 = vld [vmem:[#allocation174_spill] sm:$0xff] }
 0x48a   : > { %4681 = vmatmul.f32.gmra.mxu3 %v10649_v1 }
 0x48b   : > { %v9021_v59 = vadd.f32 %v3848_v56, %v3637_v14  ;;  %4344 = vmatmul.f32.gmra.mxu2 %v10650_v45  ;;  %v10656_v56 = vld [vmem:[#allocation180_spill] sm:$0xff] }
 0x48d   : > { %v3179_v16 = vpop.f32.mrf.mxu0 }
 0x48e   : > { %v3444_v54 = vpop.f32.mrf.mxu1  ;;  %v3641_v20 = vpop.f32.mrf.mxu2  ;;  %v3180_v52 = vadd.f32 %v3179_v16, %v8763_v4 }
 0x48f   : > { %v3445_v17 = vadd.f32 %v3444_v54, %v3172_v37  ;;  %v3854_v62 = vpop.f32.mrf.mxu3 }
 0x490   : > { %4010 = vmatmul.f32.gmra.mxu0 %v10500_v61 }
 0x491   : > { %v3642_v5 = vadd.f32 %v3641_v20, %v3445_v17  ;;  %4167 = vmatmul.f32.gmra.mxu1 %v10496_v18 }
 0x492   : > { %4685 = vmatmul.f32.gmra.mxu3 %v10651_v34 }
 0x493   : > { %v9028_v0 = vadd.f32 %v3854_v62, %v3642_v5  ;;  %4352 = vmatmul.f32.gmra.mxu2 %v10652_v49  ;;  %v10657_v62 = vld [vmem:[#allocation178_spill] sm:$0xff]  ;;  %v10658_v5 = vld [vmem:[#allocation184_spill] sm:$0xff] }
 0x495   : > { %v3187_v8 = vpop.f32.mrf.mxu0 }
 0x496   : > { %v3448_v30 = vpop.f32.mrf.mxu1  ;;  %v3646_v2 = vpop.f32.mrf.mxu2  ;;  %v3188_v18 = vadd.f32 %v3187_v8, %v8763_v4 }
 0x497   : > { %v3449_v29 = vadd.f32 %v3448_v30, %v3180_v52  ;;  %v3860_v39 = vpop.f32.mrf.mxu3 }
 0x498   : > { %4014 = vmatmul.f32.gmra.mxu0 %v10504_v40 }
 0x499   : > { %v3647_v21 = vadd.f32 %v3646_v2, %v3449_v29  ;;  %4171 = vmatmul.f32.gmra.mxu1 %v10500_v61 }
 0x49a   : > { %4689 = vmatmul.f32.gmra.mxu3 %v10653_v53 }
 0x49b   : > { %v9035_v60 = vadd.f32 %v3860_v39, %v3647_v21  ;;  %4360 = vmatmul.f32.gmra.mxu2 %v10654_v11  ;;  %v10659_v21 = vld [vmem:[#allocation182_spill] sm:$0xff] }
 0x49d   : > { %v3195_v51 = vpop.f32.mrf.mxu0 }
 0x49e   : > { %v3452_v44 = vpop.f32.mrf.mxu1  ;;  %v3651_v27 = vpop.f32.mrf.mxu2  ;;  %v3196_v61 = vadd.f32 %v3195_v51, %v8763_v4 }
 0x49f   : > { %v3453_v6 = vadd.f32 %v3452_v44, %v3188_v18  ;;  %v3866_v13 = vpop.f32.mrf.mxu3  ;;  %v10660_v18 = vld [vmem:[#allocation188_spill] sm:$0xff] }
 0x4a0   : > { %4018 = vmatmul.f32.gmra.mxu0 %v10509_v41 }
 0x4a1   : > { %v3652_v26 = vadd.f32 %v3651_v27, %v3453_v6  ;;  %4175 = vmatmul.f32.gmra.mxu1 %v10504_v40 }
 0x4a2   : > { %4693 = vmatmul.f32.gmra.mxu3 %v10655_v57 }
 0x4a3   : > { %v9042_v31 = vadd.f32 %v3866_v13, %v3652_v26  ;;  %4368 = vmatmul.f32.gmra.mxu2 %v10656_v56  ;;  %v10662_v56 = vld [vmem:[#allocation192_spill] sm:$0xff] }
 0x4a5   : > { %v3203_v14 = vpop.f32.mrf.mxu0 }
 0x4a6   : > { %v3456_v37 = vpop.f32.mrf.mxu1  ;;  %v3656_v16 = vpop.f32.mrf.mxu2  ;;  %v3204_v40 = vadd.f32 %v3203_v14, %v8763_v4 }
 0x4a7   : > { %v3457_v45 = vadd.f32 %v3456_v37, %v3196_v61  ;;  %v3872_v54 = vpop.f32.mrf.mxu3  ;;  %v10661_v61 = vld [vmem:[#allocation186_spill] sm:$0xff] }
 0x4a8   : > { %4022 = vmatmul.f32.gmra.mxu0 %v10514_v43 }
 0x4a9   : > { %v3657_v17 = vadd.f32 %v3656_v16, %v3457_v45  ;;  %4179 = vmatmul.f32.gmra.mxu1 %v10509_v41 }
 0x4aa   : > { %4697 = vmatmul.f32.gmra.mxu3 %v10657_v62 }
 0x4ab   : > { %v9049_v20 = vadd.f32 %v3872_v54, %v3657_v17  ;;  %4376 = vmatmul.f32.gmra.mxu2 %v10658_v5  ;;  %v10663_v5 = vld [vmem:[#allocation190_spill] sm:$0xff] }
 0x4ad   : > { %v3211_v52 = vpop.f32.mrf.mxu0 }
 0x4ae   : > { %v3460_v49 = vpop.f32.mrf.mxu1  ;;  %v3661_v30 = vpop.f32.mrf.mxu2  ;;  %v3212_v41 = vadd.f32 %v3211_v52, %v8763_v4  ;;  %v10664_v52 = vld [vmem:[#allocation197_spill] sm:$0xff] }
 0x4af   : > { %v3461_v8 = vadd.f32 %v3460_v49, %v3204_v40  ;;  %v3878_v29 = vpop.f32.mrf.mxu3 }
 0x4b0   : > { %4026 = vmatmul.f32.gmra.mxu0 %v10519_v36 }
 0x4b1   : > { %v3662_v2 = vadd.f32 %v3661_v30, %v3461_v8  ;;  %4183 = vmatmul.f32.gmra.mxu1 %v10514_v43 }
 0x4b2   : > { %4701 = vmatmul.f32.gmra.mxu3 %v10659_v21 }
 0x4b3   : > { %v9056_v39 = vadd.f32 %v3878_v29, %v3662_v2  ;;  %4384 = vmatmul.f32.gmra.mxu2 %v10660_v18 }
 0x4b5   : > { %v3219_v11 = vpop.f32.mrf.mxu0 }
 0x4b6   : > { %v3464_v51 = vpop.f32.mrf.mxu1  ;;  %v3666_v6 = vpop.f32.mrf.mxu2  ;;  %v3220_v43 = vadd.f32 %v3219_v11, %v8763_v4  ;;  %v10665_v11 = vld [vmem:[#allocation194_spill] sm:$0xff] }
 0x4b7   : > { %v3465_v44 = vadd.f32 %v3464_v51, %v3212_v41  ;;  %v3884_v27 = vpop.f32.mrf.mxu3  ;;  %v10666_v51 = vld [vmem:[#allocation202_spill] sm:$0xff] }
 0x4b8   : > { %4030 = vmatmul.f32.gmra.mxu0 %v10524_v48 }
 0x4b9   : > { %v3667_v13 = vadd.f32 %v3666_v6, %v3465_v44  ;;  %4187 = vmatmul.f32.gmra.mxu1 %v10519_v36 }
 0x4ba   : > { %4705 = vmatmul.f32.gmra.mxu3 %v10661_v61 }
 0x4bb   : > { %v9063_v26 = vadd.f32 %v3884_v27, %v3667_v13  ;;  %4392 = vmatmul.f32.gmra.mxu2 %v10662_v56 }
 0x4bd   : > { %v3227_v14 = vpop.f32.mrf.mxu0 }
 0x4be   : > { %v3468_v37 = vpop.f32.mrf.mxu1  ;;  %v3671_v16 = vpop.f32.mrf.mxu2  ;;  %v3228_v36 = vadd.f32 %v3227_v14, %v8763_v4 }
 0x4bf   : > { %v3469_v45 = vadd.f32 %v3468_v37, %v3220_v43  ;;  %v3890_v54 = vpop.f32.mrf.mxu3  ;;  %v10667_v37 = vld [vmem:[#allocation199_spill] sm:$0xff] }
 0x4c0   : > { %4034 = vmatmul.f32.gmra.mxu0 %v10529_v38 }
 0x4c1   : > { %v3672_v17 = vadd.f32 %v3671_v16, %v3469_v45  ;;  %4191 = vmatmul.f32.gmra.mxu1 %v10524_v48  ;;  %v10668_v45 = vld [vmem:[#allocation207_spill] sm:$0xff] }
 0x4c2   : > { %4709 = vmatmul.f32.gmra.mxu3 %v10663_v5 }
 0x4c3   : > { %v9070_v40 = vadd.f32 %v3890_v54, %v3672_v17  ;;  %4400 = vmatmul.f32.gmra.mxu2 %v10664_v52 }
 0x4c5   : > { %v3235_v49 = vpop.f32.mrf.mxu0 }
 0x4c6   : > { %v3472_v8 = vpop.f32.mrf.mxu1  ;;  %v3676_v29 = vpop.f32.mrf.mxu2  ;;  %v3236_v48 = vadd.f32 %v3235_v49, %v8763_v4 }
 0x4c7   : > { %v3473_v30 = vadd.f32 %v3472_v8, %v3228_v36  ;;  %v3896_v2 = vpop.f32.mrf.mxu3 }
 0x4c8   : > { %4038 = vmatmul.f32.gmra.mxu0 %v10534_v9 }
 0x4c9   : > { %v3677_v41 = vadd.f32 %v3676_v29, %v3473_v30  ;;  %4195 = vmatmul.f32.gmra.mxu1 %v10529_v38  ;;  %v10669_v30 = vld [vmem:[#allocation204_spill] sm:$0xff] }
 0x4ca   : > { %4713 = vmatmul.f32.gmra.mxu3 %v10665_v11  ;;  %v10670_v29 = vld [vmem:[#allocation212_spill] sm:$0xff] }
 0x4cb   : > { %v9077_v18 = vadd.f32 %v3896_v2, %v3677_v41  ;;  %4408 = vmatmul.f32.gmra.mxu2 %v10666_v51 }
 0x4cd   : > { %v3243_v44 = vpop.f32.mrf.mxu0 }
 0x4ce   : > { %v3476_v6 = vpop.f32.mrf.mxu1  ;;  %v3681_v13 = vpop.f32.mrf.mxu2  ;;  %v3244_v38 = vadd.f32 %v3243_v44, %v8763_v4 }
 0x4cf   : > { %v3477_v27 = vadd.f32 %v3476_v6, %v3236_v48  ;;  %v3902_v43 = vpop.f32.mrf.mxu3 }
 0x4d0   : > { %4042 = vmatmul.f32.gmra.mxu0 %v10539_v33 }
 0x4d1   : > { %v3682_v56 = vadd.f32 %v3681_v13, %v3477_v27  ;;  %4199 = vmatmul.f32.gmra.mxu1 %v10534_v9  ;;  %v10671_v13 = vld [vmem:[#allocation209_spill] sm:$0xff] }
 0x4d2   : > { %4717 = vmatmul.f32.gmra.mxu3 %v10667_v37 }
 0x4d3   : > { %v9084_v14 = vadd.f32 %v3902_v43, %v3682_v56  ;;  %4416 = vmatmul.f32.gmra.mxu2 %v10668_v45  ;;  %v10672_v43 = vld [vmem:[#allocation217_spill] sm:$0xff] }
 0x4d5   : > { %v3251_v16 = vpop.f32.mrf.mxu0 }
 0x4d6   : > { %v3480_v54 = vpop.f32.mrf.mxu1  ;;  %v3686_v36 = vpop.f32.mrf.mxu2  ;;  %v3252_v9 = vadd.f32 %v3251_v16, %v8763_v4 }
 0x4d7   : > { %v3481_v17 = vadd.f32 %v3480_v54, %v3244_v38  ;;  %v3908_v52 = vpop.f32.mrf.mxu3 }
 0x4d8   : > { %4046 = vmatmul.f32.gmra.mxu0 %v10544_v22 }
 0x4d9   : > { %v3687_v49 = vadd.f32 %v3686_v36, %v3481_v17  ;;  %4203 = vmatmul.f32.gmra.mxu1 %v10539_v33 }
 0x4da   : > { %4721 = vmatmul.f32.gmra.mxu3 %v10669_v30 }
 0x4db   : > { %v9091_v8 = vadd.f32 %v3908_v52, %v3687_v49  ;;  %4424 = vmatmul.f32.gmra.mxu2 %v10670_v29  ;;  %v10673_v52 = vld [vmem:[#allocation214_spill] sm:$0xff] }
 0x4dc   : > { %v10674_v49 = vld [vmem:[#allocation222_spill] sm:$0xff] }
 0x4dd   : > { %v3259_v2 = vpop.f32.mrf.mxu0 }
 0x4de   : > { %v3484_v41 = vpop.f32.mrf.mxu1  ;;  %v3691_v51 = vpop.f32.mrf.mxu2  ;;  %v3260_v33 = vadd.f32 %v3259_v2, %v8763_v4 }
 0x4df   : > { %v3485_v48 = vadd.f32 %v3484_v41, %v3252_v9  ;;  %v3914_v44 = vpop.f32.mrf.mxu3 }
 0x4e0   : > { %4050 = vmatmul.f32.gmra.mxu0 %v10549_v47 }
 0x4e1   : > { %v3692_v6 = vadd.f32 %v3691_v51, %v3485_v48  ;;  %4207 = vmatmul.f32.gmra.mxu1 %v10544_v22 }
 0x4e2   : > { %4725 = vmatmul.f32.gmra.mxu3 %v10671_v13 }
 0x4e3   : > { %v9098_v27 = vadd.f32 %v3914_v44, %v3692_v6  ;;  %4432 = vmatmul.f32.gmra.mxu2 %v10672_v43  ;;  %v10675_v44 = vld [vmem:[#allocation75_spill] sm:$0xff] }
 0x4e5   : > { %v3267_v56 = vpop.f32.mrf.mxu0 }
 0x4e6   : > { %v3488_v38 = vpop.f32.mrf.mxu1  ;;  %v3696_v16 = vpop.f32.mrf.mxu2  ;;  %v3268_v22 = vadd.f32 %v3267_v56, %v8763_v4  ;;  %v10677_v4 = vld [vmem:[#allocation226_spill] sm:$0xff] }
 0x4e7   : > { %v3489_v45 = vadd.f32 %v3488_v38, %v3260_v33  ;;  %v3920_v54 = vpop.f32.mrf.mxu3  ;;  %v10678_v33 = vld [vmem:[#allocation233_spill] sm:$0xff] }
 0x4e8   : > { %4054 = vmatmul.f32.gmra.mxu0 %v10554_v25 }
 0x4e9   : > { %v3697_v17 = vadd.f32 %v3696_v16, %v3489_v45  ;;  %4211 = vmatmul.f32.gmra.mxu1 %v10549_v47  ;;  %v10676_v47 = vld [vmem:[#allocation219_spill] sm:$0xff] }
 0x4ea   : > { %4729 = vmatmul.f32.gmra.mxu3 %v10673_v52 }
 0x4eb   : > { %v9105_v36 = vadd.f32 %v3920_v54, %v3697_v17  ;;  %4440 = vmatmul.f32.gmra.mxu2 %v10674_v49 }
 0x4ed   : > { %v3995_v29 = vpop.f32.mrf.mxu0 }
 0x4ee   : > { %v3492_v9 = vpop.f32.mrf.mxu1  ;;  %v3701_v41 = vpop.f32.mrf.mxu2  ;;  %v3996_v43 = vadd.f32 %v3995_v29, %v10678_v33 }
 0x4ef   : > { %v3493_v2 = vadd.f32 %v3492_v9, %v3268_v22  ;;  %v3926_v48 = vpop.f32.mrf.mxu3  ;;  %v10679_v22 = vld [vmem:[#allocation79_spill] sm:$0xff]  ;;  %v10682_v9 = vld [vmem:[#allocation89_spill] sm:$0xff] }
 0x4f0   : > { %4058 = vmatmul.f32.gmra.mxu0 %v10675_v44 }
 0x4f1   : > { %v3702_v51 = vadd.f32 %v3701_v41, %v3493_v2  ;;  %4215 = vmatmul.f32.gmra.mxu1 %v10554_v25  ;;  %v10681_v25 = vld [vmem:[#allocation224_spill] sm:$0xff]  ;;  %v10683_v2 = vld [vmem:[#allocation237_spill] sm:$0xff] }
 0x4f2   : > { %4733 = vmatmul.f32.gmra.mxu3 %v10676_v47 }
 0x4f3   : > { %v9111_v6 = vadd.f32 %v3926_v48, %v3702_v51  ;;  %4448 = vmatmul.f32.gmra.mxu2 %v10677_v4 }
 0x4f5   : > { %v3999_v56 = vpop.f32.mrf.mxu0 }
 0x4f6   : > { %v4156_v38 = vpop.f32.mrf.mxu1  ;;  %v4321_v16 = vpop.f32.mrf.mxu2  ;;  %v4000_v41 = vadd.f32 %v3999_v56, %v10683_v2 }
 0x4f7   : > { %v4157_v45 = vadd.f32 %v4156_v38, %v3996_v43  ;;  %v4670_v54 = vpop.f32.mrf.mxu3  ;;  %v10684_v38 = vld [vmem:[#allocation83_spill] sm:$0xff] }
 0x4f8   : > { %4062 = vmatmul.f32.gmra.mxu0 %v10679_v22 }
 0x4f9   : > { %v4322_v17 = vadd.f32 %v4321_v16, %v4157_v45  ;;  %4219 = vmatmul.f32.gmra.mxu1 %v10675_v44  ;;  %v10686_v44 = vld [vmem:[#allocation228_spill] sm:$0xff]  ;;  %v10687_v16 = vld [vmem:[#allocation94_spill] sm:$0xff] }
 0x4fa   : > { %4737 = vmatmul.f32.gmra.mxu3 %v10681_v25 }
 0x4fb   : > { %v9118_v49 = vadd.f32 %v4670_v54, %v4322_v17  ;;  %4456 = vmatmul.f32.gmra.mxu2 %v10682_v9  ;;  %v10688_v54 = vld [vmem:[#allocation241_spill] sm:$0xff] }
 0x4fd   : > { %10680 = vst [vmem:[#allocation14_spill] sm:$0xff] %v9118_v49  ;;  %v4003_v48 = vpop.f32.mrf.mxu0  ;;  %v10689_v49 = vld [vmem:[#allocation87_spill] sm:$0xff] }
 0x4fe   : > { %v4160_v29 = vpop.f32.mrf.mxu1  ;;  %v4329_v4 = vpop.f32.mrf.mxu2  ;;  %v4004_v17 = vadd.f32 %v4003_v48, %v10688_v54 }
 0x4ff   : > { %v4161_v51 = vadd.f32 %v4160_v29, %v4000_v41  ;;  %v4674_v33 = vpop.f32.mrf.mxu3 }
 0x500   : > { %4066 = vmatmul.f32.gmra.mxu0 %v10684_v38 }
 0x501   : > { %v4330_v43 = vadd.f32 %v4329_v4, %v4161_v51  ;;  %4223 = vmatmul.f32.gmra.mxu1 %v10679_v22  ;;  %v10691_v22 = vld [vmem:[#allocation232_spill] sm:$0xff]  ;;  %v10692_v4 = vld [vmem:[#allocation99_spill] sm:$0xff] }
 0x502   : > { %4741 = vmatmul.f32.gmra.mxu3 %v10686_v44 }
 0x503   : > { %v9125_v45 = vadd.f32 %v4674_v33, %v4330_v43  ;;  %4464 = vmatmul.f32.gmra.mxu2 %v10687_v16  ;;  %v10693_v33 = vld [vmem:[#allocation245_spill] sm:$0xff] }
 0x505   : > { %10685 = vst [vmem:[#allocation13_spill] sm:$0xff] %v9125_v45  ;;  %v4007_v9 = vpop.f32.mrf.mxu0  ;;  %v10694_v45 = vld [vmem:[#allocation92_spill] sm:$0xff] }
 0x506   : > { %v4164_v56 = vpop.f32.mrf.mxu1  ;;  %v4337_v25 = vpop.f32.mrf.mxu2  ;;  %v4008_v43 = vadd.f32 %v4007_v9, %v10693_v33 }
 0x507   : > { %v4165_v2 = vadd.f32 %v4164_v56, %v4004_v17  ;;  %v4678_v41 = vpop.f32.mrf.mxu3 }
 0x508   : > { %4070 = vmatmul.f32.gmra.mxu0 %v10689_v49 }
 0x509   : > { %v4338_v29 = vadd.f32 %v4337_v25, %v4165_v2  ;;  %4227 = vmatmul.f32.gmra.mxu1 %v10684_v38  ;;  %v10696_v38 = vld [vmem:[#allocation236_spill] sm:$0xff] }
 0x50a   : > { %4745 = vmatmul.f32.gmra.mxu3 %v10691_v22  ;;  %v10697_v2 = vld [vmem:[#allocation104_spill] sm:$0xff] }
 0x50b   : > { %v9132_v51 = vadd.f32 %v4678_v41, %v4338_v29  ;;  %4472 = vmatmul.f32.gmra.mxu2 %v10692_v4  ;;  %v10698_v41 = vld [vmem:[#allocation249_spill] sm:$0xff] }
 0x50d   : > { %10690 = vst [vmem:[#allocation21_spill] sm:$0xff] %v9132_v51  ;;  %v4011_v16 = vpop.f32.mrf.mxu0  ;;  %v10699_v51 = vld [vmem:[#allocation97_spill] sm:$0xff] }
 0x50e   : > { %v4168_v48 = vpop.f32.mrf.mxu1  ;;  %v4345_v44 = vpop.f32.mrf.mxu2  ;;  %v4012_v29 = vadd.f32 %v4011_v16, %v10698_v41 }
 0x50f   : > { %v4169_v54 = vadd.f32 %v4168_v48, %v4008_v43  ;;  %v4682_v17 = vpop.f32.mrf.mxu3 }
 0x510   : > { %4074 = vmatmul.f32.gmra.mxu0 %v10694_v45 }
 0x511   : > { %v4346_v56 = vadd.f32 %v4345_v44, %v4169_v54  ;;  %4231 = vmatmul.f32.gmra.mxu1 %v10689_v49  ;;  %v10701_v49 = vld [vmem:[#allocation240_spill] sm:$0xff]  ;;  %v10702_v54 = vld [vmem:[#allocation109_spill] sm:$0xff] }
 0x512   : > { %4749 = vmatmul.f32.gmra.mxu3 %v10696_v38 }
 0x513   : > { %v9139_v25 = vadd.f32 %v4682_v17, %v4346_v56  ;;  %4480 = vmatmul.f32.gmra.mxu2 %v10697_v2  ;;  %v10703_v17 = vld [vmem:[#allocation253_spill] sm:$0xff] }
 0x515   : > { %10695 = vst [vmem:[#allocation12_spill] sm:$0xff] %v9139_v25  ;;  %v4015_v4 = vpop.f32.mrf.mxu0  ;;  %v10704_v25 = vld [vmem:[#allocation102_spill] sm:$0xff] }
 0x516   : > { %v4172_v9 = vpop.f32.mrf.mxu1  ;;  %v4353_v22 = vpop.f32.mrf.mxu2  ;;  %v4016_v56 = vadd.f32 %v4015_v4, %v10703_v17 }
 0x517   : > { %v4173_v33 = vadd.f32 %v4172_v9, %v4012_v29  ;;  %v4686_v43 = vpop.f32.mrf.mxu3 }
 0x518   : > { %4078 = vmatmul.f32.gmra.mxu0 %v10699_v51 }
 0x519   : > { %v4354_v48 = vadd.f32 %v4353_v22, %v4173_v33  ;;  %4235 = vmatmul.f32.gmra.mxu1 %v10694_v45  ;;  %v10706_v45 = vld [vmem:[#allocation244_spill] sm:$0xff]  ;;  %v10707_v33 = vld [vmem:[#allocation114_spill] sm:$0xff] }
 0x51a   : > { %4753 = vmatmul.f32.gmra.mxu3 %v10701_v49 }
 0x51b   : > { %v9146_v44 = vadd.f32 %v4686_v43, %v4354_v48  ;;  %4488 = vmatmul.f32.gmra.mxu2 %v10702_v54  ;;  %v10708_v43 = vld [vmem:[#allocation257_spill] sm:$0xff] }
 0x51d   : > { %10700 = vst [vmem:[#allocation18_spill] sm:$0xff] %v9146_v44  ;;  %v4019_v2 = vpop.f32.mrf.mxu0  ;;  %v10709_v44 = vld [vmem:[#allocation107_spill] sm:$0xff] }
 0x51e   : > { %v4176_v16 = vpop.f32.mrf.mxu1  ;;  %v4361_v38 = vpop.f32.mrf.mxu2  ;;  %v4020_v48 = vadd.f32 %v4019_v2, %v10708_v43 }
 0x51f   : > { %v4177_v41 = vadd.f32 %v4176_v16, %v4016_v56  ;;  %v4690_v29 = vpop.f32.mrf.mxu3 }
 0x520   : > { %4082 = vmatmul.f32.gmra.mxu0 %v10704_v25 }
 0x521   : > { %v4362_v9 = vadd.f32 %v4361_v38, %v4177_v41  ;;  %4239 = vmatmul.f32.gmra.mxu1 %v10699_v51  ;;  %v10710_v51 = vld [vmem:[#allocation248_spill] sm:$0xff]  ;;  %v10711_v41 = vld [vmem:[#allocation119_spill] sm:$0xff] }
 0x522   : > { %4757 = vmatmul.f32.gmra.mxu3 %v10706_v45 }
 0x523   : > { %v9153_v22 = vadd.f32 %v4690_v29, %v4362_v9  ;;  %4496 = vmatmul.f32.gmra.mxu2 %v10707_v33  ;;  %v10712_v29 = vld [vmem:[#allocation261_spill] sm:$0xff] }
 0x525   : > { %10705 = vst [vmem:[#allocation16_spill] sm:$0xff] %v9153_v22  ;;  %v4023_v54 = vpop.f32.mrf.mxu0  ;;  %v10713_v22 = vld [vmem:[#allocation112_spill] sm:$0xff] }
 0x526   : > { %v4180_v4 = vpop.f32.mrf.mxu1  ;;  %v4369_v49 = vpop.f32.mrf.mxu2  ;;  %v4024_v9 = vadd.f32 %v4023_v54, %v10712_v29 }
 0x527   : > { %v4181_v17 = vadd.f32 %v4180_v4, %v4020_v48  ;;  %v4694_v56 = vpop.f32.mrf.mxu3 }
 0x528   : > { %4086 = vmatmul.f32.gmra.mxu0 %v10709_v44 }
 0x529   : > { %v4370_v16 = vadd.f32 %v4369_v49, %v4181_v17  ;;  %4243 = vmatmul.f32.gmra.mxu1 %v10704_v25  ;;  %v10715_v25 = vld [vmem:[#allocation252_spill] sm:$0xff] }
 0x52a   : > { %4761 = vmatmul.f32.gmra.mxu3 %v10710_v51  ;;  %v10716_v17 = vld [vmem:[#allocation124_spill] sm:$0xff] }
 0x52b   : > { %v9160_v38 = vadd.f32 %v4694_v56, %v4370_v16  ;;  %4504 = vmatmul.f32.gmra.mxu2 %v10711_v41  ;;  %v10717_v56 = vld [vmem:[#allocation279_spill] sm:$0xff] }
 0x52d   : > { %v4027_v33 = vpop.f32.mrf.mxu0 }
 0x52e   : > { %v4184_v2 = vpop.f32.mrf.mxu1  ;;  %v4377_v45 = vpop.f32.mrf.mxu2  ;;  %v4028_v16 = vadd.f32 %v4027_v33, %v10717_v56 }
 0x52f   : > { %v4185_v43 = vadd.f32 %v4184_v2, %v4024_v9  ;;  %v4698_v48 = vpop.f32.mrf.mxu3 }
 0x530   : > { %4090 = vmatmul.f32.gmra.mxu0 %v10713_v22 }
 0x531   : > { %v4378_v4 = vadd.f32 %v4377_v45, %v4185_v43  ;;  %4247 = vmatmul.f32.gmra.mxu1 %v10709_v44  ;;  %v10718_v44 = vld [vmem:[#allocation256_spill] sm:$0xff]  ;;  %v10719_v43 = vld [vmem:[#allocation129_spill] sm:$0xff] }
 0x532   : > { %4765 = vmatmul.f32.gmra.mxu3 %v10715_v25 }
 0x533   : > { %v9167_v49 = vadd.f32 %v4698_v48, %v4378_v4  ;;  %4512 = vmatmul.f32.gmra.mxu2 %v10716_v17  ;;  %v10720_v48 = vld [vmem:[#allocation17_spill] sm:$0xff] }
 0x535   : > { %10714 = vst [vmem:[#allocation25_spill] sm:$0xff] %v9167_v49  ;;  %v4031_v41 = vpop.f32.mrf.mxu0  ;;  %v10721_v49 = vld [vmem:[#allocation122_spill] sm:$0xff] }
 0x536   : > { %v4188_v54 = vpop.f32.mrf.mxu1  ;;  %v4385_v51 = vpop.f32.mrf.mxu2  ;;  %v4032_v4 = vadd.f32 %v4031_v41, %v10720_v48 }
 0x537   : > { %v4189_v29 = vadd.f32 %v4188_v54, %v4028_v16  ;;  %v4702_v9 = vpop.f32.mrf.mxu3 }
 0x538   : > { %4094 = vmatmul.f32.gmra.mxu0 %v10603_v19 }
 0x539   : > { %v4386_v2 = vadd.f32 %v4385_v51, %v4189_v29  ;;  %4251 = vmatmul.f32.gmra.mxu1 %v10713_v22  ;;  %v10722_v22 = vld [vmem:[#allocation260_spill] sm:$0xff]  ;;  %v10723_v29 = vld [vmem:[#allocation134_spill] sm:$0xff] }
 0x53a   : > { %4769 = vmatmul.f32.gmra.mxu3 %v10718_v44 }
 0x53b   : > { %v9174_v45 = vadd.f32 %v4702_v9, %v4386_v2  ;;  %4520 = vmatmul.f32.gmra.mxu2 %v10719_v43 }
 0x53d   : > { %v4035_v17 = vpop.f32.mrf.mxu0 }
 0x53e   : > { %v4192_v33 = vpop.f32.mrf.mxu1  ;;  %v4393_v25 = vpop.f32.mrf.mxu2  ;;  %v4036_v9 = vadd.f32 %v4035_v17, %v8918_v7 }
 0x53f   : > { %v4193_v56 = vadd.f32 %v4192_v33, %v4032_v4  ;;  %v4706_v16 = vpop.f32.mrf.mxu3 }
 0x540   : > { %4098 = vmatmul.f32.gmra.mxu0 %v10721_v49 }
 0x541   : > { %v4394_v54 = vadd.f32 %v4393_v25, %v4193_v56  ;;  %4255 = vmatmul.f32.gmra.mxu1 %v10603_v19  ;;  %v10724_v19 = vld [vmem:[#allocation264_spill] sm:$0xff]  ;;  %v10725_v56 = vld [vmem:[#allocation139_spill] sm:$0xff] }
 0x542   : > { %4773 = vmatmul.f32.gmra.mxu3 %v10722_v22 }
 0x543   : > { %v9181_v51 = vadd.f32 %v4706_v16, %v4394_v54  ;;  %4528 = vmatmul.f32.gmra.mxu2 %v10723_v29 }
 0x545   : > { %v4039_v2 = vpop.f32.mrf.mxu0 }
 0x546   : > { %v4196_v41 = vpop.f32.mrf.mxu1  ;;  %v4401_v48 = vpop.f32.mrf.mxu2  ;;  %v4040_v16 = vadd.f32 %v4039_v2, %v8936_v63 }
 0x547   : > { %v4197_v43 = vadd.f32 %v4196_v41, %v4036_v9  ;;  %v4710_v4 = vpop.f32.mrf.mxu3 }
 0x548   : > { %4102 = vmatmul.f32.gmra.mxu0 %v10616_v3 }
 0x549   : > { %v4402_v33 = vadd.f32 %v4401_v48, %v4197_v43  ;;  %4259 = vmatmul.f32.gmra.mxu1 %v10721_v49  ;;  %v10726_v49 = vld [vmem:[#allocation267_spill] sm:$0xff]  ;;  %v10727_v48 = vld [vmem:[#allocation272_spill] sm:$0xff] }
 0x54a   : > { %4777 = vmatmul.f32.gmra.mxu3 %v10724_v19 }
 0x54b   : > { %v9188_v25 = vadd.f32 %v4710_v4, %v4402_v33  ;;  %4536 = vmatmul.f32.gmra.mxu2 %v10725_v56 }
 0x54d   : > { %v4043_v54 = vpop.f32.mrf.mxu0 }
 0x54e   : > { %v4200_v7 = vpop.f32.mrf.mxu1  ;;  %v4409_v29 = vpop.f32.mrf.mxu2  ;;  %v4044_v4 = vadd.f32 %v4043_v54, %v8953_v50 }
 0x54f   : > { %v4201_v17 = vadd.f32 %v4200_v7, %v4040_v16  ;;  %v4714_v9 = vpop.f32.mrf.mxu3 }
 0x550   : > { %4106 = vmatmul.f32.gmra.mxu0 %v10623_v55 }
 0x551   : > { %v4410_v41 = vadd.f32 %v4409_v29, %v4201_v17  ;;  %4263 = vmatmul.f32.gmra.mxu1 %v10616_v3  ;;  %v10728_v3 = vld [vmem:[#allocation270_spill] sm:$0xff]  ;;  %v10729_v29 = vld [vmem:[#allocation276_spill] sm:$0xff] }
 0x552   : > { %4781 = vmatmul.f32.gmra.mxu3 %v10726_v49 }
 0x553   : > { %v9195_v43 = vadd.f32 %v4714_v9, %v4410_v41  ;;  %4544 = vmatmul.f32.gmra.mxu2 %v10727_v48 }
 0x555   : > { %v4047_v33 = vpop.f32.mrf.mxu0 }
 0x556   : > { %v4204_v63 = vpop.f32.mrf.mxu1  ;;  %v4417_v56 = vpop.f32.mrf.mxu2  ;;  %v4048_v9 = vadd.f32 %v4047_v33, %v8970_v32 }
 0x557   : > { %v4205_v2 = vadd.f32 %v4204_v63, %v4044_v4  ;;  %v4718_v16 = vpop.f32.mrf.mxu3 }
 0x558   : > { %4110 = vmatmul.f32.gmra.mxu0 %v10630_v23 }
 0x559   : > { %v4418_v7 = vadd.f32 %v4417_v56, %v4205_v2  ;;  %4267 = vmatmul.f32.gmra.mxu1 %v10623_v55  ;;  %v10730_v55 = vld [vmem:[#allocation274_spill] sm:$0xff]  ;;  %v10731_v56 = vld [vmem:[#allocation281_spill] sm:$0xff] }
 0x55a   : > { %4785 = vmatmul.f32.gmra.mxu3 %v10728_v3 }
 0x55b   : > { %v9202_v17 = vadd.f32 %v4718_v16, %v4418_v7  ;;  %4552 = vmatmul.f32.gmra.mxu2 %v10729_v29 }
 0x55d   : > { %v4051_v41 = vpop.f32.mrf.mxu0 }
 0x55e   : > { %v4208_v50 = vpop.f32.mrf.mxu1  ;;  %v4425_v48 = vpop.f32.mrf.mxu2  ;;  %v4052_v16 = vadd.f32 %v4051_v41, %v8987_v35 }
 0x55f   : > { %v4209_v54 = vadd.f32 %v4208_v50, %v4048_v9  ;;  %v4722_v4 = vpop.f32.mrf.mxu3 }
 0x560   : > { %4114 = vmatmul.f32.gmra.mxu0 %v10637_v42 }
 0x561   : > { %v4426_v63 = vadd.f32 %v4425_v48, %v4209_v54  ;;  %4271 = vmatmul.f32.gmra.mxu1 %v10630_v23  ;;  %v10732_v23 = vld [vmem:[#allocation278_spill] sm:$0xff]  ;;  %v10733_v48 = vld [vmem:[#allocation283_spill] sm:$0xff] }
 0x562   : > { %4789 = vmatmul.f32.gmra.mxu3 %v10730_v55 }
 0x563   : > { %v9209_v2 = vadd.f32 %v4722_v4, %v4426_v63  ;;  %4560 = vmatmul.f32.gmra.mxu2 %v10731_v56 }
 0x565   : > { %v4055_v7 = vpop.f32.mrf.mxu0 }
 0x566   : > { %v4212_v32 = vpop.f32.mrf.mxu1  ;;  %v4433_v29 = vpop.f32.mrf.mxu2  ;;  %v4056_v4 = vadd.f32 %v4055_v7, %v9000_v10 }
 0x567   : > { %v4213_v33 = vadd.f32 %v4212_v32, %v4052_v16  ;;  %v4726_v9 = vpop.f32.mrf.mxu3 }
 0x568   : > { %4118 = vmatmul.f32.gmra.mxu0 %v10642_v24 }
 0x569   : > { %v4434_v50 = vadd.f32 %v4433_v29, %v4213_v33  ;;  %4275 = vmatmul.f32.gmra.mxu1 %v10637_v42  ;;  %v10734_v33 = vld [vmem:[#allocation151_spill] sm:$0xff] }
 0x56a   : > { %4793 = vmatmul.f32.gmra.mxu3 %v10732_v23 }
 0x56b   : > { %v9216_v54 = vadd.f32 %v4726_v9, %v4434_v50  ;;  %4568 = vmatmul.f32.gmra.mxu2 %v10733_v48 }
 0x56d   : > { %v4059_v63 = vpop.f32.mrf.mxu0 }
 0x56e   : > { %v4216_v35 = vpop.f32.mrf.mxu1  ;;  %v4441_v56 = vpop.f32.mrf.mxu2  ;;  %v4060_v42 = vadd.f32 %v4059_v63, %v9007_v58 }
 0x56f   : > { %v4217_v41 = vadd.f32 %v4216_v35, %v4056_v4  ;;  %v4730_v16 = vpop.f32.mrf.mxu3  ;;  %v10735_v35 = vld [vmem:[#allocation155_spill] sm:$0xff] }
 0x570   : > { %4847 = vmatmul.f32.vlgmr.msrb.gmra.mxu0 %v10734_v33 }
 0x571   : > { %v4442_v32 = vadd.f32 %v4441_v56, %v4217_v41  ;;  %4279 = vmatmul.f32.gmra.mxu1 %v10642_v24  ;;  %v10736_v41 = vld [vmem:[#allocation153_spill] sm:$0xff] }
 0x572   : > { %5457 = vmatmul.f32.vlgmr.msrb.gmra.mxu3 %v10643_v15 }
 0x573   : > { %v9223_v29 = vadd.f32 %v4730_v16, %v4442_v32  ;;  %5296 = vmatmul.f32.vlgmr.msrb.gmra.mxu2 %v10643_v15 }
 0x575   : > { %v4063_v9 = vpop.f32.mrf.mxu0 }
 0x576   : > { %v4220_v10 = vpop.f32.mrf.mxu1  ;;  %v4449_v50 = vpop.f32.mrf.mxu2  ;;  %v4064_v15 = vadd.f32 %v4063_v9, %v9014_v12 }
 0x577   : > { %v4221_v7 = vadd.f32 %v4220_v10, %v4060_v42  ;;  %v4734_v48 = vpop.f32.mrf.mxu3  ;;  %v10737_v42 = vld [vmem:[#allocation159_spill] sm:$0xff]  ;;  %v10738_v10 = vld [vmem:[#allocation157_spill] sm:$0xff] }
 0x578   : > { %4852 = vmatmul.f32.gmra.mxu0 %v10735_v35 }
 0x579   : > { %v4450_v4 = vadd.f32 %v4449_v50, %v4221_v7  ;;  %5041 = vmatmul.f32.vlgmr.msrb.gmra.mxu1 %v10736_v41  ;;  %v10739_v41 = vld [vmem:[#allocation163_spill] sm:$0xff] }
 0x57a   : > { %5461 = vmatmul.f32.gmra.mxu3 %v10645_v28 }
 0x57b   : > { %v9230_v24 = vadd.f32 %v4734_v48, %v4450_v4  ;;  %5300 = vmatmul.f32.gmra.mxu2 %v10645_v28 }
 0x57d   : > { %v4067_v56 = vpop.f32.mrf.mxu0 }
 0x57e   : > { %v4224_v58 = vpop.f32.mrf.mxu1  ;;  %v4457_v16 = vpop.f32.mrf.mxu2  ;;  %v4068_v28 = vadd.f32 %v4067_v56, %v9021_v59 }
 0x57f   : > { %v4225_v63 = vadd.f32 %v4224_v58, %v4064_v15  ;;  %v4738_v32 = vpop.f32.mrf.mxu3  ;;  %v10740_v15 = vld [vmem:[#allocation161_spill] sm:$0xff] }
 0x580   : > { %4857 = vmatmul.f32.gmra.mxu0 %v10737_v42  ;;  %v10741_v42 = vld [vmem:[#allocation167_spill] sm:$0xff] }
 0x581   : > { %v4458_v33 = vadd.f32 %v4457_v16, %v4225_v63  ;;  %5047 = vmatmul.f32.gmra.mxu1 %v10738_v10  ;;  %v10742_v10 = vld [vmem:[#allocation165_spill] sm:$0xff] }
 0x582   : > { %5465 = vmatmul.f32.gmra.mxu3 %v10647_v46 }
 0x583   : > { %v9237_v7 = vadd.f32 %v4738_v32, %v4458_v33  ;;  %5304 = vmatmul.f32.gmra.mxu2 %v10647_v46 }
 0x585   : > { %v4071_v50 = vpop.f32.mrf.mxu0 }
 0x586   : > { %v4228_v12 = vpop.f32.mrf.mxu1  ;;  %v4465_v48 = vpop.f32.mrf.mxu2  ;;  %v4072_v46 = vadd.f32 %v4071_v50, %v9028_v0 }
 0x587   : > { %v4229_v9 = vadd.f32 %v4228_v12, %v4068_v28  ;;  %v4742_v4 = vpop.f32.mrf.mxu3 }
 0x588   : > { %4862 = vmatmul.f32.gmra.mxu0 %v10739_v41  ;;  %v10744_v41 = vld [vmem:[#allocation169_spill] sm:$0xff] }
 0x589   : > { %v4466_v35 = vadd.f32 %v4465_v48, %v4229_v9  ;;  %5053 = vmatmul.f32.gmra.mxu1 %v10740_v15 }
 0x58a   : > { %5469 = vmatmul.f32.gmra.mxu3 %v10649_v1 }
 0x58b   : > { %v9244_v58 = vadd.f32 %v4742_v4, %v4466_v35  ;;  %5308 = vmatmul.f32.gmra.mxu2 %v10649_v1  ;;  %v10743_v35 = vld [vmem:[#allocation171_spill] sm:$0xff] }
 0x58d   : > { %v4075_v63 = vpop.f32.mrf.mxu0 }
 0x58e   : > { %v4232_v59 = vpop.f32.mrf.mxu1  ;;  %v4473_v16 = vpop.f32.mrf.mxu2  ;;  %v4076_v1 = vadd.f32 %v4075_v63, %v9035_v60 }
 0x58f   : > { %v4233_v56 = vadd.f32 %v4232_v59, %v4072_v46  ;;  %v4746_v32 = vpop.f32.mrf.mxu3 }
 0x590   : > { %4867 = vmatmul.f32.gmra.mxu0 %v10741_v42 }
 0x591   : > { %v4474_v33 = vadd.f32 %v4473_v16, %v4233_v56  ;;  %5059 = vmatmul.f32.gmra.mxu1 %v10742_v10 }
 0x592   : > { %5473 = vmatmul.f32.gmra.mxu3 %v10651_v34 }
 0x593   : > { %v9251_v28 = vadd.f32 %v4746_v32, %v4474_v33  ;;  %5312 = vmatmul.f32.gmra.mxu2 %v10651_v34  ;;  %v10745_v32 = vld [vmem:[#allocation175_spill] sm:$0xff]  ;;  %v10746_v33 = vld [vmem:[#allocation173_spill] sm:$0xff] }
 0x595   : > { %v4079_v12 = vpop.f32.mrf.mxu0 }
 0x596   : > { %v4236_v0 = vpop.f32.mrf.mxu1  ;;  %v4481_v9 = vpop.f32.mrf.mxu2  ;;  %v4080_v34 = vadd.f32 %v4079_v12, %v9042_v31 }
 0x597   : > { %v4237_v50 = vadd.f32 %v4236_v0, %v4076_v1  ;;  %v4750_v48 = vpop.f32.mrf.mxu3 }
 0x598   : > { %4872 = vmatmul.f32.gmra.mxu0 %v10743_v35 }
 0x599   : > { %v4482_v4 = vadd.f32 %v4481_v9, %v4237_v50  ;;  %5065 = vmatmul.f32.gmra.mxu1 %v10744_v41  ;;  %v10747_v9 = vld [vmem:[#allocation179_spill] sm:$0xff] }
 0x59a   : > { %5477 = vmatmul.f32.gmra.mxu3 %v10653_v53 }
 0x59b   : > { %v9258_v15 = vadd.f32 %v4750_v48, %v4482_v4  ;;  %5316 = vmatmul.f32.gmra.mxu2 %v10653_v53  ;;  %v10748_v48 = vld [vmem:[#allocation177_spill] sm:$0xff] }
 0x59d   : > { %v4083_v46 = vpop.f32.mrf.mxu0 }
 0x59e   : > { %v4240_v60 = vpop.f32.mrf.mxu1  ;;  %v4489_v59 = vpop.f32.mrf.mxu2  ;;  %v4084_v53 = vadd.f32 %v4083_v46, %v9049_v20 }
 0x59f   : > { %v4241_v63 = vadd.f32 %v4240_v60, %v4080_v34  ;;  %v4754_v56 = vpop.f32.mrf.mxu3 }
 0x5a0   : > { %4877 = vmatmul.f32.gmra.mxu0 %v10745_v32 }
 0x5a1   : > { %v4490_v16 = vadd.f32 %v4489_v59, %v4241_v63  ;;  %5071 = vmatmul.f32.gmra.mxu1 %v10746_v33  ;;  %v10749_v63 = vld [vmem:[#allocation183_spill] sm:$0xff]  ;;  %v10750_v59 = vld [vmem:[#allocation181_spill] sm:$0xff] }
 0x5a2   : > { %5481 = vmatmul.f32.gmra.mxu3 %v10655_v57 }
 0x5a3   : > { %v9265_v42 = vadd.f32 %v4754_v56, %v4490_v16  ;;  %5320 = vmatmul.f32.gmra.mxu2 %v10655_v57 }
 0x5a5   : > { %v4087_v10 = vpop.f32.mrf.mxu0 }
 0x5a6   : > { %v4244_v31 = vpop.f32.mrf.mxu1  ;;  %v4497_v12 = vpop.f32.mrf.mxu2  ;;  %v4088_v57 = vadd.f32 %v4087_v10, %v9056_v39 }
 0x5a7   : > { %v4245_v1 = vadd.f32 %v4244_v31, %v4084_v53  ;;  %v4758_v0 = vpop.f32.mrf.mxu3  ;;  %v10751_v31 = vld [vmem:[#allocation187_spill] sm:$0xff] }
 0x5a8   : > { %4882 = vmatmul.f32.gmra.mxu0 %v10747_v9 }
 0x5a9   : > { %v4498_v50 = vadd.f32 %v4497_v12, %v4245_v1  ;;  %5077 = vmatmul.f32.gmra.mxu1 %v10748_v48  ;;  %v10752_v1 = vld [vmem:[#allocation185_spill] sm:$0xff] }
 0x5aa   : > { %5485 = vmatmul.f32.gmra.mxu3 %v10657_v62 }
 0x5ab   : > { %v9272_v4 = vadd.f32 %v4758_v0, %v4498_v50  ;;  %5324 = vmatmul.f32.gmra.mxu2 %v10657_v62 }
 0x5ad   : > { %v4091_v35 = vpop.f32.mrf.mxu0 }
 0x5ae   : > { %v4248_v20 = vpop.f32.mrf.mxu1  ;;  %v4505_v34 = vpop.f32.mrf.mxu2  ;;  %v4092_v62 = vadd.f32 %v4091_v35, %v9063_v26  ;;  %v10753_v35 = vld [vmem:[#allocation191_spill] sm:$0xff] }
 0x5af   : > { %v4249_v41 = vadd.f32 %v4248_v20, %v4088_v57  ;;  %v4762_v46 = vpop.f32.mrf.mxu3  ;;  %v10754_v20 = vld [vmem:[#allocation189_spill] sm:$0xff] }
 0x5b0   : > { %4887 = vmatmul.f32.gmra.mxu0 %v10749_v63 }
 0x5b1   : > { %v4506_v60 = vadd.f32 %v4505_v34, %v4249_v41  ;;  %5083 = vmatmul.f32.gmra.mxu1 %v10750_v59 }
 0x5b2   : > { %5489 = vmatmul.f32.gmra.mxu3 %v10659_v21 }
 0x5b3   : > { %v9279_v56 = vadd.f32 %v4762_v46, %v4506_v60  ;;  %5328 = vmatmul.f32.gmra.mxu2 %v10659_v21 }
 0x5b5   : > { %v4095_v16 = vpop.f32.mrf.mxu0 }
 0x5b6   : > { %v4252_v39 = vpop.f32.mrf.mxu1  ;;  %v4513_v33 = vpop.f32.mrf.mxu2  ;;  %v4096_v21 = vadd.f32 %v4095_v16, %v9070_v40  ;;  %v10756_v16 = vld [vmem:[#allocation193_spill] sm:$0xff] }
 0x5b7   : > { %v4253_v32 = vadd.f32 %v4252_v39, %v4092_v62  ;;  %v4766_v53 = vpop.f32.mrf.mxu3  ;;  %v10755_v62 = vld [vmem:[#allocation196_spill] sm:$0xff] }
 0x5b8   : > { %4892 = vmatmul.f32.gmra.mxu0 %v10751_v31 }
 0x5b9   : > { %v4514_v10 = vadd.f32 %v4513_v33, %v4253_v32  ;;  %5089 = vmatmul.f32.gmra.mxu1 %v10752_v1  ;;  %v10757_v1 = vld [vmem:[#allocation201_spill] sm:$0xff] }
 0x5ba   : > { %5493 = vmatmul.f32.gmra.mxu3 %v10661_v61 }
 0x5bb   : > { %v9286_v12 = vadd.f32 %v4766_v53, %v4514_v10  ;;  %5332 = vmatmul.f32.gmra.mxu2 %v10661_v61 }
 0x5bd   : > { %v4099_v0 = vpop.f32.mrf.mxu0 }
 0x5be   : > { %v4256_v26 = vpop.f32.mrf.mxu1  ;;  %v4521_v9 = vpop.f32.mrf.mxu2  ;;  %v4100_v61 = vadd.f32 %v4099_v0, %v9077_v18 }
 0x5bf   : > { %v4257_v50 = vadd.f32 %v4256_v26, %v4096_v21  ;;  %v4770_v48 = vpop.f32.mrf.mxu3  ;;  %v10758_v21 = vld [vmem:[#allocation198_spill] sm:$0xff] }
 0x5c0   : > { %4897 = vmatmul.f32.gmra.mxu0 %v10753_v35  ;;  %v10759_v35 = vld [vmem:[#allocation206_spill] sm:$0xff] }
 0x5c1   : > { %v4522_v57 = vadd.f32 %v4521_v9, %v4257_v50  ;;  %5095 = vmatmul.f32.gmra.mxu1 %v10754_v20  ;;  %v10760_v20 = vld [vmem:[#allocation203_spill] sm:$0xff] }
 0x5c2   : > { %5497 = vmatmul.f32.gmra.mxu3 %v10663_v5 }
 0x5c3   : > { %v9293_v41 = vadd.f32 %v4770_v48, %v4522_v57  ;;  %5336 = vmatmul.f32.gmra.mxu2 %v10663_v5 }
 0x5c5   : > { %v4103_v34 = vpop.f32.mrf.mxu0 }
 0x5c6   : > { %v4260_v40 = vpop.f32.mrf.mxu1  ;;  %v4529_v60 = vpop.f32.mrf.mxu2  ;;  %v4104_v5 = vadd.f32 %v4103_v34, %v9084_v14 }
 0x5c7   : > { %v4261_v46 = vadd.f32 %v4260_v40, %v4100_v61  ;;  %v4774_v63 = vpop.f32.mrf.mxu3 }
 0x5c8   : > { %4902 = vmatmul.f32.gmra.mxu0 %v10755_v62  ;;  %v10762_v62 = vld [vmem:[#allocation208_spill] sm:$0xff] }
 0x5c9   : > { %v4530_v59 = vadd.f32 %v4529_v60, %v4261_v46  ;;  %5101 = vmatmul.f32.gmra.mxu1 %v10756_v16 }
 0x5ca   : > { %5501 = vmatmul.f32.gmra.mxu3 %v10665_v11 }
 0x5cb   : > { %v9300_v39 = vadd.f32 %v4774_v63, %v4530_v59  ;;  %5340 = vmatmul.f32.gmra.mxu2 %v10665_v11  ;;  %v10761_v59 = vld [vmem:[#allocation211_spill] sm:$0xff] }
 0x5cd   : > { %v4107_v32 = vpop.f32.mrf.mxu0 }
 0x5ce   : > { %v4264_v18 = vpop.f32.mrf.mxu1  ;;  %v4537_v53 = vpop.f32.mrf.mxu2  ;;  %v4108_v11 = vadd.f32 %v4107_v32, %v9091_v8 }
 0x5cf   : > { %v4265_v33 = vadd.f32 %v4264_v18, %v4104_v5  ;;  %v4778_v10 = vpop.f32.mrf.mxu3 }
 0x5d0   : > { %4907 = vmatmul.f32.gmra.mxu0 %v10757_v1 }
 0x5d1   : > { %v4538_v31 = vadd.f32 %v4537_v53, %v4265_v33  ;;  %5107 = vmatmul.f32.gmra.mxu1 %v10758_v21 }
 0x5d2   : > { %5505 = vmatmul.f32.gmra.mxu3 %v10667_v37 }
 0x5d3   : > { %v9307_v0 = vadd.f32 %v4778_v10, %v4538_v31  ;;  %5344 = vmatmul.f32.gmra.mxu2 %v10667_v37  ;;  %v10763_v10 = vld [vmem:[#allocation216_spill] sm:$0xff]  ;;  %v10764_v31 = vld [vmem:[#allocation213_spill] sm:$0xff] }
 0x5d5   : > { %v4111_v26 = vpop.f32.mrf.mxu0 }
 0x5d6   : > { %v4268_v14 = vpop.f32.mrf.mxu1  ;;  %v4545_v9 = vpop.f32.mrf.mxu2  ;;  %v4112_v37 = vadd.f32 %v4111_v26, %v9098_v27 }
 0x5d7   : > { %v4269_v50 = vadd.f32 %v4268_v14, %v4108_v11  ;;  %v4782_v48 = vpop.f32.mrf.mxu3 }
 0x5d8   : > { %4912 = vmatmul.f32.gmra.mxu0 %v10759_v35 }
 0x5d9   : > { %v4546_v57 = vadd.f32 %v4545_v9, %v4269_v50  ;;  %5113 = vmatmul.f32.gmra.mxu1 %v10760_v20  ;;  %v10765_v9 = vld [vmem:[#allocation221_spill] sm:$0xff] }
 0x5da   : > { %5509 = vmatmul.f32.gmra.mxu3 %v10669_v30 }
 0x5db   : > { %v9314_v61 = vadd.f32 %v4782_v48, %v4546_v57  ;;  %5348 = vmatmul.f32.gmra.mxu2 %v10669_v30  ;;  %v10766_v48 = vld [vmem:[#allocation218_spill] sm:$0xff] }
 0x5dd   : > { %v4115_v34 = vpop.f32.mrf.mxu0 }
 0x5de   : > { %v4272_v8 = vpop.f32.mrf.mxu1  ;;  %v4553_v46 = vpop.f32.mrf.mxu2  ;;  %v4116_v30 = vadd.f32 %v4115_v34, %v9105_v36 }
 0x5df   : > { %v4273_v40 = vadd.f32 %v4272_v8, %v4112_v37  ;;  %v4786_v60 = vpop.f32.mrf.mxu3 }
 0x5e0   : > { %4917 = vmatmul.f32.gmra.mxu0 %v10761_v59  ;;  %v10770_v59 = vld [vmem:[#allocation224_spill] sm:$0xff] }
 0x5e1   : > { %v4554_v63 = vadd.f32 %v4553_v46, %v4273_v40  ;;  %5119 = vmatmul.f32.gmra.mxu1 %v10762_v62  ;;  %v10768_v46 = vld [vmem:[#allocation225_spill] sm:$0xff] }
 0x5e2   : > { %5513 = vmatmul.f32.gmra.mxu3 %v10671_v13  ;;  %v10771_v62 = vld [vmem:[#allocation13_spill] sm:$0xff] }
 0x5e3   : > { %v9321_v16 = vadd.f32 %v4786_v60, %v4554_v63  ;;  %5352 = vmatmul.f32.gmra.mxu2 %v10671_v13  ;;  %v10769_v60 = vld [vmem:[#allocation223_spill] sm:$0xff] }
 0x5e5   : > { %v4119_v5 = vpop.f32.mrf.mxu0 }
 0x5e6   : > { %v4276_v27 = vpop.f32.mrf.mxu1  ;;  %v4561_v18 = vpop.f32.mrf.mxu2  ;;  %v4120_v13 = vadd.f32 %v4119_v5, %v9111_v6 }
 0x5e7   : > { %v4277_v32 = vadd.f32 %v4276_v27, %v4116_v30  ;;  %v4790_v33 = vpop.f32.mrf.mxu3  ;;  %v5965_v30 = vld [vmem:[%s6342_s7 + $0x8] sm:$0xff] }
 0x5e8   : > { %4922 = vmatmul.f32.gmra.mxu0 %v10763_v10 }
 0x5e9   : > { %v4562_v53 = vadd.f32 %v4561_v18, %v4277_v32  ;;  %5125 = vmatmul.f32.gmra.mxu1 %v10764_v31  ;;  %v10772_v31 = vld [vmem:[#allocation230_spill] sm:$0xff] }
 0x5ea   : > { %5517 = vmatmul.f32.gmra.mxu3 %v10673_v52 }
 0x5eb   : > { %v9328_v1 = vadd.f32 %v4790_v33, %v4562_v53  ;;  %5356 = vmatmul.f32.gmra.mxu2 %v10673_v52  ;;  %v10767_v52 = vld [vmem:[#allocation14_spill] sm:$0xff] }
 0x5ed   : > { %v4848_v36 = vpop.f32.mrf.mxu0 }
 0x5ee   : > { %v4280_v21 = vpop.f32.mrf.mxu1  ;;  %v4569_v26 = vpop.f32.mrf.mxu2  ;;  %v4849_v35 = vadd.f32 %v4848_v36, %v10767_v52  ;;  %v10774_v36 = vld [vmem:[#allocation228_spill] sm:$0xff] }
 0x5ef   : > { %v4281_v11 = vadd.f32 %v4280_v21, %v4120_v13  ;;  %v4794_v14 = vpop.f32.mrf.mxu3  ;;  %v10773_v13 = vld [vmem:[#allocation227_spill] sm:$0xff] }
 0x5f0   : > { %4927 = vmatmul.f32.gmra.mxu0 %v10765_v9 }
 0x5f1   : > { %v4570_v50 = vadd.f32 %v4569_v26, %v4281_v11  ;;  %5131 = vmatmul.f32.gmra.mxu1 %v10766_v48  ;;  %v10775_v11 = vld [vmem:[#allocation21_spill] sm:$0xff] }
 0x5f2   : > { %5521 = vmatmul.f32.gmra.mxu3 %v10676_v47 }
 0x5f3   : > { %v9335_v57 = vadd.f32 %v4794_v14, %v4570_v50  ;;  %5360 = vmatmul.f32.gmra.mxu2 %v10676_v47  ;;  %v5966_v14 = vld [vmem:[%s6342_s7 + $0x18] sm:$0xff] }
 0x5f5   : > { %v4853_v6 = vpop.f32.mrf.mxu0 }
 0x5f6   : > { %v5042_v20 = vpop.f32.mrf.mxu1  ;;  %v5297_v34 = vpop.f32.mrf.mxu2  ;;  %v4854_v47 = vadd.f32 %v4853_v6, %v10771_v62 }
 0x5f7   : > { %v5043_v37 = vadd.f32 %v5042_v20, %v4849_v35  ;;  %v5458_v8 = vpop.f32.mrf.mxu3 }
 0x5f8   : > { %4932 = vmatmul.f32.gmra.mxu0 %v10768_v46  ;;  %v10779_v46 = vld [vmem:[#allocation12_spill] sm:$0xff] }
 0x5f9   : > { %v5298_v40 = vadd.f32 %v5297_v34, %v5043_v37  ;;  %5137 = vmatmul.f32.gmra.mxu1 %v10769_v60  ;;  %v10776_v37 = vld [vmem:[#allocation234_spill] sm:$0xff]  ;;  %v10777_v34 = vld [vmem:[#allocation231_spill] sm:$0xff] }
 0x5fa   : > { %5525 = vmatmul.f32.gmra.mxu3 %v10770_v59 }
 0x5fb   : > { %v5459_v63 = vadd.f32 %v5458_v8, %v5298_v40  ;;  %5364 = vmatmul.f32.gmra.mxu2 %v10770_v59  ;;  %v10778_v40 = vld [vmem:[#allocation232_spill] sm:$0xff] }
 0x5fd   : > { %v5586_v5 = vadd.f32 %v5965_v30, %v5459_v63  ;;  %v4858_v27 = vpop.f32.mrf.mxu0  ;;  %v5967_v63 = vld [vmem:[%s6342_s7 + $0x28] sm:$0xff] }
 0x5fe   : > { %v5048_v32 = vpop.f32.mrf.mxu1  ;;  %v5301_v33 = vpop.f32.mrf.mxu2  ;;  %v4859_v26 = vadd.f32 %v4858_v27, %v10775_v11 }
 0x5ff   : > { %5650 = vst [vmem:[%s8322_s23 + $0x8] sm:$0xff] %v5586_v5  ;;  %v5049_v18 = vadd.f32 %v5048_v32, %v4854_v47  ;;  %v5462_v53 = vpop.f32.mrf.mxu3 }
 0x600   : > { %4937 = vmatmul.f32.gmra.mxu0 %v10772_v31  ;;  %v10783_v31 = vld [vmem:[#allocation18_spill] sm:$0xff] }
 0x601   : > { %v5302_v10 = vadd.f32 %v5301_v33, %v5049_v18  ;;  %5143 = vmatmul.f32.gmra.mxu1 %v10773_v13  ;;  %v10780_v18 = vld [vmem:[#allocation238_spill] sm:$0xff]  ;;  %v10781_v33 = vld [vmem:[#allocation235_spill] sm:$0xff] }
 0x602   : > { %5529 = vmatmul.f32.gmra.mxu3 %v10774_v36 }
 0x603   : > { %v5463_v21 = vadd.f32 %v5462_v53, %v5302_v10  ;;  %5368 = vmatmul.f32.gmra.mxu2 %v10774_v36  ;;  %v10782_v10 = vld [vmem:[#allocation236_spill] sm:$0xff] }
 0x605   : > { %v5588_v50 = vadd.f32 %v5966_v14, %v5463_v21  ;;  %v4863_v9 = vpop.f32.mrf.mxu0  ;;  %v5968_v21 = vld [vmem:[%s6342_s7 + $0x38] sm:$0xff] }
 0x606   : > { %v5054_v48 = vpop.f32.mrf.mxu1  ;;  %v5305_v35 = vpop.f32.mrf.mxu2  ;;  %v4864_v60 = vadd.f32 %v4863_v9, %v10779_v46 }
 0x607   : > { %5652 = vst [vmem:[%s8322_s23 + $0x18] sm:$0xff] %v5588_v50  ;;  %v5055_v52 = vadd.f32 %v5054_v48, %v4859_v26  ;;  %v5466_v6 = vpop.f32.mrf.mxu3 }
 0x608   : > { %4942 = vmatmul.f32.gmra.mxu0 %v10776_v37  ;;  %v10787_v37 = vld [vmem:[#allocation16_spill] sm:$0xff] }
 0x609   : > { %v5306_v20 = vadd.f32 %v5305_v35, %v5055_v52  ;;  %5149 = vmatmul.f32.gmra.mxu1 %v10777_v34  ;;  %v10784_v52 = vld [vmem:[#allocation242_spill] sm:$0xff]  ;;  %v10785_v35 = vld [vmem:[#allocation239_spill] sm:$0xff] }
 0x60a   : > { %5533 = vmatmul.f32.gmra.mxu3 %v10778_v40 }
 0x60b   : > { %v5467_v8 = vadd.f32 %v5466_v6, %v5306_v20  ;;  %5372 = vmatmul.f32.gmra.mxu2 %v10778_v40  ;;  %v10786_v20 = vld [vmem:[#allocation240_spill] sm:$0xff] }
 0x60d   : > { %v5590_v59 = vadd.f32 %v5967_v63, %v5467_v8  ;;  %v4868_v62 = vpop.f32.mrf.mxu0  ;;  %v5969_v8 = vld [vmem:[%s6342_s7 + $0x48] sm:$0xff] }
 0x60e   : > { %v5060_v47 = vpop.f32.mrf.mxu1  ;;  %v5309_v5 = vpop.f32.mrf.mxu2  ;;  %v4869_v13 = vadd.f32 %v4868_v62, %v10783_v31 }
 0x60f   : > { %5654 = vst [vmem:[%s8322_s23 + $0x28] sm:$0xff] %v5590_v59  ;;  %v5061_v30 = vadd.f32 %v5060_v47, %v4864_v60  ;;  %v5470_v27 = vpop.f32.mrf.mxu3 }
 0x610   : > { %4947 = vmatmul.f32.gmra.mxu0 %v10780_v18 }
 0x611   : > { %v5310_v32 = vadd.f32 %v5309_v5, %v5061_v30  ;;  %5155 = vmatmul.f32.gmra.mxu1 %v10781_v33  ;;  %v10788_v30 = vld [vmem:[#allocation246_spill] sm:$0xff]  ;;  %v10789_v5 = vld [vmem:[#allocation243_spill] sm:$0xff] }
 0x612   : > { %5537 = vmatmul.f32.gmra.mxu3 %v10782_v10  ;;  %v5970_v33 = vld [vmem:[%s6342_s7 + $0x58] sm:$0xff] }
 0x613   : > { %v5471_v53 = vadd.f32 %v5470_v27, %v5310_v32  ;;  %5376 = vmatmul.f32.gmra.mxu2 %v10782_v10  ;;  %v10790_v32 = vld [vmem:[#allocation244_spill] sm:$0xff] }
 0x615   : > { %v5592_v36 = vadd.f32 %v5968_v21, %v5471_v53  ;;  %v4873_v11 = vpop.f32.mrf.mxu0 }
 0x616   : > { %v5066_v26 = vpop.f32.mrf.mxu1  ;;  %v5313_v50 = vpop.f32.mrf.mxu2  ;;  %v4874_v34 = vadd.f32 %v4873_v11, %v10787_v37 }
 0x617   : > { %5656 = vst [vmem:[%s8322_s23 + $0x38] sm:$0xff] %v5592_v36  ;;  %v5067_v14 = vadd.f32 %v5066_v26, %v4869_v13  ;;  %v5474_v9 = vpop.f32.mrf.mxu3  ;;  %v10791_v26 = vld [vmem:[#allocation250_spill] sm:$0xff] }
 0x618   : > { %4952 = vmatmul.f32.gmra.mxu0 %v10784_v52  ;;  %v5971_v52 = vld [vmem:[%s6342_s7 + $0x68] sm:$0xff] }
 0x619   : > { %v5314_v48 = vadd.f32 %v5313_v50, %v5067_v14  ;;  %5161 = vmatmul.f32.gmra.mxu1 %v10785_v35  ;;  %v10792_v14 = vld [vmem:[#allocation247_spill] sm:$0xff] }
 0x61a   : > { %5541 = vmatmul.f32.gmra.mxu3 %v10786_v20 }
 0x61b   : > { %v5475_v6 = vadd.f32 %v5474_v9, %v5314_v48  ;;  %5380 = vmatmul.f32.gmra.mxu2 %v10786_v20  ;;  %v10793_v9 = vld [vmem:[#allocation248_spill] sm:$0xff] }
 0x61d   : > { %v5594_v40 = vadd.f32 %v5969_v8, %v5475_v6  ;;  %v4878_v46 = vpop.f32.mrf.mxu0 }
 0x61e   : > { %v5072_v60 = vpop.f32.mrf.mxu1  ;;  %v5317_v59 = vpop.f32.mrf.mxu2  ;;  %v4879_v18 = vadd.f32 %v4878_v46, %v9160_v38  ;;  %v10794_v38 = vld [vmem:[#allocation25_spill] sm:$0xff]  ;;  %v10795_v46 = vld [vmem:[#allocation254_spill] sm:$0xff] }
 0x61f   : > { %5658 = vst [vmem:[%s8322_s23 + $0x48] sm:$0xff] %v5594_v40  ;;  %v5073_v63 = vadd.f32 %v5072_v60, %v4874_v34  ;;  %v5478_v62 = vpop.f32.mrf.mxu3  ;;  %v10796_v60 = vld [vmem:[#allocation251_spill] sm:$0xff] }
 0x620   : > { %4957 = vmatmul.f32.gmra.mxu0 %v10788_v30 }
 0x621   : > { %v5318_v47 = vadd.f32 %v5317_v59, %v5073_v63  ;;  %5167 = vmatmul.f32.gmra.mxu1 %v10789_v5  ;;  %v10797_v59 = vld [vmem:[#allocation252_spill] sm:$0xff] }
 0x622   : > { %5545 = vmatmul.f32.gmra.mxu3 %v10790_v32 }
 0x623   : > { %v5479_v27 = vadd.f32 %v5478_v62, %v5318_v47  ;;  %5384 = vmatmul.f32.gmra.mxu2 %v10790_v32  ;;  %v5972_v47 = vld [vmem:[%s6342_s7 + $0x78] sm:$0xff] }
 0x625   : > { %v5596_v53 = vadd.f32 %v5970_v33, %v5479_v27  ;;  %v4883_v10 = vpop.f32.mrf.mxu0 }
 0x626   : > { %v5078_v31 = vpop.f32.mrf.mxu1  ;;  %v5321_v21 = vpop.f32.mrf.mxu2  ;;  %v4884_v48 = vadd.f32 %v4883_v10, %v10794_v38  ;;  %v10798_v10 = vld [vmem:[#allocation258_spill] sm:$0xff] }
 0x627   : > { %5660 = vst [vmem:[%s8322_s23 + $0x58] sm:$0xff] %v5596_v53  ;;  %v5079_v13 = vadd.f32 %v5078_v31, %v4879_v18  ;;  %v5482_v36 = vpop.f32.mrf.mxu3  ;;  %v10799_v31 = vld [vmem:[#allocation255_spill] sm:$0xff] }
 0x628   : > { %4962 = vmatmul.f32.gmra.mxu0 %v10791_v26 }
 0x629   : > { %v5322_v11 = vadd.f32 %v5321_v21, %v5079_v13  ;;  %5173 = vmatmul.f32.gmra.mxu1 %v10792_v14  ;;  %v5973_v21 = vld [vmem:[%s6342_s7 + $0x88] sm:$0xff] }
 0x62a   : > { %5549 = vmatmul.f32.gmra.mxu3 %v10793_v9 }
 0x62b   : > { %v5483_v50 = vadd.f32 %v5482_v36, %v5322_v11  ;;  %5388 = vmatmul.f32.gmra.mxu2 %v10793_v9 }
 0x62d   : > { %v5598_v35 = vadd.f32 %v5971_v52, %v5483_v50  ;;  %v4888_v6 = vpop.f32.mrf.mxu0  ;;  %v10801_v52 = vld [vmem:[#allocation259_spill] sm:$0xff] }
 0x62e   : > { %v5084_v20 = vpop.f32.mrf.mxu1  ;;  %v5325_v34 = vpop.f32.mrf.mxu2  ;;  %v4889_v62 = vadd.f32 %v4888_v6, %v9174_v45 }
 0x62f   : > { %5662 = vst [vmem:[%s8322_s23 + $0x68] sm:$0xff] %v5598_v35  ;;  %v5085_v37 = vadd.f32 %v5084_v20, %v4884_v48  ;;  %v5486_v8 = vpop.f32.mrf.mxu3  ;;  %v10800_v48 = vld [vmem:[#allocation262_spill] sm:$0xff] }
 0x630   : > { %4967 = vmatmul.f32.gmra.mxu0 %v10795_v46 }
 0x631   : > { %v5326_v40 = vadd.f32 %v5325_v34, %v5085_v37  ;;  %5179 = vmatmul.f32.gmra.mxu1 %v10796_v60  ;;  %v10802_v60 = vld [vmem:[#allocation265_spill] sm:$0xff] }
 0x632   : > { %5553 = vmatmul.f32.gmra.mxu3 %v10797_v59 }
 0x633   : > { %v5487_v63 = vadd.f32 %v5486_v8, %v5326_v40  ;;  %5392 = vmatmul.f32.gmra.mxu2 %v10797_v59 }
 0x635   : > { %v5600_v30 = vadd.f32 %v5972_v47, %v5487_v63  ;;  %v4893_v5 = vpop.f32.mrf.mxu0  ;;  %v10803_v63 = vld [vmem:[#allocation263_spill] sm:$0xff] }
 0x636   : > { %v5090_v27 = vpop.f32.mrf.mxu1  ;;  %v5329_v18 = vpop.f32.mrf.mxu2  ;;  %v4894_v45 = vadd.f32 %v4893_v5, %v9181_v51  ;;  %v5974_v51 = vld [vmem:[%s6342_s7 + $0x98] sm:$0xff] }
 0x637   : > { %5664 = vst [vmem:[%s8322_s23 + $0x78] sm:$0xff] %v5600_v30  ;;  %v5091_v32 = vadd.f32 %v5090_v27, %v4889_v62  ;;  %v5490_v33 = vpop.f32.mrf.mxu3 }
 0x638   : > { %4972 = vmatmul.f32.gmra.mxu0 %v10798_v10 }
 0x639   : > { %v5330_v53 = vadd.f32 %v5329_v18, %v5091_v32  ;;  %5185 = vmatmul.f32.gmra.mxu1 %v10799_v31 }
 0x63a   : > { %5557 = vmatmul.f32.gmra.mxu3 %v10718_v44 }
 0x63b   : > { %v5491_v13 = vadd.f32 %v5490_v33, %v5330_v53  ;;  %5396 = vmatmul.f32.gmra.mxu2 %v10718_v44  ;;  %v10804_v33 = vld [vmem:[#allocation268_spill] sm:$0xff]  ;;  %v10805_v53 = vld [vmem:[#allocation266_spill] sm:$0xff] }
 0x63d   : > { %v5602_v36 = vadd.f32 %v5973_v21, %v5491_v13  ;;  %v4898_v11 = vpop.f32.mrf.mxu0 }
 0x63e   : > { %v5096_v26 = vpop.f32.mrf.mxu1  ;;  %v5333_v50 = vpop.f32.mrf.mxu2  ;;  %v4899_v44 = vadd.f32 %v4898_v11, %v9188_v25  ;;  %v5975_v25 = vld [vmem:[%s6342_s7 + $0xa8] sm:$0xff] }
 0x63f   : > { %5666 = vst [vmem:[%s8322_s23 + $0x88] sm:$0xff] %v5602_v36  ;;  %v5097_v14 = vadd.f32 %v5096_v26, %v4894_v45  ;;  %v5494_v9 = vpop.f32.mrf.mxu3 }
 0x640   : > { %4977 = vmatmul.f32.gmra.mxu0 %v10800_v48 }
 0x641   : > { %v5334_v38 = vadd.f32 %v5333_v50, %v5097_v14  ;;  %5191 = vmatmul.f32.gmra.mxu1 %v10801_v52  ;;  %v10806_v14 = vld [vmem:[#allocation271_spill] sm:$0xff]  ;;  %v10807_v50 = vld [vmem:[#allocation269_spill] sm:$0xff] }
 0x642   : > { %5561 = vmatmul.f32.gmra.mxu3 %v10722_v22 }
 0x643   : > { %v5495_v35 = vadd.f32 %v5494_v9, %v5334_v38  ;;  %5400 = vmatmul.f32.gmra.mxu2 %v10722_v22 }
 0x645   : > { %v5604_v6 = vadd.f32 %v5974_v51, %v5495_v35  ;;  %v4903_v20 = vpop.f32.mrf.mxu0 }
 0x646   : > { %v5102_v37 = vpop.f32.mrf.mxu1  ;;  %v5337_v8 = vpop.f32.mrf.mxu2  ;;  %v4904_v22 = vadd.f32 %v4903_v20, %v9195_v43  ;;  %v5976_v43 = vld [vmem:[%s6342_s7 + $0xb8] sm:$0xff] }
 0x647   : > { %5668 = vst [vmem:[%s8322_s23 + $0x98] sm:$0xff] %v5604_v6  ;;  %v5103_v34 = vadd.f32 %v5102_v37, %v4899_v44  ;;  %v5498_v40 = vpop.f32.mrf.mxu3  ;;  %v10808_v20 = vld [vmem:[#allocation275_spill] sm:$0xff]  ;;  %v10809_v37 = vld [vmem:[#allocation273_spill] sm:$0xff] }
 0x648   : > { %4982 = vmatmul.f32.gmra.mxu0 %v10802_v60 }
 0x649   : > { %v5338_v46 = vadd.f32 %v5337_v8, %v5103_v34  ;;  %5197 = vmatmul.f32.gmra.mxu1 %v10803_v63 }
 0x64a   : > { %5565 = vmatmul.f32.gmra.mxu3 %v10724_v19 }
 0x64b   : > { %v5499_v59 = vadd.f32 %v5498_v40, %v5338_v46  ;;  %5404 = vmatmul.f32.gmra.mxu2 %v10724_v19 }
 0x64d   : > { %v5606_v62 = vadd.f32 %v5975_v25, %v5499_v59  ;;  %v4908_v47 = vpop.f32.mrf.mxu0  ;;  %v10810_v25 = vld [vmem:[#allocation280_spill] sm:$0xff] }
 0x64e   : > { %v5108_v30 = vpop.f32.mrf.mxu1  ;;  %v5341_v27 = vpop.f32.mrf.mxu2  ;;  %v4909_v19 = vadd.f32 %v4908_v47, %v9202_v17  ;;  %v5977_v17 = vld [vmem:[%s6342_s7 + $0xc8] sm:$0xff] }
 0x64f   : > { %5670 = vst [vmem:[%s8322_s23 + $0xa8] sm:$0xff] %v5606_v62  ;;  %v5109_v5 = vadd.f32 %v5108_v30, %v4904_v22  ;;  %v5502_v32 = vpop.f32.mrf.mxu3  ;;  %v10811_v62 = vld [vmem:[#allocation277_spill] sm:$0xff] }
 0x650   : > { %4987 = vmatmul.f32.gmra.mxu0 %v10804_v33 }
 0x651   : > { %v5342_v18 = vadd.f32 %v5341_v27, %v5109_v5  ;;  %5203 = vmatmul.f32.gmra.mxu1 %v10805_v53 }
 0x652   : > { %5569 = vmatmul.f32.gmra.mxu3 %v10726_v49 }
 0x653   : > { %v5503_v10 = vadd.f32 %v5502_v32, %v5342_v18  ;;  %5408 = vmatmul.f32.gmra.mxu2 %v10726_v49 }
 0x655   : > { %v5608_v31 = vadd.f32 %v5976_v43, %v5503_v10  ;;  %v4913_v13 = vpop.f32.mrf.mxu0  ;;  %v10812_v10 = vld [vmem:[#allocation282_spill] sm:$0xff] }
 0x656   : > { %v5114_v45 = vpop.f32.mrf.mxu1  ;;  %v5345_v36 = vpop.f32.mrf.mxu2  ;;  %v4914_v49 = vadd.f32 %v4913_v13, %v9209_v2  ;;  %v5978_v2 = vld [vmem:[%s6342_s7 + $0xd8] sm:$0xff] }
 0x657   : > { %5672 = vst [vmem:[%s8322_s23 + $0xb8] sm:$0xff] %v5608_v31  ;;  %v5115_v21 = vadd.f32 %v5114_v45, %v4909_v19  ;;  %v5506_v11 = vpop.f32.mrf.mxu3 }
 0x658   : > { %4992 = vmatmul.f32.gmra.mxu0 %v10806_v14 }
 0x659   : > { %v5346_v26 = vadd.f32 %v5345_v36, %v5115_v21  ;;  %5209 = vmatmul.f32.gmra.mxu1 %v10807_v50  ;;  %v5981_v50 = vld [vmem:[%s6342_s7 + $0x108] sm:$0xff] }
 0x65a   : > { %5573 = vmatmul.f32.gmra.mxu3 %v10728_v3 }
 0x65b   : > { %v5507_v9 = vadd.f32 %v5506_v11, %v5346_v26  ;;  %5412 = vmatmul.f32.gmra.mxu2 %v10728_v3 }
 0x65d   : > { %v5610_v38 = vadd.f32 %v5977_v17, %v5507_v9  ;;  %v4918_v48 = vpop.f32.mrf.mxu0 }
 0x65e   : > { %v5120_v52 = vpop.f32.mrf.mxu1  ;;  %v5349_v44 = vpop.f32.mrf.mxu2  ;;  %v4919_v3 = vadd.f32 %v4918_v48, %v9216_v54  ;;  %v5979_v54 = vld [vmem:[%s6342_s7 + $0xe8] sm:$0xff] }
 0x65f   : > { %5674 = vst [vmem:[%s8322_s23 + $0xc8] sm:$0xff] %v5610_v38  ;;  %v5121_v35 = vadd.f32 %v5120_v52, %v4914_v49  ;;  %v5510_v51 = vpop.f32.mrf.mxu3 }
 0x660   : > { %4997 = vmatmul.f32.gmra.mxu0 %v10808_v20 }
 0x661   : > { %v5350_v6 = vadd.f32 %v5349_v44, %v5121_v35  ;;  %5215 = vmatmul.f32.gmra.mxu1 %v10809_v37 }
 0x662   : > { %5577 = vmatmul.f32.gmra.mxu3 %v10730_v55 }
 0x663   : > { %v5511_v34 = vadd.f32 %v5510_v51, %v5350_v6  ;;  %5416 = vmatmul.f32.gmra.mxu2 %v10730_v55  ;;  %v5982_v51 = vld [vmem:[%s6342_s7 + $0x118] sm:$0xff] }
 0x665   : > { %v5612_v8 = vadd.f32 %v5978_v2, %v5511_v34  ;;  %v4923_v40 = vpop.f32.mrf.mxu0 }
 0x666   : > { %v5126_v46 = vpop.f32.mrf.mxu1  ;;  %v5353_v63 = vpop.f32.mrf.mxu2  ;;  %v4924_v55 = vadd.f32 %v4923_v40, %v9223_v29 }
 0x667   : > { %5676 = vst [vmem:[%s8322_s23 + $0xd8] sm:$0xff] %v5612_v8  ;;  %v5127_v60 = vadd.f32 %v5126_v46, %v4919_v3  ;;  %v5514_v59 = vpop.f32.mrf.mxu3  ;;  %v5983_v46 = vld [vmem:[%s6342_s7 + $0x128] sm:$0xff] }
 0x668   : > { %5002 = vmatmul.f32.gmra.mxu0 %v10810_v25 }
 0x669   : > { %v5354_v22 = vadd.f32 %v5353_v63, %v5127_v60  ;;  %5221 = vmatmul.f32.gmra.mxu1 %v10811_v62 }
 0x66a   : > { %5581 = vmatmul.f32.gmra.mxu3 %v10732_v23 }
 0x66b   : > { %v5515_v47 = vadd.f32 %v5514_v59, %v5354_v22  ;;  %5420 = vmatmul.f32.gmra.mxu2 %v10732_v23  ;;  %v5980_v23 = vld [vmem:[%s6342_s7 + $0xf8] sm:$0xff] }
 0x66d   : > { %v5614_v30 = vadd.f32 %v5979_v54, %v5515_v47  ;;  %v4928_v5 = vpop.f32.mrf.mxu0  ;;  %v5984_v54 = vld [vmem:[%s6342_s7 + $0x138] sm:$0xff] }
 0x66e   : > { %v5132_v27 = vpop.f32.mrf.mxu1  ;;  %v5357_v18 = vpop.f32.mrf.mxu2  ;;  %v4929_v43 = vadd.f32 %v4928_v5, %v9230_v24 }
 0x66f   : > { %5678 = vst [vmem:[%s8322_s23 + $0xe8] sm:$0xff] %v5614_v30  ;;  %v5133_v32 = vadd.f32 %v5132_v27, %v4924_v55  ;;  %v5518_v33 = vpop.f32.mrf.mxu3 }
 0x671   : > { %v5358_v53 = vadd.f32 %v5357_v18, %v5133_v32  ;;  %5227 = vmatmul.f32.gmra.mxu1 %v10812_v10 }
 0x673   : > { %v5519_v19 = vadd.f32 %v5518_v33, %v5358_v53 }
 0x675   : > { %v5616_v31 = vadd.f32 %v5980_v23, %v5519_v19  ;;  %v4933_v29 = vpop.f32.mrf.mxu0  ;;  %v5985_v19 = vld [vmem:[%s6342_s7 + $0x148] sm:$0xff] }
 0x676   : > { %v5138_v13 = vpop.f32.mrf.mxu1  ;;  %v5361_v21 = vpop.f32.mrf.mxu2  ;;  %v4934_v14 = vadd.f32 %v4933_v29, %v9237_v7 }
 0x677   : > { %5680 = vst [vmem:[%s8322_s23 + $0xf8] sm:$0xff] %v5616_v31  ;;  %v5139_v45 = vadd.f32 %v5138_v13, %v4929_v43  ;;  %v5522_v36 = vpop.f32.mrf.mxu3 }
 0x679   : > { %v5362_v11 = vadd.f32 %v5361_v21, %v5139_v45 }
 0x67b   : > { %v5523_v26 = vadd.f32 %v5522_v36, %v5362_v11  ;;  %v5986_v11 = vld [vmem:[%s6342_s7 + $0x158] sm:$0xff] }
 0x67d   : > { %v5618_v9 = vadd.f32 %v5981_v50, %v5523_v26  ;;  %v4938_v49 = vpop.f32.mrf.mxu0 }
 0x67e   : > { %v5144_v17 = vpop.f32.mrf.mxu1  ;;  %v5365_v38 = vpop.f32.mrf.mxu2  ;;  %v4939_v44 = vadd.f32 %v4938_v49, %v9244_v58 }
 0x67f   : > { %5682 = vst [vmem:[%s8322_s23 + $0x108] sm:$0xff] %v5618_v9  ;;  %v5145_v24 = vadd.f32 %v5144_v17, %v4934_v14  ;;  %v5526_v48 = vpop.f32.mrf.mxu3 }
 0x681   : > { %v5366_v52 = vadd.f32 %v5365_v38, %v5145_v24 }
 0x683   : > { %v5527_v35 = vadd.f32 %v5526_v48, %v5366_v52  ;;  %v5987_v48 = vld [vmem:[%s6342_s7 + $0x168] sm:$0xff] }
 0x685   : > { %v5620_v6 = vadd.f32 %v5982_v51, %v5527_v35  ;;  %v4943_v20 = vpop.f32.mrf.mxu0 }
 0x686   : > { %v5150_v37 = vpop.f32.mrf.mxu1  ;;  %v5369_v34 = vpop.f32.mrf.mxu2  ;;  %v4944_v40 = vadd.f32 %v4943_v20, %v9251_v28 }
 0x687   : > { %5684 = vst [vmem:[%s8322_s23 + $0x118] sm:$0xff] %v5620_v6  ;;  %v5151_v7 = vadd.f32 %v5150_v37, %v4939_v44  ;;  %v5530_v3 = vpop.f32.mrf.mxu3 }
 0x689   : > { %v5370_v2 = vadd.f32 %v5369_v34, %v5151_v7  ;;  %v5988_v34 = vld [vmem:[%s6342_s7 + $0x178] sm:$0xff] }
 0x68b   : > { %v5531_v8 = vadd.f32 %v5530_v3, %v5370_v2 }
 0x68d   : > { %v5622_v60 = vadd.f32 %v5983_v46, %v5531_v8  ;;  %v4948_v63 = vpop.f32.mrf.mxu0 }
 0x68e   : > { %v5156_v59 = vpop.f32.mrf.mxu1  ;;  %v5373_v22 = vpop.f32.mrf.mxu2  ;;  %v4949_v55 = vadd.f32 %v4948_v63, %v9258_v15 }
 0x68f   : > { %5686 = vst [vmem:[%s8322_s23 + $0x128] sm:$0xff] %v5622_v60  ;;  %v5157_v58 = vadd.f32 %v5156_v59, %v4944_v40  ;;  %v5534_v25 = vpop.f32.mrf.mxu3 }
 0x691   : > { %v5374_v62 = vadd.f32 %v5373_v22, %v5157_v58  ;;  %v5989_v58 = vld [vmem:[%s6342_s7 + $0x188] sm:$0xff] }
 0x693   : > { %v5535_v47 = vadd.f32 %v5534_v25, %v5374_v62 }
 0x695   : > { %v5624_v30 = vadd.f32 %v5984_v54, %v5535_v47  ;;  %v4953_v5 = vpop.f32.mrf.mxu0 }
 0x696   : > { %v5162_v27 = vpop.f32.mrf.mxu1  ;;  %v5377_v32 = vpop.f32.mrf.mxu2  ;;  %v4954_v10 = vadd.f32 %v4953_v5, %v9265_v42 }
 0x697   : > { %5688 = vst [vmem:[%s8322_s23 + $0x138] sm:$0xff] %v5624_v30  ;;  %v5163_v28 = vadd.f32 %v5162_v27, %v4949_v55  ;;  %v5538_v18 = vpop.f32.mrf.mxu3  ;;  %v5990_v27 = vld [vmem:[%s6342_s7 + $0x198] sm:$0xff] }
 0x699   : > { %v5378_v33 = vadd.f32 %v5377_v32, %v5163_v28 }
 0x69b   : > { %v5539_v53 = vadd.f32 %v5538_v18, %v5378_v33 }
 0x69d   : > { %v5626_v43 = vadd.f32 %v5985_v19, %v5539_v53  ;;  %v4958_v23 = vpop.f32.mrf.mxu0 }
 0x69e   : > { %v5168_v31 = vpop.f32.mrf.mxu1  ;;  %v5381_v29 = vpop.f32.mrf.mxu2  ;;  %v4959_v36 = vadd.f32 %v4958_v23, %v9272_v4  ;;  %v5991_v23 = vld [vmem:[%s6342_s7 + $0x1a8] sm:$0xff] }
 0x69f   : > { %5690 = vst [vmem:[%s8322_s23 + $0x148] sm:$0xff] %v5626_v43  ;;  %v5169_v15 = vadd.f32 %v5168_v31, %v4954_v10  ;;  %v5542_v13 = vpop.f32.mrf.mxu3 }
 0x6a1   : > { %v5382_v45 = vadd.f32 %v5381_v29, %v5169_v15 }
 0x6a3   : > { %v5543_v21 = vadd.f32 %v5542_v13, %v5382_v45 }
 0x6a5   : > { %v5628_v26 = vadd.f32 %v5986_v11, %v5543_v21  ;;  %v4963_v14 = vpop.f32.mrf.mxu0 }
 0x6a6   : > { %v5174_v50 = vpop.f32.mrf.mxu1  ;;  %v5385_v9 = vpop.f32.mrf.mxu2  ;;  %v4964_v38 = vadd.f32 %v4963_v14, %v9279_v56 }
 0x6a7   : > { %5692 = vst [vmem:[%s8322_s23 + $0x158] sm:$0xff] %v5628_v26  ;;  %v5175_v42 = vadd.f32 %v5174_v50, %v4959_v36  ;;  %v5546_v49 = vpop.f32.mrf.mxu3  ;;  %v5992_v26 = vld [vmem:[%s6342_s7 + $0x1b8] sm:$0xff] }
 0x6a9   : > { %v5386_v17 = vadd.f32 %v5385_v9, %v5175_v42 }
 0x6ab   : > { %v5547_v24 = vadd.f32 %v5546_v49, %v5386_v17 }
 0x6ad   : > { %v5630_v52 = vadd.f32 %v5987_v48, %v5547_v24  ;;  %v4968_v35 = vpop.f32.mrf.mxu0  ;;  %v5993_v48 = vld [vmem:[%s6342_s7 + $0x1c8] sm:$0xff] }
 0x6ae   : > { %v5180_v44 = vpop.f32.mrf.mxu1  ;;  %v5389_v51 = vpop.f32.mrf.mxu2  ;;  %v4969_v7 = vadd.f32 %v4968_v35, %v9286_v12 }
 0x6af   : > { %5694 = vst [vmem:[%s8322_s23 + $0x168] sm:$0xff] %v5630_v52  ;;  %v5181_v4 = vadd.f32 %v5180_v44, %v4964_v38  ;;  %v5550_v6 = vpop.f32.mrf.mxu3 }
 0x6b1   : > { %v5390_v20 = vadd.f32 %v5389_v51, %v5181_v4 }
 0x6b3   : > { %v5551_v37 = vadd.f32 %v5550_v6, %v5390_v20 }
 0x6b5   : > { %v5632_v3 = vadd.f32 %v5988_v34, %v5551_v37  ;;  %v4973_v2 = vpop.f32.mrf.mxu0 }
 0x6b6   : > { %v5186_v8 = vpop.f32.mrf.mxu1  ;;  %v5393_v40 = vpop.f32.mrf.mxu2  ;;  %v4974_v59 = vadd.f32 %v4973_v2, %v9293_v41 }
 0x6b7   : > { %5696 = vst [vmem:[%s8322_s23 + $0x178] sm:$0xff] %v5632_v3  ;;  %v5187_v56 = vadd.f32 %v5186_v8, %v4969_v7  ;;  %v5554_v46 = vpop.f32.mrf.mxu3  ;;  %v5994_v7 = vld [vmem:[%s6342_s7 + $0x1d8] sm:$0xff] }
 0x6b9   : > { %v5394_v60 = vadd.f32 %v5393_v40, %v5187_v56 }
 0x6bb   : > { %v5555_v63 = vadd.f32 %v5554_v46, %v5394_v60 }
 0x6bd   : > { %v5634_v22 = vadd.f32 %v5989_v58, %v5555_v63  ;;  %v4978_v25 = vpop.f32.mrf.mxu0  ;;  %v5995_v63 = vld [vmem:[%s6342_s7 + $0x1e8] sm:$0xff] }
 0x6be   : > { %v5192_v62 = vpop.f32.mrf.mxu1  ;;  %v5397_v47 = vpop.f32.mrf.mxu2  ;;  %v4979_v5 = vadd.f32 %v4978_v25, %v9300_v39 }
 0x6bf   : > { %5698 = vst [vmem:[%s8322_s23 + $0x188] sm:$0xff] %v5634_v22  ;;  %v5193_v12 = vadd.f32 %v5192_v62, %v4974_v59  ;;  %v5558_v55 = vpop.f32.mrf.mxu3 }
 0x6c1   : > { %v5398_v54 = vadd.f32 %v5397_v47, %v5193_v12  ;;  %v5996_v47 = vld [vmem:[%s6342_s7 + $0x1f8] sm:$0xff] }
 0x6c3   : > { %v5559_v30 = vadd.f32 %v5558_v55, %v5398_v54 }
 0x6c5   : > { %v5636_v28 = vadd.f32 %v5990_v27, %v5559_v30  ;;  %v4983_v32 = vpop.f32.mrf.mxu0 }
 0x6c6   : > { %v5198_v18 = vpop.f32.mrf.mxu1  ;;  %v5401_v33 = vpop.f32.mrf.mxu2  ;;  %v4984_v43 = vadd.f32 %v4983_v32, %v9307_v0 }
 0x6c7   : > { %5700 = vst [vmem:[%s8322_s23 + $0x198] sm:$0xff] %v5636_v28  ;;  %v5199_v41 = vadd.f32 %v5198_v18, %v4979_v5  ;;  %v5562_v53 = vpop.f32.mrf.mxu3 }
 0x6c9   : > { %v5402_v10 = vadd.f32 %v5401_v33, %v5199_v41 }
 0x6cb   : > { %v5563_v19 = vadd.f32 %v5562_v53, %v5402_v10 }
 0x6cd   : > { %v5638_v31 = vadd.f32 %v5991_v23, %v5563_v19  ;;  %v4988_v15 = vpop.f32.mrf.mxu0 }
 0x6ce   : > { %v5204_v29 = vpop.f32.mrf.mxu1  ;;  %v5405_v13 = vpop.f32.mrf.mxu2  ;;  %v4989_v11 = vadd.f32 %v4988_v15, %v9314_v61 }
 0x6cf   : > { %5702 = vst [vmem:[%s8322_s23 + $0x1a8] sm:$0xff] %v5638_v31  ;;  %v5205_v39 = vadd.f32 %v5204_v29, %v4984_v43  ;;  %v5566_v45 = vpop.f32.mrf.mxu3 }
 0x6d1   : > { %v5406_v21 = vadd.f32 %v5405_v13, %v5205_v39 }
 0x6d3   : > { %v5567_v36 = vadd.f32 %v5566_v45, %v5406_v21 }
 0x6d5   : > { %v5640_v14 = vadd.f32 %v5992_v26, %v5567_v36  ;;  %v4993_v50 = vpop.f32.mrf.mxu0 }
 0x6d6   : > { %v5210_v42 = vpop.f32.mrf.mxu1  ;;  %v5409_v9 = vpop.f32.mrf.mxu2  ;;  %v4994_v38 = vadd.f32 %v4993_v50, %v9321_v16 }
 0x6d7   : > { %5704 = vst [vmem:[%s8322_s23 + $0x1b8] sm:$0xff] %v5640_v14  ;;  %v5211_v0 = vadd.f32 %v5210_v42, %v4989_v11  ;;  %v5570_v49 = vpop.f32.mrf.mxu3 }
 0x6d9   : > { %v5410_v17 = vadd.f32 %v5409_v9, %v5211_v0 }
 0x6db   : > { %v5571_v24 = vadd.f32 %v5570_v49, %v5410_v17 }
 0x6dd   : > { %v5642_v52 = vadd.f32 %v5993_v48, %v5571_v24  ;;  %v4998_v51 = vpop.f32.mrf.mxu0 }
 0x6de   : > { %v5216_v35 = vpop.f32.mrf.mxu1  ;;  %v5413_v61 = vpop.f32.mrf.mxu2  ;;  %v4999_v37 = vadd.f32 %v4998_v51, %v9328_v1 }
 0x6df   : > { %5706 = vst [vmem:[%s8322_s23 + $0x1c8] sm:$0xff] %v5642_v52  ;;  %v5217_v44 = vadd.f32 %v5216_v35, %v4994_v38  ;;  %v5574_v4 = vpop.f32.mrf.mxu3 }
 0x6e1   : > { %v5414_v6 = vadd.f32 %v5413_v61, %v5217_v44 }
 0x6e3   : > { %v5575_v20 = vadd.f32 %v5574_v4, %v5414_v6 }
 0x6e5   : > { %v5644_v34 = vadd.f32 %v5994_v7, %v5575_v20  ;;  %v5003_v40 = vpop.f32.mrf.mxu0 }
 0x6e6   : > { %v5222_v3 = vpop.f32.mrf.mxu1  ;;  %v5417_v16 = vpop.f32.mrf.mxu2  ;;  %v5004_v60 = vadd.f32 %v5003_v40, %v9335_v57 }
 0x6e7   : > { %5708 = vst [vmem:[%s8322_s23 + $0x1d8] sm:$0xff] %v5644_v34  ;;  %v5223_v2 = vadd.f32 %v5222_v3, %v4999_v37  ;;  %v5578_v8 = vpop.f32.mrf.mxu3 }
 0x6e9   : > { %v5418_v56 = vadd.f32 %v5417_v16, %v5223_v2 }
 0x6eb   : > { %v5579_v46 = vadd.f32 %v5578_v8, %v5418_v56 }
 0x6ed   : > { %v5646_v59 = vadd.f32 %v5995_v63, %v5579_v46 }
 0x6ee   : > { %v5228_v58 = vpop.f32.mrf.mxu1  ;;  %v5421_v22 = vpop.f32.mrf.mxu2 }
 0x6ef   : > { %5710 = vst [vmem:[%s8322_s23 + $0x1e8] sm:$0xff] %v5646_v59  ;;  %v5229_v1 = vadd.f32 %v5228_v58, %v5004_v60  ;;  %v5582_v25 = vpop.f32.mrf.mxu3 }
 0x6f1   : > { %v5422_v62 = vadd.f32 %v5421_v22, %v5229_v1 }
 0x6f3   : > { %v5583_v12 = vadd.f32 %v5582_v25, %v5422_v62  ;;  %5720 = sbr.rel (!%p6261_p11) target bundleno = 1815 (0x717), region = 48 }
 0x6f5   : > { %v5648_v55 = vadd.f32 %v5996_v47, %v5583_v12 }
 0x6f7   : > { %5712 = vst [vmem:[%s8322_s23 + $0x1f8] sm:$0xff] %v5648_v55 }
 0x6f8   : > { %s10823_s4 = smov (!%p5723_p6, %s5722_s4), 32 }
 0x6f9   : > { %s5863_s22 = sshll.u32 %s10823_s4, 4 }
 0x6fa   : > { %s5727_s10 = ssub.s32 512, %s5863_s22 }
 0x6fb   : > { %s5728_s11 = sshll.u32 %s5727_s10, 4 }
 0x6fc   : > { %5729 = vsyncadd %s5714_s26, %s5728_s11  ;;  %p9505_p13 = scmp.ne.s32.totalorder %s5863_s22, 0  ;;  %s5865_s17 = sshll.u32 %s6230_s16, 9 }
 0x6fd   : > { %s5733_s29 = scalar_lea.hbm %s9562_s3, %s5865_s17  ;;  %s5735_s30 = sshll.u32 %s8322_s23, 4  ;;  %s9514_s30 = int_to_ptr.vmem [resolvable:$true] %s5735_s30 }
 0x6fe   : > { %s5737_s19 = sshll.u32 %s5733_s29, 4  ;;  %s5857_s28 = sshll.u32 %s10823_s4, 8  ;;  %s9516_s19 = int_to_ptr.hbm [resolvable:$true] %s5737_s19 }
 0x6ff   : > { %s6096_s5 = sshra.s32 %s9514_s30, 4  ;;  %s6098_s6 = sshrl.u32 %s5857_s28, 4  ;;  %s6097_s5 = int_to_ptr.vmem [resolvable:$true] %s6096_s5 }
 0x700   : > { %s6103_s7 = scalar_lea.vmem %s6097_s5, %s6098_s6  ;;  %s6186_s16 = smov [#allocation8]  }
 0x701   : > { %p6104_p11 = scmp.ne.s32.totalorder %s6097_s5, %s6103_s7  ;;  %s6107_s27 = scalar_lea.vmem %s6186_s16, 1024 }
 0x702   : > { %p6109_p9 = scmp.lt.s32.totalorder %s6107_s27, %s6103_s7 }
 0x703   : > { %p6105_p2 = pnand %p6104_p11, %p9505_p13 }
 0x705   : > { %p6106_p5 = pneg %p6105_p2 }
 0x707   : > { %p6111_p10 = pnand %p6109_p9, %p6106_p5 }
 0x709   : > { %6114 = shalt.err (!%p6111_p10)
}
 0x70a   : > { %s6115_s23 = sshra.s32 %s9516_s19, 4  ;;  %s6126_s17 = scalar_lea.hbm %s9562_s3, 800  ;;  %s6116_s23 = int_to_ptr.hbm [resolvable:$true] %s6115_s23 }
 0x70b   : > { %s6122_s22 = scalar_lea.hbm %s6116_s23, %s6098_s6  ;;  %p6127_p7 = scmp.lt.s32.totalorder %s6116_s23, %s9562_s3 }
 0x70c   : > { %p6123_p1 = scmp.ne.s32.totalorder %s6116_s23, %s6122_s22  ;;  %p6128_p8 = scmp.lt.s32.totalorder %s6126_s17, %s6122_s22 }
 0x70e   : > { %p6124_p0 = pnand %p6123_p1, %p9505_p13  ;;  %p6129_p4 = por %p6128_p8, %p6127_p7 }
 0x710   : > { %p6125_p3 = pneg %p6124_p0 }
 0x712   : > { %p6130_p12 = pnand %p6129_p4, %p6125_p3 }
 0x714   : > { %6133 = shalt.err (!%p6130_p12)
}
 0x715   : > { %s6187_s29 = smov 256   ;;  %s6188_s5 = smov 16  }
 0x716   : > { %5743 = dma.vmem_to_hbm [thread:$0]  (%p9505_p13), %s9514_s30, %s5857_s28, %s9516_s19, %s5714_s26, %s6187_s29, %s6187_s29, %s6188_s5  }
 0x717 PF: > { %s5752_s6 = sand.u32 1, %s6165_s12   ;;  %p10814_p6 = scmp.ne.s32.totalorder %s10029_s25, 0 }
 0x718   : > { %p10815_p11 = scmp.ge.s32.totalorder %s6177_s15, 2  ;;  %s5753_s7 = scalar_lea.sflag [#allocation4], %s5752_s6 }
 0x71a   : > { %p5884_p2 = pnand %p10815_p11, %p10814_p6 }
 0x71c   : > { %p5885_p5 = pneg %p5884_p2 }
 0x71e   : > { %6160 = dma.done.wait (%p5885_p5), %s5753_s7, 8192  }
 0x71f   : > { %6162 = vsyncadd (%p5885_p5), %s5753_s7, 4294959104  ;;  %p17_p9 = scmp.ge.s32.totalorder %s6234_s18, 4   ;;  %s10816_s12 = smov %s6169_s13 }
 0x720   : > { %s10817_s13 = smov %s6173_s14  ;;  %s10818_s14 = smov %s6246_s21 }
 0x721   : > { %s10819_s15 = smov %s6234_s18  ;;  %19 = sbr.rel (!%p17_p9) target bundleno = 6 (0x6), region = 85 }
 0x726   :  { %5759 = vsyncpa [#allocation3], 1 }
 0x727   :  { %5761 = vsyncpa [#allocation3 + $0x1], 1 }
 0x728   :  { %5762 = vsyncpa [#allocation6], 1 }
 0x729   :  { %5763 = vsyncpa [#allocation4], 1 }
 0x72a   :  { %5765 = vsyncpa [#allocation4 + $0x1], 1 }

</bundles_post_ra>
